<compile_context>
chip_gen: v6e
topology: v6e:2x2x1
jax: 0.10.0
libtpu: 0.0.40
codegen_flags: <defaults>
</compile_context>

<pallas_src>
import jax
import jax.numpy as jnp
from jax.experimental import pallas as pl
from jax.experimental.pallas import tpu as pltpu

EPS = 1e-5  # nn.InstanceNorm2d default eps (affine=False, biased variance)

# Tap order: centre tap first so the 1x1 identity path is the lane-aligned
# slice [:, :C] of the im2col matrix.  Used consistently for the folded
# weights, the host-side stride-2 im2col and the in-kernel stride-1 im2col.
_TAPS = ((1, 1), (0, 0), (0, 1), (0, 2), (1, 0), (1, 2), (2, 0), (2, 1), (2, 2))


# ---------------------------------------------------------------------------
# In-kernel helpers (traced inside the Pallas kernel body)
# ---------------------------------------------------------------------------
def _scratch_rows(batch, ho, wo):
    # flat row-padded layout:
    # [extra pad row][top pad][img 0][shared pad][img 1]...[bottom pad][extra pad]
    return (batch * ho + batch + 3) * wo


def _img_start(b, ho, wo):
    return (2 + b * (ho + 1)) * wo


def _instance_norm(z, batch, p):
    """Per-sample, per-channel normalization over the spatial axis. z: (batch*p, C)."""
    parts = []
    for b in range(batch):
        zb = z[b * p:(b + 1) * p, :]
        mean = jnp.mean(zb, axis=0, keepdims=True)
        var = jnp.mean(jnp.square(zb - mean), axis=0, keepdims=True)
        parts.append((zb - mean) * jax.lax.rsqrt(var + EPS))
    return jnp.concatenate(parts, axis=0)


def _im2col_3x3_s1(scratch_ref, y, batch, ho, wo):
    """y: (batch*ho*wo, C), row-major spatial per sample.

    Writes y into a row-padded flat VMEM scratch and returns the
    (batch*ho*wo, 9*C) im2col of the 3x3 / stride-1 / pad-1 neighbourhood
    (tap-major columns, _TAPS order), using only static contiguous slices +
    lane masks.
    """
    p = ho * wo
    scratch_ref[...] = jnp.zeros_like(scratch_ref)
    for b in range(batch):
        s = _img_start(b, ho, wo)
        scratch_ref[s:s + p, :] = y[b * p:(b + 1) * p, :]

    col = jax.lax.broadcasted_iota(jnp.int32, (p, 1), 0) % wo
    mask_l = col != 0           # valid positions for kw == 0 taps (j != 0)
    mask_r = col != (wo - 1)    # valid positions for kw == 2 taps (j != wo-1)

    rows = []
    for b in range(batch):
        base = _img_start(b, ho, wo)
        taps = []
        for kh, kw in _TAPS:
            s = base + (kh - 1) * wo + (kw - 1)
            t = scratch_ref[s:s + p, :]
            if kw == 0:
                t = jnp.where(mask_l, t, 0.0)
            elif kw == 2:
                t = jnp.where(mask_r, t, 0.0)
            taps.append(t)
        rows.append(jnp.concatenate(taps, axis=1))        # (p, 9*C)
    return jnp.concatenate(rows, axis=0)                  # (batch*p, 9*C)


def _subsample(z, sel, batch, p_full):
    """Select stride-2 spatial positions with a 0/1 matrix: per-sample sel @ z."""
    parts = [jnp.dot(sel, z[b * p_full:(b + 1) * p_full, :],
                     preferred_element_type=jnp.float32)
             for b in range(batch)]
    return jnp.concatenate(parts, axis=0)


# ---------------------------------------------------------------------------
# The fused whole-network kernel
# ---------------------------------------------------------------------------
def _make_kernel(batch, c0, c1, c2, h1, h2, h3):
    p1, p2, p3 = h1 * h1, h2 * h2, h3 * h3

    def kernel(taps1_ref, wa1_ref, wb1_ref, wd1_ref,
               wa2_ref, wb2_ref, wd2_ref,
               wa3_ref, wb3_ref, wd3_ref,
               s2_ref, s3_ref, wh_ref, bh_ref,
               o_ref, sc_a, sc_b, sc_c):
        f32 = jnp.float32

        # ------------------------------ block 1 ------------------------------
        taps1 = taps1_ref[...]                                   # (B*p1, 9*c0)
        z = jnp.dot(taps1, wa1_ref[...], preferred_element_type=f32)
        y = jnp.maximum(_instance_norm(z, batch, p1), 0.0)
        cols = _im2col_3x3_s1(sc_a, y, batch, h1, h1)            # (B*p1, 9*c1)
        z = _instance_norm(
            jnp.dot(cols, wb1_ref[...], preferred_element_type=f32), batch, p1)
        # identity: 1x1 stride-2 == centre tap of the stride-2 im2col
        ident = jnp.dot(taps1[:, :c0], wd1_ref[...],
                        preferred_element_type=f32)
        x1 = jnp.maximum(z + ident, 0.0)                         # outer ReLU folded

        # ------------------------------ block 2 ------------------------------
        # full-res im2col, subsample ROWS before the (9*c1 x c2) matmul
        cols = _im2col_3x3_s1(sc_a, x1, batch, h1, h1)           # reuse sc_a
        cols_s = _subsample(cols, s2_ref[...], batch, p1)        # (B*p2, 9*c1)
        z = jnp.dot(cols_s, wa2_ref[...], preferred_element_type=f32)
        y = jnp.maximum(_instance_norm(z, batch, p2), 0.0)
        cols = _im2col_3x3_s1(sc_b, y, batch, h2, h2)
        z = _instance_norm(
            jnp.dot(cols, wb2_ref[...], preferred_element_type=f32), batch, p2)
        ident = jnp.dot(cols_s[:, :c1], wd2_ref[...],            # centre tap
                        preferred_element_type=f32)
        x2 = jnp.maximum(z + ident, 0.0)

        # ------------------------------ block 3 ------------------------------
        cols = _im2col_3x3_s1(sc_b, x2, batch, h2, h2)           # reuse sc_b
        cols_s = _subsample(cols, s3_ref[...], batch, p2)        # (B*p3, 9*c2)
        z = jnp.dot(cols_s, wa3_ref[...], preferred_element_type=f32)
        y = jnp.maximum(_instance_norm(z, batch, p3), 0.0)
        cols = _im2col_3x3_s1(sc_c, y, batch, h3, h3)
        z = _instance_norm(
            jnp.dot(cols, wb3_ref[...], preferred_element_type=f32), batch, p3)
        ident = jnp.dot(cols_s[:, :c2], wd3_ref[...],            # centre tap
                        preferred_element_type=f32)
        x3 = jnp.maximum(z + ident, 0.0)                         # (B*p3, c3)

        # ------------------------- avgpool + heads --------------------------
        pooled = jnp.concatenate(
            [jnp.mean(x3[b * p3:(b + 1) * p3, :], axis=0, keepdims=True)
             for b in range(batch)], axis=0)                     # (B, c3)
        o_ref[...] = (jnp.dot(pooled, wh_ref[...], preferred_element_type=f32)
                      + bh_ref[...])

    return kernel


# ---------------------------------------------------------------------------
# Wrapper-side (JAX) prep: weight folding, block-1 im2col, head fusion
# ---------------------------------------------------------------------------
def _fold_depthwise_pointwise(dw, pw):
    """dw: (9, Cin) in kh*3+kw order, pw: (Cin, Cout) -> (9*Cin, Cout) in _TAPS order."""
    cin, cout = pw.shape
    order = jnp.array([kh * 3 + kw for kh, kw in _TAPS], dtype=jnp.int32)
    dw_r = dw[order, :]
    return (dw_r[:, :, None] * pw[None, :, :]).reshape(9 * cin, cout)


def _sel_matrix(w_in, w_out):
    """0/1 matrix selecting flat positions (2i, 2j) of a w_in x w_in grid."""
    r = jnp.arange(w_out * w_out)
    flat = (2 * (r // w_out)) * w_in + 2 * (r % w_out)
    return jax.nn.one_hot(flat, w_in * w_in, dtype=jnp.float32)


def _gather_stride2_taps(x_nhwc):
    """x: (B, H, W, C) -> (B*(H//2)*(W//2), 9*C) im2col of the 3x3/s2/pad-1 conv."""
    b, h, w, c = x_nhwc.shape
    ho, wo = h // 2, w // 2
    xp = jnp.pad(x_nhwc, ((0, 0), (1, 1), (1, 1), (0, 0)))
    taps = []
    for kh, kw in _TAPS:
        t = xp[:, kh:kh + 2 * ho:2, kw:kw + 2 * wo:2, :]
        taps.append(t.reshape(b, ho * wo, c))
    return jnp.concatenate(taps, axis=-1).reshape(b * ho * wo, 9 * c)


def deep_q_net_forward(x, params):
    """x: (B, n_frames, channels, H, W) -> (out_ss, out1, out2, out3)."""
    blocks, head = params["blocks"], params["head"]
    batch, n_frames, channels, h, w = x.shape
    assert h == w and h % 8 == 0, "spatial size must be divisible by 8"

    # NCHW (frames merged into channels) -> NHWC
    xc = x.reshape(batch, n_frames * channels, h, w).transpose(0, 2, 3, 1)

    c0 = n_frames * channels
    c1 = blocks[0]["pw1"].shape[1]
    c2 = blocks[1]["pw1"].shape[1]
    c3 = blocks[2]["pw1"].shape[1]
    h1, h2, h3 = h // 2, h // 4, h // 8

    taps1 = _gather_stride2_taps(xc)                          # (B*h1*h1, 9*c0)
    wa1 = _fold_depthwise_pointwise(blocks[0]["dw1"], blocks[0]["pw1"])
    wb1 = _fold_depthwise_pointwise(blocks[0]["dw2"], blocks[0]["pw2"])
    wa2 = _fold_depthwise_pointwise(blocks[1]["dw1"], blocks[1]["pw1"])
    wb2 = _fold_depthwise_pointwise(blocks[1]["dw2"], blocks[1]["pw2"])
    wa3 = _fold_depthwise_pointwise(blocks[2]["dw1"], blocks[2]["pw1"])
    wb3 = _fold_depthwise_pointwise(blocks[2]["dw2"], blocks[2]["pw2"])
    wd1, wd2, wd3 = blocks[0]["down"], blocks[1]["down"], blocks[2]["down"]
    s2 = _sel_matrix(h1, h2)
    s3 = _sel_matrix(h2, h3)

    n_actions = head["w1"].shape[1]
    n_head = 2 + 3 * n_actions
    head_pad = ((n_head + 127) // 128) * 128                  # lane-dense output
    wh = jnp.concatenate([head["wss"], head["w1"], head["w2"], head["w3"]], axis=1)
    wh = jnp.pad(wh, ((0, 0), (0, head_pad - n_head)))
    bh = jnp.concatenate([head["bss"], head["b1"], head["b2"], head["b3"]], axis=1)
    bh = jnp.pad(bh, ((0, 0), (0, head_pad - n_head)))

    kernel = _make_kernel(batch, c0, c1, c2, h1, h2, h3)
    out = pl.pallas_call(
        kernel,
        out_shape=jax.ShapeDtypeStruct((batch, head_pad), jnp.float32),
        scratch_shapes=[
            pltpu.VMEM((_scratch_rows(batch, h1, h1), c1), jnp.float32),  # h1-grid taps
            pltpu.VMEM((_scratch_rows(batch, h2, h2), c2), jnp.float32),  # h2-grid taps
            pltpu.VMEM((_scratch_rows(batch, h3, h3), c3), jnp.float32),  # h3-grid taps
        ],
    )(taps1, wa1, wb1, wd1, wa2, wb2, wd2, wa3, wb3, wd3, s2, s3, wh, bh)

    return (out[:, :2],
            out[:, 2:2 + n_actions],
            out[:, 2 + n_actions:2 + 2 * n_actions],
            out[:, 2 + 2 * n_actions:2 + 3 * n_actions])


# ---------------------------------------------------------------------------
# Deterministic synthetic parameter initialization
# ---------------------------------------------------------------------------
def init_params(key, channels=3, features=32, n_frames=5, n_actions=3):
    cin0 = channels * n_frames
    dims = [(cin0, features), (features, 2 * features), (2 * features, 4 * features)]
    keys = iter(jax.random.split(key, 40))
    blocks = []
    for ci, co in dims:
        blocks.append({
            "dw1": jax.random.normal(next(keys), (9, ci), jnp.float32) * 0.1,
            "pw1": jax.random.normal(next(keys), (ci, co), jnp.float32) * 0.1,
            "dw2": jax.random.normal(next(keys), (9, co), jnp.float32) * 0.1,
            "pw2": jax.random.normal(next(keys), (co, co), jnp.float32) * 0.1,
            "down": jax.random.normal(next(keys), (ci, co), jnp.float32) * 0.1,
        })
    c4 = 4 * features
    head = {
        "wss": jax.random.normal(next(keys), (c4, 2), jnp.float32) * 0.1,
        "bss": jax.random.normal(next(keys), (1, 2), jnp.float32) * 0.1,
        "w1": jax.random.normal(next(keys), (c4, n_actions), jnp.float32) * 0.1,
        "b1": jax.random.normal(next(keys), (1, n_actions), jnp.float32) * 0.1,
        "w2": jax.random.normal(next(keys), (c4, n_actions), jnp.float32) * 0.1,
        "b2": jax.random.normal(next(keys), (1, n_actions), jnp.float32) * 0.1,
        "w3": jax.random.normal(next(keys), (c4, n_actions), jnp.float32) * 0.1,
        "b3": jax.random.normal(next(keys), (1, n_actions), jnp.float32) * 0.1,
    }
    return {"blocks": blocks, "head": head}


if __name__ == "__main__":
    key = jax.random.PRNGKey(0)
    k_x, k_p = jax.random.split(key)

    B, n_frames, channels, H, W = 2, 5, 3, 16, 16
    n_actions, features = 3, 32

    x = jax.random.normal(k_x, (B, n_frames, channels, H, W), jnp.float32)
    params = init_params(k_p, channels=channels, features=features,
                         n_frames=n_frames, n_actions=n_actions)

    fwd = jax.jit(deep_q_net_forward)
    out_ss, out1, out2, out3 = fwd(x, params)
    jax.block_until_ready((out_ss, out1, out2, out3))

    assert out_ss.shape == (B, 2)
    assert out1.shape == (B, n_actions)
    assert out2.shape == (B, n_actions)
    assert out3.shape == (B, n_actions)
    print("KERNEL_OK")
</pallas_src>

<mosaic_0001>
module attributes {stable_mosaic.version = 11 : i64} {
  func.func @kernel(%arg0: memref<128x135xf32, #tpu.memory_space<vmem>>, %arg1: memref<135x32xf32, #tpu.memory_space<vmem>>, %arg2: memref<288x32xf32, #tpu.memory_space<vmem>>, %arg3: memref<15x32xf32, #tpu.memory_space<vmem>>, %arg4: memref<288x64xf32, #tpu.memory_space<vmem>>, %arg5: memref<576x64xf32, #tpu.memory_space<vmem>>, %arg6: memref<32x64xf32, #tpu.memory_space<vmem>>, %arg7: memref<576x128xf32, #tpu.memory_space<vmem>>, %arg8: memref<1152x128xf32, #tpu.memory_space<vmem>>, %arg9: memref<64x128xf32, #tpu.memory_space<vmem>>, %arg10: memref<16x64xf32, #tpu.memory_space<vmem>>, %arg11: memref<4x16xf32, #tpu.memory_space<vmem>>, %arg12: memref<128x128xf32, #tpu.memory_space<vmem>>, %arg13: memref<1x128xf32, #tpu.memory_space<vmem>>, %arg14: memref<2x128xf32, #tpu.memory_space<vmem>>, %arg15: memref<168x32xf32, #tpu.memory_space<vmem>>, %arg16: memref<52x64xf32, #tpu.memory_space<vmem>>, %arg17: memref<18x128xf32, #tpu.memory_space<vmem>>) attributes {dimension_semantics = [], scalar_prefetch = 0 : i64, scratch_operands = 3 : i64, tpu.core_type = #tpu.core_type<tc>} {
    %c0 = arith.constant 0 : index
    %c0_0 = arith.constant 0 : index
    %0 = vector.load %arg0[%c0, %c0_0] : memref<128x135xf32, #tpu.memory_space<vmem>>, vector<128x135xf32>
    %c0_1 = arith.constant 0 : index
    %c0_2 = arith.constant 0 : index
    %1 = vector.load %arg1[%c0_1, %c0_2] : memref<135x32xf32, #tpu.memory_space<vmem>>, vector<135x32xf32>
    %cst = arith.constant dense<0.000000e+00> : vector<128x32xf32>
    %2 = tpu.matmul %0, %1, %cst {dimension_numbers = #tpu.dot_dimension_numbers<[1], [0], [0], [1], [0, 0, 1, 1], [], []>} : vector<128x135xf32>, vector<135x32xf32>, vector<128x32xf32> -> vector<128x32xf32>
    %3 = vector.extract_strided_slice %2 {offsets = [0, 0], sizes = [64, 32], strides = [1, 1]} : vector<128x32xf32> to vector<64x32xf32>
    %cst_3 = arith.constant dense<0.000000e+00> : vector<32xf32>
    %4 = vector.multi_reduction <add>, %3, %cst_3 [0] : vector<64x32xf32> to vector<32xf32>
    %5 = vector.shape_cast %4 : vector<32xf32> to vector<1x32xf32>
    %cst_4 = arith.constant 6.400000e+01 : f32
    %6 = vector.broadcast %cst_4 : f32 to vector<1x32xf32>
    %7 = arith.divf %5, %6 : vector<1x32xf32>
    %8 = vector.broadcast %7 : vector<1x32xf32> to vector<64x32xf32>
    %9 = arith.subf %3, %8 : vector<64x32xf32>
    %10 = arith.mulf %9, %9 : vector<64x32xf32>
    %cst_5 = arith.constant dense<0.000000e+00> : vector<32xf32>
    %11 = vector.multi_reduction <add>, %10, %cst_5 [0] : vector<64x32xf32> to vector<32xf32>
    %12 = vector.shape_cast %11 : vector<32xf32> to vector<1x32xf32>
    %cst_6 = arith.constant 6.400000e+01 : f32
    %13 = vector.broadcast %cst_6 : f32 to vector<1x32xf32>
    %14 = arith.divf %12, %13 : vector<1x32xf32>
    %15 = vector.broadcast %7 : vector<1x32xf32> to vector<64x32xf32>
    %16 = arith.subf %3, %15 : vector<64x32xf32>
    %cst_7 = arith.constant 9.99999974E-6 : f32
    %17 = vector.broadcast %cst_7 : f32 to vector<1x32xf32>
    %18 = arith.addf %14, %17 : vector<1x32xf32>
    %19 = math.rsqrt %18 : vector<1x32xf32>
    %20 = vector.broadcast %19 : vector<1x32xf32> to vector<64x32xf32>
    %21 = arith.mulf %16, %20 : vector<64x32xf32>
    %22 = vector.extract_strided_slice %2 {offsets = [64, 0], sizes = [64, 32], strides = [1, 1]} : vector<128x32xf32> to vector<64x32xf32>
    %cst_8 = arith.constant dense<0.000000e+00> : vector<32xf32>
    %23 = vector.multi_reduction <add>, %22, %cst_8 [0] : vector<64x32xf32> to vector<32xf32>
    %24 = vector.shape_cast %23 : vector<32xf32> to vector<1x32xf32>
    %cst_9 = arith.constant 6.400000e+01 : f32
    %25 = vector.broadcast %cst_9 : f32 to vector<1x32xf32>
    %26 = arith.divf %24, %25 : vector<1x32xf32>
    %27 = vector.broadcast %26 : vector<1x32xf32> to vector<64x32xf32>
    %28 = arith.subf %22, %27 : vector<64x32xf32>
    %29 = arith.mulf %28, %28 : vector<64x32xf32>
    %cst_10 = arith.constant dense<0.000000e+00> : vector<32xf32>
    %30 = vector.multi_reduction <add>, %29, %cst_10 [0] : vector<64x32xf32> to vector<32xf32>
    %31 = vector.shape_cast %30 : vector<32xf32> to vector<1x32xf32>
    %cst_11 = arith.constant 6.400000e+01 : f32
    %32 = vector.broadcast %cst_11 : f32 to vector<1x32xf32>
    %33 = arith.divf %31, %32 : vector<1x32xf32>
    %34 = vector.broadcast %26 : vector<1x32xf32> to vector<64x32xf32>
    %35 = arith.subf %22, %34 : vector<64x32xf32>
    %cst_12 = arith.constant 9.99999974E-6 : f32
    %36 = vector.broadcast %cst_12 : f32 to vector<1x32xf32>
    %37 = arith.addf %33, %36 : vector<1x32xf32>
    %38 = math.rsqrt %37 : vector<1x32xf32>
    %39 = vector.broadcast %38 : vector<1x32xf32> to vector<64x32xf32>
    %40 = arith.mulf %35, %39 : vector<64x32xf32>
    %41 = tpu.concatenate %21, %40 in 0 : vector<64x32xf32>, vector<64x32xf32> -> vector<128x32xf32>
    %cst_13 = arith.constant 0.000000e+00 : f32
    %42 = vector.broadcast %cst_13 : f32 to vector<128x32xf32>
    %43 = arith.maximumf %41, %42 : vector<128x32xf32>
    %cst_14 = arith.constant 0.000000e+00 : f32
    %44 = vector.broadcast %cst_14 : f32 to vector<168x32xf32>
    %c0_15 = arith.constant 0 : index
    %c0_16 = arith.constant 0 : index
    %45 = vector.load %arg15[%c0_15, %c0_16] : memref<168x32xf32, #tpu.memory_space<vmem>>, vector<168x32xf32>
    tpu.vector_store %arg15[%c0_15, %c0_16], %44 {strides = array<i32>} : memref<168x32xf32, #tpu.memory_space<vmem>>, vector<168x32xf32>,
    %46 = vector.extract_strided_slice %43 {offsets = [0, 0], sizes = [64, 32], strides = [1, 1]} : vector<128x32xf32> to vector<64x32xf32>
    %c16 = arith.constant 16 : index
    %c0_17 = arith.constant 0 : index
    %47 = vector.load %arg15[%c16, %c0_17] : memref<168x32xf32, #tpu.memory_space<vmem>>, vector<64x32xf32>
    tpu.vector_store %arg15[%c16, %c0_17], %46 {strides = array<i32>} : memref<168x32xf32, #tpu.memory_space<vmem>>, vector<64x32xf32>,
    %48 = vector.extract_strided_slice %43 {offsets = [64, 0], sizes = [64, 32], strides = [1, 1]} : vector<128x32xf32> to vector<64x32xf32>
    %c88 = arith.constant 88 : index
    %c0_18 = arith.constant 0 : index
    %49 = vector.load %arg15[%c88, %c0_18] : memref<168x32xf32, #tpu.memory_space<vmem>>, vector<64x32xf32>
    tpu.vector_store %arg15[%c88, %c0_18], %48 {strides = array<i32>} : memref<168x32xf32, #tpu.memory_space<vmem>>, vector<64x32xf32>,
    %50 = tpu.iota {dimensions = array<i32: 0>} : vector<64x1xi32>
    %c8_i32 = arith.constant 8 : i32
    %c0_i32 = arith.constant 0 : i32
    %51 = arith.cmpi eq, %c8_i32, %c0_i32 : i32
    %c1_i32 = arith.constant 1 : i32
    %52 = arith.select %51, %c1_i32, %c8_i32 : i32
    %53 = vector.broadcast %52 : i32 to vector<64x1xi32>
    %54 = arith.remsi %50, %53 : vector<64x1xi32>
    %c0_i32_19 = arith.constant 0 : i32
    %55 = vector.broadcast %c0_i32_19 : i32 to vector<64x1xi32>
    %56 = arith.cmpi ne, %54, %55 : vector<64x1xi32>
    %c0_i32_20 = arith.constant 0 : i32
    %57 = vector.broadcast %c0_i32_20 : i32 to vector<64x1xi32>
    %58 = arith.cmpi slt, %54, %57 : vector<64x1xi32>
    %c0_i32_21 = arith.constant 0 : i32
    %59 = arith.cmpi slt, %52, %c0_i32_21 : i32
    %60 = vector.broadcast %59 : i1 to vector<64x1xi1>
    %61 = vector.broadcast %60 : vector<64x1xi1> to vector<64x1xi1>
    %62 = arith.xori %58, %61 : vector<64x1xi1>
    %63 = arith.andi %62, %56 : vector<64x1xi1>
    %64 = vector.broadcast %52 : i32 to vector<64x1xi32>
    %65 = arith.addi %54, %64 : vector<64x1xi32>
    %66 = arith.select %63, %65, %54 : vector<64x1xi1>, vector<64x1xi32>
    %c0_i32_22 = arith.constant 0 : i32
    %67 = vector.broadcast %c0_i32_22 : i32 to vector<64x1xi32>
    %68 = arith.cmpi ne, %66, %67 : vector<64x1xi32>
    %c7_i32 = arith.constant 7 : i32
    %69 = vector.broadcast %c7_i32 : i32 to vector<64x1xi32>
    %70 = arith.cmpi ne, %66, %69 : vector<64x1xi32>
    %c16_23 = arith.constant 16 : index
    %c0_24 = arith.constant 0 : index
    %71 = vector.load %arg15[%c16_23, %c0_24] : memref<168x32xf32, #tpu.memory_space<vmem>>, vector<64x32xf32>
    %c7 = arith.constant 7 : index
    %c0_25 = arith.constant 0 : index
    %72 = vector.load %arg15[%c7, %c0_25] : memref<168x32xf32, #tpu.memory_space<vmem>>, vector<64x32xf32>
    %cst_26 = arith.constant 0.000000e+00 : f32
    %73 = vector.shape_cast %68 : vector<64x1xi1> to vector<64x1xi1>
    %74 = vector.broadcast %73 : vector<64x1xi1> to vector<64x32xi1>
    %75 = vector.broadcast %cst_26 : f32 to vector<64x32xf32>
    %76 = arith.select %74, %72, %75 : vector<64x32xi1>, vector<64x32xf32>
    %c8 = arith.constant 8 : index
    %c0_27 = arith.constant 0 : index
    %77 = vector.load %arg15[%c8, %c0_27] : memref<168x32xf32, #tpu.memory_space<vmem>>, vector<64x32xf32>
    %c9 = arith.constant 9 : index
    %c0_28 = arith.constant 0 : index
    %78 = vector.load %arg15[%c9, %c0_28] : memref<168x32xf32, #tpu.memory_space<vmem>>, vector<64x32xf32>
    %cst_29 = arith.constant 0.000000e+00 : f32
    %79 = vector.shape_cast %70 : vector<64x1xi1> to vector<64x1xi1>
    %80 = vector.broadcast %79 : vector<64x1xi1> to vector<64x32xi1>
    %81 = vector.broadcast %cst_29 : f32 to vector<64x32xf32>
    %82 = arith.select %80, %78, %81 : vector<64x32xi1>, vector<64x32xf32>
    %c15 = arith.constant 15 : index
    %c0_30 = arith.constant 0 : index
    %83 = vector.load %arg15[%c15, %c0_30] : memref<168x32xf32, #tpu.memory_space<vmem>>, vector<64x32xf32>
    %cst_31 = arith.constant 0.000000e+00 : f32
    %84 = vector.shape_cast %68 : vector<64x1xi1> to vector<64x1xi1>
    %85 = vector.broadcast %84 : vector<64x1xi1> to vector<64x32xi1>
    %86 = vector.broadcast %cst_31 : f32 to vector<64x32xf32>
    %87 = arith.select %85, %83, %86 : vector<64x32xi1>, vector<64x32xf32>
    %c17 = arith.constant 17 : index
    %c0_32 = arith.constant 0 : index
    %88 = vector.load %arg15[%c17, %c0_32] : memref<168x32xf32, #tpu.memory_space<vmem>>, vector<64x32xf32>
    %cst_33 = arith.constant 0.000000e+00 : f32
    %89 = vector.shape_cast %70 : vector<64x1xi1> to vector<64x1xi1>
    %90 = vector.broadcast %89 : vector<64x1xi1> to vector<64x32xi1>
    %91 = vector.broadcast %cst_33 : f32 to vector<64x32xf32>
    %92 = arith.select %90, %88, %91 : vector<64x32xi1>, vector<64x32xf32>
    %c23 = arith.constant 23 : index
    %c0_34 = arith.constant 0 : index
    %93 = vector.load %arg15[%c23, %c0_34] : memref<168x32xf32, #tpu.memory_space<vmem>>, vector<64x32xf32>
    %cst_35 = arith.constant 0.000000e+00 : f32
    %94 = vector.shape_cast %68 : vector<64x1xi1> to vector<64x1xi1>
    %95 = vector.broadcast %94 : vector<64x1xi1> to vector<64x32xi1>
    %96 = vector.broadcast %cst_35 : f32 to vector<64x32xf32>
    %97 = arith.select %95, %93, %96 : vector<64x32xi1>, vector<64x32xf32>
    %c24 = arith.constant 24 : index
    %c0_36 = arith.constant 0 : index
    %98 = vector.load %arg15[%c24, %c0_36] : memref<168x32xf32, #tpu.memory_space<vmem>>, vector<64x32xf32>
    %c25 = arith.constant 25 : index
    %c0_37 = arith.constant 0 : index
    %99 = vector.load %arg15[%c25, %c0_37] : memref<168x32xf32, #tpu.memory_space<vmem>>, vector<64x32xf32>
    %cst_38 = arith.constant 0.000000e+00 : f32
    %100 = vector.shape_cast %70 : vector<64x1xi1> to vector<64x1xi1>
    %101 = vector.broadcast %100 : vector<64x1xi1> to vector<64x32xi1>
    %102 = vector.broadcast %cst_38 : f32 to vector<64x32xf32>
    %103 = arith.select %101, %99, %102 : vector<64x32xi1>, vector<64x32xf32>
    %104 = tpu.concatenate %71, %76, %77, %82, %87, %92, %97, %98, %103 in 1 : vector<64x32xf32>, vector<64x32xf32>, vector<64x32xf32>, vector<64x32xf32>, vector<64x32xf32>, vector<64x32xf32>, vector<64x32xf32>, vector<64x32xf32>, vector<64x32xf32> -> vector<64x288xf32>
    %c88_39 = arith.constant 88 : index
    %c0_40 = arith.constant 0 : index
    %105 = vector.load %arg15[%c88_39, %c0_40] : memref<168x32xf32, #tpu.memory_space<vmem>>, vector<64x32xf32>
    %c79 = arith.constant 79 : index
    %c0_41 = arith.constant 0 : index
    %106 = vector.load %arg15[%c79, %c0_41] : memref<168x32xf32, #tpu.memory_space<vmem>>, vector<64x32xf32>
    %cst_42 = arith.constant 0.000000e+00 : f32
    %107 = vector.shape_cast %68 : vector<64x1xi1> to vector<64x1xi1>
    %108 = vector.broadcast %107 : vector<64x1xi1> to vector<64x32xi1>
    %109 = vector.broadcast %cst_42 : f32 to vector<64x32xf32>
    %110 = arith.select %108, %106, %109 : vector<64x32xi1>, vector<64x32xf32>
    %c80 = arith.constant 80 : index
    %c0_43 = arith.constant 0 : index
    %111 = vector.load %arg15[%c80, %c0_43] : memref<168x32xf32, #tpu.memory_space<vmem>>, vector<64x32xf32>
    %c81 = arith.constant 81 : index
    %c0_44 = arith.constant 0 : index
    %112 = vector.load %arg15[%c81, %c0_44] : memref<168x32xf32, #tpu.memory_space<vmem>>, vector<64x32xf32>
    %cst_45 = arith.constant 0.000000e+00 : f32
    %113 = vector.shape_cast %70 : vector<64x1xi1> to vector<64x1xi1>
    %114 = vector.broadcast %113 : vector<64x1xi1> to vector<64x32xi1>
    %115 = vector.broadcast %cst_45 : f32 to vector<64x32xf32>
    %116 = arith.select %114, %112, %115 : vector<64x32xi1>, vector<64x32xf32>
    %c87 = arith.constant 87 : index
    %c0_46 = arith.constant 0 : index
    %117 = vector.load %arg15[%c87, %c0_46] : memref<168x32xf32, #tpu.memory_space<vmem>>, vector<64x32xf32>
    %cst_47 = arith.constant 0.000000e+00 : f32
    %118 = vector.shape_cast %68 : vector<64x1xi1> to vector<64x1xi1>
    %119 = vector.broadcast %118 : vector<64x1xi1> to vector<64x32xi1>
    %120 = vector.broadcast %cst_47 : f32 to vector<64x32xf32>
    %121 = arith.select %119, %117, %120 : vector<64x32xi1>, vector<64x32xf32>
    %c89 = arith.constant 89 : index
    %c0_48 = arith.constant 0 : index
    %122 = vector.load %arg15[%c89, %c0_48] : memref<168x32xf32, #tpu.memory_space<vmem>>, vector<64x32xf32>
    %cst_49 = arith.constant 0.000000e+00 : f32
    %123 = vector.shape_cast %70 : vector<64x1xi1> to vector<64x1xi1>
    %124 = vector.broadcast %123 : vector<64x1xi1> to vector<64x32xi1>
    %125 = vector.broadcast %cst_49 : f32 to vector<64x32xf32>
    %126 = arith.select %124, %122, %125 : vector<64x32xi1>, vector<64x32xf32>
    %c95 = arith.constant 95 : index
    %c0_50 = arith.constant 0 : index
    %127 = vector.load %arg15[%c95, %c0_50] : memref<168x32xf32, #tpu.memory_space<vmem>>, vector<64x32xf32>
    %cst_51 = arith.constant 0.000000e+00 : f32
    %128 = vector.shape_cast %68 : vector<64x1xi1> to vector<64x1xi1>
    %129 = vector.broadcast %128 : vector<64x1xi1> to vector<64x32xi1>
    %130 = vector.broadcast %cst_51 : f32 to vector<64x32xf32>
    %131 = arith.select %129, %127, %130 : vector<64x32xi1>, vector<64x32xf32>
    %c96 = arith.constant 96 : index
    %c0_52 = arith.constant 0 : index
    %132 = vector.load %arg15[%c96, %c0_52] : memref<168x32xf32, #tpu.memory_space<vmem>>, vector<64x32xf32>
    %c97 = arith.constant 97 : index
    %c0_53 = arith.constant 0 : index
    %133 = vector.load %arg15[%c97, %c0_53] : memref<168x32xf32, #tpu.memory_space<vmem>>, vector<64x32xf32>
    %cst_54 = arith.constant 0.000000e+00 : f32
    %134 = vector.shape_cast %70 : vector<64x1xi1> to vector<64x1xi1>
    %135 = vector.broadcast %134 : vector<64x1xi1> to vector<64x32xi1>
    %136 = vector.broadcast %cst_54 : f32 to vector<64x32xf32>
    %137 = arith.select %135, %133, %136 : vector<64x32xi1>, vector<64x32xf32>
    %138 = tpu.concatenate %105, %110, %111, %116, %121, %126, %131, %132, %137 in 1 : vector<64x32xf32>, vector<64x32xf32>, vector<64x32xf32>, vector<64x32xf32>, vector<64x32xf32>, vector<64x32xf32>, vector<64x32xf32>, vector<64x32xf32>, vector<64x32xf32> -> vector<64x288xf32>
    %139 = tpu.concatenate %104, %138 in 0 : vector<64x288xf32>, vector<64x288xf32> -> vector<128x288xf32>
    %c0_55 = arith.constant 0 : index
    %c0_56 = arith.constant 0 : index
    %140 = vector.load %arg2[%c0_55, %c0_56] : memref<288x32xf32, #tpu.memory_space<vmem>>, vector<288x32xf32>
    %cst_57 = arith.constant dense<0.000000e+00> : vector<128x32xf32>
    %141 = tpu.matmul %139, %140, %cst_57 {dimension_numbers = #tpu.dot_dimension_numbers<[1], [0], [0], [1], [0, 0, 1, 1], [], []>} : vector<128x288xf32>, vector<288x32xf32>, vector<128x32xf32> -> vector<128x32xf32>
    %142 = vector.extract_strided_slice %141 {offsets = [0, 0], sizes = [64, 32], strides = [1, 1]} : vector<128x32xf32> to vector<64x32xf32>
    %cst_58 = arith.constant dense<0.000000e+00> : vector<32xf32>
    %143 = vector.multi_reduction <add>, %142, %cst_58 [0] : vector<64x32xf32> to vector<32xf32>
    %144 = vector.shape_cast %143 : vector<32xf32> to vector<1x32xf32>
    %cst_59 = arith.constant 6.400000e+01 : f32
    %145 = vector.broadcast %cst_59 : f32 to vector<1x32xf32>
    %146 = arith.divf %144, %145 : vector<1x32xf32>
    %147 = vector.broadcast %146 : vector<1x32xf32> to vector<64x32xf32>
    %148 = arith.subf %142, %147 : vector<64x32xf32>
    %149 = arith.mulf %148, %148 : vector<64x32xf32>
    %cst_60 = arith.constant dense<0.000000e+00> : vector<32xf32>
    %150 = vector.multi_reduction <add>, %149, %cst_60 [0] : vector<64x32xf32> to vector<32xf32>
    %151 = vector.shape_cast %150 : vector<32xf32> to vector<1x32xf32>
    %cst_61 = arith.constant 6.400000e+01 : f32
    %152 = vector.broadcast %cst_61 : f32 to vector<1x32xf32>
    %153 = arith.divf %151, %152 : vector<1x32xf32>
    %154 = vector.broadcast %146 : vector<1x32xf32> to vector<64x32xf32>
    %155 = arith.subf %142, %154 : vector<64x32xf32>
    %cst_62 = arith.constant 9.99999974E-6 : f32
    %156 = vector.broadcast %cst_62 : f32 to vector<1x32xf32>
    %157 = arith.addf %153, %156 : vector<1x32xf32>
    %158 = math.rsqrt %157 : vector<1x32xf32>
    %159 = vector.broadcast %158 : vector<1x32xf32> to vector<64x32xf32>
    %160 = arith.mulf %155, %159 : vector<64x32xf32>
    %161 = vector.extract_strided_slice %141 {offsets = [64, 0], sizes = [64, 32], strides = [1, 1]} : vector<128x32xf32> to vector<64x32xf32>
    %cst_63 = arith.constant dense<0.000000e+00> : vector<32xf32>
    %162 = vector.multi_reduction <add>, %161, %cst_63 [0] : vector<64x32xf32> to vector<32xf32>
    %163 = vector.shape_cast %162 : vector<32xf32> to vector<1x32xf32>
    %cst_64 = arith.constant 6.400000e+01 : f32
    %164 = vector.broadcast %cst_64 : f32 to vector<1x32xf32>
    %165 = arith.divf %163, %164 : vector<1x32xf32>
    %166 = vector.broadcast %165 : vector<1x32xf32> to vector<64x32xf32>
    %167 = arith.subf %161, %166 : vector<64x32xf32>
    %168 = arith.mulf %167, %167 : vector<64x32xf32>
    %cst_65 = arith.constant dense<0.000000e+00> : vector<32xf32>
    %169 = vector.multi_reduction <add>, %168, %cst_65 [0] : vector<64x32xf32> to vector<32xf32>
    %170 = vector.shape_cast %169 : vector<32xf32> to vector<1x32xf32>
    %cst_66 = arith.constant 6.400000e+01 : f32
    %171 = vector.broadcast %cst_66 : f32 to vector<1x32xf32>
    %172 = arith.divf %170, %171 : vector<1x32xf32>
    %173 = vector.broadcast %165 : vector<1x32xf32> to vector<64x32xf32>
    %174 = arith.subf %161, %173 : vector<64x32xf32>
    %cst_67 = arith.constant 9.99999974E-6 : f32
    %175 = vector.broadcast %cst_67 : f32 to vector<1x32xf32>
    %176 = arith.addf %172, %175 : vector<1x32xf32>
    %177 = math.rsqrt %176 : vector<1x32xf32>
    %178 = vector.broadcast %177 : vector<1x32xf32> to vector<64x32xf32>
    %179 = arith.mulf %174, %178 : vector<64x32xf32>
    %180 = tpu.concatenate %160, %179 in 0 : vector<64x32xf32>, vector<64x32xf32> -> vector<128x32xf32>
    %181 = vector.extract_strided_slice %0 {offsets = [0, 0], sizes = [128, 15], strides = [1, 1]} : vector<128x135xf32> to vector<128x15xf32>
    %c0_68 = arith.constant 0 : index
    %c0_69 = arith.constant 0 : index
    %182 = vector.load %arg3[%c0_68, %c0_69] : memref<15x32xf32, #tpu.memory_space<vmem>>, vector<15x32xf32>
    %cst_70 = arith.constant dense<0.000000e+00> : vector<128x32xf32>
    %183 = tpu.matmul %181, %182, %cst_70 {dimension_numbers = #tpu.dot_dimension_numbers<[1], [0], [0], [1], [0, 0, 1, 1], [], []>} : vector<128x15xf32>, vector<15x32xf32>, vector<128x32xf32> -> vector<128x32xf32>
    %184 = arith.addf %180, %183 : vector<128x32xf32>
    %cst_71 = arith.constant 0.000000e+00 : f32
    %185 = vector.broadcast %cst_71 : f32 to vector<128x32xf32>
    %186 = arith.maximumf %184, %185 : vector<128x32xf32>
    %cst_72 = arith.constant 0.000000e+00 : f32
    %187 = vector.broadcast %cst_72 : f32 to vector<168x32xf32>
    %c0_73 = arith.constant 0 : index
    %c0_74 = arith.constant 0 : index
    %188 = vector.load %arg15[%c0_73, %c0_74] : memref<168x32xf32, #tpu.memory_space<vmem>>, vector<168x32xf32>
    tpu.vector_store %arg15[%c0_73, %c0_74], %187 {strides = array<i32>} : memref<168x32xf32, #tpu.memory_space<vmem>>, vector<168x32xf32>,
    %189 = vector.extract_strided_slice %186 {offsets = [0, 0], sizes = [64, 32], strides = [1, 1]} : vector<128x32xf32> to vector<64x32xf32>
    %c16_75 = arith.constant 16 : index
    %c0_76 = arith.constant 0 : index
    %190 = vector.load %arg15[%c16_75, %c0_76] : memref<168x32xf32, #tpu.memory_space<vmem>>, vector<64x32xf32>
    tpu.vector_store %arg15[%c16_75, %c0_76], %189 {strides = array<i32>} : memref<168x32xf32, #tpu.memory_space<vmem>>, vector<64x32xf32>,
    %191 = vector.extract_strided_slice %186 {offsets = [64, 0], sizes = [64, 32], strides = [1, 1]} : vector<128x32xf32> to vector<64x32xf32>
    %c88_77 = arith.constant 88 : index
    %c0_78 = arith.constant 0 : index
    %192 = vector.load %arg15[%c88_77, %c0_78] : memref<168x32xf32, #tpu.memory_space<vmem>>, vector<64x32xf32>
    tpu.vector_store %arg15[%c88_77, %c0_78], %191 {strides = array<i32>} : memref<168x32xf32, #tpu.memory_space<vmem>>, vector<64x32xf32>,
    %193 = tpu.iota {dimensions = array<i32: 0>} : vector<64x1xi32>
    %c8_i32_79 = arith.constant 8 : i32
    %c0_i32_80 = arith.constant 0 : i32
    %194 = arith.cmpi eq, %c8_i32_79, %c0_i32_80 : i32
    %c1_i32_81 = arith.constant 1 : i32
    %195 = arith.select %194, %c1_i32_81, %c8_i32_79 : i32
    %196 = vector.broadcast %195 : i32 to vector<64x1xi32>
    %197 = arith.remsi %193, %196 : vector<64x1xi32>
    %c0_i32_82 = arith.constant 0 : i32
    %198 = vector.broadcast %c0_i32_82 : i32 to vector<64x1xi32>
    %199 = arith.cmpi ne, %197, %198 : vector<64x1xi32>
    %c0_i32_83 = arith.constant 0 : i32
    %200 = vector.broadcast %c0_i32_83 : i32 to vector<64x1xi32>
    %201 = arith.cmpi slt, %197, %200 : vector<64x1xi32>
    %c0_i32_84 = arith.constant 0 : i32
    %202 = arith.cmpi slt, %195, %c0_i32_84 : i32
    %203 = vector.broadcast %202 : i1 to vector<64x1xi1>
    %204 = vector.broadcast %203 : vector<64x1xi1> to vector<64x1xi1>
    %205 = arith.xori %201, %204 : vector<64x1xi1>
    %206 = arith.andi %205, %199 : vector<64x1xi1>
    %207 = vector.broadcast %195 : i32 to vector<64x1xi32>
    %208 = arith.addi %197, %207 : vector<64x1xi32>
    %209 = arith.select %206, %208, %197 : vector<64x1xi1>, vector<64x1xi32>
    %c0_i32_85 = arith.constant 0 : i32
    %210 = vector.broadcast %c0_i32_85 : i32 to vector<64x1xi32>
    %211 = arith.cmpi ne, %209, %210 : vector<64x1xi32>
    %c7_i32_86 = arith.constant 7 : i32
    %212 = vector.broadcast %c7_i32_86 : i32 to vector<64x1xi32>
    %213 = arith.cmpi ne, %209, %212 : vector<64x1xi32>
    %c16_87 = arith.constant 16 : index
    %c0_88 = arith.constant 0 : index
    %214 = vector.load %arg15[%c16_87, %c0_88] : memref<168x32xf32, #tpu.memory_space<vmem>>, vector<64x32xf32>
    %c7_89 = arith.constant 7 : index
    %c0_90 = arith.constant 0 : index
    %215 = vector.load %arg15[%c7_89, %c0_90] : memref<168x32xf32, #tpu.memory_space<vmem>>, vector<64x32xf32>
    %cst_91 = arith.constant 0.000000e+00 : f32
    %216 = vector.shape_cast %211 : vector<64x1xi1> to vector<64x1xi1>
    %217 = vector.broadcast %216 : vector<64x1xi1> to vector<64x32xi1>
    %218 = vector.broadcast %cst_91 : f32 to vector<64x32xf32>
    %219 = arith.select %217, %215, %218 : vector<64x32xi1>, vector<64x32xf32>
    %c8_92 = arith.constant 8 : index
    %c0_93 = arith.constant 0 : index
    %220 = vector.load %arg15[%c8_92, %c0_93] : memref<168x32xf32, #tpu.memory_space<vmem>>, vector<64x32xf32>
    %c9_94 = arith.constant 9 : index
    %c0_95 = arith.constant 0 : index
    %221 = vector.load %arg15[%c9_94, %c0_95] : memref<168x32xf32, #tpu.memory_space<vmem>>, vector<64x32xf32>
    %cst_96 = arith.constant 0.000000e+00 : f32
    %222 = vector.shape_cast %213 : vector<64x1xi1> to vector<64x1xi1>
    %223 = vector.broadcast %222 : vector<64x1xi1> to vector<64x32xi1>
    %224 = vector.broadcast %cst_96 : f32 to vector<64x32xf32>
    %225 = arith.select %223, %221, %224 : vector<64x32xi1>, vector<64x32xf32>
    %c15_97 = arith.constant 15 : index
    %c0_98 = arith.constant 0 : index
    %226 = vector.load %arg15[%c15_97, %c0_98] : memref<168x32xf32, #tpu.memory_space<vmem>>, vector<64x32xf32>
    %cst_99 = arith.constant 0.000000e+00 : f32
    %227 = vector.shape_cast %211 : vector<64x1xi1> to vector<64x1xi1>
    %228 = vector.broadcast %227 : vector<64x1xi1> to vector<64x32xi1>
    %229 = vector.broadcast %cst_99 : f32 to vector<64x32xf32>
    %230 = arith.select %228, %226, %229 : vector<64x32xi1>, vector<64x32xf32>
    %c17_100 = arith.constant 17 : index
    %c0_101 = arith.constant 0 : index
    %231 = vector.load %arg15[%c17_100, %c0_101] : memref<168x32xf32, #tpu.memory_space<vmem>>, vector<64x32xf32>
    %cst_102 = arith.constant 0.000000e+00 : f32
    %232 = vector.shape_cast %213 : vector<64x1xi1> to vector<64x1xi1>
    %233 = vector.broadcast %232 : vector<64x1xi1> to vector<64x32xi1>
    %234 = vector.broadcast %cst_102 : f32 to vector<64x32xf32>
    %235 = arith.select %233, %231, %234 : vector<64x32xi1>, vector<64x32xf32>
    %c23_103 = arith.constant 23 : index
    %c0_104 = arith.constant 0 : index
    %236 = vector.load %arg15[%c23_103, %c0_104] : memref<168x32xf32, #tpu.memory_space<vmem>>, vector<64x32xf32>
    %cst_105 = arith.constant 0.000000e+00 : f32
    %237 = vector.shape_cast %211 : vector<64x1xi1> to vector<64x1xi1>
    %238 = vector.broadcast %237 : vector<64x1xi1> to vector<64x32xi1>
    %239 = vector.broadcast %cst_105 : f32 to vector<64x32xf32>
    %240 = arith.select %238, %236, %239 : vector<64x32xi1>, vector<64x32xf32>
    %c24_106 = arith.constant 24 : index
    %c0_107 = arith.constant 0 : index
    %241 = vector.load %arg15[%c24_106, %c0_107] : memref<168x32xf32, #tpu.memory_space<vmem>>, vector<64x32xf32>
    %c25_108 = arith.constant 25 : index
    %c0_109 = arith.constant 0 : index
    %242 = vector.load %arg15[%c25_108, %c0_109] : memref<168x32xf32, #tpu.memory_space<vmem>>, vector<64x32xf32>
    %cst_110 = arith.constant 0.000000e+00 : f32
    %243 = vector.shape_cast %213 : vector<64x1xi1> to vector<64x1xi1>
    %244 = vector.broadcast %243 : vector<64x1xi1> to vector<64x32xi1>
    %245 = vector.broadcast %cst_110 : f32 to vector<64x32xf32>
    %246 = arith.select %244, %242, %245 : vector<64x32xi1>, vector<64x32xf32>
    %247 = tpu.concatenate %214, %219, %220, %225, %230, %235, %240, %241, %246 in 1 : vector<64x32xf32>, vector<64x32xf32>, vector<64x32xf32>, vector<64x32xf32>, vector<64x32xf32>, vector<64x32xf32>, vector<64x32xf32>, vector<64x32xf32>, vector<64x32xf32> -> vector<64x288xf32>
    %c88_111 = arith.constant 88 : index
    %c0_112 = arith.constant 0 : index
    %248 = vector.load %arg15[%c88_111, %c0_112] : memref<168x32xf32, #tpu.memory_space<vmem>>, vector<64x32xf32>
    %c79_113 = arith.constant 79 : index
    %c0_114 = arith.constant 0 : index
    %249 = vector.load %arg15[%c79_113, %c0_114] : memref<168x32xf32, #tpu.memory_space<vmem>>, vector<64x32xf32>
    %cst_115 = arith.constant 0.000000e+00 : f32
    %250 = vector.shape_cast %211 : vector<64x1xi1> to vector<64x1xi1>
    %251 = vector.broadcast %250 : vector<64x1xi1> to vector<64x32xi1>
    %252 = vector.broadcast %cst_115 : f32 to vector<64x32xf32>
    %253 = arith.select %251, %249, %252 : vector<64x32xi1>, vector<64x32xf32>
    %c80_116 = arith.constant 80 : index
    %c0_117 = arith.constant 0 : index
    %254 = vector.load %arg15[%c80_116, %c0_117] : memref<168x32xf32, #tpu.memory_space<vmem>>, vector<64x32xf32>
    %c81_118 = arith.constant 81 : index
    %c0_119 = arith.constant 0 : index
    %255 = vector.load %arg15[%c81_118, %c0_119] : memref<168x32xf32, #tpu.memory_space<vmem>>, vector<64x32xf32>
    %cst_120 = arith.constant 0.000000e+00 : f32
    %256 = vector.shape_cast %213 : vector<64x1xi1> to vector<64x1xi1>
    %257 = vector.broadcast %256 : vector<64x1xi1> to vector<64x32xi1>
    %258 = vector.broadcast %cst_120 : f32 to vector<64x32xf32>
    %259 = arith.select %257, %255, %258 : vector<64x32xi1>, vector<64x32xf32>
    %c87_121 = arith.constant 87 : index
    %c0_122 = arith.constant 0 : index
    %260 = vector.load %arg15[%c87_121, %c0_122] : memref<168x32xf32, #tpu.memory_space<vmem>>, vector<64x32xf32>
    %cst_123 = arith.constant 0.000000e+00 : f32
    %261 = vector.shape_cast %211 : vector<64x1xi1> to vector<64x1xi1>
    %262 = vector.broadcast %261 : vector<64x1xi1> to vector<64x32xi1>
    %263 = vector.broadcast %cst_123 : f32 to vector<64x32xf32>
    %264 = arith.select %262, %260, %263 : vector<64x32xi1>, vector<64x32xf32>
    %c89_124 = arith.constant 89 : index
    %c0_125 = arith.constant 0 : index
    %265 = vector.load %arg15[%c89_124, %c0_125] : memref<168x32xf32, #tpu.memory_space<vmem>>, vector<64x32xf32>
    %cst_126 = arith.constant 0.000000e+00 : f32
    %266 = vector.shape_cast %213 : vector<64x1xi1> to vector<64x1xi1>
    %267 = vector.broadcast %266 : vector<64x1xi1> to vector<64x32xi1>
    %268 = vector.broadcast %cst_126 : f32 to vector<64x32xf32>
    %269 = arith.select %267, %265, %268 : vector<64x32xi1>, vector<64x32xf32>
    %c95_127 = arith.constant 95 : index
    %c0_128 = arith.constant 0 : index
    %270 = vector.load %arg15[%c95_127, %c0_128] : memref<168x32xf32, #tpu.memory_space<vmem>>, vector<64x32xf32>
    %cst_129 = arith.constant 0.000000e+00 : f32
    %271 = vector.shape_cast %211 : vector<64x1xi1> to vector<64x1xi1>
    %272 = vector.broadcast %271 : vector<64x1xi1> to vector<64x32xi1>
    %273 = vector.broadcast %cst_129 : f32 to vector<64x32xf32>
    %274 = arith.select %272, %270, %273 : vector<64x32xi1>, vector<64x32xf32>
    %c96_130 = arith.constant 96 : index
    %c0_131 = arith.constant 0 : index
    %275 = vector.load %arg15[%c96_130, %c0_131] : memref<168x32xf32, #tpu.memory_space<vmem>>, vector<64x32xf32>
    %c97_132 = arith.constant 97 : index
    %c0_133 = arith.constant 0 : index
    %276 = vector.load %arg15[%c97_132, %c0_133] : memref<168x32xf32, #tpu.memory_space<vmem>>, vector<64x32xf32>
    %cst_134 = arith.constant 0.000000e+00 : f32
    %277 = vector.shape_cast %213 : vector<64x1xi1> to vector<64x1xi1>
    %278 = vector.broadcast %277 : vector<64x1xi1> to vector<64x32xi1>
    %279 = vector.broadcast %cst_134 : f32 to vector<64x32xf32>
    %280 = arith.select %278, %276, %279 : vector<64x32xi1>, vector<64x32xf32>
    %281 = tpu.concatenate %248, %253, %254, %259, %264, %269, %274, %275, %280 in 1 : vector<64x32xf32>, vector<64x32xf32>, vector<64x32xf32>, vector<64x32xf32>, vector<64x32xf32>, vector<64x32xf32>, vector<64x32xf32>, vector<64x32xf32>, vector<64x32xf32> -> vector<64x288xf32>
    %282 = tpu.concatenate %247, %281 in 0 : vector<64x288xf32>, vector<64x288xf32> -> vector<128x288xf32>
    %c0_135 = arith.constant 0 : index
    %c0_136 = arith.constant 0 : index
    %283 = vector.load %arg10[%c0_135, %c0_136] : memref<16x64xf32, #tpu.memory_space<vmem>>, vector<16x64xf32>
    %284 = vector.extract_strided_slice %282 {offsets = [0, 0], sizes = [64, 288], strides = [1, 1]} : vector<128x288xf32> to vector<64x288xf32>
    %cst_137 = arith.constant dense<0.000000e+00> : vector<16x288xf32>
    %285 = tpu.matmul %283, %284, %cst_137 {dimension_numbers = #tpu.dot_dimension_numbers<[1], [0], [0], [1], [0, 0, 1, 1], [], []>} : vector<16x64xf32>, vector<64x288xf32>, vector<16x288xf32> -> vector<16x288xf32>
    %286 = vector.extract_strided_slice %282 {offsets = [64, 0], sizes = [64, 288], strides = [1, 1]} : vector<128x288xf32> to vector<64x288xf32>
    %cst_138 = arith.constant dense<0.000000e+00> : vector<16x288xf32>
    %287 = tpu.matmul %283, %286, %cst_138 {dimension_numbers = #tpu.dot_dimension_numbers<[1], [0], [0], [1], [0, 0, 1, 1], [], []>} : vector<16x64xf32>, vector<64x288xf32>, vector<16x288xf32> -> vector<16x288xf32>
    %288 = tpu.concatenate %285, %287 in 0 : vector<16x288xf32>, vector<16x288xf32> -> vector<32x288xf32>
    %c0_139 = arith.constant 0 : index
    %c0_140 = arith.constant 0 : index
    %289 = vector.load %arg4[%c0_139, %c0_140] : memref<288x64xf32, #tpu.memory_space<vmem>>, vector<288x64xf32>
    %cst_141 = arith.constant dense<0.000000e+00> : vector<32x64xf32>
    %290 = tpu.matmul %288, %289, %cst_141 {dimension_numbers = #tpu.dot_dimension_numbers<[1], [0], [0], [1], [0, 0, 1, 1], [], []>} : vector<32x288xf32>, vector<288x64xf32>, vector<32x64xf32> -> vector<32x64xf32>
    %291 = vector.extract_strided_slice %290 {offsets = [0, 0], sizes = [16, 64], strides = [1, 1]} : vector<32x64xf32> to vector<16x64xf32>
    %cst_142 = arith.constant dense<0.000000e+00> : vector<64xf32>
    %292 = vector.multi_reduction <add>, %291, %cst_142 [0] : vector<16x64xf32> to vector<64xf32>
    %293 = vector.shape_cast %292 : vector<64xf32> to vector<1x64xf32>
    %cst_143 = arith.constant 1.600000e+01 : f32
    %294 = vector.broadcast %cst_143 : f32 to vector<1x64xf32>
    %295 = arith.divf %293, %294 : vector<1x64xf32>
    %296 = vector.broadcast %295 : vector<1x64xf32> to vector<16x64xf32>
    %297 = arith.subf %291, %296 : vector<16x64xf32>
    %298 = arith.mulf %297, %297 : vector<16x64xf32>
    %cst_144 = arith.constant dense<0.000000e+00> : vector<64xf32>
    %299 = vector.multi_reduction <add>, %298, %cst_144 [0] : vector<16x64xf32> to vector<64xf32>
    %300 = vector.shape_cast %299 : vector<64xf32> to vector<1x64xf32>
    %cst_145 = arith.constant 1.600000e+01 : f32
    %301 = vector.broadcast %cst_145 : f32 to vector<1x64xf32>
    %302 = arith.divf %300, %301 : vector<1x64xf32>
    %303 = vector.broadcast %295 : vector<1x64xf32> to vector<16x64xf32>
    %304 = arith.subf %291, %303 : vector<16x64xf32>
    %cst_146 = arith.constant 9.99999974E-6 : f32
    %305 = vector.broadcast %cst_146 : f32 to vector<1x64xf32>
    %306 = arith.addf %302, %305 : vector<1x64xf32>
    %307 = math.rsqrt %306 : vector<1x64xf32>
    %308 = vector.broadcast %307 : vector<1x64xf32> to vector<16x64xf32>
    %309 = arith.mulf %304, %308 : vector<16x64xf32>
    %310 = vector.extract_strided_slice %290 {offsets = [16, 0], sizes = [16, 64], strides = [1, 1]} : vector<32x64xf32> to vector<16x64xf32>
    %cst_147 = arith.constant dense<0.000000e+00> : vector<64xf32>
    %311 = vector.multi_reduction <add>, %310, %cst_147 [0] : vector<16x64xf32> to vector<64xf32>
    %312 = vector.shape_cast %311 : vector<64xf32> to vector<1x64xf32>
    %cst_148 = arith.constant 1.600000e+01 : f32
    %313 = vector.broadcast %cst_148 : f32 to vector<1x64xf32>
    %314 = arith.divf %312, %313 : vector<1x64xf32>
    %315 = vector.broadcast %314 : vector<1x64xf32> to vector<16x64xf32>
    %316 = arith.subf %310, %315 : vector<16x64xf32>
    %317 = arith.mulf %316, %316 : vector<16x64xf32>
    %cst_149 = arith.constant dense<0.000000e+00> : vector<64xf32>
    %318 = vector.multi_reduction <add>, %317, %cst_149 [0] : vector<16x64xf32> to vector<64xf32>
    %319 = vector.shape_cast %318 : vector<64xf32> to vector<1x64xf32>
    %cst_150 = arith.constant 1.600000e+01 : f32
    %320 = vector.broadcast %cst_150 : f32 to vector<1x64xf32>
    %321 = arith.divf %319, %320 : vector<1x64xf32>
    %322 = vector.broadcast %314 : vector<1x64xf32> to vector<16x64xf32>
    %323 = arith.subf %310, %322 : vector<16x64xf32>
    %cst_151 = arith.constant 9.99999974E-6 : f32
    %324 = vector.broadcast %cst_151 : f32 to vector<1x64xf32>
    %325 = arith.addf %321, %324 : vector<1x64xf32>
    %326 = math.rsqrt %325 : vector<1x64xf32>
    %327 = vector.broadcast %326 : vector<1x64xf32> to vector<16x64xf32>
    %328 = arith.mulf %323, %327 : vector<16x64xf32>
    %329 = tpu.concatenate %309, %328 in 0 : vector<16x64xf32>, vector<16x64xf32> -> vector<32x64xf32>
    %cst_152 = arith.constant 0.000000e+00 : f32
    %330 = vector.broadcast %cst_152 : f32 to vector<32x64xf32>
    %331 = arith.maximumf %329, %330 : vector<32x64xf32>
    %cst_153 = arith.constant 0.000000e+00 : f32
    %332 = vector.broadcast %cst_153 : f32 to vector<52x64xf32>
    %c0_154 = arith.constant 0 : index
    %c0_155 = arith.constant 0 : index
    %333 = vector.load %arg16[%c0_154, %c0_155] : memref<52x64xf32, #tpu.memory_space<vmem>>, vector<52x64xf32>
    tpu.vector_store %arg16[%c0_154, %c0_155], %332 {strides = array<i32>} : memref<52x64xf32, #tpu.memory_space<vmem>>, vector<52x64xf32>,
    %334 = vector.extract_strided_slice %331 {offsets = [0, 0], sizes = [16, 64], strides = [1, 1]} : vector<32x64xf32> to vector<16x64xf32>
    %c8_156 = arith.constant 8 : index
    %c0_157 = arith.constant 0 : index
    %335 = vector.load %arg16[%c8_156, %c0_157] : memref<52x64xf32, #tpu.memory_space<vmem>>, vector<16x64xf32>
    tpu.vector_store %arg16[%c8_156, %c0_157], %334 {strides = array<i32>} : memref<52x64xf32, #tpu.memory_space<vmem>>, vector<16x64xf32>,
    %336 = vector.extract_strided_slice %331 {offsets = [16, 0], sizes = [16, 64], strides = [1, 1]} : vector<32x64xf32> to vector<16x64xf32>
    %c28 = arith.constant 28 : index
    %c0_158 = arith.constant 0 : index
    %337 = vector.load %arg16[%c28, %c0_158] : memref<52x64xf32, #tpu.memory_space<vmem>>, vector<16x64xf32>
    tpu.vector_store %arg16[%c28, %c0_158], %336 {strides = array<i32>} : memref<52x64xf32, #tpu.memory_space<vmem>>, vector<16x64xf32>,
    %338 = tpu.iota {dimensions = array<i32: 0>} : vector<16x1xi32>
    %c4_i32 = arith.constant 4 : i32
    %c0_i32_159 = arith.constant 0 : i32
    %339 = arith.cmpi eq, %c4_i32, %c0_i32_159 : i32
    %c1_i32_160 = arith.constant 1 : i32
    %340 = arith.select %339, %c1_i32_160, %c4_i32 : i32
    %341 = vector.broadcast %340 : i32 to vector<16x1xi32>
    %342 = arith.remsi %338, %341 : vector<16x1xi32>
    %c0_i32_161 = arith.constant 0 : i32
    %343 = vector.broadcast %c0_i32_161 : i32 to vector<16x1xi32>
    %344 = arith.cmpi ne, %342, %343 : vector<16x1xi32>
    %c0_i32_162 = arith.constant 0 : i32
    %345 = vector.broadcast %c0_i32_162 : i32 to vector<16x1xi32>
    %346 = arith.cmpi slt, %342, %345 : vector<16x1xi32>
    %c0_i32_163 = arith.constant 0 : i32
    %347 = arith.cmpi slt, %340, %c0_i32_163 : i32
    %348 = vector.broadcast %347 : i1 to vector<16x1xi1>
    %349 = vector.broadcast %348 : vector<16x1xi1> to vector<16x1xi1>
    %350 = arith.xori %346, %349 : vector<16x1xi1>
    %351 = arith.andi %350, %344 : vector<16x1xi1>
    %352 = vector.broadcast %340 : i32 to vector<16x1xi32>
    %353 = arith.addi %342, %352 : vector<16x1xi32>
    %354 = arith.select %351, %353, %342 : vector<16x1xi1>, vector<16x1xi32>
    %c0_i32_164 = arith.constant 0 : i32
    %355 = vector.broadcast %c0_i32_164 : i32 to vector<16x1xi32>
    %356 = arith.cmpi ne, %354, %355 : vector<16x1xi32>
    %c3_i32 = arith.constant 3 : i32
    %357 = vector.broadcast %c3_i32 : i32 to vector<16x1xi32>
    %358 = arith.cmpi ne, %354, %357 : vector<16x1xi32>
    %c8_165 = arith.constant 8 : index
    %c0_166 = arith.constant 0 : index
    %359 = vector.load %arg16[%c8_165, %c0_166] : memref<52x64xf32, #tpu.memory_space<vmem>>, vector<16x64xf32>
    %c3 = arith.constant 3 : index
    %c0_167 = arith.constant 0 : index
    %360 = vector.load %arg16[%c3, %c0_167] : memref<52x64xf32, #tpu.memory_space<vmem>>, vector<16x64xf32>
    %cst_168 = arith.constant 0.000000e+00 : f32
    %361 = vector.shape_cast %356 : vector<16x1xi1> to vector<16x1xi1>
    %362 = vector.broadcast %361 : vector<16x1xi1> to vector<16x64xi1>
    %363 = vector.broadcast %cst_168 : f32 to vector<16x64xf32>
    %364 = arith.select %362, %360, %363 : vector<16x64xi1>, vector<16x64xf32>
    %c4 = arith.constant 4 : index
    %c0_169 = arith.constant 0 : index
    %365 = vector.load %arg16[%c4, %c0_169] : memref<52x64xf32, #tpu.memory_space<vmem>>, vector<16x64xf32>
    %c5 = arith.constant 5 : index
    %c0_170 = arith.constant 0 : index
    %366 = vector.load %arg16[%c5, %c0_170] : memref<52x64xf32, #tpu.memory_space<vmem>>, vector<16x64xf32>
    %cst_171 = arith.constant 0.000000e+00 : f32
    %367 = vector.shape_cast %358 : vector<16x1xi1> to vector<16x1xi1>
    %368 = vector.broadcast %367 : vector<16x1xi1> to vector<16x64xi1>
    %369 = vector.broadcast %cst_171 : f32 to vector<16x64xf32>
    %370 = arith.select %368, %366, %369 : vector<16x64xi1>, vector<16x64xf32>
    %c7_172 = arith.constant 7 : index
    %c0_173 = arith.constant 0 : index
    %371 = vector.load %arg16[%c7_172, %c0_173] : memref<52x64xf32, #tpu.memory_space<vmem>>, vector<16x64xf32>
    %cst_174 = arith.constant 0.000000e+00 : f32
    %372 = vector.shape_cast %356 : vector<16x1xi1> to vector<16x1xi1>
    %373 = vector.broadcast %372 : vector<16x1xi1> to vector<16x64xi1>
    %374 = vector.broadcast %cst_174 : f32 to vector<16x64xf32>
    %375 = arith.select %373, %371, %374 : vector<16x64xi1>, vector<16x64xf32>
    %c9_175 = arith.constant 9 : index
    %c0_176 = arith.constant 0 : index
    %376 = vector.load %arg16[%c9_175, %c0_176] : memref<52x64xf32, #tpu.memory_space<vmem>>, vector<16x64xf32>
    %cst_177 = arith.constant 0.000000e+00 : f32
    %377 = vector.shape_cast %358 : vector<16x1xi1> to vector<16x1xi1>
    %378 = vector.broadcast %377 : vector<16x1xi1> to vector<16x64xi1>
    %379 = vector.broadcast %cst_177 : f32 to vector<16x64xf32>
    %380 = arith.select %378, %376, %379 : vector<16x64xi1>, vector<16x64xf32>
    %c11 = arith.constant 11 : index
    %c0_178 = arith.constant 0 : index
    %381 = vector.load %arg16[%c11, %c0_178] : memref<52x64xf32, #tpu.memory_space<vmem>>, vector<16x64xf32>
    %cst_179 = arith.constant 0.000000e+00 : f32
    %382 = vector.shape_cast %356 : vector<16x1xi1> to vector<16x1xi1>
    %383 = vector.broadcast %382 : vector<16x1xi1> to vector<16x64xi1>
    %384 = vector.broadcast %cst_179 : f32 to vector<16x64xf32>
    %385 = arith.select %383, %381, %384 : vector<16x64xi1>, vector<16x64xf32>
    %c12 = arith.constant 12 : index
    %c0_180 = arith.constant 0 : index
    %386 = vector.load %arg16[%c12, %c0_180] : memref<52x64xf32, #tpu.memory_space<vmem>>, vector<16x64xf32>
    %c13 = arith.constant 13 : index
    %c0_181 = arith.constant 0 : index
    %387 = vector.load %arg16[%c13, %c0_181] : memref<52x64xf32, #tpu.memory_space<vmem>>, vector<16x64xf32>
    %cst_182 = arith.constant 0.000000e+00 : f32
    %388 = vector.shape_cast %358 : vector<16x1xi1> to vector<16x1xi1>
    %389 = vector.broadcast %388 : vector<16x1xi1> to vector<16x64xi1>
    %390 = vector.broadcast %cst_182 : f32 to vector<16x64xf32>
    %391 = arith.select %389, %387, %390 : vector<16x64xi1>, vector<16x64xf32>
    %392 = tpu.concatenate %359, %364, %365, %370, %375, %380, %385, %386, %391 in 1 : vector<16x64xf32>, vector<16x64xf32>, vector<16x64xf32>, vector<16x64xf32>, vector<16x64xf32>, vector<16x64xf32>, vector<16x64xf32>, vector<16x64xf32>, vector<16x64xf32> -> vector<16x576xf32>
    %c28_183 = arith.constant 28 : index
    %c0_184 = arith.constant 0 : index
    %393 = vector.load %arg16[%c28_183, %c0_184] : memref<52x64xf32, #tpu.memory_space<vmem>>, vector<16x64xf32>
    %c23_185 = arith.constant 23 : index
    %c0_186 = arith.constant 0 : index
    %394 = vector.load %arg16[%c23_185, %c0_186] : memref<52x64xf32, #tpu.memory_space<vmem>>, vector<16x64xf32>
    %cst_187 = arith.constant 0.000000e+00 : f32
    %395 = vector.shape_cast %356 : vector<16x1xi1> to vector<16x1xi1>
    %396 = vector.broadcast %395 : vector<16x1xi1> to vector<16x64xi1>
    %397 = vector.broadcast %cst_187 : f32 to vector<16x64xf32>
    %398 = arith.select %396, %394, %397 : vector<16x64xi1>, vector<16x64xf32>
    %c24_188 = arith.constant 24 : index
    %c0_189 = arith.constant 0 : index
    %399 = vector.load %arg16[%c24_188, %c0_189] : memref<52x64xf32, #tpu.memory_space<vmem>>, vector<16x64xf32>
    %c25_190 = arith.constant 25 : index
    %c0_191 = arith.constant 0 : index
    %400 = vector.load %arg16[%c25_190, %c0_191] : memref<52x64xf32, #tpu.memory_space<vmem>>, vector<16x64xf32>
    %cst_192 = arith.constant 0.000000e+00 : f32
    %401 = vector.shape_cast %358 : vector<16x1xi1> to vector<16x1xi1>
    %402 = vector.broadcast %401 : vector<16x1xi1> to vector<16x64xi1>
    %403 = vector.broadcast %cst_192 : f32 to vector<16x64xf32>
    %404 = arith.select %402, %400, %403 : vector<16x64xi1>, vector<16x64xf32>
    %c27 = arith.constant 27 : index
    %c0_193 = arith.constant 0 : index
    %405 = vector.load %arg16[%c27, %c0_193] : memref<52x64xf32, #tpu.memory_space<vmem>>, vector<16x64xf32>
    %cst_194 = arith.constant 0.000000e+00 : f32
    %406 = vector.shape_cast %356 : vector<16x1xi1> to vector<16x1xi1>
    %407 = vector.broadcast %406 : vector<16x1xi1> to vector<16x64xi1>
    %408 = vector.broadcast %cst_194 : f32 to vector<16x64xf32>
    %409 = arith.select %407, %405, %408 : vector<16x64xi1>, vector<16x64xf32>
    %c29 = arith.constant 29 : index
    %c0_195 = arith.constant 0 : index
    %410 = vector.load %arg16[%c29, %c0_195] : memref<52x64xf32, #tpu.memory_space<vmem>>, vector<16x64xf32>
    %cst_196 = arith.constant 0.000000e+00 : f32
    %411 = vector.shape_cast %358 : vector<16x1xi1> to vector<16x1xi1>
    %412 = vector.broadcast %411 : vector<16x1xi1> to vector<16x64xi1>
    %413 = vector.broadcast %cst_196 : f32 to vector<16x64xf32>
    %414 = arith.select %412, %410, %413 : vector<16x64xi1>, vector<16x64xf32>
    %c31 = arith.constant 31 : index
    %c0_197 = arith.constant 0 : index
    %415 = vector.load %arg16[%c31, %c0_197] : memref<52x64xf32, #tpu.memory_space<vmem>>, vector<16x64xf32>
    %cst_198 = arith.constant 0.000000e+00 : f32
    %416 = vector.shape_cast %356 : vector<16x1xi1> to vector<16x1xi1>
    %417 = vector.broadcast %416 : vector<16x1xi1> to vector<16x64xi1>
    %418 = vector.broadcast %cst_198 : f32 to vector<16x64xf32>
    %419 = arith.select %417, %415, %418 : vector<16x64xi1>, vector<16x64xf32>
    %c32 = arith.constant 32 : index
    %c0_199 = arith.constant 0 : index
    %420 = vector.load %arg16[%c32, %c0_199] : memref<52x64xf32, #tpu.memory_space<vmem>>, vector<16x64xf32>
    %c33 = arith.constant 33 : index
    %c0_200 = arith.constant 0 : index
    %421 = vector.load %arg16[%c33, %c0_200] : memref<52x64xf32, #tpu.memory_space<vmem>>, vector<16x64xf32>
    %cst_201 = arith.constant 0.000000e+00 : f32
    %422 = vector.shape_cast %358 : vector<16x1xi1> to vector<16x1xi1>
    %423 = vector.broadcast %422 : vector<16x1xi1> to vector<16x64xi1>
    %424 = vector.broadcast %cst_201 : f32 to vector<16x64xf32>
    %425 = arith.select %423, %421, %424 : vector<16x64xi1>, vector<16x64xf32>
    %426 = tpu.concatenate %393, %398, %399, %404, %409, %414, %419, %420, %425 in 1 : vector<16x64xf32>, vector<16x64xf32>, vector<16x64xf32>, vector<16x64xf32>, vector<16x64xf32>, vector<16x64xf32>, vector<16x64xf32>, vector<16x64xf32>, vector<16x64xf32> -> vector<16x576xf32>
    %427 = tpu.concatenate %392, %426 in 0 : vector<16x576xf32>, vector<16x576xf32> -> vector<32x576xf32>
    %c0_202 = arith.constant 0 : index
    %c0_203 = arith.constant 0 : index
    %428 = vector.load %arg5[%c0_202, %c0_203] : memref<576x64xf32, #tpu.memory_space<vmem>>, vector<576x64xf32>
    %cst_204 = arith.constant dense<0.000000e+00> : vector<32x64xf32>
    %429 = tpu.matmul %427, %428, %cst_204 {dimension_numbers = #tpu.dot_dimension_numbers<[1], [0], [0], [1], [0, 0, 1, 1], [], []>} : vector<32x576xf32>, vector<576x64xf32>, vector<32x64xf32> -> vector<32x64xf32>
    %430 = vector.extract_strided_slice %429 {offsets = [0, 0], sizes = [16, 64], strides = [1, 1]} : vector<32x64xf32> to vector<16x64xf32>
    %cst_205 = arith.constant dense<0.000000e+00> : vector<64xf32>
    %431 = vector.multi_reduction <add>, %430, %cst_205 [0] : vector<16x64xf32> to vector<64xf32>
    %432 = vector.shape_cast %431 : vector<64xf32> to vector<1x64xf32>
    %cst_206 = arith.constant 1.600000e+01 : f32
    %433 = vector.broadcast %cst_206 : f32 to vector<1x64xf32>
    %434 = arith.divf %432, %433 : vector<1x64xf32>
    %435 = vector.broadcast %434 : vector<1x64xf32> to vector<16x64xf32>
    %436 = arith.subf %430, %435 : vector<16x64xf32>
    %437 = arith.mulf %436, %436 : vector<16x64xf32>
    %cst_207 = arith.constant dense<0.000000e+00> : vector<64xf32>
    %438 = vector.multi_reduction <add>, %437, %cst_207 [0] : vector<16x64xf32> to vector<64xf32>
    %439 = vector.shape_cast %438 : vector<64xf32> to vector<1x64xf32>
    %cst_208 = arith.constant 1.600000e+01 : f32
    %440 = vector.broadcast %cst_208 : f32 to vector<1x64xf32>
    %441 = arith.divf %439, %440 : vector<1x64xf32>
    %442 = vector.broadcast %434 : vector<1x64xf32> to vector<16x64xf32>
    %443 = arith.subf %430, %442 : vector<16x64xf32>
    %cst_209 = arith.constant 9.99999974E-6 : f32
    %444 = vector.broadcast %cst_209 : f32 to vector<1x64xf32>
    %445 = arith.addf %441, %444 : vector<1x64xf32>
    %446 = math.rsqrt %445 : vector<1x64xf32>
    %447 = vector.broadcast %446 : vector<1x64xf32> to vector<16x64xf32>
    %448 = arith.mulf %443, %447 : vector<16x64xf32>
    %449 = vector.extract_strided_slice %429 {offsets = [16, 0], sizes = [16, 64], strides = [1, 1]} : vector<32x64xf32> to vector<16x64xf32>
    %cst_210 = arith.constant dense<0.000000e+00> : vector<64xf32>
    %450 = vector.multi_reduction <add>, %449, %cst_210 [0] : vector<16x64xf32> to vector<64xf32>
    %451 = vector.shape_cast %450 : vector<64xf32> to vector<1x64xf32>
    %cst_211 = arith.constant 1.600000e+01 : f32
    %452 = vector.broadcast %cst_211 : f32 to vector<1x64xf32>
    %453 = arith.divf %451, %452 : vector<1x64xf32>
    %454 = vector.broadcast %453 : vector<1x64xf32> to vector<16x64xf32>
    %455 = arith.subf %449, %454 : vector<16x64xf32>
    %456 = arith.mulf %455, %455 : vector<16x64xf32>
    %cst_212 = arith.constant dense<0.000000e+00> : vector<64xf32>
    %457 = vector.multi_reduction <add>, %456, %cst_212 [0] : vector<16x64xf32> to vector<64xf32>
    %458 = vector.shape_cast %457 : vector<64xf32> to vector<1x64xf32>
    %cst_213 = arith.constant 1.600000e+01 : f32
    %459 = vector.broadcast %cst_213 : f32 to vector<1x64xf32>
    %460 = arith.divf %458, %459 : vector<1x64xf32>
    %461 = vector.broadcast %453 : vector<1x64xf32> to vector<16x64xf32>
    %462 = arith.subf %449, %461 : vector<16x64xf32>
    %cst_214 = arith.constant 9.99999974E-6 : f32
    %463 = vector.broadcast %cst_214 : f32 to vector<1x64xf32>
    %464 = arith.addf %460, %463 : vector<1x64xf32>
    %465 = math.rsqrt %464 : vector<1x64xf32>
    %466 = vector.broadcast %465 : vector<1x64xf32> to vector<16x64xf32>
    %467 = arith.mulf %462, %466 : vector<16x64xf32>
    %468 = tpu.concatenate %448, %467 in 0 : vector<16x64xf32>, vector<16x64xf32> -> vector<32x64xf32>
    %469 = vector.extract_strided_slice %288 {offsets = [0, 0], sizes = [32, 32], strides = [1, 1]} : vector<32x288xf32> to vector<32x32xf32>
    %c0_215 = arith.constant 0 : index
    %c0_216 = arith.constant 0 : index
    %470 = vector.load %arg6[%c0_215, %c0_216] : memref<32x64xf32, #tpu.memory_space<vmem>>, vector<32x64xf32>
    %cst_217 = arith.constant dense<0.000000e+00> : vector<32x64xf32>
    %471 = tpu.matmul %469, %470, %cst_217 {dimension_numbers = #tpu.dot_dimension_numbers<[1], [0], [0], [1], [0, 0, 1, 1], [], []>} : vector<32x32xf32>, vector<32x64xf32>, vector<32x64xf32> -> vector<32x64xf32>
    %472 = arith.addf %468, %471 : vector<32x64xf32>
    %cst_218 = arith.constant 0.000000e+00 : f32
    %473 = vector.broadcast %cst_218 : f32 to vector<32x64xf32>
    %474 = arith.maximumf %472, %473 : vector<32x64xf32>
    %cst_219 = arith.constant 0.000000e+00 : f32
    %475 = vector.broadcast %cst_219 : f32 to vector<52x64xf32>
    %c0_220 = arith.constant 0 : index
    %c0_221 = arith.constant 0 : index
    %476 = vector.load %arg16[%c0_220, %c0_221] : memref<52x64xf32, #tpu.memory_space<vmem>>, vector<52x64xf32>
    tpu.vector_store %arg16[%c0_220, %c0_221], %475 {strides = array<i32>} : memref<52x64xf32, #tpu.memory_space<vmem>>, vector<52x64xf32>,
    %477 = vector.extract_strided_slice %474 {offsets = [0, 0], sizes = [16, 64], strides = [1, 1]} : vector<32x64xf32> to vector<16x64xf32>
    %c8_222 = arith.constant 8 : index
    %c0_223 = arith.constant 0 : index
    %478 = vector.load %arg16[%c8_222, %c0_223] : memref<52x64xf32, #tpu.memory_space<vmem>>, vector<16x64xf32>
    tpu.vector_store %arg16[%c8_222, %c0_223], %477 {strides = array<i32>} : memref<52x64xf32, #tpu.memory_space<vmem>>, vector<16x64xf32>,
    %479 = vector.extract_strided_slice %474 {offsets = [16, 0], sizes = [16, 64], strides = [1, 1]} : vector<32x64xf32> to vector<16x64xf32>
    %c28_224 = arith.constant 28 : index
    %c0_225 = arith.constant 0 : index
    %480 = vector.load %arg16[%c28_224, %c0_225] : memref<52x64xf32, #tpu.memory_space<vmem>>, vector<16x64xf32>
    tpu.vector_store %arg16[%c28_224, %c0_225], %479 {strides = array<i32>} : memref<52x64xf32, #tpu.memory_space<vmem>>, vector<16x64xf32>,
    %481 = tpu.iota {dimensions = array<i32: 0>} : vector<16x1xi32>
    %c4_i32_226 = arith.constant 4 : i32
    %c0_i32_227 = arith.constant 0 : i32
    %482 = arith.cmpi eq, %c4_i32_226, %c0_i32_227 : i32
    %c1_i32_228 = arith.constant 1 : i32
    %483 = arith.select %482, %c1_i32_228, %c4_i32_226 : i32
    %484 = vector.broadcast %483 : i32 to vector<16x1xi32>
    %485 = arith.remsi %481, %484 : vector<16x1xi32>
    %c0_i32_229 = arith.constant 0 : i32
    %486 = vector.broadcast %c0_i32_229 : i32 to vector<16x1xi32>
    %487 = arith.cmpi ne, %485, %486 : vector<16x1xi32>
    %c0_i32_230 = arith.constant 0 : i32
    %488 = vector.broadcast %c0_i32_230 : i32 to vector<16x1xi32>
    %489 = arith.cmpi slt, %485, %488 : vector<16x1xi32>
    %c0_i32_231 = arith.constant 0 : i32
    %490 = arith.cmpi slt, %483, %c0_i32_231 : i32
    %491 = vector.broadcast %490 : i1 to vector<16x1xi1>
    %492 = vector.broadcast %491 : vector<16x1xi1> to vector<16x1xi1>
    %493 = arith.xori %489, %492 : vector<16x1xi1>
    %494 = arith.andi %493, %487 : vector<16x1xi1>
    %495 = vector.broadcast %483 : i32 to vector<16x1xi32>
    %496 = arith.addi %485, %495 : vector<16x1xi32>
    %497 = arith.select %494, %496, %485 : vector<16x1xi1>, vector<16x1xi32>
    %c0_i32_232 = arith.constant 0 : i32
    %498 = vector.broadcast %c0_i32_232 : i32 to vector<16x1xi32>
    %499 = arith.cmpi ne, %497, %498 : vector<16x1xi32>
    %c3_i32_233 = arith.constant 3 : i32
    %500 = vector.broadcast %c3_i32_233 : i32 to vector<16x1xi32>
    %501 = arith.cmpi ne, %497, %500 : vector<16x1xi32>
    %c8_234 = arith.constant 8 : index
    %c0_235 = arith.constant 0 : index
    %502 = vector.load %arg16[%c8_234, %c0_235] : memref<52x64xf32, #tpu.memory_space<vmem>>, vector<16x64xf32>
    %c3_236 = arith.constant 3 : index
    %c0_237 = arith.constant 0 : index
    %503 = vector.load %arg16[%c3_236, %c0_237] : memref<52x64xf32, #tpu.memory_space<vmem>>, vector<16x64xf32>
    %cst_238 = arith.constant 0.000000e+00 : f32
    %504 = vector.shape_cast %499 : vector<16x1xi1> to vector<16x1xi1>
    %505 = vector.broadcast %504 : vector<16x1xi1> to vector<16x64xi1>
    %506 = vector.broadcast %cst_238 : f32 to vector<16x64xf32>
    %507 = arith.select %505, %503, %506 : vector<16x64xi1>, vector<16x64xf32>
    %c4_239 = arith.constant 4 : index
    %c0_240 = arith.constant 0 : index
    %508 = vector.load %arg16[%c4_239, %c0_240] : memref<52x64xf32, #tpu.memory_space<vmem>>, vector<16x64xf32>
    %c5_241 = arith.constant 5 : index
    %c0_242 = arith.constant 0 : index
    %509 = vector.load %arg16[%c5_241, %c0_242] : memref<52x64xf32, #tpu.memory_space<vmem>>, vector<16x64xf32>
    %cst_243 = arith.constant 0.000000e+00 : f32
    %510 = vector.shape_cast %501 : vector<16x1xi1> to vector<16x1xi1>
    %511 = vector.broadcast %510 : vector<16x1xi1> to vector<16x64xi1>
    %512 = vector.broadcast %cst_243 : f32 to vector<16x64xf32>
    %513 = arith.select %511, %509, %512 : vector<16x64xi1>, vector<16x64xf32>
    %c7_244 = arith.constant 7 : index
    %c0_245 = arith.constant 0 : index
    %514 = vector.load %arg16[%c7_244, %c0_245] : memref<52x64xf32, #tpu.memory_space<vmem>>, vector<16x64xf32>
    %cst_246 = arith.constant 0.000000e+00 : f32
    %515 = vector.shape_cast %499 : vector<16x1xi1> to vector<16x1xi1>
    %516 = vector.broadcast %515 : vector<16x1xi1> to vector<16x64xi1>
    %517 = vector.broadcast %cst_246 : f32 to vector<16x64xf32>
    %518 = arith.select %516, %514, %517 : vector<16x64xi1>, vector<16x64xf32>
    %c9_247 = arith.constant 9 : index
    %c0_248 = arith.constant 0 : index
    %519 = vector.load %arg16[%c9_247, %c0_248] : memref<52x64xf32, #tpu.memory_space<vmem>>, vector<16x64xf32>
    %cst_249 = arith.constant 0.000000e+00 : f32
    %520 = vector.shape_cast %501 : vector<16x1xi1> to vector<16x1xi1>
    %521 = vector.broadcast %520 : vector<16x1xi1> to vector<16x64xi1>
    %522 = vector.broadcast %cst_249 : f32 to vector<16x64xf32>
    %523 = arith.select %521, %519, %522 : vector<16x64xi1>, vector<16x64xf32>
    %c11_250 = arith.constant 11 : index
    %c0_251 = arith.constant 0 : index
    %524 = vector.load %arg16[%c11_250, %c0_251] : memref<52x64xf32, #tpu.memory_space<vmem>>, vector<16x64xf32>
    %cst_252 = arith.constant 0.000000e+00 : f32
    %525 = vector.shape_cast %499 : vector<16x1xi1> to vector<16x1xi1>
    %526 = vector.broadcast %525 : vector<16x1xi1> to vector<16x64xi1>
    %527 = vector.broadcast %cst_252 : f32 to vector<16x64xf32>
    %528 = arith.select %526, %524, %527 : vector<16x64xi1>, vector<16x64xf32>
    %c12_253 = arith.constant 12 : index
    %c0_254 = arith.constant 0 : index
    %529 = vector.load %arg16[%c12_253, %c0_254] : memref<52x64xf32, #tpu.memory_space<vmem>>, vector<16x64xf32>
    %c13_255 = arith.constant 13 : index
    %c0_256 = arith.constant 0 : index
    %530 = vector.load %arg16[%c13_255, %c0_256] : memref<52x64xf32, #tpu.memory_space<vmem>>, vector<16x64xf32>
    %cst_257 = arith.constant 0.000000e+00 : f32
    %531 = vector.shape_cast %501 : vector<16x1xi1> to vector<16x1xi1>
    %532 = vector.broadcast %531 : vector<16x1xi1> to vector<16x64xi1>
    %533 = vector.broadcast %cst_257 : f32 to vector<16x64xf32>
    %534 = arith.select %532, %530, %533 : vector<16x64xi1>, vector<16x64xf32>
    %535 = tpu.concatenate %502, %507, %508, %513, %518, %523, %528, %529, %534 in 1 : vector<16x64xf32>, vector<16x64xf32>, vector<16x64xf32>, vector<16x64xf32>, vector<16x64xf32>, vector<16x64xf32>, vector<16x64xf32>, vector<16x64xf32>, vector<16x64xf32> -> vector<16x576xf32>
    %c28_258 = arith.constant 28 : index
    %c0_259 = arith.constant 0 : index
    %536 = vector.load %arg16[%c28_258, %c0_259] : memref<52x64xf32, #tpu.memory_space<vmem>>, vector<16x64xf32>
    %c23_260 = arith.constant 23 : index
    %c0_261 = arith.constant 0 : index
    %537 = vector.load %arg16[%c23_260, %c0_261] : memref<52x64xf32, #tpu.memory_space<vmem>>, vector<16x64xf32>
    %cst_262 = arith.constant 0.000000e+00 : f32
    %538 = vector.shape_cast %499 : vector<16x1xi1> to vector<16x1xi1>
    %539 = vector.broadcast %538 : vector<16x1xi1> to vector<16x64xi1>
    %540 = vector.broadcast %cst_262 : f32 to vector<16x64xf32>
    %541 = arith.select %539, %537, %540 : vector<16x64xi1>, vector<16x64xf32>
    %c24_263 = arith.constant 24 : index
    %c0_264 = arith.constant 0 : index
    %542 = vector.load %arg16[%c24_263, %c0_264] : memref<52x64xf32, #tpu.memory_space<vmem>>, vector<16x64xf32>
    %c25_265 = arith.constant 25 : index
    %c0_266 = arith.constant 0 : index
    %543 = vector.load %arg16[%c25_265, %c0_266] : memref<52x64xf32, #tpu.memory_space<vmem>>, vector<16x64xf32>
    %cst_267 = arith.constant 0.000000e+00 : f32
    %544 = vector.shape_cast %501 : vector<16x1xi1> to vector<16x1xi1>
    %545 = vector.broadcast %544 : vector<16x1xi1> to vector<16x64xi1>
    %546 = vector.broadcast %cst_267 : f32 to vector<16x64xf32>
    %547 = arith.select %545, %543, %546 : vector<16x64xi1>, vector<16x64xf32>
    %c27_268 = arith.constant 27 : index
    %c0_269 = arith.constant 0 : index
    %548 = vector.load %arg16[%c27_268, %c0_269] : memref<52x64xf32, #tpu.memory_space<vmem>>, vector<16x64xf32>
    %cst_270 = arith.constant 0.000000e+00 : f32
    %549 = vector.shape_cast %499 : vector<16x1xi1> to vector<16x1xi1>
    %550 = vector.broadcast %549 : vector<16x1xi1> to vector<16x64xi1>
    %551 = vector.broadcast %cst_270 : f32 to vector<16x64xf32>
    %552 = arith.select %550, %548, %551 : vector<16x64xi1>, vector<16x64xf32>
    %c29_271 = arith.constant 29 : index
    %c0_272 = arith.constant 0 : index
    %553 = vector.load %arg16[%c29_271, %c0_272] : memref<52x64xf32, #tpu.memory_space<vmem>>, vector<16x64xf32>
    %cst_273 = arith.constant 0.000000e+00 : f32
    %554 = vector.shape_cast %501 : vector<16x1xi1> to vector<16x1xi1>
    %555 = vector.broadcast %554 : vector<16x1xi1> to vector<16x64xi1>
    %556 = vector.broadcast %cst_273 : f32 to vector<16x64xf32>
    %557 = arith.select %555, %553, %556 : vector<16x64xi1>, vector<16x64xf32>
    %c31_274 = arith.constant 31 : index
    %c0_275 = arith.constant 0 : index
    %558 = vector.load %arg16[%c31_274, %c0_275] : memref<52x64xf32, #tpu.memory_space<vmem>>, vector<16x64xf32>
    %cst_276 = arith.constant 0.000000e+00 : f32
    %559 = vector.shape_cast %499 : vector<16x1xi1> to vector<16x1xi1>
    %560 = vector.broadcast %559 : vector<16x1xi1> to vector<16x64xi1>
    %561 = vector.broadcast %cst_276 : f32 to vector<16x64xf32>
    %562 = arith.select %560, %558, %561 : vector<16x64xi1>, vector<16x64xf32>
    %c32_277 = arith.constant 32 : index
    %c0_278 = arith.constant 0 : index
    %563 = vector.load %arg16[%c32_277, %c0_278] : memref<52x64xf32, #tpu.memory_space<vmem>>, vector<16x64xf32>
    %c33_279 = arith.constant 33 : index
    %c0_280 = arith.constant 0 : index
    %564 = vector.load %arg16[%c33_279, %c0_280] : memref<52x64xf32, #tpu.memory_space<vmem>>, vector<16x64xf32>
    %cst_281 = arith.constant 0.000000e+00 : f32
    %565 = vector.shape_cast %501 : vector<16x1xi1> to vector<16x1xi1>
    %566 = vector.broadcast %565 : vector<16x1xi1> to vector<16x64xi1>
    %567 = vector.broadcast %cst_281 : f32 to vector<16x64xf32>
    %568 = arith.select %566, %564, %567 : vector<16x64xi1>, vector<16x64xf32>
    %569 = tpu.concatenate %536, %541, %542, %547, %552, %557, %562, %563, %568 in 1 : vector<16x64xf32>, vector<16x64xf32>, vector<16x64xf32>, vector<16x64xf32>, vector<16x64xf32>, vector<16x64xf32>, vector<16x64xf32>, vector<16x64xf32>, vector<16x64xf32> -> vector<16x576xf32>
    %570 = tpu.concatenate %535, %569 in 0 : vector<16x576xf32>, vector<16x576xf32> -> vector<32x576xf32>
    %c0_282 = arith.constant 0 : index
    %c0_283 = arith.constant 0 : index
    %571 = vector.load %arg11[%c0_282, %c0_283] : memref<4x16xf32, #tpu.memory_space<vmem>>, vector<4x16xf32>
    %572 = vector.extract_strided_slice %570 {offsets = [0, 0], sizes = [16, 576], strides = [1, 1]} : vector<32x576xf32> to vector<16x576xf32>
    %cst_284 = arith.constant dense<0.000000e+00> : vector<4x576xf32>
    %573 = tpu.matmul %571, %572, %cst_284 {dimension_numbers = #tpu.dot_dimension_numbers<[1], [0], [0], [1], [0, 0, 1, 1], [], []>} : vector<4x16xf32>, vector<16x576xf32>, vector<4x576xf32> -> vector<4x576xf32>
    %574 = vector.extract_strided_slice %570 {offsets = [16, 0], sizes = [16, 576], strides = [1, 1]} : vector<32x576xf32> to vector<16x576xf32>
    %cst_285 = arith.constant dense<0.000000e+00> : vector<4x576xf32>
    %575 = tpu.matmul %571, %574, %cst_285 {dimension_numbers = #tpu.dot_dimension_numbers<[1], [0], [0], [1], [0, 0, 1, 1], [], []>} : vector<4x16xf32>, vector<16x576xf32>, vector<4x576xf32> -> vector<4x576xf32>
    %576 = tpu.concatenate %573, %575 in 0 : vector<4x576xf32>, vector<4x576xf32> -> vector<8x576xf32>
    %c0_286 = arith.constant 0 : index
    %c0_287 = arith.constant 0 : index
    %577 = vector.load %arg7[%c0_286, %c0_287] : memref<576x128xf32, #tpu.memory_space<vmem>>, vector<576x128xf32>
    %cst_288 = arith.constant dense<0.000000e+00> : vector<8x128xf32>
    %578 = tpu.matmul %576, %577, %cst_288 {dimension_numbers = #tpu.dot_dimension_numbers<[1], [0], [0], [1], [0, 0, 1, 1], [], []>} : vector<8x576xf32>, vector<576x128xf32>, vector<8x128xf32> -> vector<8x128xf32>
    %579 = vector.extract_strided_slice %578 {offsets = [0, 0], sizes = [4, 128], strides = [1, 1]} : vector<8x128xf32> to vector<4x128xf32>
    %cst_289 = arith.constant dense<0.000000e+00> : vector<128xf32>
    %580 = vector.multi_reduction <add>, %579, %cst_289 [0] : vector<4x128xf32> to vector<128xf32>
    %581 = vector.shape_cast %580 : vector<128xf32> to vector<1x128xf32>
    %cst_290 = arith.constant 4.000000e+00 : f32
    %582 = vector.broadcast %cst_290 : f32 to vector<1x128xf32>
    %583 = arith.divf %581, %582 : vector<1x128xf32>
    %584 = vector.broadcast %583 : vector<1x128xf32> to vector<4x128xf32>
    %585 = arith.subf %579, %584 : vector<4x128xf32>
    %586 = arith.mulf %585, %585 : vector<4x128xf32>
    %cst_291 = arith.constant dense<0.000000e+00> : vector<128xf32>
    %587 = vector.multi_reduction <add>, %586, %cst_291 [0] : vector<4x128xf32> to vector<128xf32>
    %588 = vector.shape_cast %587 : vector<128xf32> to vector<1x128xf32>
    %cst_292 = arith.constant 4.000000e+00 : f32
    %589 = vector.broadcast %cst_292 : f32 to vector<1x128xf32>
    %590 = arith.divf %588, %589 : vector<1x128xf32>
    %591 = vector.broadcast %583 : vector<1x128xf32> to vector<4x128xf32>
    %592 = arith.subf %579, %591 : vector<4x128xf32>
    %cst_293 = arith.constant 9.99999974E-6 : f32
    %593 = vector.broadcast %cst_293 : f32 to vector<1x128xf32>
    %594 = arith.addf %590, %593 : vector<1x128xf32>
    %595 = math.rsqrt %594 : vector<1x128xf32>
    %596 = vector.broadcast %595 : vector<1x128xf32> to vector<4x128xf32>
    %597 = arith.mulf %592, %596 : vector<4x128xf32>
    %598 = vector.extract_strided_slice %578 {offsets = [4, 0], sizes = [4, 128], strides = [1, 1]} : vector<8x128xf32> to vector<4x128xf32>
    %cst_294 = arith.constant dense<0.000000e+00> : vector<128xf32>
    %599 = vector.multi_reduction <add>, %598, %cst_294 [0] : vector<4x128xf32> to vector<128xf32>
    %600 = vector.shape_cast %599 : vector<128xf32> to vector<1x128xf32>
    %cst_295 = arith.constant 4.000000e+00 : f32
    %601 = vector.broadcast %cst_295 : f32 to vector<1x128xf32>
    %602 = arith.divf %600, %601 : vector<1x128xf32>
    %603 = vector.broadcast %602 : vector<1x128xf32> to vector<4x128xf32>
    %604 = arith.subf %598, %603 : vector<4x128xf32>
    %605 = arith.mulf %604, %604 : vector<4x128xf32>
    %cst_296 = arith.constant dense<0.000000e+00> : vector<128xf32>
    %606 = vector.multi_reduction <add>, %605, %cst_296 [0] : vector<4x128xf32> to vector<128xf32>
    %607 = vector.shape_cast %606 : vector<128xf32> to vector<1x128xf32>
    %cst_297 = arith.constant 4.000000e+00 : f32
    %608 = vector.broadcast %cst_297 : f32 to vector<1x128xf32>
    %609 = arith.divf %607, %608 : vector<1x128xf32>
    %610 = vector.broadcast %602 : vector<1x128xf32> to vector<4x128xf32>
    %611 = arith.subf %598, %610 : vector<4x128xf32>
    %cst_298 = arith.constant 9.99999974E-6 : f32
    %612 = vector.broadcast %cst_298 : f32 to vector<1x128xf32>
    %613 = arith.addf %609, %612 : vector<1x128xf32>
    %614 = math.rsqrt %613 : vector<1x128xf32>
    %615 = vector.broadcast %614 : vector<1x128xf32> to vector<4x128xf32>
    %616 = arith.mulf %611, %615 : vector<4x128xf32>
    %617 = tpu.concatenate %597, %616 in 0 : vector<4x128xf32>, vector<4x128xf32> -> vector<8x128xf32>
    %cst_299 = arith.constant 0.000000e+00 : f32
    %618 = vector.broadcast %cst_299 : f32 to vector<8x128xf32>
    %619 = arith.maximumf %617, %618 : vector<8x128xf32>
    %cst_300 = arith.constant 0.000000e+00 : f32
    %620 = vector.broadcast %cst_300 : f32 to vector<18x128xf32>
    %c0_301 = arith.constant 0 : index
    %c0_302 = arith.constant 0 : index
    %621 = vector.load %arg17[%c0_301, %c0_302] : memref<18x128xf32, #tpu.memory_space<vmem>>, vector<18x128xf32>
    tpu.vector_store %arg17[%c0_301, %c0_302], %620 {strides = array<i32>} : memref<18x128xf32, #tpu.memory_space<vmem>>, vector<18x128xf32>,
    %622 = vector.extract_strided_slice %619 {offsets = [0, 0], sizes = [4, 128], strides = [1, 1]} : vector<8x128xf32> to vector<4x128xf32>
    %c4_303 = arith.constant 4 : index
    %c0_304 = arith.constant 0 : index
    %623 = vector.load %arg17[%c4_303, %c0_304] : memref<18x128xf32, #tpu.memory_space<vmem>>, vector<4x128xf32>
    tpu.vector_store %arg17[%c4_303, %c0_304], %622 {strides = array<i32>} : memref<18x128xf32, #tpu.memory_space<vmem>>, vector<4x128xf32>,
    %624 = vector.extract_strided_slice %619 {offsets = [4, 0], sizes = [4, 128], strides = [1, 1]} : vector<8x128xf32> to vector<4x128xf32>
    %c10 = arith.constant 10 : index
    %c0_305 = arith.constant 0 : index
    %625 = vector.load %arg17[%c10, %c0_305] : memref<18x128xf32, #tpu.memory_space<vmem>>, vector<4x128xf32>
    tpu.vector_store %arg17[%c10, %c0_305], %624 {strides = array<i32>} : memref<18x128xf32, #tpu.memory_space<vmem>>, vector<4x128xf32>,
    %626 = tpu.iota {dimensions = array<i32: 0>} : vector<4x1xi32>
    %c2_i32 = arith.constant 2 : i32
    %c0_i32_306 = arith.constant 0 : i32
    %627 = arith.cmpi eq, %c2_i32, %c0_i32_306 : i32
    %c1_i32_307 = arith.constant 1 : i32
    %628 = arith.select %627, %c1_i32_307, %c2_i32 : i32
    %629 = vector.broadcast %628 : i32 to vector<4x1xi32>
    %630 = arith.remsi %626, %629 : vector<4x1xi32>
    %c0_i32_308 = arith.constant 0 : i32
    %631 = vector.broadcast %c0_i32_308 : i32 to vector<4x1xi32>
    %632 = arith.cmpi ne, %630, %631 : vector<4x1xi32>
    %c0_i32_309 = arith.constant 0 : i32
    %633 = vector.broadcast %c0_i32_309 : i32 to vector<4x1xi32>
    %634 = arith.cmpi slt, %630, %633 : vector<4x1xi32>
    %c0_i32_310 = arith.constant 0 : i32
    %635 = arith.cmpi slt, %628, %c0_i32_310 : i32
    %636 = vector.broadcast %635 : i1 to vector<4x1xi1>
    %637 = vector.broadcast %636 : vector<4x1xi1> to vector<4x1xi1>
    %638 = arith.xori %634, %637 : vector<4x1xi1>
    %639 = arith.andi %638, %632 : vector<4x1xi1>
    %640 = vector.broadcast %628 : i32 to vector<4x1xi32>
    %641 = arith.addi %630, %640 : vector<4x1xi32>
    %642 = arith.select %639, %641, %630 : vector<4x1xi1>, vector<4x1xi32>
    %c0_i32_311 = arith.constant 0 : i32
    %643 = vector.broadcast %c0_i32_311 : i32 to vector<4x1xi32>
    %644 = arith.cmpi ne, %642, %643 : vector<4x1xi32>
    %c1_i32_312 = arith.constant 1 : i32
    %645 = vector.broadcast %c1_i32_312 : i32 to vector<4x1xi32>
    %646 = arith.cmpi ne, %642, %645 : vector<4x1xi32>
    %c4_313 = arith.constant 4 : index
    %c0_314 = arith.constant 0 : index
    %647 = vector.load %arg17[%c4_313, %c0_314] : memref<18x128xf32, #tpu.memory_space<vmem>>, vector<4x128xf32>
    %c1 = arith.constant 1 : index
    %c0_315 = arith.constant 0 : index
    %648 = vector.load %arg17[%c1, %c0_315] : memref<18x128xf32, #tpu.memory_space<vmem>>, vector<4x128xf32>
    %cst_316 = arith.constant 0.000000e+00 : f32
    %649 = vector.shape_cast %644 : vector<4x1xi1> to vector<4x1xi1>
    %650 = vector.broadcast %649 : vector<4x1xi1> to vector<4x128xi1>
    %651 = vector.broadcast %cst_316 : f32 to vector<4x128xf32>
    %652 = arith.select %650, %648, %651 : vector<4x128xi1>, vector<4x128xf32>
    %c2 = arith.constant 2 : index
    %c0_317 = arith.constant 0 : index
    %653 = vector.load %arg17[%c2, %c0_317] : memref<18x128xf32, #tpu.memory_space<vmem>>, vector<4x128xf32>
    %c3_318 = arith.constant 3 : index
    %c0_319 = arith.constant 0 : index
    %654 = vector.load %arg17[%c3_318, %c0_319] : memref<18x128xf32, #tpu.memory_space<vmem>>, vector<4x128xf32>
    %cst_320 = arith.constant 0.000000e+00 : f32
    %655 = vector.shape_cast %646 : vector<4x1xi1> to vector<4x1xi1>
    %656 = vector.broadcast %655 : vector<4x1xi1> to vector<4x128xi1>
    %657 = vector.broadcast %cst_320 : f32 to vector<4x128xf32>
    %658 = arith.select %656, %654, %657 : vector<4x128xi1>, vector<4x128xf32>
    %c3_321 = arith.constant 3 : index
    %c0_322 = arith.constant 0 : index
    %659 = vector.load %arg17[%c3_321, %c0_322] : memref<18x128xf32, #tpu.memory_space<vmem>>, vector<4x128xf32>
    %cst_323 = arith.constant 0.000000e+00 : f32
    %660 = vector.shape_cast %644 : vector<4x1xi1> to vector<4x1xi1>
    %661 = vector.broadcast %660 : vector<4x1xi1> to vector<4x128xi1>
    %662 = vector.broadcast %cst_323 : f32 to vector<4x128xf32>
    %663 = arith.select %661, %659, %662 : vector<4x128xi1>, vector<4x128xf32>
    %c5_324 = arith.constant 5 : index
    %c0_325 = arith.constant 0 : index
    %664 = vector.load %arg17[%c5_324, %c0_325] : memref<18x128xf32, #tpu.memory_space<vmem>>, vector<4x128xf32>
    %cst_326 = arith.constant 0.000000e+00 : f32
    %665 = vector.shape_cast %646 : vector<4x1xi1> to vector<4x1xi1>
    %666 = vector.broadcast %665 : vector<4x1xi1> to vector<4x128xi1>
    %667 = vector.broadcast %cst_326 : f32 to vector<4x128xf32>
    %668 = arith.select %666, %664, %667 : vector<4x128xi1>, vector<4x128xf32>
    %c5_327 = arith.constant 5 : index
    %c0_328 = arith.constant 0 : index
    %669 = vector.load %arg17[%c5_327, %c0_328] : memref<18x128xf32, #tpu.memory_space<vmem>>, vector<4x128xf32>
    %cst_329 = arith.constant 0.000000e+00 : f32
    %670 = vector.shape_cast %644 : vector<4x1xi1> to vector<4x1xi1>
    %671 = vector.broadcast %670 : vector<4x1xi1> to vector<4x128xi1>
    %672 = vector.broadcast %cst_329 : f32 to vector<4x128xf32>
    %673 = arith.select %671, %669, %672 : vector<4x128xi1>, vector<4x128xf32>
    %c6 = arith.constant 6 : index
    %c0_330 = arith.constant 0 : index
    %674 = vector.load %arg17[%c6, %c0_330] : memref<18x128xf32, #tpu.memory_space<vmem>>, vector<4x128xf32>
    %c7_331 = arith.constant 7 : index
    %c0_332 = arith.constant 0 : index
    %675 = vector.load %arg17[%c7_331, %c0_332] : memref<18x128xf32, #tpu.memory_space<vmem>>, vector<4x128xf32>
    %cst_333 = arith.constant 0.000000e+00 : f32
    %676 = vector.shape_cast %646 : vector<4x1xi1> to vector<4x1xi1>
    %677 = vector.broadcast %676 : vector<4x1xi1> to vector<4x128xi1>
    %678 = vector.broadcast %cst_333 : f32 to vector<4x128xf32>
    %679 = arith.select %677, %675, %678 : vector<4x128xi1>, vector<4x128xf32>
    %680 = tpu.concatenate %647, %652, %653, %658, %663, %668, %673, %674, %679 in 1 : vector<4x128xf32>, vector<4x128xf32>, vector<4x128xf32>, vector<4x128xf32>, vector<4x128xf32>, vector<4x128xf32>, vector<4x128xf32>, vector<4x128xf32>, vector<4x128xf32> -> vector<4x1152xf32>
    %c10_334 = arith.constant 10 : index
    %c0_335 = arith.constant 0 : index
    %681 = vector.load %arg17[%c10_334, %c0_335] : memref<18x128xf32, #tpu.memory_space<vmem>>, vector<4x128xf32>
    %c7_336 = arith.constant 7 : index
    %c0_337 = arith.constant 0 : index
    %682 = vector.load %arg17[%c7_336, %c0_337] : memref<18x128xf32, #tpu.memory_space<vmem>>, vector<4x128xf32>
    %cst_338 = arith.constant 0.000000e+00 : f32
    %683 = vector.shape_cast %644 : vector<4x1xi1> to vector<4x1xi1>
    %684 = vector.broadcast %683 : vector<4x1xi1> to vector<4x128xi1>
    %685 = vector.broadcast %cst_338 : f32 to vector<4x128xf32>
    %686 = arith.select %684, %682, %685 : vector<4x128xi1>, vector<4x128xf32>
    %c8_339 = arith.constant 8 : index
    %c0_340 = arith.constant 0 : index
    %687 = vector.load %arg17[%c8_339, %c0_340] : memref<18x128xf32, #tpu.memory_space<vmem>>, vector<4x128xf32>
    %c9_341 = arith.constant 9 : index
    %c0_342 = arith.constant 0 : index
    %688 = vector.load %arg17[%c9_341, %c0_342] : memref<18x128xf32, #tpu.memory_space<vmem>>, vector<4x128xf32>
    %cst_343 = arith.constant 0.000000e+00 : f32
    %689 = vector.shape_cast %646 : vector<4x1xi1> to vector<4x1xi1>
    %690 = vector.broadcast %689 : vector<4x1xi1> to vector<4x128xi1>
    %691 = vector.broadcast %cst_343 : f32 to vector<4x128xf32>
    %692 = arith.select %690, %688, %691 : vector<4x128xi1>, vector<4x128xf32>
    %c9_344 = arith.constant 9 : index
    %c0_345 = arith.constant 0 : index
    %693 = vector.load %arg17[%c9_344, %c0_345] : memref<18x128xf32, #tpu.memory_space<vmem>>, vector<4x128xf32>
    %cst_346 = arith.constant 0.000000e+00 : f32
    %694 = vector.shape_cast %644 : vector<4x1xi1> to vector<4x1xi1>
    %695 = vector.broadcast %694 : vector<4x1xi1> to vector<4x128xi1>
    %696 = vector.broadcast %cst_346 : f32 to vector<4x128xf32>
    %697 = arith.select %695, %693, %696 : vector<4x128xi1>, vector<4x128xf32>
    %c11_347 = arith.constant 11 : index
    %c0_348 = arith.constant 0 : index
    %698 = vector.load %arg17[%c11_347, %c0_348] : memref<18x128xf32, #tpu.memory_space<vmem>>, vector<4x128xf32>
    %cst_349 = arith.constant 0.000000e+00 : f32
    %699 = vector.shape_cast %646 : vector<4x1xi1> to vector<4x1xi1>
    %700 = vector.broadcast %699 : vector<4x1xi1> to vector<4x128xi1>
    %701 = vector.broadcast %cst_349 : f32 to vector<4x128xf32>
    %702 = arith.select %700, %698, %701 : vector<4x128xi1>, vector<4x128xf32>
    %c11_350 = arith.constant 11 : index
    %c0_351 = arith.constant 0 : index
    %703 = vector.load %arg17[%c11_350, %c0_351] : memref<18x128xf32, #tpu.memory_space<vmem>>, vector<4x128xf32>
    %cst_352 = arith.constant 0.000000e+00 : f32
    %704 = vector.shape_cast %644 : vector<4x1xi1> to vector<4x1xi1>
    %705 = vector.broadcast %704 : vector<4x1xi1> to vector<4x128xi1>
    %706 = vector.broadcast %cst_352 : f32 to vector<4x128xf32>
    %707 = arith.select %705, %703, %706 : vector<4x128xi1>, vector<4x128xf32>
    %c12_353 = arith.constant 12 : index
    %c0_354 = arith.constant 0 : index
    %708 = vector.load %arg17[%c12_353, %c0_354] : memref<18x128xf32, #tpu.memory_space<vmem>>, vector<4x128xf32>
    %c13_355 = arith.constant 13 : index
    %c0_356 = arith.constant 0 : index
    %709 = vector.load %arg17[%c13_355, %c0_356] : memref<18x128xf32, #tpu.memory_space<vmem>>, vector<4x128xf32>
    %cst_357 = arith.constant 0.000000e+00 : f32
    %710 = vector.shape_cast %646 : vector<4x1xi1> to vector<4x1xi1>
    %711 = vector.broadcast %710 : vector<4x1xi1> to vector<4x128xi1>
    %712 = vector.broadcast %cst_357 : f32 to vector<4x128xf32>
    %713 = arith.select %711, %709, %712 : vector<4x128xi1>, vector<4x128xf32>
    %714 = tpu.concatenate %681, %686, %687, %692, %697, %702, %707, %708, %713 in 1 : vector<4x128xf32>, vector<4x128xf32>, vector<4x128xf32>, vector<4x128xf32>, vector<4x128xf32>, vector<4x128xf32>, vector<4x128xf32>, vector<4x128xf32>, vector<4x128xf32> -> vector<4x1152xf32>
    %715 = tpu.concatenate %680, %714 in 0 : vector<4x1152xf32>, vector<4x1152xf32> -> vector<8x1152xf32>
    %c0_358 = arith.constant 0 : index
    %c0_359 = arith.constant 0 : index
    %716 = vector.load %arg8[%c0_358, %c0_359] : memref<1152x128xf32, #tpu.memory_space<vmem>>, vector<1152x128xf32>
    %cst_360 = arith.constant dense<0.000000e+00> : vector<8x128xf32>
    %717 = tpu.matmul %715, %716, %cst_360 {dimension_numbers = #tpu.dot_dimension_numbers<[1], [0], [0], [1], [0, 0, 1, 1], [], []>} : vector<8x1152xf32>, vector<1152x128xf32>, vector<8x128xf32> -> vector<8x128xf32>
    %718 = vector.extract_strided_slice %717 {offsets = [0, 0], sizes = [4, 128], strides = [1, 1]} : vector<8x128xf32> to vector<4x128xf32>
    %cst_361 = arith.constant dense<0.000000e+00> : vector<128xf32>
    %719 = vector.multi_reduction <add>, %718, %cst_361 [0] : vector<4x128xf32> to vector<128xf32>
    %720 = vector.shape_cast %719 : vector<128xf32> to vector<1x128xf32>
    %cst_362 = arith.constant 4.000000e+00 : f32
    %721 = vector.broadcast %cst_362 : f32 to vector<1x128xf32>
    %722 = arith.divf %720, %721 : vector<1x128xf32>
    %723 = vector.broadcast %722 : vector<1x128xf32> to vector<4x128xf32>
    %724 = arith.subf %718, %723 : vector<4x128xf32>
    %725 = arith.mulf %724, %724 : vector<4x128xf32>
    %cst_363 = arith.constant dense<0.000000e+00> : vector<128xf32>
    %726 = vector.multi_reduction <add>, %725, %cst_363 [0] : vector<4x128xf32> to vector<128xf32>
    %727 = vector.shape_cast %726 : vector<128xf32> to vector<1x128xf32>
    %cst_364 = arith.constant 4.000000e+00 : f32
    %728 = vector.broadcast %cst_364 : f32 to vector<1x128xf32>
    %729 = arith.divf %727, %728 : vector<1x128xf32>
    %730 = vector.broadcast %722 : vector<1x128xf32> to vector<4x128xf32>
    %731 = arith.subf %718, %730 : vector<4x128xf32>
    %cst_365 = arith.constant 9.99999974E-6 : f32
    %732 = vector.broadcast %cst_365 : f32 to vector<1x128xf32>
    %733 = arith.addf %729, %732 : vector<1x128xf32>
    %734 = math.rsqrt %733 : vector<1x128xf32>
    %735 = vector.broadcast %734 : vector<1x128xf32> to vector<4x128xf32>
    %736 = arith.mulf %731, %735 : vector<4x128xf32>
    %737 = vector.extract_strided_slice %717 {offsets = [4, 0], sizes = [4, 128], strides = [1, 1]} : vector<8x128xf32> to vector<4x128xf32>
    %cst_366 = arith.constant dense<0.000000e+00> : vector<128xf32>
    %738 = vector.multi_reduction <add>, %737, %cst_366 [0] : vector<4x128xf32> to vector<128xf32>
    %739 = vector.shape_cast %738 : vector<128xf32> to vector<1x128xf32>
    %cst_367 = arith.constant 4.000000e+00 : f32
    %740 = vector.broadcast %cst_367 : f32 to vector<1x128xf32>
    %741 = arith.divf %739, %740 : vector<1x128xf32>
    %742 = vector.broadcast %741 : vector<1x128xf32> to vector<4x128xf32>
    %743 = arith.subf %737, %742 : vector<4x128xf32>
    %744 = arith.mulf %743, %743 : vector<4x128xf32>
    %cst_368 = arith.constant dense<0.000000e+00> : vector<128xf32>
    %745 = vector.multi_reduction <add>, %744, %cst_368 [0] : vector<4x128xf32> to vector<128xf32>
    %746 = vector.shape_cast %745 : vector<128xf32> to vector<1x128xf32>
    %cst_369 = arith.constant 4.000000e+00 : f32
    %747 = vector.broadcast %cst_369 : f32 to vector<1x128xf32>
    %748 = arith.divf %746, %747 : vector<1x128xf32>
    %749 = vector.broadcast %741 : vector<1x128xf32> to vector<4x128xf32>
    %750 = arith.subf %737, %749 : vector<4x128xf32>
    %cst_370 = arith.constant 9.99999974E-6 : f32
    %751 = vector.broadcast %cst_370 : f32 to vector<1x128xf32>
    %752 = arith.addf %748, %751 : vector<1x128xf32>
    %753 = math.rsqrt %752 : vector<1x128xf32>
    %754 = vector.broadcast %753 : vector<1x128xf32> to vector<4x128xf32>
    %755 = arith.mulf %750, %754 : vector<4x128xf32>
    %756 = tpu.concatenate %736, %755 in 0 : vector<4x128xf32>, vector<4x128xf32> -> vector<8x128xf32>
    %757 = vector.extract_strided_slice %576 {offsets = [0, 0], sizes = [8, 64], strides = [1, 1]} : vector<8x576xf32> to vector<8x64xf32>
    %c0_371 = arith.constant 0 : index
    %c0_372 = arith.constant 0 : index
    %758 = vector.load %arg9[%c0_371, %c0_372] : memref<64x128xf32, #tpu.memory_space<vmem>>, vector<64x128xf32>
    %cst_373 = arith.constant dense<0.000000e+00> : vector<8x128xf32>
    %759 = tpu.matmul %757, %758, %cst_373 {dimension_numbers = #tpu.dot_dimension_numbers<[1], [0], [0], [1], [0, 0, 1, 1], [], []>} : vector<8x64xf32>, vector<64x128xf32>, vector<8x128xf32> -> vector<8x128xf32>
    %760 = arith.addf %756, %759 : vector<8x128xf32>
    %cst_374 = arith.constant 0.000000e+00 : f32
    %761 = vector.broadcast %cst_374 : f32 to vector<8x128xf32>
    %762 = arith.maximumf %760, %761 : vector<8x128xf32>
    %763 = vector.extract_strided_slice %762 {offsets = [0, 0], sizes = [4, 128], strides = [1, 1]} : vector<8x128xf32> to vector<4x128xf32>
    %cst_375 = arith.constant dense<0.000000e+00> : vector<128xf32>
    %764 = vector.multi_reduction <add>, %763, %cst_375 [0] : vector<4x128xf32> to vector<128xf32>
    %765 = vector.shape_cast %764 : vector<128xf32> to vector<1x128xf32>
    %cst_376 = arith.constant 4.000000e+00 : f32
    %766 = vector.broadcast %cst_376 : f32 to vector<1x128xf32>
    %767 = arith.divf %765, %766 : vector<1x128xf32>
    %768 = vector.extract_strided_slice %762 {offsets = [4, 0], sizes = [4, 128], strides = [1, 1]} : vector<8x128xf32> to vector<4x128xf32>
    %cst_377 = arith.constant dense<0.000000e+00> : vector<128xf32>
    %769 = vector.multi_reduction <add>, %768, %cst_377 [0] : vector<4x128xf32> to vector<128xf32>
    %770 = vector.shape_cast %769 : vector<128xf32> to vector<1x128xf32>
    %cst_378 = arith.constant 4.000000e+00 : f32
    %771 = vector.broadcast %cst_378 : f32 to vector<1x128xf32>
    %772 = arith.divf %770, %771 : vector<1x128xf32>
    %773 = tpu.concatenate %767, %772 in 0 : vector<1x128xf32>, vector<1x128xf32> -> vector<2x128xf32>
    %c0_379 = arith.constant 0 : index
    %c0_380 = arith.constant 0 : index
    %774 = vector.load %arg12[%c0_379, %c0_380] : memref<128x128xf32, #tpu.memory_space<vmem>>, vector<128x128xf32>
    %cst_381 = arith.constant dense<0.000000e+00> : vector<2x128xf32>
    %775 = tpu.matmul %773, %774, %cst_381 {dimension_numbers = #tpu.dot_dimension_numbers<[1], [0], [0], [1], [0, 0, 1, 1], [], []>} : vector<2x128xf32>, vector<128x128xf32>, vector<2x128xf32> -> vector<2x128xf32>
    %c0_382 = arith.constant 0 : index
    %c0_383 = arith.constant 0 : index
    %776 = vector.load %arg13[%c0_382, %c0_383] : memref<1x128xf32, #tpu.memory_space<vmem>>, vector<1x128xf32>
    %777 = vector.broadcast %776 : vector<1x128xf32> to vector<2x128xf32>
    %778 = arith.addf %775, %777 : vector<2x128xf32>
    %c0_384 = arith.constant 0 : index
    %c0_385 = arith.constant 0 : index
    %779 = vector.load %arg14[%c0_384, %c0_385] : memref<2x128xf32, #tpu.memory_space<vmem>>, vector<2x128xf32>
    tpu.vector_store %arg14[%c0_384, %c0_385], %778 {strides = array<i32>} : memref<2x128xf32, #tpu.memory_space<vmem>>, vector<2x128xf32>,
    return
  }
}

</mosaic_0001>

<bundles_post_ra>
// kernel: deep_q_net_forward.1
= control target key start
LH: loop header
LB: loop body
LE: loop exit
PB: predicated region body
PF: predicated region fallthrough
CT: control target
= control target key end

     0   :  { %v6979_v0 = vmov 0.0   ;;  %vm96_vm0 = vcmask 56320   ;;  %vm10944_vm1 = vcmask 1046528   ;;  %vm10945_vm2 = vcmask 261120   ;;  %s6980_s29 = smov 32   ;;  %s6981_s30 = smov 96   ;;  %s10924_s1 = inlined_call_operand.vmem [shape: f32[135,32], index: 1, kind: input, shape index: {}]   ;;  %s10925_s0 = inlined_call_operand.vmem [shape: f32[128,135], index: 0, kind: input, shape index: {}]   ;;  %s10926_s2 = inlined_call_operand.vmem [shape: f32[288,32], index: 2, kind: input, shape index: {}]   ;;  %s10927_s3 = inlined_call_operand.vmem [shape: f32[15,32], index: 3, kind: input, shape index: {}]   ;;  %s10928_s10 = inlined_call_operand.vmem [shape: f32[16,64], index: 10, kind: input, shape index: {}]   ;;  %s10929_s4 = inlined_call_operand.vmem [shape: f32[288,64], index: 4, kind: input, shape index: {}]   ;;  %s10930_s5 = inlined_call_operand.vmem [shape: f32[576,64], index: 5, kind: input, shape index: {}]   ;;  %s10931_s6 = inlined_call_operand.vmem [shape: f32[32,64], index: 6, kind: input, shape index: {}]   ;;  %s10932_s11 = inlined_call_operand.vmem [shape: f32[4,16], index: 11, kind: input, shape index: {}]   ;;  %s10933_s7 = inlined_call_operand.vmem [shape: f32[576,128], index: 7, kind: input, shape index: {}]   ;;  %s10934_s8 = inlined_call_operand.vmem [shape: f32[1152,128], index: 8, kind: input, shape index: {}]   ;;  %s10935_s9 = inlined_call_operand.vmem [shape: f32[64,128], index: 9, kind: input, shape index: {}]   ;;  %s10936_s12 = inlined_call_operand.vmem [shape: f32[128,128], index: 12, kind: input, shape index: {}]   ;;  %s10937_s13 = inlined_call_operand.vmem [shape: f32[1,128], index: 13, kind: input, shape index: {}]   ;;  %s10938_s14 = inlined_call_operand.vmem [shape: f32[2,128], index: 14, kind: output, shape index: {}]  }
   0x1   :  { %149 = vmatprep.subr.mxu0 %v6979_v0  ;;  %4874 = vst [vmem:[#allocation4] sm:$0xff] %v6979_v0  ;;  %4875 = vst [vmem:[#allocation4 + $0x8] sm:$0xff] %v6979_v0  ;;  %v94_v1 = vld [vmem:[%s10924_s1 + $0x78] sm:$0xff]  ;;  %v93_v2 = vld [vmem:[%s10924_s1 + $0x70] sm:$0xff]  ;;  %vm10943_vm8 = vcmask 523264   ;;  %s6982_s15 = smov 64  }
   0x2   :  { %4876 = vst [vmem:[#allocation4 + $0x10] sm:$0x3] %v6979_v0  ;;  %150 = vmatpush1.msra.mxu0 %v94_v1  ;;  %v92_v3 = vld [vmem:[%s10924_s1 + $0x68] sm:$0xff]  ;;  %v91_v4 = vld [vmem:[%s10924_s1 + $0x60] sm:$0xff]  ;;  %v90_v6 = vld [vmem:[%s10924_s1 + $0x58] sm:$0xff] }
   0x3   :  { %151 = vmatprep.subr.mxu0 %v6979_v0  ;;  %v48_v5 = vld [vmem:[%s10925_s0 + $0x8] sm:$0xff]  ;;  %v89_v7 = vld [vmem:[%s10924_s1 + $0x50] sm:$0xff]  ;;  %v87_v9 = vld [vmem:[%s10924_s1 + $0x40] sm:$0xff]  ;;  %452 = vst.msk [vmem:[#allocation2] sm:$0xff] %vm10945_vm2, %v6979_v0 }
   0x4   :  { %152 = vmatpush1.msra.mxu0 %v93_v2  ;;  %5704 = vmatprep.mubr.msk.f32.mxu0 %vm96_vm0, %v48_v5  ;;  %v88_v8 = vld [vmem:[%s10924_s1 + $0x48] sm:$0xff]  ;;  %v86_v10 = vld [vmem:[%s10924_s1 + $0x38] sm:$0xff]  ;;  %v85_v11 = vld [vmem:[%s10924_s1 + $0x30] sm:$0xff]  ;;  %453 = vst.msk [vmem:[#allocation2 + $0x8] sm:$0xff] %vm10945_vm2, %v6979_v0 }
   0x5   :  { %153 = vmatprep.subr.mxu0 %v6979_v0  ;;  %v84_v12 = vld [vmem:[%s10924_s1 + $0x28] sm:$0xff]  ;;  %v83_v13 = vld [vmem:[%s10924_s1 + $0x20] sm:$0xff]  ;;  %v82_v14 = vld [vmem:[%s10924_s1 + $0x18] sm:$0xff]  ;;  %454 = vst.msk [vmem:[#allocation2 + $0x10] sm:$0xff] %vm10945_vm2, %v6979_v0 }
   0x6   :  { %154 = vmatpush1.msra.mxu0 %v92_v3  ;;  %v81_v15 = vld [vmem:[%s10924_s1 + $0x10] sm:$0xff]  ;;  %v80_v16 = vld [vmem:[%s10924_s1 + $0x8] sm:$0xff]  ;;  %v79_v17 = vld [vmem:[%s10924_s1] sm:$0xff]  ;;  %455 = vst.msk [vmem:[#allocation2 + $0x18] sm:$0xff] %vm10945_vm2, %v6979_v0 }
   0x7   :  { %155 = vmatprep.subr.mxu0 %v6979_v0  ;;  %v95_v18 = vld [vmem:[%s10924_s1 + $0x80] sm:$0x7f]  ;;  %v50_v20 = vld [vmem:[%s10925_s0 + $0x18] sm:$0xff]  ;;  %v49_v21 = vld [vmem:[%s10925_s0 + $0x10] sm:$0xff]  ;;  %456 = vst.msk [vmem:[#allocation2 + $0x20] sm:$0xff] %vm10945_vm2, %v6979_v0 }
   0x8   :  { %156 = vmatpush1.msra.mxu0 %v91_v4  ;;  %v47_v19 = vld [vmem:[%s10925_s0] sm:$0xff]  ;;  %v52_v22 = vld [vmem:[%s10925_s0 + $0x28] sm:$0xff]  ;;  %v54_v24 = vld [vmem:[%s10925_s0 + $0x38] sm:$0xff]  ;;  %457 = vst.msk [vmem:[#allocation2 + $0x28] sm:$0xff] %vm10945_vm2, %v6979_v0 }
   0x9   :  { %157 = vmatprep.subr.mxu0 %v6979_v0  ;;  %v51_v23 = vld [vmem:[%s10925_s0 + $0x20] sm:$0xff]  ;;  %v53_v25 = vld [vmem:[%s10925_s0 + $0x30] sm:$0xff]  ;;  %v56_v26 = vld [vmem:[%s10925_s0 + $0x48] sm:$0xff]  ;;  %458 = vst.msk [vmem:[#allocation2 + $0x30] sm:$0xff] %vm10945_vm2, %v6979_v0 }
   0xa   :  { %158 = vmatpush1.msra.mxu0 %v90_v6  ;;  %v55_v27 = vld [vmem:[%s10925_s0 + $0x40] sm:$0xff]  ;;  %v58_v28 = vld [vmem:[%s10925_s0 + $0x58] sm:$0xff]  ;;  %v57_v29 = vld [vmem:[%s10925_s0 + $0x50] sm:$0xff]  ;;  %459 = vst.msk [vmem:[#allocation2 + $0x38] sm:$0xff] %vm10945_vm2, %v6979_v0 }
   0xb   :  { %159 = vmatprep.subr.mxu0 %v6979_v0  ;;  %v60_v30 = vld [vmem:[%s10925_s0 + $0x68] sm:$0xff]  ;;  %v59_v31 = vld [vmem:[%s10925_s0 + $0x60] sm:$0xff]  ;;  %v62_v32 = vld [vmem:[%s10925_s0 + $0x78] sm:$0xff]  ;;  %460 = vst.msk [vmem:[#allocation2 + $0x40] sm:$0xff] %vm10945_vm2, %v6979_v0 }
   0xc   :  { %160 = vmatpush1.msra.mxu0 %v89_v7  ;;  %v61_v33 = vld [vmem:[%s10925_s0 + $0x70] sm:$0xff]  ;;  %v64_v34 = vld [vmem:[%s10925_s0 + $0x88] sm:$0xff]  ;;  %v63_v35 = vld [vmem:[%s10925_s0 + $0x80] sm:$0xff]  ;;  %461 = vst.msk [vmem:[#allocation2 + $0x48] sm:$0xff] %vm10945_vm2, %v6979_v0 }
   0xd   :  { %161 = vmatprep.subr.mxu0 %v6979_v0  ;;  %v66_v36 = vld [vmem:[%s10925_s0 + $0x98] sm:$0xff]  ;;  %v65_v37 = vld [vmem:[%s10925_s0 + $0x90] sm:$0xff]  ;;  %v68_v38 = vld [vmem:[%s10925_s0 + $0xa8] sm:$0xff]  ;;  %462 = vst.msk [vmem:[#allocation2 + $0x50] sm:$0xff] %vm10945_vm2, %v6979_v0 }
   0xe   :  { %162 = vmatpush1.msra.mxu0 %v88_v8  ;;  %v67_v39 = vld [vmem:[%s10925_s0 + $0xa0] sm:$0xff]  ;;  %v70_v40 = vld [vmem:[%s10925_s0 + $0xb8] sm:$0xff]  ;;  %v69_v41 = vld [vmem:[%s10925_s0 + $0xb0] sm:$0xff]  ;;  %463 = vst.msk [vmem:[#allocation2 + $0x58] sm:$0xff] %vm10945_vm2, %v6979_v0 }
   0xf   :  { %163 = vmatprep.subr.mxu0 %v6979_v0  ;;  %v72_v42 = vld [vmem:[%s10925_s0 + $0xc8] sm:$0xff]  ;;  %v71_v43 = vld [vmem:[%s10925_s0 + $0xc0] sm:$0xff]  ;;  %v74_v44 = vld [vmem:[%s10925_s0 + $0xd8] sm:$0xff]  ;;  %464 = vst.msk [vmem:[#allocation2 + $0x60] sm:$0xff] %vm10945_vm2, %v6979_v0 }
  0x10   :  { %164 = vmatpush1.msra.mxu0 %v87_v9  ;;  %v73_v45 = vld [vmem:[%s10925_s0 + $0xd0] sm:$0xff]  ;;  %v76_v46 = vld [vmem:[%s10925_s0 + $0xe8] sm:$0xff]  ;;  %v75_v47 = vld [vmem:[%s10925_s0 + $0xe0] sm:$0xff]  ;;  %465 = vst.msk [vmem:[#allocation2 + $0x68] sm:$0xff] %vm10945_vm2, %v6979_v0 }
  0x11   :  { %165 = vmatprep.subr.mxu0 %v6979_v0  ;;  %v78_v48 = vld [vmem:[%s10925_s0 + $0xf8] sm:$0xff]  ;;  %v77_v49 = vld [vmem:[%s10925_s0 + $0xf0] sm:$0xff]  ;;  %466 = vst.msk [vmem:[#allocation2 + $0x70] sm:$0xff] %vm10945_vm2, %v6979_v0  ;;  %467 = vst.msk [vmem:[#allocation2 + $0x78] sm:$0xff] %vm10945_vm2, %v6979_v0 }
  0x12   :  { %166 = vmatpush1.msra.mxu0 %v86_v10  ;;  %468 = vst.msk [vmem:[#allocation2 + $0x80] sm:$0xff] %vm10945_vm2, %v6979_v0  ;;  %469 = vst.msk [vmem:[#allocation2 + $0x88] sm:$0xff] %vm10945_vm2, %v6979_v0  ;;  %v7288_v50 = vld [vmem:[%s10926_s2 + $0x118] sm:$0xff]  ;;  %v1298_v51 = vld [vmem:[%s10926_s2 + $0x110] sm:$0xff] }
  0x13   :  { %167 = vmatprep.subr.mxu0 %v6979_v0  ;;  %470 = vst.msk [vmem:[#allocation2 + $0x90] sm:$0xff] %vm10945_vm2, %v6979_v0  ;;  %471 = vst.msk [vmem:[#allocation2 + $0x98] sm:$0xff] %vm10945_vm2, %v6979_v0  ;;  %v1297_v52 = vld [vmem:[%s10926_s2 + $0x108] sm:$0xff]  ;;  %v1296_v53 = vld [vmem:[%s10926_s2 + $0x100] sm:$0xff] }
  0x14   :  { %168 = vmatpush1.msra.mxu0 %v85_v11  ;;  %472 = vst.msk [vmem:[#allocation2 + $0xa0] sm:$0xff] %vm10945_vm2, %v6979_v0  ;;  %v7301_v54 = vld [vmem:[#allocation2 + $0x7] sm:$0xff] }
  0x15   :  { %169 = vmatprep.subr.mxu0 %v6979_v0  ;;  %2009 = vst.msk [vmem:[#allocation2] sm:$0xff] %vm10945_vm2, %v6979_v0 }
  0x16   :  { %170 = vmatpush1.msra.mxu0 %v84_v12  ;;  %3257 = vst.msk [vmem:[#allocation3] sm:$0xff] %vm10943_vm8, %v6979_v0  ;;  %3258 = vst.msk [vmem:[#allocation3 + $0x8] sm:$0xff] %vm10943_vm8, %v6979_v0 }
  0x17   :  { %171 = vmatprep.subr.mxu0 %v6979_v0  ;;  %3259 = vst.msk [vmem:[#allocation3 + $0x10] sm:$0xff] %vm10943_vm8, %v6979_v0  ;;  %3260 = vst.msk [vmem:[#allocation3 + $0x18] sm:$0xff] %vm10943_vm8, %v6979_v0 }
  0x18   :  { %172 = vmatpush1.msra.mxu0 %v83_v13  ;;  %3261 = vst.msk [vmem:[#allocation3 + $0x20] sm:$0xff] %vm10943_vm8, %v6979_v0  ;;  %3262 = vst.msk [vmem:[#allocation3 + $0x28] sm:$0xff] %vm10943_vm8, %v6979_v0 }
  0x19   :  { %173 = vmatprep.subr.mxu0 %v6979_v0 }
  0x1a   :  { %174 = vmatpush1.msra.mxu0 %v82_v14 }
  0x1b   :  { %175 = vmatprep.subr.mxu0 %v6979_v0 }
  0x1c   :  { %176 = vmatpush1.msra.mxu0 %v81_v15 }
  0x1d   :  { %177 = vmatprep.subr.mxu0 %v6979_v0 }
  0x1e   :  { %178 = vmatpush1.msra.mxu0 %v80_v16 }
  0x1f   :  { %179 = vmatprep.subr.mxu0 %v6979_v0 }
  0x20   :  { %180 = vmatpush1.msra.mxu0 %v79_v17 }
  0x21   :  { %211 = vmatprep.subr.mxu0 %v6979_v0 }
  0x22   :  { %5703 = vmatpush2.msk.msra.mxu0 %vm10944_vm1, %v95_v18 }
  0x23   :  { %214 = vmatmul.mubr.f32.vlgmr.msra.gmra.mxu0 %v47_v19  ;;  %6368 = vmatprep.subr.mxu0 %v7288_v50 }
  0x24   :  { %5705 = vmatprep.mubr.msk.f32.mxu0 %vm96_vm0, %v50_v20  ;;  %6369 = vmatpush3.msra.mxu0 %v7288_v50 }
  0x25   :  { %6370 = vmatprep.subr.mxu0 %v1298_v51 }
  0x26   :  { %6371 = vmatpush3.msra.mxu0 %v1298_v51 }
  0x27   :  { %219 = vmatmul.mubr.f32.gmra.mxu0 %v49_v21  ;;  %6372 = vmatprep.subr.mxu0 %v1297_v52 }
  0x28   :  { %5706 = vmatprep.mubr.msk.f32.mxu0 %vm96_vm0, %v52_v22  ;;  %6373 = vmatpush3.msra.mxu0 %v1297_v52 }
  0x29   :  { %6374 = vmatprep.subr.mxu0 %v1296_v53 }
  0x2a   :  { %6375 = vmatpush3.msra.mxu0 %v1296_v53 }
  0x2b   :  { %224 = vmatmul.mubr.f32.gmra.mxu0 %v51_v23 }
  0x2c   :  { %5707 = vmatprep.mubr.msk.f32.mxu0 %vm96_vm0, %v54_v24 }
  0x2f   :  { %229 = vmatmul.mubr.f32.gmra.mxu0 %v53_v25 }
  0x30   :  { %5708 = vmatprep.mubr.msk.f32.mxu0 %vm96_vm0, %v56_v26 }
  0x33   :  { %234 = vmatmul.mubr.f32.gmra.mxu0 %v55_v27 }
  0x34   :  { %5709 = vmatprep.mubr.msk.f32.mxu0 %vm96_vm0, %v58_v28 }
  0x37   :  { %239 = vmatmul.mubr.f32.gmra.mxu0 %v57_v29 }
  0x38   :  { %5710 = vmatprep.mubr.msk.f32.mxu0 %vm96_vm0, %v60_v30 }
  0x3b   :  { %244 = vmatmul.mubr.f32.gmra.mxu0 %v59_v31 }
  0x3c   :  { %5711 = vmatprep.mubr.msk.f32.mxu0 %vm96_vm0, %v62_v32 }
  0x3f   :  { %249 = vmatmul.mubr.f32.gmra.mxu0 %v61_v33 }
  0x40   :  { %5712 = vmatprep.mubr.msk.f32.mxu0 %vm96_vm0, %v64_v34 }
  0x43   :  { %254 = vmatmul.mubr.f32.gmra.mxu0 %v63_v35 }
  0x44   :  { %5713 = vmatprep.mubr.msk.f32.mxu0 %vm96_vm0, %v66_v36 }
  0x47   :  { %259 = vmatmul.mubr.f32.gmra.mxu0 %v65_v37 }
  0x48   :  { %5714 = vmatprep.mubr.msk.f32.mxu0 %vm96_vm0, %v68_v38 }
  0x4b   :  { %264 = vmatmul.mubr.f32.gmra.mxu0 %v67_v39 }
  0x4c   :  { %5715 = vmatprep.mubr.msk.f32.mxu0 %vm96_vm0, %v70_v40 }
  0x4f   :  { %269 = vmatmul.mubr.f32.gmra.mxu0 %v69_v41 }
  0x50   :  { %5716 = vmatprep.mubr.msk.f32.mxu0 %vm96_vm0, %v72_v42 }
  0x53   :  { %274 = vmatmul.mubr.f32.gmra.mxu0 %v71_v43 }
  0x54   :  { %5717 = vmatprep.mubr.msk.f32.mxu0 %vm96_vm0, %v74_v44 }
  0x57   :  { %279 = vmatmul.mubr.f32.gmra.mxu0 %v73_v45 }
  0x58   :  { %5718 = vmatprep.mubr.msk.f32.mxu0 %vm96_vm0, %v76_v46 }
  0x5b   :  { %284 = vmatmul.mubr.f32.gmra.mxu0 %v75_v47 }
  0x5c   :  { %5719 = vmatprep.mubr.msk.f32.mxu0 %vm96_vm0, %v78_v48 }
  0x5f   :  { %289 = vmatmul.mubr.f32.gmra.mxu0 %v77_v49 }
  0xe3   :  { %v215_v55 = vpop.f32.mrf.mxu0 }
  0xe4   :  { %v295_v2 = vsel %vm10945_vm2, %v215_v55, 0.0 }
  0xe5   :  { %v217_v56 = vpop.f32.mrf.mxu0 }
  0xe7   :  { %v220_v57 = vpop.f32.mrf.mxu0 }
  0xe8   :  { %v296_v63 = vsel %vm10945_vm2, %v220_v57, 0.0 }
  0xe9   :  { %v222_v58 = vpop.f32.mrf.mxu0  ;;  %v297_v4 = vadd.f32 %v296_v63, %v295_v2 }
  0xeb   :  { %v225_v59 = vpop.f32.mrf.mxu0 }
  0xec   :  { %v298_v3 = vsel %vm10945_vm2, %v225_v59, 0.0 }
  0xed   :  { %v227_v60 = vpop.f32.mrf.mxu0  ;;  %v299_v7 = vadd.f32 %v298_v3, %v297_v4 }
  0xef   :  { %v230_v61 = vpop.f32.mrf.mxu0 }
  0xf0   :  { %v300_v6 = vsel %vm10945_vm2, %v230_v61, 0.0 }
  0xf1   :  { %v232_v62 = vpop.f32.mrf.mxu0  ;;  %v301_v10 = vadd.f32 %v300_v6, %v299_v7 }
  0xf3   :  { %v235_v1 = vpop.f32.mrf.mxu0 }
  0xf4   :  { %v302_v9 = vsel %vm10945_vm2, %v235_v1, 0.0 }
  0xf5   :  { %v237_v5 = vpop.f32.mrf.mxu0  ;;  %v303_v13 = vadd.f32 %v302_v9, %v301_v10 }
  0xf7   :  { %v240_v8 = vpop.f32.mrf.mxu0 }
  0xf8   :  { %v304_v12 = vsel %vm10945_vm2, %v240_v8, 0.0 }
  0xf9   :  { %v242_v11 = vpop.f32.mrf.mxu0  ;;  %v305_v16 = vadd.f32 %v304_v12, %v303_v13 }
  0xfb   :  { %v245_v14 = vpop.f32.mrf.mxu0 }
  0xfc   :  { %v306_v15 = vsel %vm10945_vm2, %v245_v14, 0.0 }
  0xfd   :  { %v247_v17 = vpop.f32.mrf.mxu0  ;;  %v307_v18 = vadd.f32 %v306_v15, %v305_v16 }
  0xff   :  { %v250_v19 = vpop.f32.mrf.mxu0 }
 0x100   :  { %v308_v20 = vsel %vm10945_vm2, %v250_v19, 0.0 }
 0x101   :  { %v309_v21 = vadd.f32 %v308_v20, %v307_v18  ;;  %v252_v22 = vpop.f32.mrf.mxu0 }
 0x103   :  { %v310_v23 = vrot.slane %v309_v21, 4  ;;  %v7313_v24 = vpop.f32.mrf.mxu0 }
 0x104   :  { %v366_v32 = vsel %vm10945_vm2, %v7313_v24, 0.0 }
 0x105   :  { %v311_v25 = vadd.f32 %v310_v23, %v309_v21  ;;  %v257_v26 = vpop.f32.mrf.mxu0 }
 0x107   :  { %v312_v27 = vrot.slane %v311_v25, 2  ;;  %v7315_v28 = vpop.f32.mrf.mxu0 }
 0x108   :  { %v367_v33 = vsel %vm10945_vm2, %v7315_v28, 0.0 }
 0x109   :  { %v313_v29 = vadd.f32 %v312_v27, %v311_v25  ;;  %v262_v30 = vpop.f32.mrf.mxu0  ;;  %v368_v37 = vadd.f32 %v367_v33, %v366_v32 }
 0x10b   :  { %v314_v31 = vrot.slane %v313_v29, 1  ;;  %v7321_v34 = vpop.f32.mrf.mxu0 }
 0x10c   :  { %v369_v39 = vsel %vm10945_vm2, %v7321_v34, 0.0 }
 0x10d   :  { %v315_v35 = vadd.f32 %v314_v31, %v313_v29  ;;  %v267_v36 = vpop.f32.mrf.mxu0  ;;  %v370_v46 = vadd.f32 %v369_v39, %v368_v37 }
 0x10f   :  { %v317_v38 = vmul.f32 0.015625, %v315_v35  ;;  %v7325_v40 = vpop.f32.mrf.mxu0 }
 0x110   :  { %v371_v53 = vsel %vm10945_vm2, %v7325_v40, 0.0 }
 0x111   :  { %v7327_v41 = vsub.f32 %v215_v55, %v317_v38  ;;  %v7329_v42 = vsub.f32 %v220_v57, %v317_v38  ;;  %v7331_v43 = vsub.f32 %v225_v59, %v317_v38  ;;  %v7333_v44 = vsub.f32 %v230_v61, %v317_v38  ;;  %v272_v45 = vpop.f32.mrf.mxu0 }
 0x112   :  { %v7335_v47 = vsub.f32 %v235_v1, %v317_v38  ;;  %v7347_v55 = vsub.f32 %v240_v8, %v317_v38  ;;  %v7353_v60 = vsub.f32 %v245_v14, %v317_v38  ;;  %v372_v1 = vadd.f32 %v371_v53, %v370_v46 }
 0x113   :  { %v326_v48 = vmul.f32 %v7327_v41, %v7327_v41  ;;  %v327_v49 = vmul.f32 %v7329_v42, %v7329_v42  ;;  %v328_v51 = vmul.f32 %v7331_v43, %v7331_v43  ;;  %v7343_v52 = vpop.f32.mrf.mxu0  ;;  %v329_v56 = vmul.f32 %v7333_v44, %v7333_v44 }
 0x114   :  { %v330_v62 = vmul.f32 %v7335_v47, %v7335_v47  ;;  %v373_v2 = vsel %vm10945_vm2, %v7343_v52, 0.0  ;;  %v7361_v6 = vsub.f32 %v250_v19, %v317_v38  ;;  %v331_v7 = vmul.f32 %v7347_v55, %v7347_v55 }
 0x115   :  { %v334_v57 = vsel %vm10945_vm2, %v326_v48, 0.0  ;;  %v335_v58 = vsel %vm10945_vm2, %v327_v49, 0.0  ;;  %v277_v59 = vpop.f32.mrf.mxu0  ;;  %v337_v63 = vsel %vm10945_vm2, %v328_v51, 0.0  ;;  %v339_v8 = vsel %vm10945_vm2, %v329_v56, 0.0  ;;  %v1295_v48 = vld [vmem:[%s10926_s2 + $0xf8] sm:$0xff] }
 0x116   :  { %v336_v61 = vadd.f32 %v335_v58, %v334_v57  ;;  %v374_v9 = vadd.f32 %v373_v2, %v372_v1  ;;  %v332_v12 = vmul.f32 %v7353_v60, %v7353_v60  ;;  %v341_v13 = vsel %vm10945_vm2, %v330_v62, 0.0  ;;  %5802 = vmatprep.subr.mxu1 %v1295_v48  ;;  %v1279_v57 = vld [vmem:[%s10926_s2 + $0x78] sm:$0xff]  ;;  %v1294_v58 = vld [vmem:[%s10926_s2 + $0xf0] sm:$0xff]  ;;  %v1293_v62 = vld [vmem:[%s10926_s2 + $0xe8] sm:$0xff] }
 0x117   :  { %v280_v3 = vpop.f32.mrf.mxu0  ;;  %v333_v18 = vmul.f32 %v7361_v6, %v7361_v6  ;;  %v343_v19 = vsel %vm10945_vm2, %v331_v7, 0.0  ;;  %v1278_v59 = vld [vmem:[%s10926_s2 + $0x70] sm:$0xff]  ;;  %5803 = vmatpush3.msra.mxu1 %v1279_v57  ;;  %v1277_v1 = vld [vmem:[%s10926_s2 + $0x68] sm:$0xff] }
 0x118   :  { %v338_v4 = vadd.f32 %v337_v63, %v336_v61  ;;  %v375_v5 = vsel %vm10945_vm2, %v280_v3, 0.0  ;;  %v345_v23 = vsel %vm10945_vm2, %v332_v12, 0.0  ;;  %5804 = vmatprep.subr.mxu1 %v1294_v58  ;;  %v1286_v48 = vld [vmem:[%s10926_s2 + $0xb0] sm:$0xff]  ;;  %v1269_v58 = vld [vmem:[%s10926_s2 + $0x28] sm:$0xff] }
 0x119   :  { %v282_v10 = vpop.f32.mrf.mxu0  ;;  %v376_v14 = vadd.f32 %v375_v5, %v374_v9  ;;  %v347_v29 = vsel %vm10945_vm2, %v333_v18, 0.0  ;;  %5805 = vmatpush3.msra.mxu1 %v1278_v59 }
 0x11a   :  { %v340_v11 = vadd.f32 %v339_v8, %v338_v4  ;;  %v1292_v8 = vld [vmem:[%s10926_s2 + $0xe0] sm:$0xff]  ;;  %5806 = vmatprep.subr.mxu1 %v1293_v62 }
 0x11b   :  { %v7369_v15 = vpop.f32.mrf.mxu0  ;;  %5807 = vmatpush3.msra.mxu1 %v1277_v1 }
 0x11c   :  { %v342_v16 = vadd.f32 %v341_v13, %v340_v11  ;;  %v377_v17 = vsel %vm10945_vm2, %v7369_v15, 0.0  ;;  %5808 = vmatprep.subr.mxu1 %v1292_v8  ;;  %v1284_v8 = vld [vmem:[%s10926_s2 + $0xa0] sm:$0xff] }
 0x11d   :  { %v378_v20 = vadd.f32 %v377_v17, %v376_v14  ;;  %v287_v21 = vpop.f32.mrf.mxu0  ;;  %v1290_v17 = vld [vmem:[%s10926_s2 + $0xd0] sm:$0xff] }
 0x11e   :  { %v344_v22 = vadd.f32 %v343_v19, %v342_v16  ;;  %v1274_v21 = vld [vmem:[%s10926_s2 + $0x50] sm:$0xff] }
 0x11f   :  { %v7377_v25 = vpop.f32.mrf.mxu0 }
 0x120   :  { %v346_v26 = vadd.f32 %v345_v23, %v344_v22  ;;  %v379_v27 = vsel %vm10945_vm2, %v7377_v25, 0.0 }
 0x121   :  { %v380_v30 = vadd.f32 %v379_v27, %v378_v20  ;;  %v292_v31 = vpop.f32.mrf.mxu0  ;;  %v489_v27 = vlaneseq }
 0x122   :  { %v348_v32 = vadd.f32 %v347_v29, %v346_v26  ;;  %v1289_v26 = vld [vmem:[%s10926_s2 + $0xc8] sm:$0xff] }
 0x123   :  { %v381_v33 = vrot.slane %v380_v30, 4  ;;  %v1273_v29 = vld [vmem:[%s10926_s2 + $0x48] sm:$0xff] }
 0x124   :  { %v349_v35 = vrot.slane %v348_v32, 4 }
 0x125   :  { %v382_v36 = vadd.f32 %v381_v33, %v380_v30 }
 0x126   :  { %v350_v37 = vadd.f32 %v349_v35, %v348_v32  ;;  %v1288_v32 = vld [vmem:[%s10926_s2 + $0xc0] sm:$0xff] }
 0x127   :  { %v383_v38 = vrot.slane %v382_v36, 2 }
 0x128   :  { %v351_v39 = vrot.slane %v350_v37, 2 }
 0x129   :  { %v384_v45 = vadd.f32 %v383_v38, %v382_v36  ;;  %v1272_v36 = vld [vmem:[%s10926_s2 + $0x40] sm:$0xff] }
 0x12a   :  { %v352_v46 = vadd.f32 %v351_v39, %v350_v37  ;;  %v7476_v39 = vshrl.u32 %v489_v27, 7  ;;  %v11009_v27 = vmov 0 }
 0x12b   :  { %v385_v49 = vrot.slane %v384_v45, 1 }
 0x12c   :  { %v353_v51 = vrot.slane %v352_v46, 1  ;;  %11007 = vst [vmem:[#allocation5_spill] sm:$0xff] %v7476_v39  ;;  %v7494_v57 = vadd.s32 8, %v7476_v39  ;;  %v7502_v1 = vadd.s32 16, %v7476_v39 }
 0x12d   :  { %v386_v53 = vadd.f32 %v385_v49, %v384_v45  ;;  %v1271_v45 = vld [vmem:[%s10926_s2 + $0x38] sm:$0xff] }
 0x12e   :  { %v354_v56 = vadd.f32 %v353_v51, %v352_v46  ;;  %11008 = vst [vmem:[#allocation6_spill] sm:$0xff] %v7494_v57 }
 0x12f   :  { %v387_v61 = vmul.f32 0.015625, %v386_v53  ;;  %v1270_v53 = vld [vmem:[%s10926_s2 + $0x30] sm:$0xff] }
 0x130   :  { %v355_v63 = vmul.f32 0.015625, %v354_v56  ;;  %v1285_v56 = vld [vmem:[%s10926_s2 + $0xa8] sm:$0xff] }
 0x131   :  { %v7401_v2 = vsub.f32 %v7313_v24, %v387_v61  ;;  %v7404_v4 = vsub.f32 %v7315_v28, %v387_v61  ;;  %v7407_v5 = vsub.f32 %v7321_v34, %v387_v61  ;;  %v7410_v7 = vsub.f32 %v7325_v40, %v387_v61  ;;  %v1276_v24 = vld [vmem:[%s10926_s2 + $0x60] sm:$0xff] }
 0x132   :  { %v356_v9 = vadd.f32 1e-05, %v355_v63  ;;  %v7416_v10 = vsub.f32 %v7343_v52, %v387_v61  ;;  %v7421_v28 = vsub.f32 %v280_v3, %v387_v61  ;;  %v1291_v52 = vld [vmem:[%s10926_s2 + $0xd8] sm:$0xff]  ;;  %5809 = vmatpush3.msra.mxu1 %v1276_v24  ;;  %v7445_v18 = vsub.f32 %v7369_v15, %v387_v61 }
 0x133   :  { %v396_v34 = vmul.f32 %v7401_v2, %v7401_v2  ;;  %v397_v40 = vmul.f32 %v7404_v4, %v7404_v4  ;;  %v398_v11 = vmul.f32 %v7407_v5, %v7407_v5  ;;  %v399_v12 = vmul.f32 %v7410_v7, %v7410_v7  ;;  %v1275_v3 = vld [vmem:[%s10926_s2 + $0x58] sm:$0xff]  ;;  %5810 = vmatprep.subr.mxu1 %v1291_v52 }
 0x134   :  { %6931 = vrsqrt.f32 %v356_v9  ;;  %v400_v13 = vmul.f32 %v7416_v10, %v7416_v10  ;;  %v401_v22 = vmul.f32 %v7421_v28, %v7421_v28  ;;  %5811 = vmatpush3.msra.mxu1 %v1275_v3  ;;  %v7461_v30 = vsub.f32 %v7377_v25, %v387_v61  ;;  %v1287_v25 = vld [vmem:[%s10926_s2 + $0xb8] sm:$0xff] }
 0x135   :  { %v404_v14 = vsel %vm10945_vm2, %v396_v34, 0.0  ;;  %v405_v16 = vsel %vm10945_vm2, %v397_v40, 0.0  ;;  %v407_v20 = vsel %vm10945_vm2, %v398_v11, 0.0  ;;  %v409_v23 = vsel %vm10945_vm2, %v399_v12, 0.0  ;;  %5812 = vmatprep.subr.mxu1 %v1290_v17 }
 0x136   :  { %v406_v19 = vadd.f32 %v405_v16, %v404_v14  ;;  %v411_v31 = vsel %vm10945_vm2, %v400_v13, 0.0  ;;  %5813 = vmatpush3.msra.mxu1 %v1274_v21  ;;  %v402_v33 = vmul.f32 %v7445_v18, %v7445_v18  ;;  %v413_v37 = vsel %vm10945_vm2, %v401_v22, 0.0 }
 0x137   :  { %5814 = vmatprep.subr.mxu1 %v1289_v26  ;;  %v403_v46 = vmul.f32 %v7461_v30, %v7461_v30  ;;  %v502_v63 = vand.u32 7, %v7476_v39  ;;  %v7537_v21 = vadd.s32 24, %v7476_v39  ;;  %v7540_v22 = vadd.s32 32, %v7476_v39 }
 0x138   :  { %v408_v15 = vadd.f32 %v407_v20, %v406_v19  ;;  %5815 = vmatpush3.msra.mxu1 %v1273_v29  ;;  %v415_v51 = vsel %vm10945_vm2, %v402_v33, 0.0  ;;  %v509_v20 = vand.u32 7, %v7494_v57  ;;  %v516_v26 = vand.u32 7, %v7502_v1  ;;  %v1266_v29 = vld [vmem:[%s10926_s2 + $0x10] sm:$0xff]  ;;  %v1264_v1 = vld [vmem:[%s10926_s2] sm:$0xff] }
 0x139   :  { %5816 = vmatprep.subr.mxu1 %v1288_v32  ;;  %v417_v62 = vsel %vm10945_vm2, %v403_v46, 0.0  ;;  %vm7546_vm3 = vcmp.ne.s32.totalorder %v502_v63, 0  ;;  %v1265_v32 = vld [vmem:[%s10926_s2 + $0x8] sm:$0xff]  ;;  %vm7565_vm4 = vcmp.ne.s32.totalorder %v502_v63, 7 }
 0x13a   :  { %v410_v35 = vadd.f32 %v409_v23, %v408_v15  ;;  %5817 = vmatpush3.msra.mxu1 %v1272_v36  ;;  %v7544_v15 = vadd.s32 40, %v7476_v39  ;;  %v11010_v27 = vsel %vm7546_vm3, 4294967295, %v11009_v27  ;;  %v1280_v36 = vld [vmem:[%s10926_s2 + $0x80] sm:$0xff]  ;;  %vm7569_vm5 = vcmp.ne.s32.totalorder %v509_v20, 7 }
 0x13b   :  { %5818 = vmatprep.subr.mxu1 %v1287_v25  ;;  %v11013_v25 = vmov 0  ;;  %vm7577_vm6 = vcmp.ne.s32.totalorder %v516_v26, 7  ;;  %vm7591_vm7 = vcmp.ne.s32.totalorder %v509_v20, 0  ;;  %vm7728_vm13 = vcmp.ne.s32.totalorder %v516_v26, 0 }
 0x13c   :  { %v412_v38 = vadd.f32 %v411_v31, %v410_v35  ;;  %5819 = vmatpush3.msra.mxu1 %v1271_v45  ;;  %v1281_v31 = vld [vmem:[%s10926_s2 + $0x88] sm:$0xff]  ;;  %v7560_v35 = vadd.s32 48, %v7476_v39  ;;  %v11014_v25 = vsel %vm7569_vm5, 4294967295, %v11013_v25  ;;  %v530_v45 = vand.u32 7, %v7540_v22 }
 0x13d   :  { %5820 = vmatprep.subr.mxu1 %v1286_v48  ;;  %v11015_v48 = vmov 0 }
 0x13e   :  { %v414_v49 = vadd.f32 %v413_v37, %v412_v38  ;;  %5821 = vmatpush3.msra.mxu1 %v1270_v53  ;;  %v11011_v37 = vmov 0  ;;  %v523_v38 = vand.u32 7, %v7537_v21  ;;  %v11016_v48 = vsel %vm7577_vm6, 4294967295, %v11015_v48 }
 0x13f   :  { %5822 = vmatprep.subr.mxu1 %v1285_v56  ;;  %v11012_v37 = vsel %vm7565_vm4, 4294967295, %v11011_v37  ;;  %vm7641_vm10 = vcmp.ne.s32.totalorder %v530_v45, 7  ;;  %vm7790_vm15 = vcmp.ne.s32.totalorder %v530_v45, 0 }
 0x140   :  { %v416_v61 = vadd.f32 %v415_v51, %v414_v49  ;;  %5823 = vmatpush3.msra.mxu1 %v1269_v58  ;;  %v642_v49 = vsel %vm7546_vm3, %v7301_v54, 0.0  ;;  %v537_v51 = vand.u32 7, %v7544_v15  ;;  %vm7625_vm9 = vcmp.ne.s32.totalorder %v523_v38, 7 }
 0x141   :  { %v6932_v59 = vpop.eup %6931  ;;  %5824 = vmatprep.subr.mxu1 %v1284_v8  ;;  %vm7772_vm14 = vcmp.ne.s32.totalorder %v523_v38, 0  ;;  %v11037_v38 = vmov 0 }
 0x142   :  { %v358_v9 = vmul.f32 %v6932_v59, %v7327_v41  ;;  %v359_v24 = vmul.f32 %v6932_v59, %v7329_v42  ;;  %v360_v34 = vmul.f32 %v6932_v59, %v7331_v43  ;;  %v361_v40 = vmul.f32 %v6932_v59, %v7333_v44  ;;  %v1268_v44 = vld [vmem:[%s10926_s2 + $0x20] sm:$0xff] }
 0x143   :  { %v362_v11 = vmul.f32 %v6932_v59, %v7335_v47  ;;  %v363_v52 = vmul.f32 %v6932_v59, %v7347_v55  ;;  %v364_v12 = vmul.f32 %v6932_v59, %v7353_v60  ;;  %v365_v3 = vmul.f32 %v6932_v59, %v7361_v6  ;;  %v1283_v47 = vld [vmem:[%s10926_s2 + $0x98] sm:$0xff]  ;;  %5825 = vmatpush3.msra.mxu1 %v1268_v44  ;;  %v1282_v6 = vld [vmem:[%s10926_s2 + $0x90] sm:$0xff] }
 0x144   :  { %v436_v13 = vmax.f32 %v358_v9, 0.0  ;;  %v437_v14 = vmax.f32 %v359_v24, 0.0  ;;  %v438_v16 = vmax.f32 %v360_v34, 0.0  ;;  %v439_v41 = vmax.f32 %v361_v40, 0.0  ;;  %v1267_v60 = vld [vmem:[%s10926_s2 + $0x18] sm:$0xff]  ;;  %5826 = vmatprep.subr.mxu1 %v1283_v47 }
 0x145   :  { %v440_v42 = vmax.f32 %v362_v11, 0.0  ;;  %v441_v17 = vmax.f32 %v363_v52, 0.0  ;;  %v442_v43 = vmax.f32 %v364_v12, 0.0  ;;  %v443_v19 = vmax.f32 %v365_v3, 0.0  ;;  %5827 = vmatpush3.msra.mxu1 %v1267_v60 }
 0x146   :  { %473 = vst.msk [vmem:[#allocation2 + $0x10] sm:$0xff] %vm10945_vm2, %v436_v13  ;;  %474 = vst.msk [vmem:[#allocation2 + $0x18] sm:$0xff] %vm10945_vm2, %v437_v14  ;;  %v418_v55 = vadd.f32 %v417_v62, %v416_v61  ;;  %5828 = vmatprep.subr.mxu1 %v1282_v6  ;;  %v11017_v59 = vmov 0  ;;  %v11019_v11 = vmov 0  ;;  %v10939_v12 = vand.u32 7, %v7560_v35 }
 0x147   :  { %475 = vst.msk [vmem:[#allocation2 + $0x20] sm:$0xff] %vm10945_vm2, %v438_v16  ;;  %476 = vst.msk [vmem:[#allocation2 + $0x28] sm:$0xff] %vm10945_vm2, %v439_v41  ;;  %5829 = vmatpush3.msra.mxu1 %v1266_v29  ;;  %v11018_v59 = vsel %vm7591_vm7, 4294967295, %v11017_v59  ;;  %v11020_v11 = vsel %vm7625_vm9, 4294967295, %v11019_v11  ;;  %v11021_v41 = vmov 0  ;;  %vm7684_vm11 = vcmp.ne.s32.totalorder %v537_v51, 7 }
 0x148   :  { %477 = vst.msk [vmem:[#allocation2 + $0x30] sm:$0xff] %vm10945_vm2, %v440_v42  ;;  %478 = vst.msk [vmem:[#allocation2 + $0x38] sm:$0xff] %vm10945_vm2, %v441_v17  ;;  %v419_v23 = vrot.slane %v418_v55, 4  ;;  %5830 = vmatprep.subr.mxu1 %v1281_v31  ;;  %v11022_v41 = vsel %vm7641_vm10, 4294967295, %v11021_v41  ;;  %v650_v42 = vld [vmem:[#allocation2 + $0x8] sm:$0xff]  ;;  %vm7690_vm12 = vcmp.ne.s32.totalorder %v10939_v12, 7 }
 0x149   :  { %479 = vst.msk [vmem:[#allocation2 + $0x40] sm:$0xff] %vm10945_vm2, %v442_v43  ;;  %480 = vst.msk [vmem:[#allocation2 + $0x48] sm:$0xff] %vm10945_vm2, %v443_v19  ;;  %5831 = vmatpush3.msra.mxu1 %v1265_v32  ;;  %v11038_v38 = vsel %vm7790_vm15, 4294967295, %v11037_v38  ;;  %vm7814_vm0 = vcmp.ne.s32.totalorder %v537_v51, 0 }
 0x14a   :  { %v420_v33 = vadd.f32 %v419_v23, %v418_v55  ;;  %5832 = vmatprep.subr.mxu1 %v1280_v36 }
 0x14b   :  { %5833 = vmatpush3.msra.mxu1 %v1264_v1 }
 0x14c   :  { %v421_v46 = vrot.slane %v420_v33, 2  ;;  %6638 = vmatprep.subr.mxu1 %v7288_v50 }
 0x14d   :  { %v7589_v58 = vld [vmem:[#allocation2 + $0x11] sm:$0xff]  ;;  %v651_v24 = vld [vmem:[#allocation2 + $0x9] sm:$0xff] }
 0x14e   :  { %v7585_v53 = vld [vmem:[#allocation2 + $0x19] sm:$0xff]  ;;  %v7587_v56 = vld [vmem:[#allocation2 + $0x21] sm:$0xff]  ;;  %v422_v61 = vadd.f32 %v421_v46, %v420_v33  ;;  %v693_v8 = vsel %vm7565_vm4, %v7589_v58, 0.0  ;;  %v675_v40 = vsel %vm7565_vm4, %v651_v24, 0.0  ;;  %v7645_v17 = vld [vmem:[#allocation2 + $0xf] sm:$0xff]  ;;  %v11023_v46 = vmov 0 }
 0x14f   :  { %v712_v54 = vsel %vm7565_vm4, %v7585_v53, 0.0  ;;  %v713_v62 = vsel %vm7569_vm5, %v7587_v56, 0.0  ;;  %v7601_v63 = vld [vmem:[#allocation2 + $0x29] sm:$0xff]  ;;  %v7606_v9 = vld [vmem:[#allocation2 + $0x18] sm:$0xff]  ;;  %v6651_v34 = vpack.i.bf16 %v642_v49, %v693_v8  ;;  %v643_v44 = vsel %vm7591_vm7, %v7645_v17, 0.0  ;;  %2010 = vst.msk [vmem:[#allocation2 + $0x8] sm:$0xff] %vm10945_vm2, %v6979_v0 }
 0x150   :  { %6376 = vmatprep.mubr.msk.f32.mxu0 %vm10945_vm2, %v712_v54  ;;  %v7629_v52 = vld [vmem:[#allocation2 + $0x17] sm:$0xff]  ;;  %v423_v3 = vrot.slane %v422_v61, 1  ;;  %v714_v13 = vsel %vm7577_vm6, %v7601_v63, 0.0  ;;  %v6661_v14 = vpack.i.bf16 %v675_v40, %v7606_v9  ;;  %v694_v47 = vsel %vm7569_vm5, %v7585_v53, 0.0  ;;  %v7662_v55 = vld [vmem:[#allocation2 + $0x20] sm:$0xff]  ;;  %v7669_v23 = vld [vmem:[#allocation2 + $0x49] sm:$0xff] }
 0x151   :  { %6377 = vmatmul.mubr.msk.f32.vlgmr.msra.gmra.mxu0 %vm10945_vm2, %v713_v62  ;;  %v7637_v16 = vld [vmem:[#allocation2 + $0x31] sm:$0xff]  ;;  %6652 = vrot.lane.b32.xlu0 %v6651_v34, %s6980_s29  ;;  %v7649_v43 = vld [vmem:[#allocation2 + $0x39] sm:$0xff]  ;;  %v702_v19 = vsel %vm7546_vm3, %v7629_v52, 0.0  ;;  %v7667_v20 = vld [vmem:[#allocation2 + $0x41] sm:$0xff]  ;;  %v11024_v46 = vsel %vm7684_vm11, 4294967295, %v11023_v46  ;;  %v11025_v49 = vmov 0  ;;  %v6666_v34 = vpack.i.bf16 %v643_v44, %v694_v47 }
 0x152   :  { %6379 = vmatprep.mubr.msk.f32.mxu0 %vm10945_vm2, %v714_v13  ;;  %v7664_v60 = vld [vmem:[#allocation2 + $0x10] sm:$0xff]  ;;  %v424_v6 = vadd.f32 %v423_v3, %v422_v61  ;;  %6662 = vrot.lane.b32.xlu1 %v6661_v14, %s6981_s30  ;;  %v7671_v29 = vld [vmem:[#allocation2 + $0x1f] sm:$0xff]  ;;  %v7675_v31 = vld [vmem:[#allocation2 + $0x27] sm:$0xff]  ;;  %v715_v33 = vsel %vm7625_vm9, %v7637_v16, 0.0  ;;  %v6656_v36 = vpack.i.bf16 %v650_v42, %v702_v19  ;;  %v11026_v49 = vsel %vm7690_vm12, 4294967295, %v11025_v49 }
 0x153   :  { %2011 = vst.msk [vmem:[#allocation2 + $0x10] sm:$0xff] %vm10945_vm2, %v6979_v0  ;;  %v7677_v32 = vld [vmem:[#allocation2 + $0x28] sm:$0xff]  ;;  %2012 = vst.msk [vmem:[#allocation2 + $0x18] sm:$0xff] %vm10945_vm2, %v6979_v0  ;;  %v7698_v61 = vld [vmem:[#allocation2 + $0x30] sm:$0xff]  ;;  %v716_v24 = vsel %vm7641_vm10, %v7649_v43, 0.0  ;;  %v703_v40 = vsel %vm7591_vm7, %v7671_v29, 0.0 }
 0x154   :  { %2013 = vst.msk [vmem:[#allocation2 + $0x20] sm:$0xff] %vm10945_vm2, %v6979_v0  ;;  %11027 = vst [vmem:[#allocation7_spill] sm:$0xff] %v7698_v61  ;;  %v7700_v54 = vld [vmem:[#allocation2 + $0x2f] sm:$0xff]  ;;  %v7702_v62 = vld [vmem:[#allocation2 + $0x37] sm:$0xff]  ;;  %v425_v8 = vmul.f32 0.015625, %v424_v6  ;;  %v676_v42 = vsel %vm7569_vm5, %v7589_v58, 0.0 }
 0x155   :  { %11028 = vst [vmem:[#allocation8_spill] sm:$0xff] %v7702_v62  ;;  %6380 = vmatmul.mubr.msk.f32.gmra.mxu0 %vm10945_vm2, %v715_v33  ;;  %2014 = vst.msk [vmem:[#allocation2 + $0x28] sm:$0xff] %vm10945_vm2, %v6979_v0  ;;  %v7715_v3 = vld [vmem:[#allocation2 + $0x38] sm:$0xff]  ;;  %v7717_v13 = vld [vmem:[#allocation2 + $0x40] sm:$0xff]  ;;  %6657 = vrot.lane.b32.xlu0 %v6656_v36, %s6982_s15  ;;  %v11031_v19 = vmov 0  ;;  %v717_v26 = vsel %vm7684_vm11, %v7667_v20, 0.0  ;;  %v6671_v36 = vpack.i.bf16 %v7664_v60, %v703_v40 }
 0x156   :  { %2015 = vst.msk [vmem:[#allocation2 + $0x30] sm:$0xff] %vm10945_vm2, %v6979_v0  ;;  %11029 = vst [vmem:[#allocation9_spill] sm:$0xff] %v7715_v3  ;;  %v7719_v14 = vld [vmem:[#allocation2 + $0x3f] sm:$0xff]  ;;  %6382 = vmatprep.mubr.msk.f32.mxu0 %vm10945_vm2, %v716_v24  ;;  %v11032_v19 = vsel %vm7728_vm13, 4294967295, %v11031_v19  ;;  %v7734_v44 = vld [vmem:[#allocation2 + $0x47] sm:$0xff]  ;;  %6667 = vrot.lane.b32.xlu1 %v6666_v34, %s6980_s29  ;;  %v718_v58 = vsel %vm7690_vm12, %v7669_v23, 0.0 }
 0x157   :  { %11030 = vst [vmem:[#allocation10_spill] sm:$0xff] %v7719_v14  ;;  %2016 = vst.msk [vmem:[#allocation2 + $0x38] sm:$0xff] %vm10945_vm2, %v6979_v0  ;;  %v7736_v47 = vld [vmem:[#allocation2 + $0x48] sm:$0xff]  ;;  %v426_v33 = vadd.f32 1e-05, %v425_v8  ;;  %v644_v8 = vsel %vm7728_vm13, %v7629_v52, 0.0 }
 0x158   :  { %11033 = vst [vmem:[#allocation11_spill] sm:$0xff] %v7734_v44  ;;  %11034 = vst [vmem:[#allocation12_spill] sm:$0xff] %v7736_v47  ;;  %v7738_v6 = vld [vmem:[#allocation2 + $0x4f] sm:$0xff]  ;;  %v695_v24 = vsel %vm7577_vm6, %v7587_v56, 0.0  ;;  %v704_v34 = vsel %vm7728_vm13, %v7675_v31, 0.0  ;;  %v11035_v40 = vmov 0 }
 0x159   :  { %2017 = vst.msk [vmem:[#allocation2 + $0x40] sm:$0xff] %vm10945_vm2, %v6979_v0  ;;  %2018 = vst.msk [vmem:[#allocation2 + $0x48] sm:$0xff] %vm10945_vm2, %v6979_v0  ;;  %6933 = vrsqrt.f32 %v426_v33  ;;  %6383 = vmatmul.mubr.msk.f32.gmra.mxu0 %vm10945_vm2, %v717_v26  ;;  %v6676_v0 = vpack.i.bf16 %v676_v42, %v7662_v55  ;;  %6672 = vrot.lane.b32.xlu0 %v6671_v36, %s6982_s15  ;;  %v11036_v40 = vsel %vm7772_vm14, 4294967295, %v11035_v40  ;;  %v677_v50 = vsel %vm7577_vm6, %v7585_v53, 0.0 }
 0x15a   :  { %6385 = vmatprep.mubr.msk.f32.mxu0 %vm10945_vm2, %v718_v58  ;;  %v6681_v42 = vpack.i.bf16 %v644_v8, %v695_v24  ;;  %v6686_v33 = vpack.i.bf16 %v7606_v9, %v704_v34  ;;  %v645_v1 = vsel %vm7772_vm14, %v7671_v29, 0.0  ;;  %v696_v21 = vsel %vm7625_vm9, %v7601_v63, 0.0 }
 0x15b   :  { %6677 = vrot.lane.b32.xlu1 %v6676_v0, %s6981_s30  ;;  %v6691_v53 = vpack.i.bf16 %v677_v50, %v7677_v32  ;;  %v6696_v26 = vpack.i.bf16 %v645_v1, %v696_v21  ;;  %v705_v58 = vsel %vm7772_vm14, %v7700_v54, 0.0  ;;  %v678_v36 = vsel %vm7625_vm9, %v7587_v56, 0.0 }
 0x15c   :  { %v706_v22 = vsel %vm7790_vm15, %v7702_v62, 0.0  ;;  %v646_v45 = vsel %vm7790_vm15, %v7675_v31, 0.0  ;;  %v697_v0 = vsel %vm7641_vm10, %v7637_v16, 0.0  ;;  %v11039_v8 = vmov 0 }
 0x15d   :  { %6682 = vrot.lane.b32.xlu0 %v6681_v42, %s6980_s29  ;;  %v11040_v8 = vsel %vm7814_vm0, 4294967295, %v11039_v8  ;;  %v6701_v56 = vpack.i.bf16 %v7662_v55, %v705_v58  ;;  %v6706_v24 = vpack.i.bf16 %v678_v36, %v7698_v61  ;;  %v6716_v34 = vpack.i.bf16 %v7677_v32, %v706_v22 }
 0x15e   :  { %v497_v42 = vadd.s32 56, %v7476_v39  ;;  %v6711_v50 = vpack.i.bf16 %v646_v45, %v697_v0  ;;  %v647_v15 = vsel %vm7814_vm0, %v7700_v54, 0.0  ;;  %v698_v51 = vsel %vm7684_vm11, %v7649_v43, 0.0 }
 0x15f   :  { %6687 = vrot.lane.b32.xlu1 %v6686_v33, %s6982_s15  ;;  %v679_v1 = vsel %vm7641_vm10, %v7601_v63, 0.0 }
 0x161   :  { %6692 = vrot.lane.b32.xlu0 %v6691_v53, %s6981_s30 }
 0x163   :  { %6697 = vrot.lane.b32.xlu1 %v6696_v26, %s6980_s29 }
 0x165   :  { %6702 = vrot.lane.b32.xlu0 %v6701_v56, %s6982_s15 }
 0x166   :  { %v6934_v33 = vpop.eup %6933 }
 0x167   :  { %v428_v21 = vmul.f32 %v6934_v33, %v7401_v2  ;;  %v429_v53 = vmul.f32 %v6934_v33, %v7404_v4  ;;  %v430_v26 = vmul.f32 %v6934_v33, %v7407_v5  ;;  %v431_v58 = vmul.f32 %v6934_v33, %v7410_v7  ;;  %6707 = vrot.lane.b32.xlu1 %v6706_v24, %s6981_s30 }
 0x168   :  { %v432_v36 = vmul.f32 %v6934_v33, %v7416_v10  ;;  %v433_v22 = vmul.f32 %v6934_v33, %v7421_v28  ;;  %v434_v45 = vmul.f32 %v6934_v33, %v7445_v18  ;;  %v435_v0 = vmul.f32 %v6934_v33, %v7461_v30 }
 0x169   :  { %v444_v56 = vmax.f32 %v428_v21, 0.0  ;;  %v445_v63 = vmax.f32 %v429_v53, 0.0  ;;  %v446_v12 = vmax.f32 %v430_v26, 0.0  ;;  %v447_v2 = vmax.f32 %v431_v58, 0.0  ;;  %6712 = vrot.lane.b32.xlu0 %v6711_v50, %s6980_s29  ;;  %v710_v50 = vld [vmem:[#allocation2 + $0x50] sm:$0xff] }
 0x16a   :  { %v448_v39 = vmax.f32 %v432_v36, 0.0  ;;  %v449_v4 = vmax.f32 %v433_v22, 0.0  ;;  %v450_v57 = vmax.f32 %v434_v45, 0.0  ;;  %v451_v5 = vmax.f32 %v435_v0, 0.0  ;;  %v7901_v36 = vld [vmem:[#allocation4] sm:$0xff] }
 0x16b   :  { %481 = vst.msk [vmem:[#allocation2 + $0x58] sm:$0xff] %vm10945_vm2, %v444_v56  ;;  %482 = vst.msk [vmem:[#allocation2 + $0x60] sm:$0xff] %vm10945_vm2, %v445_v63  ;;  %6717 = vrot.lane.b32.xlu1 %v6716_v34, %s6982_s15  ;;  %v6721_v7 = vpack.i.bf16 %v679_v1, %v7715_v3  ;;  %v6726_v10 = vpack.i.bf16 %v647_v15, %v698_v51  ;;  %v707_v28 = vsel %vm7814_vm0, %v7719_v14, 0.0  ;;  %v551_v18 = vand.u32 7, %v497_v42 }
 0x16c   :  { %483 = vst.msk [vmem:[#allocation2 + $0x68] sm:$0xff] %vm10945_vm2, %v446_v12  ;;  %484 = vst.msk [vmem:[#allocation2 + $0x70] sm:$0xff] %vm10945_vm2, %v447_v2  ;;  %v680_v30 = vsel %vm7684_vm11, %v7637_v16, 0.0  ;;  %v6731_v12 = vpack.i.bf16 %v7698_v61, %v707_v28  ;;  %v699_v16 = vsel %vm7690_vm12, %v7667_v20, 0.0  ;;  %v681_v63 = vsel %vm7690_vm12, %v7649_v43, 0.0 }
 0x16d   :  { %485 = vst.msk [vmem:[#allocation2 + $0x78] sm:$0xff] %vm10945_vm2, %v448_v39  ;;  %486 = vst.msk [vmem:[#allocation2 + $0x80] sm:$0xff] %vm10945_vm2, %v449_v4  ;;  %6722 = vrot.lane.b32.xlu0 %v6721_v7, %s6981_s30  ;;  %v11041_v39 = vand.u32 7, %v7560_v35  ;;  %v6736_v24 = vpack.i.bf16 %v680_v30, %v7717_v13  ;;  %vm7874_vm1 = vcmp.ne.s32.totalorder %v551_v18, 7  ;;  %v11044_v35 = vmov 0 }
 0x16e   :  { %487 = vst.msk [vmem:[#allocation2 + $0x88] sm:$0xff] %vm10945_vm2, %v450_v57  ;;  %488 = vst.msk [vmem:[#allocation2 + $0x90] sm:$0xff] %vm10945_vm2, %v451_v5  ;;  %v11042_v57 = vmov 0  ;;  %v11045_v35 = vsel %vm7874_vm1, 4294967295, %v11044_v35  ;;  %vm7890_vm2 = vcmp.ne.s32.totalorder %v551_v18, 0  ;;  %v700_v43 = vsel %vm7874_vm1, %v7669_v23, 0.0 }
 0x16f   :  { %vm7861_vm8 = vcmp.ne.s32.totalorder %v11041_v39, 0  ;;  %6727 = vrot.lane.b32.xlu1 %v6726_v10, %s6980_s29  ;;  %11046 = vst [vmem:[#allocation13_spill] sm:$0xff] %v11045_v35  ;;  %11050 = vst [vmem:[#allocation14_spill] sm:$0xff] %v7901_v36  ;;  %v649_v7 = vsel %vm7890_vm2, %v7719_v14, 0.0  ;;  %v6751_v23 = vpack.i.bf16 %v681_v63, %v7736_v47  ;;  %v682_v47 = vsel %vm7874_vm1, %v7667_v20, 0.0 }
 0x170   :  { %v11043_v57 = vsel %vm7861_vm8, 4294967295, %v11042_v57  ;;  %v648_v34 = vsel %vm7861_vm8, %v7702_v62, 0.0  ;;  %v708_v33 = vsel %vm7861_vm8, %v7734_v44, 0.0  ;;  %vm11049_vm8 = vcmask 261120  }
 0x171   :  { %6732 = vrot.lane.b32.xlu0 %v6731_v12, %s6982_s15  ;;  %v6741_v58 = vpack.i.bf16 %v648_v34, %v699_v16  ;;  %vm11051_vm11 = vmmov %vm11049_vm8  ;;  %v6746_v56 = vpack.i.bf16 %v7715_v3, %v708_v33  ;;  %v6756_v33 = vpack.i.bf16 %v649_v7, %v700_v43  ;;  %v6766_v14 = vpack.i.bf16 %v682_v47, %v710_v50 }
 0x172   :  { %v7878_v42 = vld [vmem:[#allocation2 + $0x51] sm:$0xff]  ;;  %v7884_v15 = vld [vmem:[#allocation2 + $0x59] sm:$0xff]  ;;  %vm11052_vm0 = vmmov %vm11049_vm8 }
 0x173   :  { %v719_v51 = vsel %vm7874_vm1, %v7878_v42, 0.0  ;;  %6737 = vrot.lane.b32.xlu1 %v6736_v24, %s6981_s30  ;;  %v7894_v21 = vld [vmem:[#allocation2 + $0x5f] sm:$0xff]  ;;  %v7896_v53 = vld [vmem:[#allocation2 + $0x57] sm:$0xff]  ;;  %v7909_v0 = vld [vmem:[#allocation2 + $0x67] sm:$0xff]  ;;  %v1004_v20 = vsel %vm7565_vm4, %v7884_v15, 0.0  ;;  %v986_v47 = vsel %vm7565_vm4, %v7878_v42, 0.0 }
 0x174   :  { %v7898_v26 = vld [vmem:[#allocation2 + $0x61] sm:$0xff]  ;;  %6386 = vmatmul.mubr.msk.f32.gmra.mxu0 %vm11049_vm8, %v719_v51  ;;  %2019 = vst.msk [vmem:[#allocation2 + $0x50] sm:$0xff] %vm11051_vm11, %v7901_v36  ;;  %v7907_v45 = vld [vmem:[#allocation2 + $0x58] sm:$0xff]  ;;  %v7921_v4 = vld [vmem:[#allocation2 + $0x6f] sm:$0xff]  ;;  %v709_v51 = vsel %vm7890_vm2, %v7738_v6, 0.0  ;;  %v1013_v3 = vsel %vm7546_vm3, %v7894_v21, 0.0 }
 0x175   :  { %v7905_v22 = vld [vmem:[#allocation2 + $0x60] sm:$0xff]  ;;  %v7915_v2 = vld [vmem:[#allocation2 + $0x68] sm:$0xff]  ;;  %2020 = vst.msk [vmem:[#allocation2 + $0x58] sm:$0xff] %vm11052_vm0, %v7901_v36  ;;  %6742 = vrot.lane.b32.xlu0 %v6741_v58, %s6980_s29  ;;  %vm11053_vm11 = vmmov %vm11052_vm0  ;;  %v6776_v61 = vpack.i.bf16 %v710_v50, %v1013_v3  ;;  %v1014_v3 = vsel %vm7591_vm7, %v7909_v0, 0.0 }
 0x176   :  { %2021 = vst.msk [vmem:[#allocation2 + $0x60] sm:$0xff] %vm11049_vm8, %v7901_v36  ;;  %v7923_v5 = vld [vmem:[#allocation2 + $0x69] sm:$0xff]  ;;  %v7934_v10 = vld [vmem:[#allocation2 + $0x71] sm:$0xff]  ;;  %v7945_v39 = vld [vmem:[#allocation2 + $0x7f] sm:$0xff]  ;;  %v6791_v42 = vpack.i.bf16 %v7907_v45, %v1014_v3 }
 0x177   :  { %2022 = vst.msk [vmem:[#allocation2 + $0x68] sm:$0xff] %vm11053_vm11, %v7901_v36  ;;  %v7936_v28 = vld [vmem:[#allocation2 + $0x70] sm:$0xff]  ;;  %6747 = vrot.lane.b32.xlu1 %v6746_v56, %s6982_s15  ;;  %v7941_v30 = vld [vmem:[#allocation2 + $0x78] sm:$0xff]  ;;  %vm11054_vm8 = vmmov %vm11052_vm0 }
 0x178   :  { %v7938_v18 = vld [vmem:[#allocation2 + $0x77] sm:$0xff]  ;;  %v7952_v24 = vld [vmem:[#allocation2 + $0x81] sm:$0xff]  ;;  %vm11055_vm11 = vmmov %vm11052_vm0 }
 0x179   :  { %2023 = vst.msk [vmem:[#allocation2 + $0x70] sm:$0xff] %vm11052_vm0, %v7901_v36  ;;  %v7947_v12 = vld [vmem:[#allocation2 + $0x79] sm:$0xff]  ;;  %v7956_v16 = vld [vmem:[#allocation2 + $0x87] sm:$0xff]  ;;  %v7965_v56 = vld [vmem:[#allocation2 + $0x8f] sm:$0xff]  ;;  %6752 = vrot.lane.b32.xlu0 %v6751_v23, %s6981_s30  ;;  %v6761_v23 = vpack.i.bf16 %v7717_v13, %v709_v51  ;;  %v972_v51 = vsel %vm7591_vm7, %v7896_v53, 0.0 }
 0x17a   :  { %2024 = vst.msk [vmem:[#allocation2 + $0x78] sm:$0xff] %vm11054_vm8, %v7901_v36  ;;  %v7954_v34 = vld [vmem:[#allocation2 + $0x80] sm:$0xff]  ;;  %v7961_v58 = vld [vmem:[#allocation2 + $0x88] sm:$0xff]  ;;  %v7975_v7 = vld [vmem:[#allocation2 + $0x91] sm:$0xff] }
 0x17b   :  { %2025 = vst.msk [vmem:[#allocation2 + $0x80] sm:$0xff] %vm11055_vm11, %v7901_v36  ;;  %v7967_v63 = vld [vmem:[#allocation2 + $0x89] sm:$0xff]  ;;  %v7979_v44 = vld [vmem:[#allocation2 + $0x97] sm:$0xff]  ;;  %6757 = vrot.lane.b32.xlu1 %v6756_v33, %s6980_s29  ;;  %vm11056_vm8 = vmmov %vm11052_vm0  ;;  %v971_v33 = vsel %vm7546_vm3, %v7738_v6, 0.0  ;;  %v6781_v6 = vpack.i.bf16 %v986_v47, %v7905_v22  ;;  %vm11057_vm11 = vnez %v11040_v8 }
 0x17c   :  { %2026 = vst.msk [vmem:[#allocation2 + $0x88] sm:$0xff] %vm11052_vm0, %v7901_v36  ;;  %v7977_v43 = vld [vmem:[#allocation2 + $0x90] sm:$0xff]  ;;  %v6771_v62 = vpack.i.bf16 %v971_v33, %v1004_v20  ;;  %v1006_v20 = vsel %vm7577_vm6, %v7923_v5, 0.0  ;;  %vm11058_vm0 = vnez %v11024_v46 }
 0x17d   :  { %2027 = vst.msk [vmem:[#allocation2 + $0x90] sm:$0xff] %vm11056_vm8, %v7901_v36  ;;  %6762 = vrot.lane.b32.xlu0 %v6761_v23, %s6982_s15  ;;  %vm11059_vm8 = vnez %v11043_v57 }
 0x17f   :  { %6767 = vrot.lane.b32.xlu1 %v6766_v14, %s6981_s30  ;;  %v1005_v14 = vsel %vm7569_vm5, %v7898_v26, 0.0 }
 0x180   :  { %v6786_v23 = vpack.i.bf16 %v972_v51, %v1005_v14  ;;  %v988_v51 = vsel %vm7577_vm6, %v7898_v26, 0.0  ;;  %v974_v14 = vsel %vm7772_vm14, %v7909_v0, 0.0  ;;  %vm11068_vm6 = vcmask 785408  }
 0x181   :  { %6772 = vrot.lane.b32.xlu0 %v6771_v62, %s6980_s29  ;;  %v987_v62 = vsel %vm7569_vm5, %v7884_v15, 0.0  ;;  %v1015_v15 = vsel %vm7728_vm13, %v7921_v4, 0.0  ;;  %vm11069_vm5 = vmmov %vm11068_vm6 }
 0x182   :  { %v6796_v50 = vpack.i.bf16 %v987_v62, %v7915_v2  ;;  %v6806_v47 = vpack.i.bf16 %v7905_v22, %v1015_v15  ;;  %v1016_v62 = vsel %vm7772_vm14, %v7938_v18, 0.0  ;;  %v1008_v15 = vsel %vm7641_vm10, %v7947_v12, 0.0 }
 0x183   :  { %6777 = vrot.lane.b32.xlu1 %v6776_v61, %s6982_s15  ;;  %v973_v61 = vsel %vm7728_vm13, %v7894_v21, 0.0 }
 0x184   :  { %v6801_v33 = vpack.i.bf16 %v973_v61, %v1006_v20  ;;  %v975_v20 = vsel %vm7790_vm15, %v7921_v4, 0.0 }
 0x185   :  { %6782 = vrot.lane.b32.xlu0 %v6781_v6, %s6981_s30  ;;  %v1007_v6 = vsel %vm7625_vm9, %v7934_v10, 0.0 }
 0x186   :  { %v6816_v3 = vpack.i.bf16 %v974_v14, %v1007_v6  ;;  %v990_v14 = vsel %vm7641_vm10, %v7934_v10, 0.0  ;;  %v976_v6 = vsel %vm11057_vm11, %v7938_v18, 0.0 }
 0x187   :  { %6787 = vrot.lane.b32.xlu1 %v6786_v23, %s6980_s29  ;;  %v6811_v23 = vpack.i.bf16 %v988_v51, %v7936_v28 }
 0x189   :  { %6792 = vrot.lane.b32.xlu0 %v6791_v42, %s6982_s15  ;;  %v989_v42 = vsel %vm7625_vm9, %v7923_v5, 0.0  ;;  %vm11066_vm9 = vcmask 523264  }
 0x18a   :  { %v6826_v61 = vpack.i.bf16 %v989_v42, %v7941_v30  ;;  %v1018_v42 = vsel %vm11057_vm11, %v7956_v16, 0.0 }
 0x18b   :  { %6797 = vrot.lane.b32.xlu1 %v6796_v50, %s6981_s30  ;;  %v6821_v50 = vpack.i.bf16 %v7915_v2, %v1016_v62 }
 0x18d   :  { %6802 = vrot.lane.b32.xlu0 %v6801_v33, %s6980_s29  ;;  %v1017_v33 = vsel %vm7790_vm15, %v7945_v39, 0.0 }
 0x18e   :  { %v6836_v51 = vpack.i.bf16 %v7936_v28, %v1017_v33  ;;  %v1010_v33 = vsel %vm7690_vm12, %v7967_v63, 0.0 }
 0x18f   :  { %6807 = vrot.lane.b32.xlu1 %v6806_v47, %s6982_s15  ;;  %v6831_v47 = vpack.i.bf16 %v975_v20, %v1008_v15  ;;  %v977_v15 = vsel %vm11059_vm8, %v7945_v39, 0.0 }
 0x191   :  { %6812 = vrot.lane.b32.xlu0 %v6811_v23, %s6981_s30  ;;  %v1009_v23 = vsel %vm11058_vm0, %v7952_v24, 0.0 }
 0x192   :  { %v6846_v62 = vpack.i.bf16 %v976_v6, %v1009_v23  ;;  %v992_v6 = vsel %vm7690_vm12, %v7952_v24, 0.0  ;;  %v978_v23 = vsel %vm7890_vm2, %v7956_v16, 0.0  ;;  %vm11060_vm12 = vcmask 1046528  }
 0x193   :  { %6817 = vrot.lane.b32.xlu1 %v6816_v3, %s6980_s29  ;;  %v6841_v3 = vpack.i.bf16 %v990_v14, %v7954_v34 }
 0x195   :  { %6822 = vrot.lane.b32.xlu0 %v6821_v50, %s6982_s15  ;;  %v991_v50 = vsel %vm11058_vm0, %v7947_v12, 0.0  ;;  %vm11061_vm0 = vmmov %vm11060_vm12 }
 0x196   :  { %v6856_v20 = vpack.i.bf16 %v991_v50, %v7961_v58 }
 0x197   :  { %6827 = vrot.lane.b32.xlu1 %v6826_v61, %s6981_s30  ;;  %v6851_v61 = vpack.i.bf16 %v7941_v30, %v1018_v42  ;;  %v1779_v42 = vld [vmem:[%s10927_s3 + $0x8] sm:$0x7f] }
 0x198   :  { %6400 = vmatprep.subr.msk.mxu0 %vm11060_vm12, %v1779_v42  ;;  %vm1780_vm12 = vcmask 121856  }
 0x199   :  { %6832 = vrot.lane.b32.xlu0 %v6831_v47, %s6980_s29  ;;  %v1019_v47 = vsel %vm11059_vm8, %v7965_v56, 0.0  ;;  %6401 = vmatpush3.msk.msra.mxu0 %vm11061_vm0, %v1779_v42  ;;  %vm11063_vm0 = vcmask 261120   ;;  %v6961_v42 = vld [vmem:[%s10925_s0 + $0x50] sm:$0xff] }
 0x19a   :  { %v6866_v14 = vpack.i.bf16 %v7954_v34, %v1019_v47  ;;  %vm11065_vm10 = vmmov %vm11063_vm0 }
 0x19b   :  { %6837 = vrot.lane.b32.xlu1 %v6836_v51, %s6982_s15  ;;  %v6861_v51 = vpack.i.bf16 %v977_v15, %v1010_v33  ;;  %v1021_v15 = vld [vmem:[#allocation2 + $0x98] sm:$0xff] }
 0x19d   :  { %6842 = vrot.lane.b32.xlu0 %v6841_v3, %s6981_s30  ;;  %v1011_v3 = vsel %vm7874_vm1, %v7975_v7, 0.0 }
 0x19e   :  { %v6876_v50 = vpack.i.bf16 %v978_v23, %v1011_v3  ;;  %v6958_v23 = vld [vmem:[%s10925_s0 + $0x20] sm:$0xff]  ;;  %v6959_v3 = vld [vmem:[%s10925_s0 + $0x30] sm:$0xff] }
 0x19f   :  { %6847 = vrot.lane.b32.xlu1 %v6846_v62, %s6980_s29  ;;  %v6871_v62 = vpack.i.bf16 %v992_v6, %v7977_v43  ;;  %v6957_v6 = vld [vmem:[%s10925_s0 + $0x10] sm:$0xff] }
 0x1a1   :  { %6852 = vrot.lane.b32.xlu0 %v6851_v61, %s6982_s15  ;;  %v1020_v61 = vsel %vm7890_vm2, %v7979_v44, 0.0  ;;  %v1778_v44 = vld [vmem:[%s10927_s3] sm:$0xff] }
 0x1a2   :  { %v6881_v33 = vpack.i.bf16 %v7961_v58, %v1020_v61  ;;  %6402 = vmatprep.subr.mxu0 %v1778_v44  ;;  %v6963_v61 = vld [vmem:[%s10925_s0 + $0x70] sm:$0xff] }
 0x1a3   :  { %6857 = vrot.lane.b32.xlu1 %v6856_v20, %s6981_s30  ;;  %v993_v20 = vsel %vm7874_vm1, %v7967_v63, 0.0  ;;  %6403 = vmatpush3.msra.mxu0 %v1778_v44  ;;  %vm11064_vm1 = vmmov %vm11063_vm0 }
 0x1a4   :  { %v6886_v47 = vpack.i.bf16 %v993_v20, %v1021_v15  ;;  %v6964_v15 = vld [vmem:[%s10925_s0 + $0x80] sm:$0xff] }
 0x1a5   :  { %6862 = vrot.lane.b32.xlu0 %v6861_v51, %s6980_s29  ;;  %v6956_v51 = vld [vmem:[%s10925_s0] sm:$0xff] }
 0x1a6   :  { %6404 = vmatprep.mubr.msk.f32.mxu0 %vm1780_vm12, %v6956_v51  ;;  %v6965_v51 = vld [vmem:[%s10925_s0 + $0x90] sm:$0xff] }
 0x1a7   :  { %6867 = vrot.lane.b32.xlu1 %v6866_v14, %s6982_s15  ;;  %v8133_v14 = vld [vmem:[#allocation2 + $0x99] sm:$0xff]  ;;  %6405 = vmatmul.mubr.msk.f32.vlgmr.msra.gmra.mxu0 %vm1780_vm12, %v6957_v6 }
 0x1a8   :  { %11062 = vst [vmem:[#allocation15_spill] sm:$0xff] %v8133_v14  ;;  %2028 = vst.msk [vmem:[#allocation2 + $0x98] sm:$0xff] %vm11063_vm0, %v7901_v36  ;;  %6407 = vmatprep.mubr.msk.f32.mxu0 %vm1780_vm12, %v6958_v23  ;;  %v684_v23 = vsel %vm7546_vm3, %v7645_v17, 0.0 }
 0x1a9   :  { %6872 = vrot.lane.b32.xlu0 %v6871_v62, %s6981_s30  ;;  %2029 = vst.msk [vmem:[#allocation2 + $0xa0] sm:$0xff] %vm11064_vm1, %v7901_v36  ;;  %v6960_v62 = vld [vmem:[%s10925_s0 + $0x40] sm:$0xff]  ;;  %vm11067_vm1 = vmmov %vm11066_vm9 }
 0x1ab   :  { %6877 = vrot.lane.b32.xlu1 %v6876_v50, %s6980_s29  ;;  %6408 = vmatmul.mubr.msk.f32.gmra.mxu0 %vm1780_vm12, %v6959_v3  ;;  %v6962_v50 = vld [vmem:[%s10925_s0 + $0x60] sm:$0xff] }
 0x1ac   :  { %6410 = vmatprep.mubr.msk.f32.mxu0 %vm1780_vm12, %v6960_v62  ;;  %v6966_v3 = vld [vmem:[%s10925_s0 + $0xa0] sm:$0xff] }
 0x1ad   :  { %6882 = vrot.lane.b32.xlu0 %v6881_v33, %s6982_s15 }
 0x1af   :  { %6887 = vrot.lane.b32.xlu1 %v6886_v47, %s6981_s30  ;;  %6411 = vmatmul.mubr.msk.f32.gmra.mxu0 %vm1780_vm12, %v6961_v42 }
 0x1b0   :  { %6413 = vmatprep.mubr.msk.f32.mxu0 %vm1780_vm12, %v6962_v50 }
 0x1b3   :  { %6414 = vmatmul.mubr.msk.f32.gmra.mxu0 %vm1780_vm12, %v6963_v61 }
 0x1b4   :  { %6416 = vmatprep.mubr.msk.f32.mxu0 %vm1780_vm12, %v6964_v15 }
 0x1b7   :  { %6417 = vmatmul.mubr.msk.f32.gmra.mxu0 %vm1780_vm12, %v6965_v51 }
 0x1b8   :  { %6419 = vmatprep.mubr.msk.f32.mxu0 %vm1780_vm12, %v6966_v3  ;;  %v6967_v3 = vld [vmem:[%s10925_s0 + $0xb0] sm:$0xff] }
 0x1bb   :  { %6420 = vmatmul.mubr.msk.f32.gmra.mxu0 %vm1780_vm12, %v6967_v3 }
 0x1c3   :  { %v6653_v20 = vpop.permute.xlu0 %6652 }
 0x1c4   :  { %v6663_v33 = vpop.permute.xlu1 %6662  ;;  %v6655_v47 = vunpack.i.h.bf16 %v6653_v20  ;;  %v6654_v44 = vunpack.i.l.bf16 %v6653_v20 }
 0x1c5   :  { %v6665_v62 = vunpack.i.h.bf16 %v6663_v33  ;;  %v6664_v42 = vunpack.i.l.bf16 %v6663_v33 }
 0x1c6   :  { %v932_v51 = vsel %vm11063_vm0, %v684_v23, %v6654_v44  ;;  %v906_v35 = vsel %vm11065_vm10, %v7664_v60, %v6655_v47  ;;  %v6968_v44 = vld [vmem:[%s10925_s0 + $0xc0] sm:$0xff]  ;;  %v685_v23 = vsel %vm7591_vm7, %v7629_v52, 0.0  ;;  %vm11073_vm10 = vmmov %vm11067_vm1  ;;  %v6970_v52 = vld [vmem:[%s10925_s0 + $0xd0] sm:$0xff] }
 0x1c7   :  { %v6658_v6 = vpop.permute.xlu0 %6657  ;;  %6422 = vmatprep.mubr.msk.f32.mxu0 %vm1780_vm12, %v6968_v44 }
 0x1c8   :  { %v6660_v50 = vunpack.i.h.bf16 %v6658_v6  ;;  %v6659_v61 = vunpack.i.l.bf16 %v6658_v6  ;;  %v6668_v20 = vpop.permute.xlu1 %6667  ;;  %6423 = vmatmul.mubr.msk.f32.gmra.mxu0 %vm1780_vm12, %v6970_v52 }
 0x1c9   :  { %v6670_v15 = vunpack.i.h.bf16 %v6668_v20  ;;  %v6669_v36 = vunpack.i.l.bf16 %v6668_v20 }
 0x1ca   :  { %v940_v17 = vsel %vm11066_vm9, %v932_v51, %v6659_v61  ;;  %v915_v14 = vsel %vm11067_vm1, %v906_v35, %v6660_v50  ;;  %vm11072_vm9 = vmmov %vm11067_vm1  ;;  %vm11074_vm1 = vcmask 785408  }
 0x1cb   :  { %v6673_v33 = vpop.permute.xlu0 %6672  ;;  %v948_v6 = vsel %vm11068_vm6, %v940_v17, %v6664_v42  ;;  %v924_v20 = vsel %vm11069_vm5, %v915_v14, %v6665_v62  ;;  %vm11070_vm6 = vmmov %vm11063_vm0  ;;  %v6969_v17 = vld [vmem:[%s10926_s2 + $0x118] sm:$0xff] }
 0x1cc   :  { %v6675_v47 = vunpack.i.h.bf16 %v6673_v33  ;;  %v6674_v35 = vunpack.i.l.bf16 %v6673_v33  ;;  %1412 = vmatprep.mubr.f32.mxu1 %v948_v6  ;;  %v933_v42 = vsel %vm11070_vm6, %v685_v23, %v6669_v36  ;;  %vm11071_vm5 = vmmov %vm11063_vm0  ;;  %v6972_v33 = vld [vmem:[%s10925_s0 + $0xe0] sm:$0xff]  ;;  %v6973_v23 = vld [vmem:[%s10926_s2 + $0x108] sm:$0xff] }
 0x1cd   :  { %v6678_v60 = vpop.permute.xlu1 %6677  ;;  %1413 = vmatmul.mubr.f32.vlgmr.msra.gmra.mxu1 %v924_v20  ;;  %v907_v14 = vsel %vm11071_vm5, %v7606_v9, %v6670_v15  ;;  %vm11075_vm0 = vmmov %vm11074_vm1  ;;  %v6971_v15 = vld [vmem:[%s10926_s2 + $0x110] sm:$0xff]  ;;  %6425 = vmatprep.mubr.msk.f32.mxu0 %vm1780_vm12, %v6972_v33 }
 0x1ce   :  { %v6680_v50 = vunpack.i.h.bf16 %v6678_v60  ;;  %v6679_v61 = vunpack.i.l.bf16 %v6678_v60  ;;  %v941_v62 = vsel %vm11072_vm9, %v933_v42, %v6674_v35  ;;  %v916_v51 = vsel %vm11073_vm10, %v907_v14, %v6675_v47  ;;  %6642 = vmatpush3.msra.mxu1 %v6969_v17  ;;  %vm11076_vm6 = vmmov %vm11071_vm5  ;;  %v6974_v42 = vld [vmem:[%s10925_s0 + $0xf0] sm:$0xff] }
 0x1cf   :  { %v6683_v3 = vpop.permute.xlu0 %6682  ;;  %6639 = vmatprep.subr.mxu1 %v6971_v15  ;;  %v686_v35 = vsel %vm7728_vm13, %v7671_v29, 0.0  ;;  %6426 = vmatmul.mubr.msk.f32.gmra.mxu0 %vm1780_vm12, %v6974_v42  ;;  %v6975_v29 = vld [vmem:[%s10926_s2 + $0x100] sm:$0xff]  ;;  %vm11077_vm10 = vmmov %vm11072_vm9 }
 0x1d0   :  { %v949_v36 = vsel %vm11074_vm1, %v941_v62, %v6679_v61  ;;  %v925_v9 = vsel %vm11075_vm0, %v916_v51, %v6680_v50  ;;  %v6685_v20 = vunpack.i.h.bf16 %v6683_v3  ;;  %v6684_v44 = vunpack.i.l.bf16 %v6683_v3  ;;  %6643 = vmatpush3.msra.mxu1 %v6971_v15  ;;  %vm11078_vm1 = vmmov %vm11075_vm0 }
 0x1d1   :  { %v6688_v6 = vpop.permute.xlu1 %6687  ;;  %1417 = vmatprep.mubr.f32.mxu1 %v949_v36  ;;  %6640 = vmatprep.subr.mxu1 %v6973_v23  ;;  %vm11079_vm12 = vmmov %vm11071_vm5 }
 0x1d2   :  { %v6690_v60 = vunpack.i.h.bf16 %v6688_v6  ;;  %v6689_v47 = vunpack.i.l.bf16 %v6688_v6  ;;  %1418 = vmatmul.mubr.f32.gmra.mxu1 %v925_v9  ;;  %v934_v50 = vsel %vm11076_vm6, %v686_v35, %v6684_v44  ;;  %v908_v61 = vsel %vm11071_vm5, %v7662_v55, %v6685_v20  ;;  %vm11080_vm6 = vmmov %vm11071_vm5 }
 0x1d3   :  { %6644 = vmatpush3.msra.mxu1 %v6973_v23  ;;  %v6693_v14 = vpop.permute.xlu0 %6692  ;;  %v687_v35 = vsel %vm7772_vm14, %v7675_v31, 0.0  ;;  %vm11081_vm5 = vmmov %vm11072_vm9 }
 0x1d4   :  { %6641 = vmatprep.subr.mxu1 %v6975_v29  ;;  %v6695_v51 = vunpack.i.h.bf16 %v6693_v14  ;;  %v6694_v17 = vunpack.i.l.bf16 %v6693_v14  ;;  %v942_v55 = vsel %vm11072_vm9, %v934_v50, %v6689_v47  ;;  %v917_v36 = vsel %vm11077_vm10, %v908_v61, %v6690_v60  ;;  %vm11082_vm9 = vmmov %vm11081_vm5 }
 0x1d5   :  { %v6698_v62 = vpop.permute.xlu1 %6697  ;;  %6645 = vmatpush3.msra.mxu1 %v6975_v29  ;;  %vm11083_vm10 = vmmov %vm11075_vm0 }
 0x1d6   :  { %v6700_v52 = vunpack.i.h.bf16 %v6698_v62  ;;  %v6699_v3 = vunpack.i.l.bf16 %v6698_v62  ;;  %v950_v9 = vsel %vm11078_vm1, %v942_v55, %v6694_v17  ;;  %v926_v15 = vsel %vm11075_vm0, %v917_v36, %v6695_v51  ;;  %vm11084_vm1 = vmmov %vm11075_vm0 }
 0x1d7   :  { %v6703_v33 = vpop.permute.xlu0 %6702  ;;  %1422 = vmatprep.mubr.f32.mxu1 %v950_v9  ;;  %vm11085_vm0 = vmmov %vm11080_vm6 }
 0x1d8   :  { %v6705_v20 = vunpack.i.h.bf16 %v6703_v33  ;;  %v6704_v44 = vunpack.i.l.bf16 %v6703_v33  ;;  %1423 = vmatmul.mubr.f32.gmra.mxu1 %v926_v15  ;;  %v935_v47 = vsel %vm11079_vm12, %v687_v35, %v6699_v3  ;;  %v909_v60 = vsel %vm11080_vm6, %v7677_v32, %v6700_v52  ;;  %v11086_v3 = vld [vmem:[#allocation7_spill] sm:$0xff]  ;;  %vm11087_vm12 = vmmov %vm11085_vm0 }
 0x1d9   :  { %v6708_v6 = vpop.permute.xlu1 %6707  ;;  %v688_v32 = vsel %vm7790_vm15, %v7700_v54, 0.0  ;;  %vm11088_vm6 = vmmov %vm11081_vm5 }
 0x1da   :  { %v6710_v23 = vunpack.i.h.bf16 %v6708_v6  ;;  %v6709_v42 = vunpack.i.l.bf16 %v6708_v6  ;;  %v943_v50 = vsel %vm11081_vm5, %v935_v47, %v6704_v44  ;;  %v918_v61 = vsel %vm11082_vm9, %v909_v60, %v6705_v20  ;;  %vm11089_vm9 = vmmov %vm11084_vm1 }
 0x1db   :  { %v6713_v14 = vpop.permute.xlu0 %6712 }
 0x1dc   :  { %v951_v29 = vsel %vm11083_vm10, %v943_v50, %v6709_v42  ;;  %v927_v62 = vsel %vm11084_vm1, %v918_v61, %v6710_v23  ;;  %v6715_v17 = vunpack.i.h.bf16 %v6713_v14  ;;  %v6714_v55 = vunpack.i.l.bf16 %v6713_v14  ;;  %vm11090_vm10 = vmmov %vm11084_vm1 }
 0x1dd   :  { %v6718_v51 = vpop.permute.xlu1 %6717  ;;  %1427 = vmatprep.mubr.f32.mxu1 %v951_v29  ;;  %v11091_v29 = vld [vmem:[#allocation8_spill] sm:$0xff]  ;;  %vm11092_vm1 = vmmov %vm11085_vm0 }
 0x1de   :  { %v6720_v31 = vunpack.i.h.bf16 %v6718_v51  ;;  %v6719_v36 = vunpack.i.l.bf16 %v6718_v51  ;;  %1428 = vmatmul.mubr.f32.gmra.mxu1 %v927_v62  ;;  %v936_v52 = vsel %vm11085_vm0, %v688_v32, %v6714_v55  ;;  %v910_v9 = vsel %vm11087_vm12, %v11086_v3, %v6715_v17  ;;  %vm11094_vm12 = vmmov %vm11081_vm5 }
 0x1df   :  { %v6723_v15 = vpop.permute.xlu0 %6722  ;;  %v689_v62 = vsel %vm11057_vm11, %v11091_v29, 0.0 }
 0x1e0   :  { %v6725_v6 = vunpack.i.h.bf16 %v6723_v15  ;;  %v6724_v20 = vunpack.i.l.bf16 %v6723_v15  ;;  %v944_v23 = vsel %vm11088_vm6, %v936_v52, %v6719_v36  ;;  %v919_v42 = vsel %vm11081_vm5, %v910_v9, %v6720_v31  ;;  %v11093_v36 = vld [vmem:[#allocation9_spill] sm:$0xff]  ;;  %vm11095_vm6 = vmmov %vm11081_vm5 }
 0x1e1   :  { %v6728_v33 = vpop.permute.xlu1 %6727  ;;  %vm11096_vm5 = vmmov %vm11089_vm9 }
 0x1e2   :  { %v6730_v44 = vunpack.i.h.bf16 %v6728_v33  ;;  %v6729_v35 = vunpack.i.l.bf16 %v6728_v33  ;;  %v952_v47 = vsel %vm11089_vm9, %v944_v23, %v6724_v20  ;;  %v928_v60 = vsel %vm11090_vm10, %v919_v42, %v6725_v6  ;;  %vm11097_vm9 = vmmov %vm11096_vm5 }
 0x1e3   :  { %v6733_v54 = vpop.permute.xlu0 %6732  ;;  %1432 = vmatprep.mubr.f32.mxu1 %v952_v47  ;;  %vm11099_vm10 = vmmov %vm11085_vm0 }
 0x1e4   :  { %v6735_v61 = vunpack.i.h.bf16 %v6733_v54  ;;  %v6734_v14 = vunpack.i.l.bf16 %v6733_v54  ;;  %1433 = vmatmul.mubr.f32.gmra.mxu1 %v928_v60  ;;  %v937_v55 = vsel %vm11092_vm1, %v689_v62, %v6729_v35  ;;  %v911_v31 = vsel %vm11085_vm0, %v11093_v36, %v6730_v44  ;;  %v11098_v35 = vld [vmem:[#allocation10_spill] sm:$0xff]  ;;  %vm11100_vm1 = vmmov %vm11085_vm0 }
 0x1e5   :  { %v6738_v50 = vpop.permute.xlu1 %6737  ;;  %v690_v44 = vsel %vm11059_vm8, %v11098_v35, 0.0  ;;  %vm11101_vm0 = vmmov %vm11095_vm6 }
 0x1e6   :  { %v6740_v51 = vunpack.i.h.bf16 %v6738_v50  ;;  %v6739_v17 = vunpack.i.l.bf16 %v6738_v50  ;;  %v945_v32 = vsel %vm11094_vm12, %v937_v55, %v6734_v14  ;;  %v920_v52 = vsel %vm11095_vm6, %v911_v31, %v6735_v61  ;;  %vm11102_vm12 = vmmov %vm11101_vm0 }
 0x1e7   :  { %v6743_v3 = vpop.permute.xlu0 %6742  ;;  %vm11103_vm6 = vmmov %vm11096_vm5 }
 0x1e8   :  { %v953_v9 = vsel %vm11096_vm5, %v945_v32, %v6739_v17  ;;  %v929_v15 = vsel %vm11097_vm9, %v920_v52, %v6740_v51  ;;  %v6745_v6 = vunpack.i.h.bf16 %v6743_v3  ;;  %v6744_v20 = vunpack.i.l.bf16 %v6743_v3  ;;  %vm11105_vm9 = vmmov %vm11100_vm1 }
 0x1e9   :  { %v6748_v33 = vpop.permute.xlu1 %6747  ;;  %1437 = vmatprep.mubr.f32.mxu1 %v953_v9 }
 0x1ea   :  { %v6750_v23 = vunpack.i.h.bf16 %v6748_v33  ;;  %v6749_v42 = vunpack.i.l.bf16 %v6748_v33  ;;  %1438 = vmatmul.mubr.f32.gmra.mxu1 %v929_v15  ;;  %v938_v47 = vsel %vm11099_vm10, %v690_v44, %v6744_v20  ;;  %v912_v60 = vsel %vm11100_vm1, %v7717_v13, %v6745_v6  ;;  %v11104_v13 = vld [vmem:[#allocation11_spill] sm:$0xff]  ;;  %v11106_v20 = vld [vmem:[#allocation12_spill] sm:$0xff]  ;;  %vm11107_vm10 = vmmov %vm11100_vm1 }
 0x1eb   :  { %v6753_v54 = vpop.permute.xlu0 %6752  ;;  %v691_v9 = vsel %vm7890_vm2, %v11104_v13, 0.0  ;;  %vm11108_vm1 = vmmov %vm11101_vm0 }
 0x1ec   :  { %v6755_v61 = vunpack.i.h.bf16 %v6753_v54  ;;  %v6754_v14 = vunpack.i.l.bf16 %v6753_v54  ;;  %v946_v51 = vsel %vm11101_vm0, %v938_v47, %v6749_v42  ;;  %v921_v17 = vsel %vm11102_vm12, %v912_v60, %v6750_v23  ;;  %vm11109_vm12 = vmmov %vm11096_vm5 }
 0x1ed   :  { %v6758_v50 = vpop.permute.xlu1 %6757 }
 0x1ee   :  { %v6760_v29 = vunpack.i.h.bf16 %v6758_v50  ;;  %v6759_v62 = vunpack.i.l.bf16 %v6758_v50  ;;  %v954_v55 = vsel %vm11103_vm6, %v946_v51, %v6754_v14  ;;  %v930_v36 = vsel %vm11096_vm5, %v921_v17, %v6755_v61  ;;  %vm11110_vm6 = vmmov %vm11096_vm5 }
 0x1ef   :  { %v6763_v31 = vpop.permute.xlu0 %6762  ;;  %1442 = vmatprep.mubr.f32.mxu1 %v954_v55  ;;  %vm11111_vm5 = vmmov %vm11105_vm9 }
 0x1f0   :  { %v6765_v52 = vunpack.i.h.bf16 %v6763_v31  ;;  %v6764_v3 = vunpack.i.l.bf16 %v6763_v31  ;;  %1443 = vmatmul.mubr.f32.gmra.mxu1 %v930_v36  ;;  %v939_v6 = vsel %vm11105_vm9, %v691_v9, %v6759_v62  ;;  %v913_v23 = vsel %vm11107_vm10, %v11106_v20, %v6760_v29  ;;  %vm11112_vm9 = vmmov %vm11111_vm5 }
 0x1f1   :  { %v6768_v32 = vpop.permute.xlu1 %6767  ;;  %v995_v29 = vsel %vm7546_vm3, %v7896_v53, 0.0  ;;  %vm11113_vm10 = vmmov %vm11101_vm0 }
 0x1f2   :  { %v6770_v15 = vunpack.i.h.bf16 %v6768_v32  ;;  %v6769_v33 = vunpack.i.l.bf16 %v6768_v32  ;;  %v947_v42 = vsel %vm11108_vm1, %v939_v6, %v6764_v3  ;;  %v922_v35 = vsel %vm11101_vm0, %v913_v23, %v6765_v52  ;;  %vm11114_vm1 = vmmov %vm11101_vm0 }
 0x1f3   :  { %v6773_v44 = vpop.permute.xlu0 %6772  ;;  %vm11115_vm0 = vmmov %vm11110_vm6 }
 0x1f4   :  { %v955_v47 = vsel %vm11109_vm12, %v947_v42, %v6769_v33  ;;  %v931_v60 = vsel %vm11110_vm6, %v922_v35, %v6770_v15  ;;  %v6775_v54 = vunpack.i.h.bf16 %v6773_v44  ;;  %v6774_v50 = vunpack.i.l.bf16 %v6773_v44  ;;  %vm11116_vm12 = vmmov %vm11115_vm0 }
 0x1f5   :  { %v6778_v61 = vpop.permute.xlu1 %6777  ;;  %1447 = vmatprep.mubr.f32.mxu1 %v955_v47  ;;  %vm11117_vm6 = vmmov %vm11111_vm5 }
 0x1f6   :  { %v6780_v14 = vunpack.i.h.bf16 %v6778_v61  ;;  %v6779_v51 = vunpack.i.l.bf16 %v6778_v61  ;;  %1448 = vmatmul.mubr.f32.gmra.mxu1 %v931_v60  ;;  %v1240_v62 = vsel %vm11111_vm5, %v995_v29, %v6774_v50  ;;  %v1216_v17 = vsel %vm11112_vm9, %v7907_v45, %v6775_v54  ;;  %vm11118_vm9 = vmmov %vm11114_vm1 }
 0x1f7   :  { %v6783_v55 = vpop.permute.xlu0 %6782  ;;  %v996_v45 = vsel %vm7591_vm7, %v7894_v21, 0.0 }
 0x1f8   :  { %v6785_v31 = vunpack.i.h.bf16 %v6783_v55  ;;  %v6784_v32 = vunpack.i.l.bf16 %v6783_v55  ;;  %v1248_v13 = vsel %vm11113_vm10, %v1240_v62, %v6779_v51  ;;  %v1224_v9 = vsel %vm11114_vm1, %v1216_v17, %v6780_v14  ;;  %vm11119_vm10 = vmmov %vm11114_vm1 }
 0x1f9   :  { %v6788_v36 = vpop.permute.xlu1 %6787  ;;  %vm11120_vm1 = vmmov %vm11115_vm0 }
 0x1fa   :  { %v6790_v52 = vunpack.i.h.bf16 %v6788_v36  ;;  %v6789_v3 = vunpack.i.l.bf16 %v6788_v36  ;;  %v1256_v15 = vsel %vm11115_vm0, %v1248_v13, %v6784_v32  ;;  %v1232_v33 = vsel %vm11116_vm12, %v1224_v9, %v6785_v31  ;;  %vm11121_vm12 = vmmov %vm11111_vm5 }
 0x1fb   :  { %v6793_v53 = vpop.permute.xlu0 %6792  ;;  %1452 = vmatprep.mubr.f32.mxu1 %v1256_v15 }
 0x1fc   :  { %v6795_v20 = vunpack.i.h.bf16 %v6793_v53  ;;  %v6794_v23 = vunpack.i.l.bf16 %v6793_v53  ;;  %1453 = vmatmul.mubr.f32.gmra.mxu1 %v1232_v33  ;;  %v1241_v44 = vsel %vm11117_vm6, %v996_v45, %v6789_v3  ;;  %v1217_v47 = vsel %vm11111_vm5, %v7905_v22, %v6790_v52  ;;  %vm11122_vm6 = vmmov %vm11111_vm5 }
 0x1fd   :  { %v6798_v6 = vpop.permute.xlu1 %6797  ;;  %v997_v22 = vsel %vm7728_vm13, %v7909_v0, 0.0  ;;  %vm11123_vm5 = vmmov %vm11118_vm9 }
 0x1fe   :  { %v6800_v42 = vunpack.i.h.bf16 %v6798_v6  ;;  %v6799_v35 = vunpack.i.l.bf16 %v6798_v6  ;;  %v1249_v60 = vsel %vm11118_vm9, %v1241_v44, %v6794_v23  ;;  %v1225_v54 = vsel %vm11119_vm10, %v1217_v47, %v6795_v20  ;;  %vm11124_vm9 = vmmov %vm11123_vm5 }
 0x1ff   :  { %v6803_v50 = vpop.permute.xlu0 %6802  ;;  %vm11125_vm10 = vmmov %vm11115_vm0 }
 0x200   :  { %v1257_v61 = vsel %vm11120_vm1, %v1249_v60, %v6799_v35  ;;  %v1233_v14 = vsel %vm11115_vm0, %v1225_v54, %v6800_v42  ;;  %v6805_v29 = vunpack.i.h.bf16 %v6803_v50  ;;  %v6804_v62 = vunpack.i.l.bf16 %v6803_v50  ;;  %vm11126_vm1 = vmmov %vm11115_vm0 }
 0x201   :  { %v6808_v51 = vpop.permute.xlu1 %6807  ;;  %1457 = vmatprep.mubr.f32.mxu1 %v1257_v61  ;;  %vm11127_vm0 = vmmov %vm11122_vm6 }
 0x202   :  { %v6810_v21 = vunpack.i.h.bf16 %v6808_v51  ;;  %v6809_v17 = vunpack.i.l.bf16 %v6808_v51  ;;  %1458 = vmatmul.mubr.f32.gmra.mxu1 %v1233_v14  ;;  %v1242_v55 = vsel %vm11121_vm12, %v997_v22, %v6804_v62  ;;  %v1218_v36 = vsel %vm11122_vm6, %v7915_v2, %v6805_v29  ;;  %vm11128_vm12 = vmmov %vm11127_vm0 }
 0x203   :  { %v6813_v31 = vpop.permute.xlu0 %6812  ;;  %v998_v2 = vsel %vm7772_vm14, %v7921_v4, 0.0  ;;  %vm11129_vm6 = vmmov %vm11123_vm5 }
 0x204   :  { %v6815_v52 = vunpack.i.h.bf16 %v6813_v31  ;;  %v6814_v3 = vunpack.i.l.bf16 %v6813_v31  ;;  %v1250_v15 = vsel %vm11123_vm5, %v1242_v55, %v6809_v17  ;;  %v1226_v33 = vsel %vm11124_vm9, %v1218_v36, %v6810_v21  ;;  %vm11130_vm9 = vmmov %vm11126_vm1 }
 0x205   :  { %v6818_v32 = vpop.permute.xlu1 %6817 }
 0x206   :  { %v6820_v13 = vunpack.i.h.bf16 %v6818_v32  ;;  %v6819_v9 = vunpack.i.l.bf16 %v6818_v32  ;;  %v1258_v53 = vsel %vm11125_vm10, %v1250_v15, %v6814_v3  ;;  %v1234_v6 = vsel %vm11126_vm1, %v1226_v33, %v6815_v52  ;;  %vm11131_vm10 = vmmov %vm11126_vm1 }
 0x207   :  { %v6823_v0 = vpop.permute.xlu0 %6822  ;;  %1462 = vmatprep.mubr.f32.mxu1 %v1258_v53  ;;  %vm11132_vm1 = vmmov %vm11127_vm0 }
 0x208   :  { %v6825_v23 = vunpack.i.h.bf16 %v6823_v0  ;;  %v6824_v45 = vunpack.i.l.bf16 %v6823_v0  ;;  %1463 = vmatmul.mubr.f32.gmra.mxu1 %v1234_v6  ;;  %v1243_v44 = vsel %vm11127_vm0, %v998_v2, %v6819_v9  ;;  %v1219_v47 = vsel %vm11128_vm12, %v7936_v28, %v6820_v13  ;;  %vm11133_vm12 = vmmov %vm11123_vm5 }
 0x209   :  { %v6828_v20 = vpop.permute.xlu1 %6827  ;;  %v999_v28 = vsel %vm7790_vm15, %v7938_v18, 0.0 }
 0x20a   :  { %v6830_v42 = vunpack.i.h.bf16 %v6828_v20  ;;  %v6829_v35 = vunpack.i.l.bf16 %v6828_v20  ;;  %v1251_v60 = vsel %vm11129_vm6, %v1243_v44, %v6824_v45  ;;  %v1227_v54 = vsel %vm11123_vm5, %v1219_v47, %v6825_v23  ;;  %vm11134_vm6 = vmmov %vm11123_vm5 }
 0x20b   :  { %v6833_v50 = vpop.permute.xlu0 %6832  ;;  %vm11135_vm5 = vmmov %vm11130_vm9 }
 0x20c   :  { %v1259_v61 = vsel %vm11130_vm9, %v1251_v60, %v6829_v35  ;;  %v1235_v14 = vsel %vm11131_vm10, %v1227_v54, %v6830_v42  ;;  %v6835_v29 = vunpack.i.h.bf16 %v6833_v50  ;;  %v6834_v62 = vunpack.i.l.bf16 %v6833_v50  ;;  %vm11136_vm9 = vmmov %vm11135_vm5 }
 0x20d   :  { %v6838_v51 = vpop.permute.xlu1 %6837  ;;  %1467 = vmatprep.mubr.f32.mxu1 %v1259_v61  ;;  %vm11137_vm10 = vmmov %vm11127_vm0 }
 0x20e   :  { %v6840_v4 = vunpack.i.h.bf16 %v6838_v51  ;;  %v6839_v21 = vunpack.i.l.bf16 %v6838_v51  ;;  %1468 = vmatmul.mubr.f32.gmra.mxu1 %v1235_v14  ;;  %v1244_v17 = vsel %vm11132_vm1, %v999_v28, %v6834_v62  ;;  %v1220_v22 = vsel %vm11127_vm0, %v7941_v30, %v6835_v29  ;;  %vm11138_vm1 = vmmov %vm11127_vm0  ;;  %v2054_v51 = vld [vmem:[#allocation2 + $0x7] sm:$0xff] }
 0x20f   :  { %v6843_v55 = vpop.permute.xlu0 %6842  ;;  %v1000_v30 = vsel %vm11057_vm11, %v7945_v39, 0.0  ;;  %vm11139_vm0 = vmmov %vm11134_vm6 }
 0x210   :  { %v6845_v31 = vunpack.i.h.bf16 %v6843_v55  ;;  %v6844_v32 = vunpack.i.l.bf16 %v6843_v55  ;;  %v1252_v13 = vsel %vm11133_vm12, %v1244_v17, %v6839_v21  ;;  %v1228_v9 = vsel %vm11134_vm6, %v1220_v22, %v6840_v4  ;;  %vm11140_vm12 = vmmov %vm11139_vm0 }
 0x211   :  { %v6848_v36 = vpop.permute.xlu1 %6847  ;;  %vm11141_vm6 = vmmov %vm11135_vm5  ;;  %v2062_v4 = vsel %vm7546_vm3, %v2054_v51, 0.0 }
 0x212   :  { %v6850_v52 = vunpack.i.h.bf16 %v6848_v36  ;;  %v6849_v3 = vunpack.i.l.bf16 %v6848_v36  ;;  %v1260_v15 = vsel %vm11135_vm5, %v1252_v13, %v6844_v32  ;;  %v1236_v33 = vsel %vm11136_vm9, %v1228_v9, %v6845_v31  ;;  %vm11142_vm9 = vmmov %vm11138_vm1  ;;  %2132 = vrot.lane.b32.xlu0 %v2062_v4, %s6980_s29 }
 0x213   :  { %v6853_v18 = vpop.permute.xlu0 %6852  ;;  %1472 = vmatprep.mubr.f32.mxu1 %v1260_v15  ;;  %v1002_v15 = vsel %vm7890_vm2, %v7965_v56, 0.0  ;;  %v1023_v56 = vsel %vm7565_vm4, %v7898_v26, 0.0 }
 0x214   :  { %v6855_v6 = vunpack.i.h.bf16 %v6853_v18  ;;  %v6854_v0 = vunpack.i.l.bf16 %v6853_v18  ;;  %1473 = vmatmul.mubr.f32.gmra.mxu1 %v1236_v33  ;;  %v1245_v45 = vsel %vm11137_vm10, %v1000_v30, %v6849_v3  ;;  %v1221_v2 = vsel %vm11138_vm1, %v7954_v34, %v6850_v52  ;;  %vm11143_vm10 = vmmov %vm11138_vm1  ;;  %v2070_v33 = vld [vmem:[#allocation2 + $0x8] sm:$0xff] }
 0x215   :  { %v6858_v53 = vpop.permute.xlu1 %6857  ;;  %v1001_v34 = vsel %vm11059_vm8, %v7956_v16, 0.0  ;;  %vm11144_vm1 = vmmov %vm11139_vm0  ;;  %2164 = vrot.lane.b32.xlu1 %v2070_v33, %s6982_s15 }
 0x216   :  { %v6860_v20 = vunpack.i.h.bf16 %v6858_v53  ;;  %v6859_v23 = vunpack.i.l.bf16 %v6858_v53  ;;  %v1253_v42 = vsel %vm11139_vm0, %v1245_v45, %v6854_v0  ;;  %v1229_v35 = vsel %vm11140_vm12, %v1221_v2, %v6855_v6  ;;  %vm11145_vm12 = vmmov %vm11135_vm5 }
 0x217   :  { %v6863_v44 = vpop.permute.xlu0 %6862 }
 0x218   :  { %v1261_v47 = vsel %vm11141_vm6, %v1253_v42, %v6859_v23  ;;  %v1237_v60 = vsel %vm11135_vm5, %v1229_v35, %v6860_v20  ;;  %v6865_v50 = vunpack.i.h.bf16 %v6863_v44  ;;  %v6864_v61 = vunpack.i.l.bf16 %v6863_v44  ;;  %vm11146_vm6 = vmmov %vm11135_vm5  ;;  %v11167_v35 = vld [vmem:[#allocation13_spill] sm:$0xff] }
 0x219   :  { %v6868_v54 = vpop.permute.xlu1 %6867  ;;  %1477 = vmatprep.mubr.f32.mxu1 %v1261_v47  ;;  %vm11147_vm5 = vmmov %vm11142_vm9 }
 0x21a   :  { %v6870_v39 = vunpack.i.h.bf16 %v6868_v54  ;;  %v6869_v14 = vunpack.i.l.bf16 %v6868_v54  ;;  %1478 = vmatmul.mubr.f32.gmra.mxu1 %v1237_v60  ;;  %v1246_v29 = vsel %vm11142_vm9, %v1001_v34, %v6864_v61  ;;  %v1222_v62 = vsel %vm11143_vm10, %v7961_v58, %v6865_v50  ;;  %vm11148_vm9 = vmmov %vm11147_vm5  ;;  %v2114_v54 = vld [vmem:[#allocation2 + $0x50] sm:$0xff]  ;;  %v2423_v50 = vld [vmem:[#allocation2 + $0x98] sm:$0xff] }
 0x21b   :  { %v6873_v21 = vpop.permute.xlu0 %6872  ;;  %vm11149_vm10 = vmmov %vm11139_vm0  ;;  %2300 = vrot.lane.b32.xlu1 %v2114_v54, %s6981_s30 }
 0x21c   :  { %v6875_v17 = vunpack.i.h.bf16 %v6873_v21  ;;  %v6874_v22 = vunpack.i.l.bf16 %v6873_v21  ;;  %v1254_v31 = vsel %vm11144_vm1, %v1246_v29, %v6869_v14  ;;  %v1230_v16 = vsel %vm11139_vm0, %v1222_v62, %v6870_v39  ;;  %vm11150_vm1 = vmmov %vm11139_vm0  ;;  %v6378_v39 = vpop.f32.mrf.mxu0 }
 0x21d   :  { %v6878_v28 = vpop.permute.xlu1 %6877  ;;  %vm11151_vm0 = vmmov %vm11146_vm6 }
 0x21e   :  { %v6880_v55 = vunpack.i.h.bf16 %v6878_v28  ;;  %v6879_v36 = vunpack.i.l.bf16 %v6878_v28  ;;  %v1262_v32 = vsel %vm11145_vm12, %v1254_v31, %v6874_v22  ;;  %v1238_v52 = vsel %vm11146_vm6, %v1230_v16, %v6875_v17  ;;  %vm11152_vm12 = vmmov %vm11151_vm0  ;;  %v1559_v34 = vpop.f32.mrf.mxu0 }
 0x21f   :  { %v6883_v58 = vpop.permute.xlu0 %6882  ;;  %1482 = vmatprep.mubr.f32.mxu1 %v1262_v32  ;;  %vm11153_vm6 = vmmov %vm11147_vm5  ;;  %2608 = vrot.lane.b32.xlu1 %v2423_v50, %s6981_s30 }
 0x220   :  { %v6885_v13 = vunpack.i.h.bf16 %v6883_v58  ;;  %v6884_v9 = vunpack.i.l.bf16 %v6883_v58  ;;  %1483 = vmatmul.mubr.f32.gmra.mxu1 %v1238_v52  ;;  %v1247_v6 = vsel %vm11147_vm5, %v1002_v15, %v6879_v36  ;;  %v1223_v0 = vsel %vm11148_vm9, %v7977_v43, %v6880_v55  ;;  %vm11155_vm9 = vmmov %vm11153_vm6  ;;  %v6381_v29 = vpop.f32.mrf.mxu0 }
 0x221   :  { %v6888_v3 = vpop.permute.xlu1 %6887  ;;  %vm11154_vm5 = vnez %v11014_v25 }
 0x222   :  { %v6890_v18 = vunpack.i.h.bf16 %v6888_v3  ;;  %v6889_v53 = vunpack.i.l.bf16 %v6888_v3  ;;  %v1255_v30 = vsel %vm11149_vm10, %v1247_v6, %v6884_v9  ;;  %v1231_v20 = vsel %vm11150_vm1, %v1223_v0, %v6885_v13  ;;  %vm11157_vm1 = vmmov %vm11153_vm6  ;;  %v1569_v21 = vpop.f32.mrf.mxu0 }
 0x223   :  { %v1024_v43 = vsel %vm11154_vm5, %v7923_v5, 0.0  ;;  %vm11156_vm10 = vnez %v11016_v48  ;;  %vm11161_vm3 = vmmov %vm11157_vm1  ;;  %2472 = vrot.lane.b32.xlu1 %v2114_v54, %s6982_s15 }
 0x224   :  { %v1263_v23 = vsel %vm11151_vm0, %v1255_v30, %v6889_v53  ;;  %v1239_v45 = vsel %vm11152_vm12, %v1231_v20, %v6890_v18  ;;  %v1025_v2 = vsel %vm11156_vm10, %v7934_v10, 0.0  ;;  %vm11158_vm0 = vnez %v11020_v11  ;;  %vm11159_vm12 = vmmov %vm11157_vm1  ;;  %v6384_v31 = vpop.f32.mrf.mxu0 }
 0x225   :  { %1487 = vmatprep.mubr.f32.mxu1 %v1263_v23  ;;  %v1026_v42 = vsel %vm11158_vm0, %v7947_v12, 0.0  ;;  %vm11163_vm4 = vmmov %vm11157_vm1  ;;  %v11166_v12 = vld [vmem:[#allocation15_spill] sm:$0xff] }
 0x226   :  { %1488 = vmatmul.mubr.f32.gmra.mxu1 %v1239_v45  ;;  %vm11165_vm7 = vmmov %vm11161_vm3  ;;  %v1579_v9 = vpop.f32.mrf.mxu0 }
 0x227   :  { %6388 = vmatprep.mubr.msk.f32.mxu1 %vm11153_vm6, %v1023_v56  ;;  %vm11160_vm6 = vnez %v11022_v41  ;;  %vm11169_vm5 = vmmov %vm11161_vm3 }
 0x228   :  { %v1027_v26 = vsel %vm11160_vm6, %v7952_v24, 0.0  ;;  %v11170_v24 = vld [vmem:[#allocation14_spill] sm:$0xff]  ;;  %vm11174_vm13 = vmmov %vm11161_vm3 }
 0x229   :  { %vm11195_vm10 = vmmov %vm11161_vm3 }
 0x22a   :  { %6389 = vmatmul.mubr.msk.f32.vlgmr.msra.gmra.mxu1 %vm11155_vm9, %v1024_v43  ;;  %vm11162_vm9 = vnez %v11024_v46  ;;  %vm11196_vm14 = vmmov %vm11161_vm3 }
 0x22b   :  { %6391 = vmatprep.mubr.msk.f32.mxu1 %vm11157_vm1, %v1025_v2  ;;  %v1028_v5 = vsel %vm11162_vm9, %v7967_v63, 0.0  ;;  %vm11164_vm1 = vnez %v11026_v49 }
 0x22c   :  { %v1029_v10 = vsel %vm11164_vm1, %v7975_v7, 0.0 }
 0x22e   :  { %6392 = vmatmul.mubr.msk.f32.gmra.mxu1 %vm11159_vm12, %v1026_v42  ;;  %vm11168_vm12 = vnez %v11167_v35 }
 0x22f   :  { %6394 = vmatprep.mubr.msk.f32.mxu1 %vm11161_vm3, %v1027_v26  ;;  %v1030_v44 = vsel %vm11168_vm12, %v11166_v12, 0.0 }
 0x232   :  { %6395 = vmatmul.mubr.msk.f32.gmra.mxu1 %vm11163_vm4, %v1028_v5  ;;  %vm11171_vm4 = vmmov %vm11161_vm3 }
 0x233   :  { %6397 = vmatprep.mubr.msk.f32.mxu1 %vm11165_vm7, %v1029_v10  ;;  %vm11172_vm7 = vmmov %vm11161_vm3 }
 0x234   :  { %v6387_v53 = vpop.f32.mrf.mxu0 }
 0x236   :  { %6398 = vmatmul.mubr.msk.f32.gmra.mxu1 %vm11169_vm5, %v1030_v44  ;;  %vm11173_vm5 = vmmov %vm11161_vm3  ;;  %v1589_v26 = vpop.f32.mrf.mxu0 }
 0x237   :  { %2738 = vmatprep.mubr.f32.mxu1 %v11170_v24 }
 0x28d   :  { %v5834_v47 = vpop.f32.mrf.mxu1 }
 0x28f   :  { %v5835_v60 = vpop.f32.mrf.mxu1 }
 0x290   :  { %v5836_v22 = vadd.f32 %v5835_v60, %v5834_v47 }
 0x292   :  { %v5837_v63 = vpop.f32.mrf.mxu1  ;;  %v1560_v58 = vadd.f32 %v5836_v22, %v1559_v34 }
 0x294   :  { %v5838_v61 = vpop.f32.mrf.mxu1  ;;  %v1638_v6 = vsel %vm11171_vm4, %v1560_v58, 0.0  ;;  %vm11175_vm4 = vmmov %vm11161_vm3 }
 0x295   :  { %v5839_v28 = vadd.f32 %v5838_v61, %v5837_v63 }
 0x297   :  { %v1565_v16 = vadd.f32 %v6378_v39, %v5839_v28 }
 0x298   :  { %v5840_v7 = vpop.f32.mrf.mxu1 }
 0x299   :  { %v1639_v15 = vsel %vm11161_vm3, %v1565_v16, 0.0 }
 0x29a   :  { %v5841_v14 = vpop.f32.mrf.mxu1  ;;  %v1640_v23 = vadd.f32 %v1639_v15, %v1638_v6 }
 0x29b   :  { %v5842_v55 = vadd.f32 %v5841_v14, %v5840_v7 }
 0x29d   :  { %v1570_v3 = vadd.f32 %v5842_v55, %v1569_v21 }
 0x29e   :  { %v5843_v51 = vpop.f32.mrf.mxu1 }
 0x29f   :  { %v1641_v0 = vsel %vm11172_vm7, %v1570_v3, 0.0  ;;  %vm11176_vm7 = vmmov %vm11161_vm3 }
 0x2a0   :  { %v5844_v62 = vpop.f32.mrf.mxu1  ;;  %v1642_v2 = vadd.f32 %v1641_v0, %v1640_v23 }
 0x2a1   :  { %v5845_v32 = vadd.f32 %v5844_v62, %v5843_v51 }
 0x2a3   :  { %v1575_v33 = vadd.f32 %v6381_v29, %v5845_v32 }
 0x2a4   :  { %v5846_v4 = vpop.f32.mrf.mxu1 }
 0x2a5   :  { %v1643_v45 = vsel %vm11173_vm5, %v1575_v33, 0.0  ;;  %vm11178_vm5 = vmmov %vm11161_vm3 }
 0x2a6   :  { %v5847_v17 = vpop.f32.mrf.mxu1  ;;  %v1644_v10 = vadd.f32 %v1643_v45, %v1642_v2 }
 0x2a7   :  { %v5848_v13 = vadd.f32 %v5847_v17, %v5846_v4 }
 0x2a9   :  { %v1580_v30 = vadd.f32 %v5848_v13, %v1579_v9 }
 0x2aa   :  { %v5849_v36 = vpop.f32.mrf.mxu1 }
 0x2ab   :  { %v1645_v5 = vsel %vm11174_vm13, %v1580_v30, 0.0  ;;  %vm11177_vm13 = vmmov %vm11161_vm3 }
 0x2ac   :  { %v5850_v52 = vpop.f32.mrf.mxu1  ;;  %v1646_v47 = vadd.f32 %v1645_v5, %v1644_v10 }
 0x2ad   :  { %v5851_v18 = vadd.f32 %v5850_v52, %v5849_v36 }
 0x2af   :  { %v1585_v56 = vadd.f32 %v6384_v31, %v5851_v18 }
 0x2b0   :  { %v5852_v20 = vpop.f32.mrf.mxu1 }
 0x2b1   :  { %v1647_v24 = vsel %vm11161_vm3, %v1585_v56, 0.0 }
 0x2b2   :  { %v5853_v43 = vpop.f32.mrf.mxu1  ;;  %v1648_v50 = vadd.f32 %v1647_v24, %v1646_v47 }
 0x2b3   :  { %v5854_v42 = vadd.f32 %v5853_v43, %v5852_v20 }
 0x2b5   :  { %v1590_v12 = vadd.f32 %v5854_v42, %v1589_v26 }
 0x2b6   :  { %v5855_v44 = vpop.f32.mrf.mxu1 }
 0x2b7   :  { %v1649_v54 = vsel %vm11175_vm4, %v1590_v12, 0.0  ;;  %vm11179_vm4 = vmmov %vm11161_vm3 }
 0x2b8   :  { %v5856_v60 = vpop.f32.mrf.mxu1  ;;  %v1650_v7 = vadd.f32 %v1649_v54, %v1648_v50 }
 0x2b9   :  { %v5857_v63 = vadd.f32 %v5856_v60, %v5855_v44 }
 0x2bb   :  { %v1595_v61 = vadd.f32 %v6387_v53, %v5857_v63 }
 0x2bc   :  { %v8419_v14 = vpop.f32.mrf.mxu1 }
 0x2bd   :  { %v1651_v39 = vsel %vm11176_vm7, %v1595_v61, 0.0  ;;  %vm11180_vm7 = vmmov %vm11161_vm3 }
 0x2be   :  { %v1652_v34 = vadd.f32 %v1651_v39, %v1650_v7  ;;  %v8421_v51 = vpop.f32.mrf.mxu1 }
 0x2c0   :  { %v1653_v29 = vrot.slane %v1652_v34, 4 }
 0x2c2   :  { %v1654_v62 = vadd.f32 %v1653_v29, %v1652_v34  ;;  %v5861_v4 = vpop.f32.mrf.mxu1 }
 0x2c4   :  { %v1655_v21 = vrot.slane %v1654_v62, 2  ;;  %v5862_v17 = vpop.f32.mrf.mxu1 }
 0x2c6   :  { %v1656_v28 = vadd.f32 %v1655_v21, %v1654_v62 }
 0x2c8   :  { %v1657_v22 = vrot.slane %v1656_v28, 1  ;;  %v8423_v55 = vpop.f32.mrf.mxu1 }
 0x2ca   :  { %v1658_v36 = vadd.f32 %v1657_v22, %v1656_v28  ;;  %v5865_v31 = vpop.f32.mrf.mxu1  ;;  %v8468_v28 = vld [vmem:[%s10928_s10] sm:$0xff] }
 0x2cc   :  { %v1659_v32 = vmul.f32 0.015625, %v1658_v36 }
 0x2ce   :  { %v8425_v52 = vsub.f32 %v1560_v58, %v1659_v32  ;;  %v8427_v13 = vsub.f32 %v1575_v33, %v1659_v32  ;;  %v5867_v9 = vpop.f32.mrf.mxu1  ;;  %v8429_v15 = vsub.f32 %v1565_v16, %v1659_v32  ;;  %v8431_v18 = vsub.f32 %v1570_v3, %v1659_v32 }
 0x2cf   :  { %v8435_v6 = vsub.f32 %v1580_v30, %v1659_v32  ;;  %v8442_v33 = vsub.f32 %v1585_v56, %v1659_v32  ;;  %v8447_v30 = vsub.f32 %v1590_v12, %v1659_v32  ;;  %v8452_v5 = vsub.f32 %v1595_v61, %v1659_v32 }
 0x2d0   :  { %v1668_v53 = vmul.f32 %v8425_v52, %v8425_v52  ;;  %v1669_v0 = vmul.f32 %v8429_v15, %v8429_v15  ;;  %v1670_v20 = vmul.f32 %v8431_v18, %v8431_v18  ;;  %v5868_v23 = vpop.f32.mrf.mxu1  ;;  %v1671_v16 = vmul.f32 %v8427_v13, %v8427_v13 }
 0x2d1   :  { %v1672_v2 = vmul.f32 %v8435_v6, %v8435_v6  ;;  %v1673_v10 = vmul.f32 %v8442_v33, %v8442_v33  ;;  %v1674_v47 = vmul.f32 %v8447_v30, %v8447_v30  ;;  %v1675_v54 = vmul.f32 %v8452_v5, %v8452_v5 }
 0x2d2   :  { %v1676_v58 = vsel %vm11177_vm13, %v1668_v53, 0.0  ;;  %v1677_v3 = vsel %vm11178_vm5, %v1669_v0, 0.0  ;;  %v1679_v42 = vsel %vm11161_vm3, %v1670_v20, 0.0  ;;  %v1681_v44 = vsel %vm11179_vm4, %v1671_v16, 0.0  ;;  %vm11181_vm13 = vmmov %vm11161_vm3  ;;  %v6406_v16 = vpop.f32.mrf.mxu0 }
 0x2d3   :  { %v1678_v45 = vadd.f32 %v1677_v3, %v1676_v58  ;;  %v1683_v12 = vsel %vm11180_vm7, %v1672_v2, 0.0  ;;  %v1685_v50 = vsel %vm11181_vm13, %v1673_v10, 0.0  ;;  %vm11182_vm5 = vmmov %vm11161_vm3  ;;  %v1689_v34 = vsel %vm11161_vm3, %v1675_v54, 0.0 }
 0x2d4   :  { %v5870_v43 = vpop.f32.mrf.mxu1  ;;  %v1687_v7 = vsel %vm11182_vm5, %v1674_v47, 0.0  ;;  %vm11183_vm4 = vcmask 523264   ;;  %v5860_v2 = vadd.f32 %v8421_v51, %v8419_v14  ;;  %v1898_v47 = vpop.f32.mrf.mxu0  ;;  %v5866_v54 = vadd.f32 %v5865_v31, %v8423_v55  ;;  %vm11184_vm7 = vmmov %vm11161_vm3 }
 0x2d5   :  { %v1680_v26 = vadd.f32 %v1679_v42, %v1678_v45  ;;  %6444 = vmatprep.mubr.msk.f32.mxu0 %vm11183_vm4, %v8468_v28  ;;  %v5863_v42 = vadd.f32 %v5862_v17, %v5861_v4  ;;  %vm11185_vm13 = vmmov %vm11161_vm3 }
 0x2d6   :  { %v5871_v56 = vpop.f32.mrf.mxu1  ;;  %v6409_v17 = vpop.f32.mrf.mxu0  ;;  %vm11186_vm5 = vmmov %vm11161_vm3 }
 0x2d7   :  { %v1682_v24 = vadd.f32 %v1681_v44, %v1680_v26  ;;  %vm11187_vm4 = vmmov %vm11161_vm3 }
 0x2d9   :  { %v1684_v60 = vadd.f32 %v1683_v12, %v1682_v24 }
 0x2da   :  { %v5873_v63 = vpop.f32.mrf.mxu1 }
 0x2db   :  { %v1686_v61 = vadd.f32 %v1685_v50, %v1684_v60  ;;  %v5869_v50 = vadd.f32 %v5868_v23, %v5867_v9 }
 0x2dc   :  { %v5874_v29 = vpop.f32.mrf.mxu1 }
 0x2dd   :  { %v1688_v39 = vadd.f32 %v1687_v7, %v1686_v61 }
 0x2df   :  { %v1690_v62 = vadd.f32 %v1689_v34, %v1688_v39 }
 0x2e0   :  { %v5876_v21 = vpop.f32.mrf.mxu1 }
 0x2e1   :  { %v1691_v22 = vrot.slane %v1690_v62, 4 }
 0x2e2   :  { %v5877_v36 = vpop.f32.mrf.mxu1 }
 0x2e3   :  { %v1692_v32 = vadd.f32 %v1691_v22, %v1690_v62  ;;  %v5872_v22 = vadd.f32 %v5871_v56, %v5870_v43 }
 0x2e5   :  { %v1693_v0 = vrot.slane %v1692_v32, 2 }
 0x2e6   :  { %v5879_v53 = vpop.f32.mrf.mxu1 }
 0x2e7   :  { %v1694_v58 = vadd.f32 %v1693_v0, %v1692_v32  ;;  %v5875_v32 = vadd.f32 %v5874_v29, %v5873_v63 }
 0x2e8   :  { %v5880_v20 = vpop.f32.mrf.mxu1 }
 0x2e9   :  { %v1695_v45 = vrot.slane %v1694_v58, 1 }
 0x2ea   :  { %v6390_v3 = vpop.f32.mrf.mxu1 }
 0x2eb   :  { %v1696_v10 = vadd.f32 %v1695_v45, %v1694_v58  ;;  %v8474_v44 = vadd.f32 %v6390_v3, %v5863_v42  ;;  %v1908_v3 = vpop.f32.mrf.mxu0  ;;  %v5878_v42 = vadd.f32 %v5877_v36, %v5876_v21 }
 0x2ec   :  { %v1599_v26 = vpop.f32.mrf.mxu1 }
 0x2ed   :  { %v8476_v24 = vadd.f32 %v5860_v2, %v1599_v26  ;;  %v1697_v60 = vmul.f32 0.015625, %v1696_v10  ;;  %v1709_v14 = vsel %vm11185_vm13, %v8474_v44, 0.0  ;;  %v5881_v26 = vadd.f32 %v5880_v20, %v5879_v53  ;;  %vm11189_vm13 = vmmov %vm11161_vm3 }
 0x2ee   :  { %v6393_v12 = vpop.f32.mrf.mxu1 }
 0x2ef   :  { %v1708_v61 = vsel %vm11184_vm7, %v8476_v24, 0.0  ;;  %v1698_v39 = vadd.f32 1e-05, %v1697_v60  ;;  %v8483_v51 = vadd.f32 %v6393_v12, %v5869_v50  ;;  %vm11188_vm7 = vmmov %vm11161_vm3  ;;  %v6412_v60 = vpop.f32.mrf.mxu0 }
 0x2f0   :  { %v1609_v7 = vpop.f32.mrf.mxu1  ;;  %v1710_v34 = vadd.f32 %v1709_v14, %v1708_v61 }
 0x2f1   :  { %v8485_v4 = vadd.f32 %v5866_v54, %v1609_v7  ;;  %6935 = vrsqrt.f32 %v1698_v39  ;;  %v1713_v23 = vsel %vm11161_vm3, %v8483_v51, 0.0  ;;  %v1918_v36 = vpop.f32.mrf.mxu0 }
 0x2f2   :  { %v6396_v62 = vpop.f32.mrf.mxu1 }
 0x2f3   :  { %v1711_v55 = vsel %vm11186_vm5, %v8485_v4, 0.0  ;;  %v8491_v0 = vadd.f32 %v6396_v62, %v5875_v32  ;;  %vm11190_vm5 = vmmov %vm11161_vm3 }
 0x2f4   :  { %v1712_v31 = vadd.f32 %v1711_v55, %v1710_v34  ;;  %v1619_v9 = vpop.f32.mrf.mxu1 }
 0x2f5   :  { %v8493_v58 = vadd.f32 %v5872_v22, %v1619_v9  ;;  %v1717_v29 = vsel %vm11188_vm7, %v8491_v0, 0.0  ;;  %vm11192_vm7 = vmmov %vm11161_vm3 }
 0x2f6   :  { %v1714_v45 = vadd.f32 %v1713_v23, %v1712_v31  ;;  %v6399_v2 = vpop.f32.mrf.mxu1  ;;  %v6415_v31 = vpop.f32.mrf.mxu0 }
 0x2f7   :  { %v1715_v43 = vsel %vm11187_vm4, %v8493_v58, 0.0  ;;  %v8499_v10 = vadd.f32 %v6399_v2, %v5881_v26  ;;  %vm11191_vm4 = vmmov %vm11161_vm3 }
 0x2f8   :  { %v1716_v56 = vadd.f32 %v1715_v43, %v1714_v45  ;;  %v1629_v63 = vpop.f32.mrf.mxu1 }
 0x2f9   :  { %v8501_v12 = vadd.f32 %v5878_v42, %v1629_v63  ;;  %v1721_v21 = vsel %vm11190_vm5, %v8499_v10, 0.0  ;;  %vm11194_vm5 = vmmov %vm11161_vm3 }
 0x2fa   :  { %v1718_v54 = vadd.f32 %v1717_v29, %v1716_v56 }
 0x2fb   :  { %v1719_v50 = vsel %vm11189_vm13, %v8501_v12, 0.0  ;;  %vm11193_vm13 = vmmov %vm11161_vm3 }
 0x2fc   :  { %v1720_v61 = vadd.f32 %v1719_v50, %v1718_v54 }
 0x2fe   :  { %v1722_v53 = vadd.f32 %v1721_v21, %v1720_v61  ;;  %v6936_v20 = vpop.eup %6935 }
 0x2ff   :  { %v1701_v7 = vmul.f32 %v6936_v20, %v8429_v15  ;;  %v1700_v39 = vmul.f32 %v6936_v20, %v8425_v52  ;;  %v1703_v14 = vmul.f32 %v6936_v20, %v8427_v13  ;;  %v1702_v62 = vmul.f32 %v6936_v20, %v8431_v18 }
 0x300   :  { %v1723_v34 = vrot.slane %v1722_v53, 4  ;;  %v1705_v22 = vmul.f32 %v6936_v20, %v8442_v33  ;;  %v1704_v32 = vmul.f32 %v6936_v20, %v8435_v6  ;;  %v1707_v55 = vmul.f32 %v6936_v20, %v8452_v5  ;;  %v1928_v6 = vpop.f32.mrf.mxu0 }
 0x301   :  { %v1978_v9 = vadd.f32 %v6406_v16, %v1701_v7  ;;  %v1977_v23 = vadd.f32 %v1898_v47, %v1700_v39  ;;  %v1980_v45 = vadd.f32 %v6409_v17, %v1703_v14  ;;  %v1979_v42 = vadd.f32 %v1908_v3, %v1702_v62 }
 0x302   :  { %v1724_v2 = vadd.f32 %v1723_v34, %v1722_v53  ;;  %v1982_v15 = vadd.f32 %v6412_v60, %v1705_v22  ;;  %v1981_v26 = vadd.f32 %v1918_v36, %v1704_v32  ;;  %v1984_v52 = vadd.f32 %v6415_v31, %v1707_v55 }
 0x303   :  { %v1994_v43 = vmax.f32 %v1978_v9, 0.0  ;;  %v1993_v13 = vmax.f32 %v1977_v23, 0.0  ;;  %v1996_v56 = vmax.f32 %v1980_v45, 0.0  ;;  %v1995_v18 = vmax.f32 %v1979_v42, 0.0 }
 0x304   :  { %v1725_v63 = vrot.slane %v1724_v2, 2  ;;  %v1998_v29 = vmax.f32 %v1982_v15, 0.0  ;;  %v1997_v33 = vmax.f32 %v1981_v26, 0.0  ;;  %v2000_v54 = vmax.f32 %v1984_v52, 0.0 }
 0x305   :  { %2031 = vst.msk [vmem:[#allocation2 + $0x18] sm:$0xff] %vm11161_vm3, %v1994_v43  ;;  %v1706_v16 = vmul.f32 %v6936_v20, %v8447_v30 }
 0x306   :  { %2030 = vst.msk [vmem:[#allocation2 + $0x10] sm:$0xff] %vm11191_vm4, %v1993_v13  ;;  %v1726_v5 = vadd.f32 %v1725_v63, %v1724_v2  ;;  %vm11201_vm4 = vmmov %vm11161_vm3 }
 0x307   :  { %2033 = vst.msk [vmem:[#allocation2 + $0x28] sm:$0xff] %vm11192_vm7, %v1996_v56  ;;  %v1983_v17 = vadd.f32 %v1928_v6, %v1706_v16  ;;  %vm11202_vm7 = vmmov %vm11161_vm3 }
 0x308   :  { %2032 = vst.msk [vmem:[#allocation2 + $0x20] sm:$0xff] %vm11193_vm13, %v1995_v18  ;;  %v1727_v47 = vrot.slane %v1726_v5, 1  ;;  %vm11204_vm13 = vmmov %vm11161_vm3 }
 0x309   :  { %2035 = vst.msk [vmem:[#allocation2 + $0x38] sm:$0xff] %vm11194_vm5, %v1998_v29  ;;  %v1999_v60 = vmax.f32 %v1983_v17, 0.0  ;;  %vm11205_vm5 = vmmov %vm11161_vm3 }
 0x30a   :  { %2034 = vst.msk [vmem:[#allocation2 + $0x30] sm:$0xff] %vm11195_vm10, %v1997_v33  ;;  %v1728_v3 = vadd.f32 %v1727_v47, %v1726_v5  ;;  %vm11199_vm10 = vmmov %vm11161_vm3 }
 0x30b   :  { %2037 = vst.msk [vmem:[#allocation2 + $0x48] sm:$0xff] %vm11196_vm14, %v2000_v54  ;;  %vm11198_vm14 = vmmov %vm11161_vm3 }
 0x30c   :  { %v1729_v50 = vmul.f32 0.015625, %v1728_v3  ;;  %2036 = vst.msk [vmem:[#allocation2 + $0x40] sm:$0xff] %vm11161_vm3, %v1999_v60  ;;  %v8523_v61 = vld [vmem:[#allocation2 + $0x18] sm:$0xff] }
 0x30d   :  { %11197 = vst [vmem:[#allocation7_spill] sm:$0xff] %v8523_v61  ;;  %2286 = vrot.lane.b32.xlu0 %v8523_v61, %s6981_s30 }
 0x30e   :  { %v8530_v21 = vsub.f32 %v8476_v24, %v1729_v50  ;;  %v8533_v36 = vsub.f32 %v8474_v44, %v1729_v50  ;;  %v8536_v53 = vsub.f32 %v8483_v51, %v1729_v50  ;;  %v8542_v7 = vsub.f32 %v8485_v4, %v1729_v50 }
 0x30f   :  { %v8554_v51 = vsub.f32 %v8493_v58, %v1729_v50  ;;  %v8562_v62 = vsub.f32 %v8491_v0, %v1729_v50  ;;  %v8574_v9 = vsub.f32 %v8501_v12, %v1729_v50  ;;  %v8584_v42 = vsub.f32 %v8499_v10, %v1729_v50 }
 0x310   :  { %v1738_v24 = vmul.f32 %v8530_v21, %v8530_v21  ;;  %v1739_v44 = vmul.f32 %v8533_v36, %v8533_v36  ;;  %v1740_v34 = vmul.f32 %v8542_v7, %v8542_v7  ;;  %v1741_v32 = vmul.f32 %v8536_v53, %v8536_v53  ;;  %v8576_v23 = vld [vmem:[#allocation2 + $0x38] sm:$0xff] }
 0x311   :  { %11200 = vst [vmem:[#allocation8_spill] sm:$0xff] %v8576_v23  ;;  %v1742_v0 = vmul.f32 %v8554_v51, %v8554_v51  ;;  %v1743_v12 = vmul.f32 %v8562_v62, %v8562_v62  ;;  %v8593_v52 = vld [vmem:[#allocation2 + $0x37] sm:$0xff]  ;;  %v1744_v13 = vmul.f32 %v8574_v9, %v8574_v9  ;;  %v1745_v29 = vmul.f32 %v8584_v42, %v8584_v42 }
 0x312   :  { %v8527_v30 = vld [vmem:[#allocation2 + $0x49] sm:$0xff]  ;;  %v1746_v4 = vsel %vm11198_vm14, %v1738_v24, 0.0  ;;  %v1747_v58 = vsel %vm11199_vm10, %v1739_v44, 0.0  ;;  %v1749_v45 = vsel %vm11201_vm4, %v1740_v34, 0.0  ;;  %v1751_v26 = vsel %vm11202_vm7, %v1741_v32, 0.0  ;;  %11203 = vst [vmem:[#allocation9_spill] sm:$0xff] %v8593_v52  ;;  %vm11207_vm14 = vmmov %vm11161_vm3 }
 0x313   :  { %v2104_v20 = vsel %vm11168_vm12, %v8527_v30, 0.0  ;;  %v8545_v39 = vld [vmem:[#allocation2 + $0x4f] sm:$0xff]  ;;  %v8551_v14 = vld [vmem:[#allocation2 + $0x40] sm:$0xff]  ;;  %v1748_v31 = vadd.f32 %v1747_v58, %v1746_v4  ;;  %v1753_v10 = vsel %vm11204_vm13, %v1742_v0, 0.0  ;;  %v2068_v18 = vsel %vm11059_vm8, %v8593_v52, 0.0  ;;  %v6418_v4 = vpop.f32.mrf.mxu0  ;;  %vm11212_vm4 = vmmov %vm11161_vm3 }
 0x314   :  { %2242 = vrot.lane.b32.xlu0 %v2104_v20, %s6980_s29  ;;  %2178 = vrot.lane.b32.xlu1 %v8551_v14, %s6982_s15  ;;  %v2113_v22 = vsel %vm7890_vm2, %v8545_v39, 0.0  ;;  %v8571_v55 = vld [vmem:[#allocation2 + $0x41] sm:$0xff]  ;;  %v1755_v33 = vsel %vm11205_vm5, %v1743_v12, 0.0  ;;  %v1757_v5 = vsel %vm11161_vm3, %v1744_v13, 0.0  ;;  %v8612_v16 = vld [vmem:[#allocation2 + $0x30] sm:$0xff]  ;;  %v1759_v3 = vsel %vm11207_vm14, %v1745_v29, 0.0  ;;  %vm11213_vm7 = vmmov %vm11161_vm3 }
 0x315   :  { %v1750_v2 = vadd.f32 %v1749_v45, %v1748_v31  ;;  %v2103_v15 = vsel %vm11164_vm1, %v8571_v55, 0.0  ;;  %v8597_v56 = vld [vmem:[#allocation2 + $0x48] sm:$0xff]  ;;  %11206 = vst [vmem:[#allocation10_spill] sm:$0xff] %v8612_v16  ;;  %v8621_v60 = vld [vmem:[#allocation2 + $0x39] sm:$0xff]  ;;  %v1938_v45 = vpop.f32.mrf.mxu0  ;;  %v8647_v12 = vld [vmem:[#allocation2 + $0x31] sm:$0xff]  ;;  %vm11211_vm10 = vnez %v11036_v40 }
 0x316   :  { %v8609_v54 = vld [vmem:[#allocation2 + $0x47] sm:$0xff]  ;;  %v2102_v24 = vsel %vm11162_vm9, %v8621_v60, 0.0  ;;  %v8629_v44 = vld [vmem:[#allocation2 + $0x2f] sm:$0xff]  ;;  %v8639_v31 = vld [vmem:[#allocation2 + $0x3f] sm:$0xff] }
 0x317   :  { %v1752_v43 = vadd.f32 %v1751_v26, %v1750_v2  ;;  %v2112_v17 = vsel %vm11059_vm8, %v8609_v54, 0.0  ;;  %11208 = vst [vmem:[#allocation11_spill] sm:$0xff] %v8629_v44  ;;  %v2067_v58 = vsel %vm11057_vm11, %v8629_v44, 0.0  ;;  %v8649_v13 = vld [vmem:[#allocation2 + $0x20] sm:$0xff]  ;;  %vm11214_vm13 = vmmov %vm11161_vm3 }
 0x318   :  { %2274 = vrot.lane.b32.xlu0 %v2113_v22, %s6982_s15  ;;  %2176 = vrot.lane.b32.xlu1 %v8576_v23, %s6982_s15  ;;  %v8631_v22 = vld [vmem:[#allocation2 + $0x28] sm:$0xff]  ;;  %vm11215_vm5 = vmmov %vm11161_vm3 }
 0x319   :  { %v1754_v63 = vadd.f32 %v1753_v10, %v1752_v43  ;;  %11209 = vst [vmem:[#allocation12_spill] sm:$0xff] %v8631_v22  ;;  %v6421_v43 = vpop.f32.mrf.mxu0  ;;  %v8657_v29 = vld [vmem:[#allocation2 + $0x27] sm:$0xff]  ;;  %vm11216_vm14 = vmmov %vm11161_vm3 }
 0x31b   :  { %v1756_v6 = vadd.f32 %v1755_v33, %v1754_v63  ;;  %v2101_v63 = vsel %vm11160_vm6, %v8647_v12, 0.0  ;;  %v1948_v33 = vpop.f32.mrf.mxu0 }
 0x31c   :  { %2240 = vrot.lane.b32.xlu0 %v2103_v15, %s6980_s29  ;;  %2298 = vrot.lane.b32.xlu1 %v8597_v56, %s6981_s30  ;;  %v2111_v15 = vsel %vm11057_vm11, %v8639_v31, 0.0  ;;  %vm11219_vm11 = vnez %v11016_v48 }
 0x31d   :  { %v1758_v47 = vadd.f32 %v1757_v5, %v1756_v6  ;;  %v2066_v6 = vsel %vm7790_vm15, %v8657_v29, 0.0  ;;  %v6424_v5 = vpop.f32.mrf.mxu0 }
 0x31f   :  { %v1760_v50 = vadd.f32 %v1759_v3, %v1758_v47  ;;  %v2110_v47 = vsel %vm7790_vm15, %v8593_v52, 0.0  ;;  %v8671_v3 = vld [vmem:[#allocation2 + $0x29] sm:$0xff]  ;;  %vm11218_vm15 = vmmov %vm11161_vm3 }
 0x320   :  { %2144 = vrot.lane.b32.xlu0 %v2068_v18, %s6980_s29  ;;  %2174 = vrot.lane.b32.xlu1 %v8612_v16, %s6982_s15 }
 0x321   :  { %v1761_v20 = vrot.slane %v1760_v50, 4 }
 0x323   :  { %v1762_v34 = vadd.f32 %v1761_v20, %v1760_v50  ;;  %v2100_v50 = vsel %vm11158_vm0, %v8671_v3, 0.0 }
 0x324   :  { %2272 = vrot.lane.b32.xlu0 %v2112_v17, %s6982_s15  ;;  %2296 = vrot.lane.b32.xlu1 %v8551_v14, %s6981_s30  ;;  %v1958_v17 = vpop.f32.mrf.mxu0 }
 0x325   :  { %v1763_v32 = vrot.slane %v1762_v34, 2 }
 0x326   :  { %v6427_v20 = vpop.f32.mrf.mxu0 }
 0x327   :  { %v1764_v0 = vadd.f32 %v1763_v32, %v1762_v34  ;;  %v8681_v34 = vld [vmem:[#allocation2 + $0x10] sm:$0xff] }
 0x328   :  { %2238 = vrot.lane.b32.xlu0 %v2102_v24, %s6980_s29  ;;  %2172 = vrot.lane.b32.xlu1 %v8631_v22, %s6982_s15  ;;  %v8679_v24 = vld [vmem:[#allocation2 + $0x1f] sm:$0xff]  ;;  %11210 = vst [vmem:[#allocation15_spill] sm:$0xff] %v8681_v34 }
 0x329   :  { %v1765_v2 = vrot.slane %v1764_v0, 1 }
 0x32b   :  { %v1766_v26 = vadd.f32 %v1765_v2, %v1764_v0  ;;  %v2069_v0 = vsel %vm7890_vm2, %v8639_v31, 0.0  ;;  %v2109_v2 = vsel %vm11211_vm10, %v8629_v44, 0.0 }
 0x32c   :  { %2142 = vrot.lane.b32.xlu0 %v2067_v58, %s6980_s29  ;;  %2294 = vrot.lane.b32.xlu1 %v8576_v23, %s6981_s30  ;;  %v2065_v58 = vsel %vm11211_vm10, %v8679_v24, 0.0  ;;  %vm11217_vm10 = vmmov %vm11161_vm3 }
 0x32d   :  { %v1767_v10 = vmul.f32 0.015625, %v1766_v26 }
 0x32f   :  { %v1768_v18 = vadd.f32 1e-05, %v1767_v10 }
 0x330   :  { %2270 = vrot.lane.b32.xlu0 %v2111_v15, %s6982_s15  ;;  %2170 = vrot.lane.b32.xlu1 %v8649_v13, %s6982_s15 }
 0x331   :  { %6937 = vrsqrt.f32 %v1768_v18  ;;  %v1968_v18 = vpop.f32.mrf.mxu0 }
 0x334   :  { %2236 = vrot.lane.b32.xlu0 %v2101_v63, %s6980_s29  ;;  %2292 = vrot.lane.b32.xlu1 %v8612_v16, %s6981_s30 }
 0x338   :  { %2140 = vrot.lane.b32.xlu0 %v2066_v6, %s6980_s29  ;;  %2168 = vrot.lane.b32.xlu1 %v8523_v61, %s6982_s15 }
 0x33c   :  { %2268 = vrot.lane.b32.xlu0 %v2110_v47, %s6982_s15  ;;  %2290 = vrot.lane.b32.xlu1 %v8631_v22, %s6981_s30 }
 0x33e   :  { %v6938_v32 = vpop.eup %6937 }
 0x33f   :  { %v1771_v15 = vmul.f32 %v6938_v32, %v8533_v36  ;;  %v1770_v26 = vmul.f32 %v6938_v32, %v8530_v21  ;;  %v1773_v10 = vmul.f32 %v6938_v32, %v8536_v53  ;;  %v1772_v63 = vmul.f32 %v6938_v32, %v8542_v7 }
 0x340   :  { %2234 = vrot.lane.b32.xlu0 %v2100_v50, %s6980_s29  ;;  %2166 = vrot.lane.b32.xlu1 %v8681_v34, %s6982_s15  ;;  %v1775_v6 = vmul.f32 %v6938_v32, %v8562_v62  ;;  %v1774_v47 = vmul.f32 %v6938_v32, %v8554_v51  ;;  %v1777_v50 = vmul.f32 %v6938_v32, %v8584_v42  ;;  %v2074_v51 = vld [vmem:[#allocation2 + $0x21] sm:$0xff] }
 0x341   :  { %v1776_v34 = vmul.f32 %v6938_v32, %v8574_v9  ;;  %v1986_v61 = vadd.f32 %v6418_v4, %v1771_v15  ;;  %v1985_v22 = vadd.f32 %v1938_v45, %v1770_v26  ;;  %v1988_v36 = vadd.f32 %v6421_v43, %v1773_v10  ;;  %v2072_v32 = vld [vmem:[#allocation2 + $0x11] sm:$0xff] }
 0x342   :  { %v1987_v16 = vadd.f32 %v1948_v33, %v1772_v63  ;;  %v1990_v21 = vadd.f32 %v6424_v5, %v1775_v6  ;;  %v1989_v53 = vadd.f32 %v1958_v17, %v1774_v47  ;;  %v1992_v7 = vadd.f32 %v6427_v20, %v1777_v50  ;;  %v2073_v33 = vld [vmem:[#allocation2 + $0x19] sm:$0xff] }
 0x343   :  { %v1991_v44 = vadd.f32 %v1968_v18, %v1776_v34  ;;  %v2001_v23 = vmax.f32 %v1985_v22, 0.0  ;;  %v2004_v62 = vmax.f32 %v1988_v36, 0.0  ;;  %v2084_v5 = vsel %vm11162_vm9, %v8647_v12, 0.0  ;;  %v2071_v18 = vld [vmem:[#allocation2 + $0x9] sm:$0xff] }
 0x344   :  { %2138 = vrot.lane.b32.xlu0 %v2065_v58, %s6980_s29  ;;  %2288 = vrot.lane.b32.xlu1 %v8649_v13, %s6981_s30  ;;  %v2002_v58 = vmax.f32 %v1986_v61, 0.0  ;;  %v2003_v52 = vmax.f32 %v1987_v16, 0.0  ;;  %v2006_v42 = vmax.f32 %v1990_v21, 0.0  ;;  %v2005_v9 = vmax.f32 %v1989_v53, 0.0 }
 0x345   :  { %v2008_v4 = vmax.f32 %v1992_v7, 0.0  ;;  %v2007_v45 = vmax.f32 %v1991_v44, 0.0  ;;  %2038 = vst.msk [vmem:[#allocation2 + $0x58] sm:$0xff] %vm11213_vm7, %v2001_v23  ;;  %v2099_v61 = vsel %vm11219_vm11, %v2074_v51, 0.0  ;;  %v8718_v23 = vld [vmem:[#allocation2 + $0x17] sm:$0xff]  ;;  %v2085_v44 = vsel %vm11164_vm1, %v8621_v60, 0.0 }
 0x346   :  { %2039 = vst.msk [vmem:[#allocation2 + $0x60] sm:$0xff] %vm11212_vm4, %v2002_v58  ;;  %vm11220_vm4 = vnez %v11032_v19  ;;  %v2083_v20 = vsel %vm11160_vm6, %v8671_v3, 0.0  ;;  %vm11223_vm7 = vnez %v11012_v37 }
 0x347   :  { %2041 = vst.msk [vmem:[#allocation2 + $0x70] sm:$0xff] %vm11214_vm13, %v2004_v62  ;;  %v2064_v16 = vsel %vm11220_vm4, %v8718_v23, 0.0  ;;  %v2108_v43 = vsel %vm11220_vm4, %v8657_v29, 0.0  ;;  %vm11224_vm13 = vcmask 523264   ;;  %v2079_v50 = vsel %vm11223_vm7, %v2071_v18, 0.0 }
 0x348   :  { %2266 = vrot.lane.b32.xlu0 %v2109_v2, %s6982_s15  ;;  %2040 = vst.msk [vmem:[#allocation2 + $0x68] sm:$0xff] %vm11215_vm5, %v2003_v52  ;;  %2146 = vrot.lane.b32.xlu1 %v2069_v0, %s6980_s29  ;;  %v2086_v52 = vsel %vm11168_vm12, %v8571_v55, 0.0  ;;  %v2081_v0 = vsel %vm11219_vm11, %v2073_v33, 0.0  ;;  %v2097_v2 = vsel %vm11223_vm7, %v2072_v32, 0.0  ;;  %vm11225_vm5 = vmmov %vm11224_vm13 }
 0x349   :  { %2043 = vst.msk [vmem:[#allocation2 + $0x80] sm:$0xff] %vm11161_vm3, %v2006_v42  ;;  %vm11226_vm3 = vnez %v11010_v27  ;;  %v8902_v42 = vpop.permute.xlu1 %2164 }
 0x34a   :  { %2042 = vst.msk [vmem:[#allocation2 + $0x78] sm:$0xff] %vm11216_vm14, %v2005_v9  ;;  %v2106_v63 = vsel %vm11226_vm3, %v8718_v23, 0.0  ;;  %v2373_v7 = vsel %vm11226_vm3, %v8545_v39, 0.0  ;;  %vm11229_vm14 = vmmov %vm11225_vm5  ;;  %vm11238_vm3 = vcmask 785408  }
 0x34b   :  { %2045 = vst.msk [vmem:[#allocation2 + $0x90] sm:$0xff] %vm11217_vm10, %v2008_v4  ;;  %vm11222_vm10 = vnez %v11018_v59 }
 0x34c   :  { %2044 = vst.msk [vmem:[#allocation2 + $0x88] sm:$0xff] %vm11218_vm15, %v2007_v45  ;;  %2232 = vrot.lane.b32.xlu0 %v2099_v61, %s6980_s29  ;;  %2210 = vrot.lane.b32.xlu1 %v2086_v52, %s6981_s30  ;;  %v8731_v22 = vld [vmem:[#allocation2 + $0x51] sm:$0xff]  ;;  %vm11221_vm15 = vnez %v11014_v25  ;;  %v2107_v34 = vsel %vm11222_vm10, %v8679_v24, 0.0 }
 0x34d   :  { %6428 = vmatprep.subr.msk.mxu0 %vm11168_vm12, %v8731_v22  ;;  %v2098_v17 = vsel %vm11221_vm15, %v2073_v33, 0.0  ;;  %v2080_v26 = vsel %vm11221_vm15, %v2072_v32, 0.0  ;;  %v2301_v4 = vpop.permute.xlu1 %2300 }
 0x34e   :  { %6429 = vmatpush3.msk.msra.mxu0 %vm11168_vm12, %v8731_v22 }
 0x34f   :  { %6430 = vmatprep.subr.msk.mxu0 %vm11164_vm1, %v8527_v30  ;;  %v8883_v53 = vld [vmem:[#allocation2 + $0x69] sm:$0xff]  ;;  %v8894_v58 = vld [vmem:[#allocation2 + $0x61] sm:$0xff] }
 0x350   :  { %2136 = vrot.lane.b32.xlu0 %v2064_v16, %s6980_s29  ;;  %2208 = vrot.lane.b32.xlu1 %v2085_v44, %s6981_s30  ;;  %v8873_v21 = vld [vmem:[#allocation2 + $0x80] sm:$0xff]  ;;  %v2407_v46 = vsel %vm11221_vm15, %v8894_v58, 0.0 }
 0x351   :  { %6431 = vmatpush3.msk.msra.mxu0 %vm11164_vm1, %v8527_v30  ;;  %v8766_v30 = vld [vmem:[#allocation2 + $0xf] sm:$0xff]  ;;  %v8860_v47 = vld [vmem:[#allocation2 + $0x79] sm:$0xff]  ;;  %11228 = vst [vmem:[#allocation14_spill] sm:$0xff] %v8873_v21  ;;  %v8929_v16 = vpop.permute.xlu1 %2608 }
 0x352   :  { %6432 = vmatprep.subr.msk.mxu0 %vm11162_vm9, %v8571_v55  ;;  %v8822_v15 = vld [vmem:[#allocation2 + $0x91] sm:$0xff]  ;;  %v8922_v61 = vld [vmem:[#allocation2 + $0x7f] sm:$0xff] }
 0x353   :  { %6433 = vmatpush3.msk.msra.mxu0 %vm11162_vm9, %v8571_v55  ;;  %v2063_v55 = vsel %vm11222_vm10, %v8766_v30, 0.0  ;;  %v8836_v10 = vld [vmem:[#allocation2 + $0x89] sm:$0xff]  ;;  %v8870_v36 = vld [vmem:[#allocation2 + $0x71] sm:$0xff]  ;;  %11231 = vst [vmem:[#allocation17_spill] sm:$0xff] %v8922_v61  ;;  %v2379_v52 = vsel %vm11059_vm8, %v8922_v61, 0.0 }
 0x354   :  { %2264 = vrot.lane.b32.xlu0 %v2108_v43, %s6982_s15  ;;  %2206 = vrot.lane.b32.xlu1 %v2084_v5, %s6981_s30  ;;  %v8850_v6 = vld [vmem:[#allocation2 + $0x88] sm:$0xff]  ;;  %v2414_v62 = vld [vmem:[#allocation2 + $0x97] sm:$0xff]  ;;  %v2412_v45 = vsel %vm11164_vm1, %v8836_v10, 0.0 }
 0x355   :  { %6434 = vmatprep.subr.msk.mxu0 %vm11160_vm6, %v8621_v60  ;;  %11227 = vst [vmem:[#allocation13_spill] sm:$0xff] %v8850_v6  ;;  %v2422_v39 = vsel %vm7890_vm2, %v2414_v62, 0.0  ;;  %v8914_v9 = vld [vmem:[#allocation2 + $0x78] sm:$0xff]  ;;  %v8932_v44 = vld [vmem:[#allocation2 + $0x8f] sm:$0xff] }
 0x356   :  { %6435 = vmatpush3.msk.msra.mxu0 %vm11160_vm6, %v8621_v60  ;;  %v2082_v60 = vsel %vm11158_vm0, %v2074_v51, 0.0  ;;  %11230 = vst [vmem:[#allocation16_spill] sm:$0xff] %v8914_v9  ;;  %v8934_v43 = vld [vmem:[#allocation2 + $0x70] sm:$0xff]  ;;  %v2421_v5 = vsel %vm11059_vm8, %v8932_v44, 0.0 }
 0x357   :  { %6436 = vmatprep.subr.msk.mxu0 %vm11158_vm0, %v8647_v12  ;;  %11232 = vst [vmem:[#allocation18_spill] sm:$0xff] %v8934_v43 }
 0x358   :  { %2230 = vrot.lane.b32.xlu0 %v2098_v17, %s6980_s29  ;;  %2204 = vrot.lane.b32.xlu1 %v2083_v20, %s6981_s30  ;;  %v8946_v17 = vpop.permute.xlu1 %2472 }
 0x359   :  { %6437 = vmatpush3.msk.msra.mxu0 %vm11158_vm0, %v8647_v12  ;;  %v2424_v12 = vld [vmem:[#allocation2 + $0x99] sm:$0xff]  ;;  %11233 = vst [vmem:[#allocation19_spill] sm:$0xff] %v8946_v17  ;;  %v2413_v17 = vsel %vm11168_vm12, %v8822_v15, 0.0 }
 0x35a   :  { %6438 = vmatprep.subr.msk.mxu0 %vm11219_vm11, %v8671_v3 }
 0x35b   :  { %6439 = vmatpush3.msk.msra.mxu0 %vm11219_vm11, %v8671_v3  ;;  %v8806_v3 = vld [vmem:[%s10928_s10 + $0x8] sm:$0xff] }
 0x35c   :  { %2134 = vrot.lane.b32.xlu0 %v2063_v55, %s6980_s29  ;;  %2202 = vrot.lane.b32.xlu1 %v2082_v60, %s6981_s30  ;;  %v8954_v60 = vld [vmem:[#allocation2 + $0x77] sm:$0xff] }
 0x35d   :  { %6440 = vmatprep.subr.msk.mxu0 %vm11221_vm15, %v2074_v51  ;;  %11234 = vst [vmem:[#allocation20_spill] sm:$0xff] %v8954_v60 }
 0x35e   :  { %6441 = vmatpush3.msk.msra.mxu0 %vm11221_vm15, %v2074_v51  ;;  %v8897_v51 = vld [vmem:[#allocation2 + $0x90] sm:$0xff] }
 0x35f   :  { %6442 = vmatprep.subr.msk.mxu0 %vm11223_vm7, %v2073_v33 }
 0x360   :  { %2262 = vrot.lane.b32.xlu0 %v2107_v34, %s6982_s15  ;;  %6443 = vmatpush3.msk.msra.mxu0 %vm11223_vm7, %v2073_v33  ;;  %v8936_v33 = vpop.permute.xlu0 %2132 }
 0x361   :  { %2200 = vrot.lane.b32.xlu1 %v2081_v0, %s6981_s30  ;;  %6447 = vmatprep.subr.msk.mxu0 %vm11168_vm12, %v2424_v12 }
 0x362   :  { %6445 = vmatmul.mubr.msk.f32.vlgmr.msra.gmra.mxu0 %vm11224_vm13, %v8806_v3  ;;  %vm11236_vm13 = vnez %v11040_v8 }
 0x363   :  { %6448 = vmatpush3.msk.msra.mxu0 %vm11168_vm12, %v2424_v12  ;;  %6463 = vmatprep.mubr.msk.f32.mxu0 %vm11225_vm5, %v8468_v28  ;;  %v8847_v28 = vld [vmem:[#allocation2 + $0x81] sm:$0xff]  ;;  %v2378_v32 = vsel %vm11236_vm13, %v8954_v60, 0.0  ;;  %vm11237_vm5 = vcmask 261120  }
 0x364   :  { %2228 = vrot.lane.b32.xlu0 %v2097_v2, %s6980_s29  ;;  %6449 = vmatprep.subr.msk.mxu0 %vm11164_vm1, %v8822_v15  ;;  %v2411_v55 = vsel %vm11162_vm9, %v8847_v28, 0.0  ;;  %v8956_v12 = vld [vmem:[#allocation2 + $0x68] sm:$0xff] }
 0x365   :  { %2198 = vrot.lane.b32.xlu1 %v2080_v26, %s6981_s30  ;;  %6450 = vmatpush3.msk.msra.mxu0 %vm11164_vm1, %v8822_v15  ;;  %11235 = vst [vmem:[#allocation21_spill] sm:$0xff] %v8956_v12  ;;  %v8966_v2 = vld [vmem:[#allocation2 + $0x87] sm:$0xff]  ;;  %v2095_v26 = vsel %vm7890_vm2, %v8609_v54, 0.0 }
 0x366   :  { %6451 = vmatprep.subr.msk.mxu0 %vm11162_vm9, %v8836_v10 }
 0x367   :  { %6452 = vmatpush3.msk.msra.mxu0 %vm11162_vm9, %v8836_v10 }
 0x368   :  { %2260 = vrot.lane.b32.xlu0 %v2106_v63, %s6982_s15  ;;  %6453 = vmatprep.subr.msk.mxu0 %vm11160_vm6, %v8847_v28 }
 0x369   :  { %2486 = vrot.lane.b32.xlu1 %v8850_v6, %s6982_s15  ;;  %6454 = vmatpush3.msk.msra.mxu0 %vm11160_vm6, %v8847_v28 }
 0x36a   :  { %6455 = vmatprep.subr.msk.mxu0 %vm11158_vm0, %v8860_v47 }
 0x36b   :  { %6456 = vmatpush3.msk.msra.mxu0 %vm11158_vm0, %v8860_v47 }
 0x36c   :  { %2196 = vrot.lane.b32.xlu0 %v2079_v50, %s6981_s30  ;;  %6457 = vmatprep.subr.msk.mxu0 %vm11219_vm11, %v8870_v36 }
 0x36d   :  { %2484 = vrot.lane.b32.xlu1 %v8873_v21, %s6982_s15  ;;  %6458 = vmatpush3.msk.msra.mxu0 %vm11219_vm11, %v8870_v36 }
 0x36e   :  { %6459 = vmatprep.subr.msk.mxu0 %vm11221_vm15, %v8883_v53 }
 0x36f   :  { %6460 = vmatpush3.msk.msra.mxu0 %vm11221_vm15, %v8883_v53 }
 0x370   :  { %2441 = vrot.lane.b32.xlu0 %v2373_v7, %s6980_s29  ;;  %6461 = vmatprep.subr.msk.mxu0 %vm11223_vm7, %v8894_v58  ;;  %v2420_v7 = vsel %vm11236_vm13, %v8966_v2, 0.0 }
 0x371   :  { %2606 = vrot.lane.b32.xlu1 %v8897_v51, %s6981_s30  ;;  %6462 = vmatpush3.msk.msra.mxu0 %vm11223_vm7, %v8894_v58 }
 0x372   :  { %6464 = vmatmul.mubr.msk.f32.vlgmr.msra.gmra.mxu0 %vm11229_vm14, %v8806_v3 }
 0x374   :  { %2582 = vrot.lane.b32.xlu0 %v2422_v39, %s6982_s15 }
 0x375   :  { %2482 = vrot.lane.b32.xlu1 %v8914_v9, %s6982_s15 }
 0x378   :  { %2548 = vrot.lane.b32.xlu0 %v2412_v45, %s6980_s29  ;;  %v8982_v45 = vld [vmem:[#allocation2 + $0x60] sm:$0xff] }
 0x379   :  { %2604 = vrot.lane.b32.xlu1 %v8850_v6, %s6981_s30 }
 0x37c   :  { %2453 = vrot.lane.b32.xlu0 %v2379_v52, %s6980_s29  ;;  %v2410_v52 = vsel %vm11160_vm6, %v8860_v47, 0.0 }
 0x37d   :  { %2480 = vrot.lane.b32.xlu1 %v8934_v43, %s6982_s15 }
 0x37f   :  { %v8948_v20 = vpop.permute.xlu0 %2286 }
 0x380   :  { %2580 = vrot.lane.b32.xlu0 %v2421_v5, %s6982_s15 }
 0x381   :  { %2602 = vrot.lane.b32.xlu1 %v8873_v21, %s6981_s30 }
 0x384   :  { %2546 = vrot.lane.b32.xlu0 %v2411_v55, %s6980_s29  ;;  %v8994_v55 = vld [vmem:[#allocation2 + $0x6f] sm:$0xff] }
 0x385   :  { %2478 = vrot.lane.b32.xlu1 %v8956_v12, %s6982_s15  ;;  %11239 = vst [vmem:[#allocation22_spill] sm:$0xff] %v8994_v55 }
 0x386   :  { %v2243_v34 = vpop.permute.xlu0 %2242  ;;  %v8963_v0 = vpop.permute.xlu1 %2178 }
 0x387   :  { %v2341_v63 = vsel %vm11237_vm5, %v2095_v26, %v2243_v34  ;;  %v9006_v26 = vld [vmem:[#allocation2 + $0x58] sm:$0xff]  ;;  %vm11243_vm5 = vnez %v11036_v40 }
 0x388   :  { %2451 = vrot.lane.b32.xlu0 %v2378_v32, %s6980_s29  ;;  %11241 = vst [vmem:[#allocation23_spill] sm:$0xff] %v9006_v26  ;;  %v2418_v15 = vsel %vm11243_vm5, %v8954_v60, 0.0  ;;  %v9066_v60 = vld [vmem:[#allocation2 + $0x5f] sm:$0xff] }
 0x389   :  { %2600 = vrot.lane.b32.xlu1 %v8914_v9, %s6981_s30  ;;  %v3013_v40 = vld [vmem:[%s10929_s4 + $0x118] sm:$0xff] }
 0x38a   :  { %v2275_v18 = vpop.permute.xlu0 %2274  ;;  %v8978_v62 = vpop.permute.xlu1 %2176  ;;  %6466 = vmatprep.subr.mxu0 %v3013_v40 }
 0x38b   :  { %v2349_v50 = vsel %vm11229_vm14, %v2341_v63, %v2275_v18  ;;  %6467 = vmatpush3.msra.mxu0 %v3013_v40  ;;  %v2986_v40 = vld [vmem:[%s10929_s4 + $0x40] sm:$0xff] }
 0x38c   :  { %2578 = vrot.lane.b32.xlu0 %v2420_v7, %s6982_s15  ;;  %v2357_v39 = vsel %vm11238_vm3, %v2349_v50, %v2301_v4  ;;  %vm11240_vm3 = vnez %v11038_v38 }
 0x38d   :  { %2690 = vmatprep.subr.mxu1 %v2357_v39  ;;  %2476 = vrot.lane.b32.xlu1 %v8982_v45, %s6982_s15  ;;  %v2377_v34 = vsel %vm11240_vm3, %v8994_v55, 0.0  ;;  %v2419_v18 = vsel %vm11240_vm3, %v8922_v61, 0.0  ;;  %v2409_v39 = vsel %vm11158_vm0, %v8870_v36, 0.0  ;;  %v2392_v61 = vsel %vm11160_vm6, %v8870_v36, 0.0  ;;  %vm11247_vm6 = vmmov %vm11229_vm14 }
 0x38e   :  { %v8986_v54 = vpop.permute.xlu0 %2240  ;;  %v8991_v5 = vpop.permute.xlu1 %2298 }
 0x390   :  { %2544 = vrot.lane.b32.xlu0 %v2410_v52, %s6980_s29 }
 0x391   :  { %2598 = vrot.lane.b32.xlu1 %v8934_v43, %s6981_s30 }
 0x392   :  { %v8998_v4 = vpop.permute.xlu0 %2144  ;;  %v9003_v32 = vpop.permute.xlu1 %2174 }
 0x394   :  { %2449 = vrot.lane.b32.xlu0 %v2377_v34, %s6980_s29  ;;  %v9028_v34 = vld [vmem:[#allocation2 + $0x67] sm:$0xff] }
 0x395   :  { %2474 = vrot.lane.b32.xlu1 %v9006_v26, %s6982_s15  ;;  %11242 = vst [vmem:[#allocation24_spill] sm:$0xff] %v9028_v34  ;;  %v2376_v26 = vsel %vm11243_vm5, %v9028_v34, 0.0 }
 0x396   :  { %v9010_v63 = vpop.permute.xlu0 %2272  ;;  %v9015_v50 = vpop.permute.xlu1 %2296 }
 0x398   :  { %2576 = vrot.lane.b32.xlu0 %v2419_v18, %s6982_s15 }
 0x399   :  { %2596 = vrot.lane.b32.xlu1 %v8956_v12, %s6981_s30 }
 0x39a   :  { %v9020_v7 = vpop.permute.xlu0 %2238  ;;  %v9025_v52 = vpop.permute.xlu1 %2172 }
 0x39c   :  { %2542 = vrot.lane.b32.xlu0 %v2409_v39, %s6980_s29  ;;  %v2380_v39 = vsel %vm7890_vm2, %v8966_v2, 0.0 }
 0x39d   :  { %2550 = vrot.lane.b32.xlu1 %v2413_v17, %s6980_s29 }
 0x39e   :  { %v9034_v18 = vpop.permute.xlu0 %2142  ;;  %v9039_v12 = vpop.permute.xlu1 %2294 }
 0x3a0   :  { %2447 = vrot.lane.b32.xlu0 %v2376_v26, %s6980_s29  ;;  %v2395_v26 = vsel %vm11168_vm12, %v8836_v10, 0.0  ;;  %v2375_v10 = vsel %vm11220_vm4, %v9066_v60, 0.0  ;;  %vm11251_vm12 = vcmask 785408  }
 0x3a1   :  { %2455 = vrot.lane.b32.xlu1 %v2380_v39, %s6980_s29  ;;  %v2408_v39 = vsel %vm11219_vm11, %v8883_v53, 0.0  ;;  %vm11253_vm14 = vmmov %vm11251_vm12 }
 0x3a2   :  { %v9046_v43 = vpop.permute.xlu0 %2270  ;;  %v9051_v17 = vpop.permute.xlu1 %2170 }
 0x3a4   :  { %2574 = vrot.lane.b32.xlu0 %v2418_v15, %s6982_s15  ;;  %v2394_v15 = vsel %vm11164_vm1, %v8847_v28, 0.0  ;;  %v2417_v28 = vsel %vm11220_vm4, %v8994_v55, 0.0  ;;  %v2381_v55 = vld [vmem:[#allocation2 + $0x59] sm:$0xff] }
 0x3a5   :  { %2518 = vrot.lane.b32.xlu1 %v2395_v26, %s6981_s30  ;;  %v2389_v48 = vsel %vm11221_vm15, %v2381_v55, 0.0 }
 0x3a6   :  { %v9058_v9 = vpop.permute.xlu0 %2236  ;;  %v9063_v21 = vpop.permute.xlu1 %2292 }
 0x3a8   :  { %2540 = vrot.lane.b32.xlu0 %v2408_v39, %s6980_s29  ;;  %v2393_v39 = vsel %vm11162_vm9, %v8860_v47, 0.0  ;;  %vm11248_vm9 = vmmov %vm11247_vm6 }
 0x3a9   :  { %2516 = vrot.lane.b32.xlu1 %v2394_v15, %s6981_s30 }
 0x3aa   :  { %v9072_v35 = vpop.permute.xlu0 %2140  ;;  %v9077_v26 = vpop.permute.xlu1 %2168 }
 0x3ac   :  { %2445 = vrot.lane.b32.xlu0 %v2375_v10, %s6980_s29 }
 0x3ad   :  { %2514 = vrot.lane.b32.xlu1 %v2393_v39, %s6981_s30  ;;  %v9100_v39 = vld [vmem:[#allocation2 + $0x57] sm:$0xff] }
 0x3ae   :  { %v2269_v49 = vpop.permute.xlu0 %2268  ;;  %v9087_v15 = vpop.permute.xlu1 %2290  ;;  %11244 = vst [vmem:[#allocation25_spill] sm:$0xff] %v9100_v39  ;;  %v2374_v36 = vsel %vm11222_vm10, %v9100_v39, 0.0  ;;  %v2094_v39 = vsel %vm11059_vm8, %v8639_v31, 0.0 }
 0x3b0   :  { %2572 = vrot.lane.b32.xlu0 %v2417_v28, %s6982_s15  ;;  %v2391_v28 = vsel %vm11158_vm0, %v8883_v53, 0.0  ;;  %v2416_v53 = vsel %vm11222_vm10, %v9028_v34, 0.0  ;;  %vm11245_vm0 = vcmask 261120  }
 0x3b1   :  { %2512 = vrot.lane.b32.xlu1 %v2392_v61, %s6981_s30  ;;  %vm11249_vm1 = vmmov %vm11245_vm0 }
 0x3b2   :  { %v2235_v10 = vpop.permute.xlu0 %2234  ;;  %v9097_v47 = vpop.permute.xlu1 %2166  ;;  %v2316_v25 = vsel %vm11249_vm1, %v8551_v14, %v8998_v4  ;;  %vm11252_vm15 = vmmov %vm11245_vm0 }
 0x3b4   :  { %2538 = vrot.lane.b32.xlu0 %v2407_v46, %s6980_s29  ;;  %v2390_v46 = vsel %vm11219_vm11, %v8894_v58, 0.0  ;;  %vm11246_vm11 = vmmov %vm11245_vm0 }
 0x3b5   :  { %2510 = vrot.lane.b32.xlu1 %v2391_v28, %s6981_s30  ;;  %v2340_v58 = vsel %vm11246_vm11, %v2094_v39, %v8986_v54  ;;  %vm11255_vm11 = vnez %v11010_v27  ;;  %v2993_v27 = vld [vmem:[%s10929_s4 + $0x78] sm:$0xff] }
 0x3b6   :  { %v2139_v41 = vpop.permute.xlu0 %2138  ;;  %v9109_v61 = vpop.permute.xlu1 %2288  ;;  %v2348_v34 = vsel %vm11247_vm6, %v2340_v58, %v9010_v63 }
 0x3b7   :  { %v2356_v63 = vsel %vm11253_vm14, %v2348_v34, %v8991_v5  ;;  %v11259_v5 = vld [vmem:[#allocation11_spill] sm:$0xff] }
 0x3b8   :  { %2443 = vrot.lane.b32.xlu0 %v2374_v36, %s6980_s29  ;;  %v2092_v34 = vsel %vm11240_vm3, %v11259_v5, 0.0 }
 0x3b9   :  { %2508 = vrot.lane.b32.xlu1 %v2390_v46, %s6981_s30 }
 0x3ba   :  { %v2267_v11 = vpop.permute.xlu0 %2266  ;;  %v2147_v28 = vpop.permute.xlu1 %2146 }
 0x3bb   :  { %v2317_v36 = vsel %vm11245_vm0, %v8597_v56, %v2147_v28  ;;  %v11250_v56 = vld [vmem:[#allocation9_spill] sm:$0xff]  ;;  %vm11254_vm0 = vmmov %vm11247_vm6 }
 0x3bc   :  { %2570 = vrot.lane.b32.xlu0 %v2416_v53, %s6982_s15  ;;  %v2406_v53 = vsel %vm11223_vm7, %v2381_v55, 0.0  ;;  %v2325_v31 = vsel %vm11248_vm9, %v2317_v36, %v8963_v0  ;;  %v2093_v54 = vsel %vm11236_vm13, %v11250_v56, 0.0  ;;  %v2388_v55 = vsel %vm11223_vm7, %v8731_v22, 0.0  ;;  %vm11256_vm7 = vmmov %vm11254_vm0 }
 0x3bd   :  { %2506 = vrot.lane.b32.xlu1 %v2389_v48, %s6981_s30  ;;  %v2339_v0 = vsel %vm11252_vm15, %v2093_v54, %v9020_v7  ;;  %v2324_v37 = vsel %vm11256_vm7, %v2316_v25, %v8978_v62  ;;  %v11257_v7 = vld [vmem:[#allocation8_spill] sm:$0xff]  ;;  %vm11258_vm6 = vmmov %vm11249_vm1  ;;  %v2338_v36 = vsel %vm11249_vm1, %v2092_v34, %v9058_v9  ;;  %v2091_v9 = vsel %vm11243_vm5, %v8657_v29, 0.0 }
 0x3be   :  { %v2233_v46 = vpop.permute.xlu0 %2232  ;;  %v2211_v6 = vpop.permute.xlu1 %2210  ;;  %v2347_v4 = vsel %vm11254_vm0, %v2339_v0, %v9046_v43  ;;  %v2315_v28 = vsel %vm11258_vm6, %v11257_v7, %v9034_v18  ;;  %vm11260_vm9 = vmmov %vm11251_vm12  ;;  %v2090_v29 = vsel %vm11220_vm4, %v8679_v24, 0.0  ;;  %v2089_v24 = vsel %vm11222_vm10, %v8718_v23, 0.0  ;;  %v11283_v23 = vld [vmem:[#allocation7_spill] sm:$0xff] }
 0x3bf   :  { %v2333_v39 = vsel %vm11251_vm12, %v2325_v31, %v2211_v6  ;;  %v2415_v6 = vsel %vm11255_vm11, %v9066_v60, 0.0  ;;  %vm11261_vm12 = vmmov %vm11260_vm9  ;;  %v11264_v31 = vld [vmem:[#allocation10_spill] sm:$0xff] }
 0x3c0   :  { %2536 = vrot.lane.b32.xlu0 %v2406_v53, %s6980_s29  ;;  %2691 = vmatpush1.msra.mxu1 %v2333_v39  ;;  %v2355_v62 = vsel %vm11261_vm12, %v2347_v4, %v9015_v50  ;;  %vm11262_vm15 = vmmov %vm11254_vm0 }
 0x3c1   :  { %2504 = vrot.lane.b32.xlu1 %v2388_v55, %s6981_s30  ;;  %2692 = vmatprep.subr.mxu1 %v2356_v63  ;;  %v2346_v58 = vsel %vm11262_vm15, %v2338_v36, %v2269_v49  ;;  %vm11263_vm14 = vmmov %vm11254_vm0  ;;  %v11271_v55 = vld [vmem:[#allocation12_spill] sm:$0xff] }
 0x3c2   :  { %v2137_v14 = vpop.permute.xlu0 %2136  ;;  %v2209_v22 = vpop.permute.xlu1 %2208  ;;  %v2323_v18 = vsel %vm11263_vm14, %v2315_v28, %v9003_v32  ;;  %vm11265_vm0 = vmmov %vm11249_vm1 }
 0x3c3   :  { %v2332_v43 = vsel %vm11260_vm9, %v2324_v37, %v2209_v22  ;;  %v2314_v25 = vsel %vm11265_vm0, %v11264_v31, %v9072_v35  ;;  %vm11266_vm7 = vmmov %vm11260_vm9  ;;  %v2336_v63 = vsel %vm11265_vm0, %v2090_v29, %v2233_v46 }
 0x3c4   :  { %2568 = vrot.lane.b32.xlu0 %v2415_v6, %s6982_s15  ;;  %2693 = vmatpush1.msra.mxu1 %v2332_v43  ;;  %vm11267_vm6 = vmmov %vm11265_vm0 }
 0x3c5   :  { %2694 = vmatprep.subr.mxu1 %v2355_v62  ;;  %v2337_v49 = vsel %vm11267_vm6, %v2091_v9, %v2235_v10  ;;  %vm11268_vm9 = vmmov %vm11266_vm7 }
 0x3c6   :  { %v2265_v48 = vpop.permute.xlu0 %2264  ;;  %v2207_v53 = vpop.permute.xlu1 %2206  ;;  %v2354_v32 = vsel %vm11268_vm9, %v2346_v58, %v9039_v12  ;;  %vm11269_vm1 = vmmov %vm11263_vm14 }
 0x3c7   :  { %v2331_v50 = vsel %vm11266_vm7, %v2323_v18, %v2207_v53  ;;  %v2345_v54 = vsel %vm11269_vm1, %v2337_v49, %v2267_v11  ;;  %vm11270_vm12 = vmmov %vm11269_vm1 }
 0x3c8   :  { %2594 = vrot.lane.b32.xlu0 %v8982_v45, %s6981_s30  ;;  %2695 = vmatpush1.msra.mxu1 %v2331_v50  ;;  %v2322_v39 = vsel %vm11270_vm12, %v2314_v25, %v9025_v52  ;;  %vm11272_vm15 = vmmov %vm11265_vm0  ;;  %v2353_v12 = vsel %vm11266_vm7, %v2345_v54, %v9063_v21  ;;  %v9237_v50 = vld [vmem:[%s10928_s10] sm:$0xff] }
 0x3c9   :  { %2696 = vmatprep.subr.mxu1 %v2354_v32  ;;  %v2313_v0 = vsel %vm11272_vm15, %v11271_v55, %v2139_v41  ;;  %vm11273_vm14 = vmmov %vm11266_vm7 }
 0x3ca   :  { %v2231_v56 = vpop.permute.xlu0 %2230  ;;  %v2205_v35 = vpop.permute.xlu1 %2204  ;;  %vm11274_vm6 = vmmov %vm11269_vm1 }
 0x3cb   :  { %v2330_v10 = vsel %vm11273_vm14, %v2322_v39, %v2205_v35  ;;  %v2344_v4 = vsel %vm11274_vm6, %v2336_v63, %v2265_v48  ;;  %vm11275_vm9 = vmmov %vm11269_vm1  ;;  %v11289_v48 = vld [vmem:[#allocation15_spill] sm:$0xff] }
 0x3cc   :  { %2697 = vmatpush1.msra.mxu1 %v2330_v10  ;;  %v2321_v52 = vsel %vm11275_vm9, %v2313_v0, %v9051_v17  ;;  %vm11276_vm1 = vmmov %vm11265_vm0 }
 0x3cd   :  { %2698 = vmatprep.subr.mxu1 %v2353_v12  ;;  %v2312_v6 = vsel %vm11276_vm1, %v8649_v13, %v2137_v14  ;;  %vm11277_vm12 = vmmov %vm11266_vm7 }
 0x3ce   :  { %v2135_v11 = vpop.permute.xlu0 %2134  ;;  %v2203_v41 = vpop.permute.xlu1 %2202  ;;  %vm11278_vm15 = vmmov %vm11265_vm0 }
 0x3cf   :  { %v2329_v46 = vsel %vm11277_vm12, %v2321_v52, %v2203_v41  ;;  %v2335_v37 = vsel %vm11278_vm15, %v2089_v24, %v2231_v56  ;;  %vm11279_vm14 = vmmov %vm11266_vm7 }
 0x3d0   :  { %2699 = vmatpush1.msra.mxu1 %v2329_v46  ;;  %v2352_v21 = vsel %vm11279_vm14, %v2344_v4, %v9087_v15  ;;  %vm11280_vm0 = vmmov %vm11274_vm6 }
 0x3d1   :  { %2700 = vmatprep.subr.mxu1 %v2352_v21  ;;  %vm11281_vm7 = vmmov %vm11280_vm0 }
 0x3d2   :  { %v2263_v22 = vpop.permute.xlu0 %2262  ;;  %v2320_v7 = vsel %vm11281_vm7, %v2312_v6, %v9077_v26  ;;  %vm11282_vm6 = vmmov %vm11277_vm12  ;;  %v2088_v26 = vsel %vm11255_vm11, %v8766_v30, 0.0 }
 0x3d3   :  { %v2343_v17 = vsel %vm11280_vm0, %v2335_v37, %v2263_v22  ;;  %v2201_v13 = vpop.permute.xlu1 %2200  ;;  %vm11284_vm9 = vmmov %vm11276_vm1  ;;  %v2404_v22 = vsel %vm7890_vm2, %v8932_v44, 0.0 }
 0x3d4   :  { %v2351_v14 = vsel %vm11282_vm6, %v2343_v17, %v9109_v61  ;;  %v2311_v28 = vsel %vm11284_vm9, %v11283_v23, %v2135_v11  ;;  %vm11285_vm1 = vmmov %vm11282_vm6 }
 0x3d5   :  { %v2328_v5 = vsel %vm11285_vm1, %v2320_v7, %v2201_v13  ;;  %vm11286_vm12 = vmmov %vm11280_vm0 }
 0x3d6   :  { %2701 = vmatpush1.msra.mxu1 %v2328_v5  ;;  %v2229_v34 = vpop.permute.xlu0 %2228  ;;  %v2319_v15 = vsel %vm11286_vm12, %v2311_v28, %v9097_v47  ;;  %vm11287_vm15 = vmmov %vm11285_vm1  ;;  %v2403_v5 = vsel %vm11059_vm8, %v8966_v2, 0.0 }
 0x3d7   :  { %2702 = vmatprep.subr.mxu1 %v2351_v14  ;;  %v2199_v43 = vpop.permute.xlu1 %2198  ;;  %vm11288_vm14 = vmmov %vm11284_vm9 }
 0x3d8   :  { %v2327_v36 = vsel %vm11287_vm15, %v2319_v15, %v2199_v43  ;;  %v2334_v61 = vsel %vm11288_vm14, %v2088_v26, %v2229_v34  ;;  %vm11290_vm0 = vmmov %vm11284_vm9 }
 0x3d9   :  { %2703 = vmatpush1.msra.mxu1 %v2327_v36  ;;  %v2310_v58 = vsel %vm11290_vm0, %v11289_v48, %v8936_v33  ;;  %vm11291_vm6 = vmmov %vm11285_vm1  ;;  %v11302_v36 = vld [vmem:[#allocation13_spill] sm:$0xff] }
 0x3da   :  { %v2261_v62 = vpop.permute.xlu0 %2260  ;;  %vm11292_vm9 = vmmov %vm11281_vm7 }
 0x3db   :  { %v2342_v18 = vsel %vm11281_vm7, %v2334_v61, %v2261_v62  ;;  %v2487_v53 = vpop.permute.xlu1 %2486  ;;  %v2318_v30 = vsel %vm11292_vm9, %v2310_v58, %v8902_v42  ;;  %vm11293_vm12 = vmmov %vm11281_vm7  ;;  %v11304_v61 = vld [vmem:[#allocation17_spill] sm:$0xff] }
 0x3dc   :  { %v2350_v47 = vsel %vm11291_vm6, %v2342_v18, %v8948_v20  ;;  %v9243_v20 = vld [vmem:[#allocation4] sm:$0xff]  ;;  %vm11294_vm15 = vmmov %vm11281_vm7  ;;  %v2402_v62 = vsel %vm11236_vm13, %v11304_v61, 0.0 }
 0x3dd   :  { %2704 = vmatprep.subr.mxu1 %v2350_v47  ;;  %vm11295_vm14 = vmmov %vm11290_vm0  ;;  %v11309_v47 = vld [vmem:[#allocation14_spill] sm:$0xff] }
 0x3de   :  { %v2197_v31 = vpop.permute.xlu0 %2196  ;;  %vm11296_vm0 = vmmov %vm11281_vm7  ;;  %v3010_v61 = vld [vmem:[%s10929_s4 + $0x100] sm:$0xff] }
 0x3df   :  { %v2326_v25 = vsel %vm11285_vm1, %v2318_v30, %v2197_v31  ;;  %v2485_v9 = vpop.permute.xlu1 %2484  ;;  %vm11297_vm7 = vmmov %vm11285_vm1  ;;  %v11310_v31 = vld [vmem:[#allocation20_spill] sm:$0xff] }
 0x3e0   :  { %2705 = vmatpush1.msra.mxu1 %v2326_v25  ;;  %vm11298_vm6 = vmmov %vm11295_vm14  ;;  %v2401_v8 = vsel %vm11240_vm3, %v11310_v31, 0.0 }
 0x3e1   :  { %5753 = vmatmul.mubr.msk.f32.vlgmr.msra.gmra.mxu1 %vm11293_vm12, %v9237_v50  ;;  %vm11299_vm9 = vmmov %vm11298_vm6 }
 0x3e2   :  { %v9241_v33 = vpop.permute.xlu0 %2441  ;;  %2744 = vmatprep.mubr.f32.mxu1 %v9243_v20  ;;  %vm11300_vm2 = vmmov %vm11296_vm0 }
 0x3e3   :  { %v2607_v42 = vpop.permute.xlu1 %2606  ;;  %vm11301_vm1 = vmmov %vm11296_vm0 }
 0x3e4   :  { %vm11303_vm12 = vmmov %vm11298_vm6 }
 0x3e5   :  { %5754 = vmatmul.mubr.msk.f32.gmra.mxu1 %vm11294_vm15, %v8806_v3  ;;  %vm11305_vm15 = vmmov %vm11297_vm7 }
 0x3e6   :  { %v2583_v49 = vpop.permute.xlu0 %2582  ;;  %2890 = vmatprep.mubr.f32.mxu1 %v9243_v20  ;;  %vm11306_vm8 = vmmov %vm11298_vm6 }
 0x3e7   :  { %v2483_v32 = vpop.permute.xlu1 %2482 }
 0x3ea   :  { %v2549_v56 = vpop.permute.xlu0 %2548 }
 0x3eb   :  { %v2605_v54 = vpop.permute.xlu1 %2604  ;;  %v2648_v1 = vsel %vm11299_vm9, %v2403_v5, %v2549_v56  ;;  %vm11312_vm9 = vmmov %vm11298_vm6  ;;  %v3012_v5 = vld [vmem:[%s10929_s4 + $0x110] sm:$0xff] }
 0x3ec   :  { %6468 = vmatprep.subr.mxu0 %v3012_v5 }
 0x3ed   :  { %6469 = vmatpush3.msra.mxu0 %v3012_v5  ;;  %v2982_v5 = vld [vmem:[%s10929_s4 + $0x20] sm:$0xff] }
 0x3ee   :  { %v2454_v39 = vpop.permute.xlu0 %2453 }
 0x3ef   :  { %v9249_v35 = vpop.permute.xlu1 %2480 }
 0x3f2   :  { %v2581_v55 = vpop.permute.xlu0 %2580 }
 0x3f3   :  { %v2603_v0 = vpop.permute.xlu1 %2602  ;;  %v2656_v15 = vsel %vm11300_vm2, %v2648_v1, %v2581_v55 }
 0x3f6   :  { %v2547_v29 = vpop.permute.xlu0 %2546 }
 0x3f7   :  { %v9251_v10 = vpop.permute.xlu1 %2478  ;;  %v2647_v2 = vsel %vm11306_vm8, %v2402_v62, %v2547_v29  ;;  %v11316_v29 = vld [vmem:[#allocation16_spill] sm:$0xff]  ;;  %vm11320_vm8 = vmmov %vm11298_vm6 }
 0x3fa   :  { %v2452_v63 = vpop.permute.xlu0 %2451 }
 0x3fb   :  { %v9253_v12 = vpop.permute.xlu1 %2600  ;;  %v2623_v30 = vsel %vm11298_vm6, %v11309_v47, %v2452_v63 }
 0x3fe   :  { %v2579_v11 = vpop.permute.xlu0 %2578 }
 0x3ff   :  { %v9255_v4 = vpop.permute.xlu1 %2476  ;;  %v2655_v58 = vsel %vm11296_vm0, %v2647_v2, %v2579_v11  ;;  %v11318_v11 = vld [vmem:[#allocation22_spill] sm:$0xff]  ;;  %v2398_v2 = vsel %vm11222_vm10, %v9066_v60, 0.0 }
 0x400   :  { %v2400_v38 = vsel %vm11243_vm5, %v11318_v11, 0.0  ;;  %vm11323_vm5 = vmmov %vm11298_vm6  ;;  %v3007_v11 = vld [vmem:[%s10929_s4 + $0xe8] sm:$0xff] }
 0x402   :  { %v2545_v52 = vpop.permute.xlu0 %2544 }
 0x403   :  { %v9257_v41 = vpop.permute.xlu1 %2598 }
 0x406   :  { %v2450_v6 = vpop.permute.xlu0 %2449 }
 0x407   :  { %v9259_v24 = vpop.permute.xlu1 %2474 }
 0x40a   :  { %v2577_v46 = vpop.permute.xlu0 %2576 }
 0x40b   :  { %v9261_v37 = vpop.permute.xlu1 %2596 }
 0x40e   :  { %v2543_v21 = vpop.permute.xlu0 %2542 }
 0x40f   :  { %v2551_v17 = vpop.permute.xlu1 %2550 }
 0x410   :  { %v2649_v7 = vsel %vm11295_vm14, %v2404_v22, %v2551_v17  ;;  %vm11307_vm14 = vmmov %vm11297_vm7 }
 0x411   :  { %v2657_v13 = vsel %vm11296_vm0, %v2649_v7, %v2583_v49  ;;  %vm11311_vm13 = vmmov %vm11307_vm14  ;;  %v2646_v49 = vsel %vm11312_vm9, %v2401_v8, %v2545_v52  ;;  %v2645_v52 = vsel %vm11320_vm8, %v2400_v38, %v2543_v21  ;;  %v11322_v7 = vld [vmem:[#allocation24_spill] sm:$0xff]  ;;  %v11347_v8 = vld [vmem:[#allocation25_spill] sm:$0xff] }
 0x412   :  { %v2448_v14 = vpop.permute.xlu0 %2447  ;;  %v2665_v23 = vsel %vm11297_vm7, %v2657_v13, %v8929_v16  ;;  %v2624_v16 = vsel %vm11303_vm12, %v11302_v36, %v2454_v39  ;;  %vm11308_vm7 = vmmov %vm11296_vm0  ;;  %v2991_v38 = vld [vmem:[%s10929_s4 + $0x68] sm:$0xff] }
 0x413   :  { %v2456_v28 = vpop.permute.xlu1 %2455  ;;  %2842 = vmatprep.subr.mxu1 %v2665_v23  ;;  %v2632_v18 = vsel %vm11308_vm7, %v2624_v16, %v2485_v9  ;;  %vm11313_vm2 = vmmov %vm11311_vm13 }
 0x414   :  { %v2625_v34 = vsel %vm11298_vm6, %v8897_v51, %v2456_v28  ;;  %v2664_v51 = vsel %vm11307_vm14, %v2656_v15, %v2607_v42  ;;  %v2663_v42 = vsel %vm11313_vm2, %v2655_v58, %v2605_v54  ;;  %vm11315_vm12 = vmmov %vm11296_vm0 }
 0x415   :  { %v2633_v43 = vsel %vm11301_vm1, %v2625_v34, %v2487_v53  ;;  %vm11314_vm1 = vmmov %vm11296_vm0  ;;  %v2631_v9 = vsel %vm11315_vm12, %v2623_v30, %v2483_v32  ;;  %v2399_v32 = vsel %vm11220_vm4, %v11322_v7, 0.0  ;;  %v11345_v30 = vld [vmem:[#allocation23_spill] sm:$0xff] }
 0x416   :  { %v2575_v44 = vpop.permute.xlu0 %2574  ;;  %v2654_v39 = vsel %vm11314_vm1, %v2646_v49, %v2577_v46  ;;  %vm11319_vm3 = vmmov %vm11313_vm2  ;;  %v2987_v7 = vld [vmem:[%s10929_s4 + $0x48] sm:$0xff] }
 0x417   :  { %v2519_v26 = vpop.permute.xlu1 %2518  ;;  %vm11321_vm14 = vmmov %vm11313_vm2  ;;  %v2653_v46 = vsel %vm11296_vm0, %v2645_v52, %v2575_v44  ;;  %v3005_v52 = vld [vmem:[%s10929_s4 + $0xd8] sm:$0xff] }
 0x418   :  { %v2641_v57 = vsel %vm11305_vm15, %v2633_v43, %v2519_v26  ;;  %vm11317_vm15 = vmmov %vm11298_vm6  ;;  %v2662_v54 = vsel %vm11321_vm14, %v2654_v39, %v2603_v0  ;;  %v11325_v0 = vld [vmem:[#allocation18_spill] sm:$0xff]  ;;  %v11332_v26 = vld [vmem:[#allocation21_spill] sm:$0xff] }
 0x419   :  { %2843 = vmatpush1.msra.mxu1 %v2641_v57  ;;  %v2622_v63 = vsel %vm11317_vm15, %v11316_v29, %v2450_v6  ;;  %vm11324_vm7 = vmmov %vm11296_vm0  ;;  %v3008_v29 = vld [vmem:[%s10929_s4 + $0xf0] sm:$0xff] }
 0x41a   :  { %v2541_v48 = vpop.permute.xlu0 %2540  ;;  %2844 = vmatprep.subr.mxu1 %v2664_v51  ;;  %v2630_v21 = vsel %vm11324_vm7, %v2622_v63, %v9249_v35  ;;  %vm11326_vm6 = vmmov %vm11323_vm5  ;;  %v2992_v63 = vld [vmem:[%s10929_s4 + $0x70] sm:$0xff] }
 0x41b   :  { %v2517_v53 = vpop.permute.xlu1 %2516  ;;  %v2644_v6 = vsel %vm11323_vm5, %v2399_v32, %v2541_v48  ;;  %v2621_v23 = vsel %vm11326_vm6, %v11325_v0, %v2448_v14  ;;  %vm11328_vm9 = vmmov %vm11296_vm0  ;;  %v3011_v14 = vld [vmem:[%s10929_s4 + $0x108] sm:$0xff]  ;;  %v3002_v32 = vld [vmem:[%s10929_s4 + $0xc0] sm:$0xff] }
 0x41c   :  { %v2640_v25 = vsel %vm11311_vm13, %v2632_v18, %v2517_v53  ;;  %vm11327_vm13 = vmmov %vm11313_vm2  ;;  %6470 = vmatprep.subr.mxu0 %v3011_v14  ;;  %v2984_v0 = vld [vmem:[%s10929_s4 + $0x30] sm:$0xff] }
 0x41d   :  { %2845 = vmatpush1.msra.mxu1 %v2640_v25  ;;  %vm11329_vm4 = vmmov %vm11313_vm2  ;;  %6471 = vmatpush3.msra.mxu0 %v3011_v14  ;;  %v2980_v14 = vld [vmem:[%s10929_s4 + $0x10] sm:$0xff] }
 0x41e   :  { %v2446_v56 = vpop.permute.xlu0 %2445  ;;  %2846 = vmatprep.subr.mxu1 %v2663_v42  ;;  %v2661_v34 = vsel %vm11329_vm4, %v2653_v46, %v9253_v12  ;;  %vm11330_vm2 = vmmov %vm11296_vm0  ;;  %6472 = vmatprep.subr.mxu0 %v3010_v61  ;;  %v3003_v46 = vld [vmem:[%s10929_s4 + $0xc8] sm:$0xff] }
 0x41f   :  { %v2515_v55 = vpop.permute.xlu1 %2514  ;;  %v2629_v44 = vsel %vm11330_vm2, %v2621_v23, %v9251_v10  ;;  %vm11331_vm1 = vmmov %vm11319_vm3  ;;  %6473 = vmatpush3.msra.mxu0 %v3010_v61  ;;  %v2999_v23 = vld [vmem:[%s10929_s4 + $0xa8] sm:$0xff] }
 0x420   :  { %v2639_v22 = vsel %vm11319_vm3, %v2631_v9, %v2515_v55  ;;  %vm11333_vm12 = vmmov %vm11323_vm5  ;;  %v3009_v55 = vld [vmem:[%s10929_s4 + $0xf8] sm:$0xff] }
 0x421   :  { %2847 = vmatpush1.msra.mxu1 %v2639_v22  ;;  %v2620_v12 = vsel %vm11333_vm12, %v11332_v26, %v2446_v56  ;;  %vm11334_vm15 = vmmov %vm11331_vm1  ;;  %v11350_v56 = vld [vmem:[#allocation19_spill] sm:$0xff]  ;;  %v2990_v22 = vld [vmem:[%s10929_s4 + $0x60] sm:$0xff] }
 0x422   :  { %v2573_v17 = vpop.permute.xlu0 %2572  ;;  %2848 = vmatprep.subr.mxu1 %v2662_v54  ;;  %v6446_v35 = vpop.f32.mrf.mxu0  ;;  %vm11335_vm3 = vmmov %vm11323_vm5  ;;  %v2989_v54 = vld [vmem:[%s10929_s4 + $0x58] sm:$0xff]  ;;  %v2978_v26 = vld [vmem:[%s10929_s4] sm:$0xff] }
 0x423   :  { %v2513_v13 = vpop.permute.xlu1 %2512  ;;  %v2652_v19 = vsel %vm11328_vm9, %v2644_v6, %v2573_v17  ;;  %vm11336_vm8 = vmmov %vm11296_vm0  ;;  %v2988_v17 = vld [vmem:[%s10929_s4 + $0x50] sm:$0xff]  ;;  %v3001_v6 = vld [vmem:[%s10929_s4 + $0xb8] sm:$0xff] }
 0x424   :  { %v2638_v28 = vsel %vm11327_vm13, %v2630_v21, %v2513_v13  ;;  %v2660_v43 = vsel %vm11331_vm1, %v2652_v19, %v9257_v41  ;;  %v2817_v16 = vpop.f32.mrf.mxu0  ;;  %v2628_v41 = vsel %vm11336_vm8, %v2620_v12, %v9255_v4  ;;  %vm11337_vm14 = vmmov %vm11335_vm3  ;;  %v2985_v21 = vld [vmem:[%s10929_s4 + $0x38] sm:$0xff]  ;;  %v3000_v13 = vld [vmem:[%s10929_s4 + $0xb0] sm:$0xff] }
 0x425   :  { %2849 = vmatpush1.msra.mxu1 %v2638_v28  ;;  %6474 = vmatprep.mubr.msk.f32.mxu0 %vm11337_vm14, %v2817_v16  ;;  %vm11338_vm0 = vmmov %vm11331_vm1  ;;  %v2983_v28 = vld [vmem:[%s10929_s4 + $0x28] sm:$0xff]  ;;  %v2998_v19 = vld [vmem:[%s10929_s4 + $0xa0] sm:$0xff] }
 0x426   :  { %v2539_v1 = vpop.permute.xlu0 %2538  ;;  %2850 = vmatprep.subr.mxu1 %v2661_v34  ;;  %vm11339_vm5 = vmmov %vm11335_vm3  ;;  %v2997_v34 = vld [vmem:[%s10929_s4 + $0x98] sm:$0xff] }
 0x427   :  { %v2511_v15 = vpop.permute.xlu1 %2510  ;;  %6475 = vmatmul.mubr.msk.f32.vlgmr.msra.gmra.mxu0 %vm11339_vm5, %v6446_v35  ;;  %vm11340_vm7 = vmmov %vm11335_vm3  ;;  %v2996_v35 = vld [vmem:[%s10929_s4 + $0x90] sm:$0xff] }
 0x428   :  { %v2637_v36 = vsel %vm11334_vm15, %v2629_v44, %v2511_v15  ;;  %v2643_v48 = vsel %vm11340_vm7, %v2398_v2, %v2539_v1  ;;  %vm11341_vm6 = vmmov %vm11330_vm2  ;;  %v2981_v1 = vld [vmem:[%s10929_s4 + $0x18] sm:$0xff]  ;;  %v2995_v44 = vld [vmem:[%s10929_s4 + $0x88] sm:$0xff] }
 0x429   :  { %2851 = vmatpush1.msra.mxu1 %v2637_v36  ;;  %vm11342_vm13 = vmmov %vm11330_vm2  ;;  %v2979_v15 = vld [vmem:[%s10929_s4 + $0x8] sm:$0xff] }
 0x42a   :  { %v2444_v62 = vpop.permute.xlu0 %2443  ;;  %2852 = vmatprep.subr.mxu1 %v2660_v43  ;;  %vm11343_vm9 = vmmov %vm11338_vm0  ;;  %v2994_v43 = vld [vmem:[%s10929_s4 + $0x80] sm:$0xff] }
 0x42b   :  { %v2619_v10 = vsel %vm11335_vm3, %v8982_v45, %v2444_v62  ;;  %v2509_v57 = vpop.permute.xlu1 %2508  ;;  %vm11344_vm4 = vmmov %vm11338_vm0 }
 0x42c   :  { %v2636_v51 = vsel %vm11338_vm0, %v2628_v41, %v2509_v57  ;;  %v2627_v45 = vsel %vm11341_vm6, %v2619_v10, %v9259_v24  ;;  %vm11346_vm10 = vmmov %vm11335_vm3  ;;  %v2397_v24 = vsel %vm11255_vm11, %v11347_v8, 0.0 }
 0x42d   :  { %2853 = vmatpush1.msra.mxu1 %v2636_v51  ;;  %v2618_v31 = vsel %vm11346_vm10, %v11345_v30, %v9241_v33  ;;  %vm11348_vm2 = vmmov %vm11335_vm3 }
 0x42e   :  { %v2571_v58 = vpop.permute.xlu0 %2570  ;;  %vm11349_vm1 = vmmov %vm11341_vm6 }
 0x42f   :  { %v2651_v4 = vsel %vm11342_vm13, %v2643_v48, %v2571_v58  ;;  %v2507_v18 = vpop.permute.xlu1 %2506  ;;  %vm11351_vm12 = vmmov %vm11349_vm1 }
 0x430   :  { %v2659_v53 = vsel %vm11343_vm9, %v2651_v4, %v9261_v37  ;;  %v2635_v59 = vsel %vm11344_vm4, %v2627_v45, %v2507_v18  ;;  %v2626_v39 = vsel %vm11351_vm12, %v2618_v31, %v11350_v56  ;;  %vm11352_vm15 = vmmov %vm11338_vm0  ;;  %vm3263_vm9 = vcmask 519168  }
 0x431   :  { %2854 = vmatprep.subr.mxu1 %v2659_v53  ;;  %vm11353_vm3 = vmmov %vm11338_vm0  ;;  %3264 = vst.msk [vmem:[#allocation3 + $0x30] sm:$0xf] %vm3263_vm9, %v9243_v20 }
 0x432   :  { %v2537_v60 = vpop.permute.xlu0 %2536  ;;  %2855 = vmatpush1.msra.mxu1 %v2635_v59  ;;  %vm11354_vm11 = vmmov %vm11349_vm1  ;;  %v6465_v12 = vpop.f32.mrf.mxu0 }
 0x433   :  { %v2505_v25 = vpop.permute.xlu1 %2504  ;;  %v2642_v49 = vsel %vm11348_vm2, %v2397_v24, %v2537_v60  ;;  %vm11355_vm8 = vmmov %vm11349_vm1 }
 0x434   :  { %v2634_v33 = vsel %vm11353_vm3, %v2626_v39, %v2505_v25  ;;  %v2969_v36 = vpop.f32.mrf.mxu0  ;;  %vm11356_vm14 = vmmov %vm11348_vm2 }
 0x435   :  { %6477 = vmatprep.mubr.msk.f32.mxu0 %vm11356_vm14, %v2969_v36  ;;  %vm11357_vm0 = vmmov %vm11348_vm2  ;;  %v3445_v36 = vld [vmem:[%s10930_s5 + $0x30] sm:$0xff] }
 0x436   :  { %v2569_v47 = vpop.permute.xlu0 %2568  ;;  %6478 = vmatmul.mubr.msk.f32.gmra.mxu0 %vm11357_vm0, %v6465_v12  ;;  %vm11358_vm5 = vmmov %vm11349_vm1  ;;  %v3461_v12 = vld [vmem:[%s10930_s5 + $0xb0] sm:$0xff] }
 0x437   :  { %v2650_v42 = vsel %vm11349_vm1, %v2642_v49, %v2569_v47  ;;  %vm11359_vm7 = vmmov %vm11349_vm1 }
 0x438   :  { %vm11360_vm6 = vmmov %vm11349_vm1 }
 0x439   :  { %vm11361_vm13 = vmmov %vm11349_vm1 }
 0x43a   :  { %v2595_v37 = vpop.permute.xlu0 %2594  ;;  %vm11362_vm4 = vmmov %vm11349_vm1 }
 0x43b   :  { %v2658_v9 = vsel %vm11352_vm15, %v2650_v42, %v2595_v37  ;;  %vm11363_vm10 = vmmov %vm11349_vm1 }
 0x43c   :  { %2856 = vmatprep.subr.mxu1 %v2658_v9  ;;  %vm11374_vm3 = vmmov %vm11362_vm4 }
 0x43d   :  { %2857 = vmatpush1.msra.mxu1 %v2634_v33  ;;  %vm11377_vm14 = vmmov %vm11374_vm3 }
 0x43e   :  { %5765 = vmatmul.mubr.msk.f32.vlgmr.msra.gmra.mxu1 %vm11354_vm11, %v9237_v50  ;;  %5940 = vmatprep.subr.mxu1 %v3009_v55  ;;  %v3006_v50 = vld [vmem:[%s10929_s4 + $0xe0] sm:$0xff]  ;;  %vm11375_vm11 = vmmov %vm11374_vm3 }
 0x43f   :  { %2896 = vmatprep.mubr.f32.mxu1 %v9243_v20  ;;  %5941 = vmatpush3.msra.mxu1 %v2993_v27  ;;  %vm11378_vm0 = vmmov %vm11374_vm3 }
 0x440   :  { %5942 = vmatprep.subr.mxu1 %v3008_v29 }
 0x441   :  { %5943 = vmatpush3.msra.mxu1 %v2992_v63 }
 0x442   :  { %5766 = vmatmul.mubr.msk.f32.gmra.mxu1 %vm11355_vm8, %v8806_v3  ;;  %5944 = vmatprep.subr.mxu1 %v3007_v11  ;;  %v3004_v3 = vld [vmem:[%s10929_s4 + $0xd0] sm:$0xff]  ;;  %vm11376_vm8 = vmmov %vm11374_vm3 }
 0x443   :  { %5945 = vmatpush3.msra.mxu1 %v2991_v38 }
 0x444   :  { %5946 = vmatprep.subr.mxu1 %v3006_v50 }
 0x445   :  { %5947 = vmatpush3.msra.mxu1 %v2990_v22  ;;  %v3470_v22 = vld [vmem:[%s10930_s5 + $0xf8] sm:$0xff] }
 0x446   :  { %5948 = vmatprep.subr.mxu1 %v3005_v52  ;;  %v3454_v52 = vld [vmem:[%s10930_s5 + $0x78] sm:$0xff]  ;;  %5992 = vmatprep.subr.mxu0 %v3470_v22 }
 0x447   :  { %5949 = vmatpush3.msra.mxu1 %v2989_v54  ;;  %v3469_v54 = vld [vmem:[%s10930_s5 + $0xf0] sm:$0xff]  ;;  %5993 = vmatpush3.msra.mxu0 %v3454_v52 }
 0x448   :  { %5950 = vmatprep.subr.mxu1 %v3004_v3  ;;  %v3453_v3 = vld [vmem:[%s10930_s5 + $0x70] sm:$0xff]  ;;  %5994 = vmatprep.subr.mxu0 %v3469_v54 }
 0x449   :  { %5951 = vmatpush3.msra.mxu1 %v2988_v17  ;;  %5995 = vmatpush3.msra.mxu0 %v3453_v3  ;;  %v3502_v3 = vld [vmem:[%s10930_s5 + $0x1f8] sm:$0xff] }
 0x44a   :  { %5952 = vmatprep.subr.mxu1 %v3003_v46  ;;  %v3468_v46 = vld [vmem:[%s10930_s5 + $0xe8] sm:$0xff] }
 0x44b   :  { %5953 = vmatpush3.msra.mxu1 %v2987_v7  ;;  %v3452_v7 = vld [vmem:[%s10930_s5 + $0x68] sm:$0xff]  ;;  %5996 = vmatprep.subr.mxu0 %v3468_v46  ;;  %v3501_v46 = vld [vmem:[%s10930_s5 + $0x1f0] sm:$0xff] }
 0x44c   :  { %5954 = vmatprep.subr.mxu1 %v3002_v32  ;;  %5997 = vmatpush3.msra.mxu0 %v3452_v7  ;;  %v3485_v7 = vld [vmem:[%s10930_s5 + $0x170] sm:$0xff] }
 0x44d   :  { %5955 = vmatpush3.msra.mxu1 %v2986_v40  ;;  %v3467_v40 = vld [vmem:[%s10930_s5 + $0xe0] sm:$0xff] }
 0x44e   :  { %5956 = vmatprep.subr.mxu1 %v3001_v6  ;;  %5998 = vmatprep.subr.mxu0 %v3467_v40  ;;  %v3484_v40 = vld [vmem:[%s10930_s5 + $0x168] sm:$0xff] }
 0x44f   :  { %5957 = vmatpush3.msra.mxu1 %v2985_v21 }
 0x450   :  { %5958 = vmatprep.subr.mxu1 %v3000_v13 }
 0x451   :  { %5959 = vmatpush3.msra.mxu1 %v2984_v0  ;;  %v3451_v0 = vld [vmem:[%s10930_s5 + $0x60] sm:$0xff] }
 0x452   :  { %5960 = vmatprep.subr.mxu1 %v2999_v23  ;;  %v3466_v23 = vld [vmem:[%s10930_s5 + $0xd8] sm:$0xff]  ;;  %5999 = vmatpush3.msra.mxu0 %v3451_v0 }
 0x453   :  { %5961 = vmatpush3.msra.mxu1 %v2983_v28  ;;  %v3450_v28 = vld [vmem:[%s10930_s5 + $0x58] sm:$0xff]  ;;  %6000 = vmatprep.subr.mxu0 %v3466_v23  ;;  %v3497_v23 = vld [vmem:[%s10930_s5 + $0x1d0] sm:$0xff] }
 0x454   :  { %5962 = vmatprep.subr.mxu1 %v2998_v19  ;;  %v3465_v19 = vld [vmem:[%s10930_s5 + $0xd0] sm:$0xff]  ;;  %6001 = vmatpush3.msra.mxu0 %v3450_v28  ;;  %v3482_v0 = vld [vmem:[%s10930_s5 + $0x158] sm:$0xff] }
 0x455   :  { %5963 = vmatpush3.msra.mxu1 %v2982_v5  ;;  %6002 = vmatprep.subr.mxu0 %v3465_v19 }
 0x456   :  { %5964 = vmatprep.subr.mxu1 %v2997_v34 }
 0x457   :  { %5965 = vmatpush3.msra.mxu1 %v2981_v1  ;;  %v3449_v1 = vld [vmem:[%s10930_s5 + $0x50] sm:$0xff] }
 0x458   :  { %5966 = vmatprep.subr.mxu1 %v2996_v35  ;;  %v3464_v35 = vld [vmem:[%s10930_s5 + $0xc8] sm:$0xff]  ;;  %6003 = vmatpush3.msra.mxu0 %v3449_v1 }
 0x459   :  { %5967 = vmatpush3.msra.mxu1 %v2980_v14  ;;  %v3448_v14 = vld [vmem:[%s10930_s5 + $0x48] sm:$0xff]  ;;  %6004 = vmatprep.subr.mxu0 %v3464_v35 }
 0x45a   :  { %5968 = vmatprep.subr.mxu1 %v2995_v44  ;;  %v3463_v44 = vld [vmem:[%s10930_s5 + $0xc0] sm:$0xff]  ;;  %6005 = vmatpush3.msra.mxu0 %v3448_v14  ;;  %v3496_v35 = vld [vmem:[%s10930_s5 + $0x1c8] sm:$0xff] }
 0x45b   :  { %5969 = vmatpush3.msra.mxu1 %v2979_v15  ;;  %6006 = vmatprep.subr.mxu0 %v3463_v44  ;;  %v3447_v15 = vld [vmem:[%s10930_s5 + $0x40] sm:$0xff] }
 0x45c   :  { %5970 = vmatprep.subr.mxu1 %v2994_v43  ;;  %v3462_v43 = vld [vmem:[%s10930_s5 + $0xb8] sm:$0xff]  ;;  %6007 = vmatpush3.msra.mxu0 %v3447_v15  ;;  %v3480_v15 = vld [vmem:[%s10930_s5 + $0x148] sm:$0xff] }
 0x45d   :  { %5971 = vmatpush3.msra.mxu1 %v2978_v26  ;;  %v3446_v26 = vld [vmem:[%s10930_s5 + $0x38] sm:$0xff]  ;;  %6008 = vmatprep.subr.mxu0 %v3462_v43 }
 0x45e   :  { %6009 = vmatpush3.msra.mxu0 %v3446_v26  ;;  %6036 = vmatprep.subr.mxu1 %v3502_v3  ;;  %v3495_v26 = vld [vmem:[%s10930_s5 + $0x1c0] sm:$0xff] }
 0x45f   :  { %6010 = vmatprep.subr.mxu0 %v3461_v12  ;;  %v3479_v12 = vld [vmem:[%s10930_s5 + $0x140] sm:$0xff] }
 0x460   :  { %6011 = vmatpush3.msra.mxu0 %v3445_v36 }
 0x4a1   :  { %v9470_v16 = vpop.f32.mrf.mxu1 }
 0x4a3   :  { %v2742_v61 = vpop.f32.mrf.mxu1 }
 0x4a4   :  { %3090 = vmatprep.mubr.f32.mxu1 %v2742_v61  ;;  %v3460_v61 = vld [vmem:[%s10930_s5 + $0xa8] sm:$0xff] }
 0x4a5   :  { %v9472_v62 = vpop.f32.mrf.mxu1  ;;  %3091 = vmatmul.mubr.f32.vlgmr.msra.gmra.mxu1 %v9470_v16  ;;  %6012 = vmatprep.subr.mxu0 %v3460_v61 }
 0x4a7   :  { %v2748_v10 = vpop.f32.mrf.mxu1 }
 0x4a8   :  { %3095 = vmatprep.mubr.f32.mxu1 %v2748_v10  ;;  %v3444_v10 = vld [vmem:[%s10930_s5 + $0x28] sm:$0xff] }
 0x4a9   :  { %3096 = vmatmul.mubr.f32.gmra.mxu1 %v9472_v62  ;;  %6013 = vmatpush3.msra.mxu0 %v3444_v10  ;;  %v3494_v10 = vld [vmem:[%s10930_s5 + $0x1b8] sm:$0xff] }
 0x4e7   :  { %v6476_v48 = vpop.f32.mrf.mxu0 }
 0x4e9   :  { %v3177_v4 = vpop.f32.mrf.mxu0 }
 0x4f6   :  { %v6479_v61 = vpop.f32.mrf.mxu0 }
 0x4fe   :  { %v9476_v41 = vpop.f32.mrf.mxu1 }
 0x500   :  { %v2894_v57 = vpop.f32.mrf.mxu1 }
 0x501   :  { %3100 = vmatprep.mubr.f32.mxu1 %v2894_v57  ;;  %v3459_v57 = vld [vmem:[%s10930_s5 + $0xa0] sm:$0xff] }
 0x502   :  { %v9478_v2 = vpop.f32.mrf.mxu1  ;;  %3101 = vmatmul.mubr.f32.gmra.mxu1 %v9476_v41  ;;  %6014 = vmatprep.subr.mxu0 %v3459_v57  ;;  %v3478_v57 = vld [vmem:[%s10930_s5 + $0x138] sm:$0xff] }
 0x504   :  { %v2900_v51 = vpop.f32.mrf.mxu1 }
 0x505   :  { %3105 = vmatprep.mubr.f32.mxu1 %v2900_v51  ;;  %v3443_v51 = vld [vmem:[%s10930_s5 + $0x20] sm:$0xff] }
 0x506   :  { %3106 = vmatmul.mubr.f32.gmra.mxu1 %v9478_v2  ;;  %6015 = vmatpush3.msra.mxu0 %v3443_v51 }
 0x565   :  { %v5972_v45 = vpop.f32.mrf.mxu1 }
 0x567   :  { %v5973_v58 = vpop.f32.mrf.mxu1 }
 0x568   :  { %v5974_v18 = vadd.f32 %v5973_v58, %v5972_v45  ;;  %v3442_v45 = vld [vmem:[%s10930_s5 + $0x18] sm:$0xff]  ;;  %v3457_v58 = vld [vmem:[%s10930_s5 + $0x90] sm:$0xff] }
 0x569   :  { %v5975_v53 = vpop.f32.mrf.mxu1 }
 0x56a   :  { %v3178_v59 = vadd.f32 %v5974_v18, %v3177_v4  ;;  %v3441_v4 = vld [vmem:[%s10930_s5 + $0x10] sm:$0xff] }
 0x56b   :  { %v5976_v60 = vpop.f32.mrf.mxu1 }
 0x56c   :  { %v5977_v47 = vadd.f32 %v5976_v60, %v5975_v53  ;;  %v3196_v31 = vsel %vm11358_vm5, %v3178_v59, 0.0  ;;  %vm11379_vm5 = vmmov %vm11378_vm0 }
 0x56e   :  { %v3183_v30 = vadd.f32 %v6476_v48, %v5977_v47  ;;  %v3458_v48 = vld [vmem:[%s10930_s5 + $0x98] sm:$0xff] }
 0x56f   :  { %6016 = vmatprep.subr.mxu0 %v3458_v48  ;;  %v3493_v48 = vld [vmem:[%s10930_s5 + $0x1b0] sm:$0xff] }
 0x570   :  { %v3197_v8 = vsel %vm11359_vm7, %v3183_v30, 0.0  ;;  %6017 = vmatpush3.msra.mxu0 %v3442_v45  ;;  %vm11380_vm7 = vmmov %vm11378_vm0 }
 0x571   :  { %v3198_v24 = vadd.f32 %v3197_v8, %v3196_v31  ;;  %6018 = vmatprep.subr.mxu0 %v3457_v58  ;;  %v3440_v31 = vld [vmem:[%s10930_s5 + $0x8] sm:$0xff]  ;;  %v3455_v8 = vld [vmem:[%s10930_s5 + $0x80] sm:$0xff]  ;;  %v3477_v58 = vld [vmem:[%s10930_s5 + $0x130] sm:$0xff] }
 0x572   :  { %6019 = vmatpush3.msra.mxu0 %v3441_v4  ;;  %v3187_v4 = vpop.f32.mrf.mxu0 }
 0x573   :  { %v3199_v25 = vrot.slane %v3198_v24, 4 }
 0x575   :  { %v3200_v49 = vadd.f32 %v3199_v25, %v3198_v24  ;;  %v3439_v24 = vld [vmem:[%s10930_s5] sm:$0xff] }
 0x576   :  { %v11364_v25 = vld [vmem:[#allocation6_spill] sm:$0xff] }
 0x577   :  { %v3201_v42 = vrot.slane %v3200_v49, 2 }
 0x579   :  { %v3202_v37 = vadd.f32 %v3201_v42, %v3200_v49  ;;  %v3280_v49 = vand.u32 3, %v11364_v25  ;;  %v11365_v42 = vld [vmem:[#allocation5_spill] sm:$0xff] }
 0x57b   :  { %v3203_v56 = vrot.slane %v3202_v37, 1  ;;  %vm9598_vm2 = vcmp.ne.s32.totalorder %v3280_v49, 0  ;;  %vm9602_vm1 = vcmp.ne.s32.totalorder %v3280_v49, 3  ;;  %v3474_v49 = vld [vmem:[%s10930_s5 + $0x118] sm:$0xff] }
 0x57d   :  { %v3204_v39 = vadd.f32 %v3203_v56, %v3202_v37  ;;  %v3273_v37 = vand.u32 3, %v11365_v42 }
 0x57f   :  { %v3206_v9 = vmul.f32 0.0625, %v3204_v39  ;;  %vm9606_vm12 = vcmp.ne.s32.totalorder %v3273_v37, 0  ;;  %vm9610_vm15 = vcmp.ne.s32.totalorder %v3273_v37, 3  ;;  %v3489_v37 = vld [vmem:[%s10930_s5 + $0x190] sm:$0xff]  ;;  %v4585_v39 = vld [vmem:[%s10933_s7 + $0x178] sm:$0xff] }
 0x581   :  { %v9484_v55 = vsub.f32 %v3178_v59, %v3206_v9  ;;  %v9486_v33 = vsub.f32 %v3183_v30, %v3206_v9  ;;  %v3456_v30 = vld [vmem:[%s10930_s5 + $0x88] sm:$0xff] }
 0x582   :  { %6020 = vmatprep.subr.mxu0 %v3456_v30  ;;  %v4599_v9 = vld [vmem:[%s10933_s7 + $0x1e8] sm:$0xff] }
 0x583   :  { %v3209_v27 = vmul.f32 %v9484_v55, %v9484_v55  ;;  %v3210_v29 = vmul.f32 %v9486_v33, %v9486_v33  ;;  %6021 = vmatpush3.msra.mxu0 %v3440_v31 }
 0x584   :  { %6022 = vmatprep.subr.mxu0 %v3455_v8  ;;  %v3475_v8 = vld [vmem:[%s10930_s5 + $0x120] sm:$0xff] }
 0x585   :  { %v3211_v63 = vsel %vm11360_vm6, %v3209_v27, 0.0  ;;  %v3212_v11 = vsel %vm11361_vm13, %v3210_v29, 0.0  ;;  %6023 = vmatpush3.msra.mxu0 %v3439_v24  ;;  %v3490_v24 = vld [vmem:[%s10930_s5 + $0x198] sm:$0xff]  ;;  %vm11381_vm6 = vmmov %vm11378_vm0 }
 0x586   :  { %v3213_v38 = vadd.f32 %v3212_v11, %v3211_v63  ;;  %vm11382_vm13 = vmmov %vm11378_vm0 }
 0x588   :  { %v3214_v50 = vrot.slane %v3213_v38, 4 }
 0x58a   :  { %v3215_v17 = vadd.f32 %v3214_v50, %v3213_v38 }
 0x58c   :  { %v3216_v32 = vrot.slane %v3215_v17, 2 }
 0x58e   :  { %v3217_v6 = vadd.f32 %v3216_v32, %v3215_v17  ;;  %v3486_v17 = vld [vmem:[%s10930_s5 + $0x178] sm:$0xff]  ;;  %v3500_v32 = vld [vmem:[%s10930_s5 + $0x1e8] sm:$0xff] }
 0x58f   :  { %6037 = vmatpush3.msra.mxu1 %v3486_v17 }
 0x590   :  { %v3218_v21 = vrot.slane %v3217_v6, 1  ;;  %6038 = vmatprep.subr.mxu1 %v3501_v46 }
 0x591   :  { %6039 = vmatpush3.msra.mxu1 %v3485_v7 }
 0x592   :  { %v3219_v13 = vadd.f32 %v3218_v21, %v3217_v6  ;;  %v3499_v6 = vld [vmem:[%s10930_s5 + $0x1e0] sm:$0xff]  ;;  %6040 = vmatprep.subr.mxu1 %v3500_v32 }
 0x593   :  { %v3483_v21 = vld [vmem:[%s10930_s5 + $0x160] sm:$0xff]  ;;  %6041 = vmatpush3.msra.mxu1 %v3484_v40 }
 0x594   :  { %v3220_v5 = vmul.f32 0.0625, %v3219_v13  ;;  %v3498_v13 = vld [vmem:[%s10930_s5 + $0x1d8] sm:$0xff]  ;;  %6042 = vmatprep.subr.mxu1 %v3499_v6 }
 0x595   :  { %6043 = vmatpush3.msra.mxu1 %v3483_v21 }
 0x596   :  { %v3221_v34 = vadd.f32 1e-05, %v3220_v5  ;;  %6044 = vmatprep.subr.mxu1 %v3498_v13  ;;  %v3481_v5 = vld [vmem:[%s10930_s5 + $0x150] sm:$0xff] }
 0x597   :  { %6045 = vmatpush3.msra.mxu1 %v3482_v0 }
 0x598   :  { %6939 = vrsqrt.f32 %v3221_v34  ;;  %v9673_v34 = vld [vmem:[%s10930_s5 + $0x238] sm:$0xff]  ;;  %6046 = vmatprep.subr.mxu1 %v3497_v23 }
 0x599   :  { %6480 = vmatprep.subr.mxu0 %v9673_v34  ;;  %6047 = vmatpush3.msra.mxu1 %v3481_v5 }
 0x59a   :  { %6048 = vmatprep.subr.mxu1 %v3496_v35 }
 0x59b   :  { %6049 = vmatpush3.msra.mxu1 %v3480_v15 }
 0x59c   :  { %6050 = vmatprep.subr.mxu1 %v3495_v26 }
 0x59d   :  { %6051 = vmatpush3.msra.mxu1 %v3479_v12 }
 0x59e   :  { %6052 = vmatprep.subr.mxu1 %v3494_v10 }
 0x59f   :  { %6053 = vmatpush3.msra.mxu1 %v3478_v57 }
 0x5a0   :  { %6054 = vmatprep.subr.mxu1 %v3493_v48 }
 0x5a1   :  { %6055 = vmatpush3.msra.mxu1 %v3477_v58  ;;  %v3488_v58 = vld [vmem:[%s10930_s5 + $0x188] sm:$0xff] }
 0x5a5   :  { %v6940_v18 = vpop.eup %6939 }
 0x5a6   :  { %v3223_v53 = vmul.f32 %v6940_v18, %v9484_v55  ;;  %v3224_v59 = vmul.f32 %v6940_v18, %v9486_v33 }
 0x5a8   :  { %v3253_v60 = vmax.f32 %v3223_v53, 0.0  ;;  %v3254_v47 = vmax.f32 %v3224_v59, 0.0  ;;  %v3492_v53 = vld [vmem:[%s10930_s5 + $0x1a8] sm:$0xff] }
 0x5a9   :  { %v3476_v59 = vld [vmem:[%s10930_s5 + $0x128] sm:$0xff]  ;;  %6056 = vmatprep.subr.mxu1 %v3492_v53  ;;  %v3471_v53 = vld [vmem:[%s10930_s5 + $0x100] sm:$0xff] }
 0x5aa   :  { %3265 = vst.msk [vmem:[#allocation3 + $0x8] sm:$0xff] %vm11362_vm4, %v3253_v60  ;;  %6057 = vmatpush3.msra.mxu1 %v3476_v59  ;;  %vm11383_vm4 = vmmov %vm11378_vm0 }
 0x5ab   :  { %3266 = vst.msk [vmem:[#allocation3 + $0x10] sm:$0xff] %vm11363_vm10, %v3254_v47  ;;  %v3491_v47 = vld [vmem:[%s10930_s5 + $0x1a0] sm:$0xff]  ;;  %vm11384_vm10 = vmmov %vm11378_vm0 }
 0x5ac   :  { %6058 = vmatprep.subr.mxu1 %v3491_v47 }
 0x5ad   :  { %6059 = vmatpush3.msra.mxu1 %v3475_v8 }
 0x5ae   :  { %6060 = vmatprep.subr.mxu1 %v3490_v24 }
 0x5af   :  { %6061 = vmatpush3.msra.mxu1 %v3474_v49 }
 0x5b0   :  { %6062 = vmatprep.subr.mxu1 %v3489_v37 }
 0x5b1   :  { %v3299_v29 = vld [vmem:[#allocation3 + $0x3] sm:$0xff] }
 0x5b2   :  { %v9614_v33 = vld [vmem:[#allocation3 + $0xb] sm:$0xff]  ;;  %v3305_v38 = vsel %vm9606_vm12, %v3299_v29, 0.0 }
 0x5b3   :  { %v9616_v27 = vld [vmem:[#allocation3 + $0xd] sm:$0xff]  ;;  %v3306_v63 = vsel %vm9598_vm2, %v9614_v33, 0.0  ;;  %v3309_v50 = vld [vmem:[#allocation3 + $0x5] sm:$0xff] }
 0x5b4   :  { %v3316_v11 = vsel %vm9602_vm1, %v9616_v27, 0.0  ;;  %v3315_v52 = vsel %vm9610_vm15, %v3309_v50, 0.0  ;;  %v9663_v28 = vld [vmem:[#allocation3 + $0x9] sm:$0xff]  ;;  %v3322_v24 = vld [vmem:[#allocation3 + $0x11] sm:$0xff] }
 0x5b5   :  { %v6896_v22 = vpack.i.bf16 %v3306_v63, %v3316_v11  ;;  %v6891_v54 = vpack.i.bf16 %v3305_v38, %v3315_v52  ;;  %v9665_v19 = vld [vmem:[#allocation3 + $0xc] sm:$0xff]  ;;  %v9675_v1 = vld [vmem:[#allocation3 + $0x4] sm:$0xff] }
 0x5b6   :  { %v9681_v14 = vld [vmem:[#allocation3 + $0x7] sm:$0xff]  ;;  %v9690_v43 = vld [vmem:[#allocation3 + $0xf] sm:$0xff] }
 0x5b7   :  { %6897 = vrot.lane.b32.xlu1 %v6896_v22, %s6982_s15  ;;  %6892 = vrot.lane.b32.xlu0 %v6891_v54, %s6982_s15  ;;  %v9683_v44 = vld [vmem:[#allocation3 + $0x8] sm:$0xff]  ;;  %3943 = vst.msk [vmem:[#allocation3] sm:$0xff] %vm11374_vm3, %v9243_v20  ;;  %vm11385_vm3 = vmmov %vm11378_vm0 }
 0x5b8   :  { %3944 = vst.msk [vmem:[#allocation3 + $0x8] sm:$0xff] %vm11375_vm11, %v9243_v20  ;;  %v3473_v11 = vld [vmem:[%s10930_s5 + $0x110] sm:$0xff]  ;;  %vm11386_vm11 = vmmov %vm11378_vm0 }
 0x5b9   :  { %6063 = vmatpush3.msra.mxu1 %v3473_v11  ;;  %v3298_v11 = vld [vmem:[#allocation3 + $0x10] sm:$0xff] }
 0x5ba   :  { %6064 = vmatprep.subr.mxu1 %v3488_v58 }
 0x5c2   :  { %v5978_v36 = vpop.f32.mrf.mxu1 }
 0x5c4   :  { %v5979_v51 = vpop.f32.mrf.mxu1 }
 0x5c5   :  { %v5980_v45 = vadd.f32 %v5979_v51, %v5978_v36 }
 0x5c6   :  { %v5981_v18 = vpop.f32.mrf.mxu1 }
 0x5c7   :  { %v3188_v30 = vadd.f32 %v5980_v45, %v3187_v4  ;;  %v3472_v4 = vld [vmem:[%s10930_s5 + $0x108] sm:$0xff] }
 0x5c8   :  { %v5982_v60 = vpop.f32.mrf.mxu1  ;;  %6065 = vmatpush3.msra.mxu1 %v3472_v4  ;;  %v3507_v4 = vld [vmem:[%s10930_s5 + $0x220] sm:$0xff] }
 0x5c9   :  { %v5983_v31 = vadd.f32 %v5982_v60, %v5981_v18  ;;  %v3225_v29 = vsel %vm11376_vm8, %v3188_v30, 0.0  ;;  %v3487_v18 = vld [vmem:[%s10930_s5 + $0x180] sm:$0xff]  ;;  %vm11388_vm8 = vmmov %vm11378_vm0 }
 0x5ca   :  { %6066 = vmatprep.subr.mxu1 %v3487_v18  ;;  %v3504_v18 = vld [vmem:[%s10930_s5 + $0x208] sm:$0xff] }
 0x5cb   :  { %v3193_v25 = vadd.f32 %v6479_v61, %v5983_v31  ;;  %6067 = vmatpush3.msra.mxu1 %v3471_v53  ;;  %v3503_v53 = vld [vmem:[%s10930_s5 + $0x200] sm:$0xff] }
 0x5cc   :  { %6516 = vmatprep.subr.mxu1 %v9243_v20 }
 0x5cd   :  { %v3226_v63 = vsel %vm11377_vm14, %v3193_v25, 0.0  ;;  %vm11389_vm14 = vmmov %vm11378_vm0 }
 0x5ce   :  { %v3227_v38 = vadd.f32 %v3226_v63, %v3225_v29  ;;  %v3328_v29 = vld [vmem:[#allocation3 + $0x14] sm:$0xff] }
 0x5d0   :  { %v3228_v50 = vrot.slane %v3227_v38, 4 }
 0x5d2   :  { %v3229_v22 = vadd.f32 %v3228_v50, %v3227_v38  ;;  %v9767_v38 = vld [vmem:[#allocation3 + $0x13] sm:$0xff] }
 0x5d4   :  { %v3230_v52 = vrot.slane %v3229_v22, 2 }
 0x5d6   :  { %v3231_v54 = vadd.f32 %v3230_v52, %v3229_v22 }
 0x5d8   :  { %v3232_v3 = vrot.slane %v3231_v54, 1 }
 0x5da   :  { %v3233_v17 = vadd.f32 %v3232_v3, %v3231_v54 }
 0x5dc   :  { %v3234_v46 = vmul.f32 0.0625, %v3233_v17 }
 0x5de   :  { %v3235_v7 = vsub.f32 %v3188_v30, %v3234_v46  ;;  %v3236_v32 = vsub.f32 %v3193_v25, %v3234_v46  ;;  %v3323_v30 = vsel %vm9610_vm15, %v9663_v28, 0.0 }
 0x5e0   :  { %v3237_v40 = vmul.f32 %v3235_v7, %v3235_v7  ;;  %v3238_v6 = vmul.f32 %v3236_v32, %v3236_v32 }
 0x5e2   :  { %v3239_v21 = vsel %vm11378_vm0, %v3237_v40, 0.0  ;;  %v3240_v13 = vsel %vm11379_vm5, %v3238_v6, 0.0  ;;  %vm11390_vm5 = vmmov %vm11378_vm0 }
 0x5e3   :  { %v3241_v0 = vadd.f32 %v3240_v13, %v3239_v21 }
 0x5e5   :  { %v3242_v23 = vrot.slane %v3241_v0, 4 }
 0x5e7   :  { %v3243_v5 = vadd.f32 %v3242_v23, %v3241_v0 }
 0x5e9   :  { %v3244_v35 = vrot.slane %v3243_v5, 2 }
 0x5eb   :  { %v3245_v15 = vadd.f32 %v3244_v35, %v3243_v5 }
 0x5ed   :  { %v3246_v26 = vrot.slane %v3245_v15, 1 }
 0x5ef   :  { %v3247_v12 = vadd.f32 %v3246_v26, %v3245_v15 }
 0x5f1   :  { %v3248_v36 = vmul.f32 0.0625, %v3247_v12 }
 0x5f3   :  { %v3249_v61 = vadd.f32 1e-05, %v3248_v36 }
 0x5f5   :  { %6941 = vrsqrt.f32 %v3249_v61 }
 0x602   :  { %v6942_v10 = vpop.eup %6941 }
 0x603   :  { %v3251_v57 = vmul.f32 %v6942_v10, %v3235_v7  ;;  %v3252_v51 = vmul.f32 %v6942_v10, %v3236_v32  ;;  %v3324_v7 = vsel %vm9602_vm1, %v3322_v24, 0.0 }
 0x605   :  { %v3255_v48 = vmax.f32 %v3251_v57, 0.0  ;;  %v3256_v45 = vmax.f32 %v3252_v51, 0.0 }
 0x607   :  { %3267 = vst.msk [vmem:[#allocation3 + $0x1c] sm:$0xff] %vm11380_vm7, %v3255_v48  ;;  %vm11391_vm7 = vmmov %vm11378_vm0 }
 0x608   :  { %3268 = vst.msk [vmem:[#allocation3 + $0x24] sm:$0xff] %vm11381_vm6, %v3256_v45  ;;  %v3509_v45 = vld [vmem:[%s10930_s5 + $0x230] sm:$0xff]  ;;  %vm11392_vm6 = vmmov %vm11378_vm0 }
 0x60e   :  { %v3374_v59 = vld [vmem:[#allocation3 + $0x17] sm:$0xff] }
 0x60f   :  { %v3380_v60 = vld [vmem:[#allocation3 + $0x19] sm:$0xff]  ;;  %v3376_v31 = vsel %vm9606_vm12, %v3374_v59, 0.0  ;;  %v9764_v25 = vld [vmem:[#allocation3 + $0x21] sm:$0xff]  ;;  %v9801_v23 = vld [vmem:[#allocation3 + $0x29] sm:$0xff] }
 0x610   :  { %v9755_v47 = vld [vmem:[#allocation3 + $0x1f] sm:$0xff]  ;;  %v3382_v8 = vsel %vm9610_vm15, %v3380_v60, 0.0  ;;  %v6906_v49 = vpack.i.bf16 %v3376_v31, %v3323_v30  ;;  %v3383_v50 = vsel %vm9602_vm1, %v9764_v25, 0.0  ;;  %v9785_v46 = vld [vmem:[#allocation3 + $0x15] sm:$0xff]  ;;  %v9795_v40 = vld [vmem:[#allocation3 + $0x27] sm:$0xff] }
 0x611   :  { %v6901_v37 = vpack.i.bf16 %v3382_v8, %v9665_v19  ;;  %v3389_v63 = vld [vmem:[#allocation3 + $0x25] sm:$0xff]  ;;  %v3377_v28 = vsel %vm9598_vm2, %v9755_v47, 0.0  ;;  %v3388_v52 = vld [vmem:[#allocation3 + $0x1d] sm:$0xff]  ;;  %3945 = vst.msk [vmem:[#allocation3 + $0x10] sm:$0xff] %vm11382_vm13, %v9243_v20  ;;  %v6911_v13 = vpack.i.bf16 %v3383_v50, %v3328_v29  ;;  %v3837_v59 = vld [vmem:[%s10931_s6 + $0x18] sm:$0xff]  ;;  %v3319_v29 = vsel %vm9606_vm12, %v9681_v14, 0.0 }
 0x612   :  { %v9775_v22 = vld [vmem:[#allocation3 + $0x20] sm:$0xff]  ;;  %v9777_v54 = vld [vmem:[#allocation3 + $0x18] sm:$0xff]  ;;  %6907 = vrot.lane.b32.xlu1 %v6906_v49, %s6982_s15  ;;  %v6916_v21 = vpack.i.bf16 %v3377_v28, %v3324_v7  ;;  %v3395_v0 = vld [vmem:[#allocation3 + $0x28] sm:$0xff]  ;;  %v3391_v5 = vsel %vm9602_vm1, %v3389_v63, 0.0  ;;  %v3390_v35 = vsel %vm9610_vm15, %v3388_v52, 0.0  ;;  %v3327_v14 = vsel %vm9598_vm2, %v9767_v38, 0.0 }
 0x613   :  { %6902 = vrot.lane.b32.xlu0 %v6901_v37, %s6982_s15  ;;  %v9781_v3 = vld [vmem:[#allocation3 + $0x1c] sm:$0xff]  ;;  %v9789_v32 = vld [vmem:[#allocation3 + $0x24] sm:$0xff]  ;;  %3949 = vst.msk [vmem:[#allocation3 + $0x30] sm:$0xf] %vm3263_vm9, %v9243_v20  ;;  %v6926_v15 = vpack.i.bf16 %v3391_v5, %v3395_v0  ;;  %v6921_v26 = vpack.i.bf16 %v3390_v35, %v9775_v22  ;;  %vm11387_vm9 = vmmov %vm11378_vm0  ;;  %v3326_v37 = vsel %vm9606_vm12, %v9614_v33, 0.0 }
 0x614   :  { %v9783_v17 = vld [vmem:[#allocation3 + $0x1b] sm:$0xff]  ;;  %v9797_v6 = vld [vmem:[#allocation3 + $0x23] sm:$0xff]  ;;  %vm11393_vm13 = vmmov %vm11378_vm0 }
 0x615   :  { %3946 = vst.msk [vmem:[#allocation3 + $0x18] sm:$0xff] %vm11383_vm4, %v9243_v20  ;;  %vm11394_vm4 = vmmov %vm11378_vm0 }
 0x616   :  { %3947 = vst.msk [vmem:[#allocation3 + $0x20] sm:$0xff] %vm11384_vm10, %v9243_v20  ;;  %6917 = vrot.lane.b32.xlu1 %v6916_v21, %s6982_s15  ;;  %vm11395_vm10 = vmmov %vm11378_vm0 }
 0x617   :  { %3948 = vst.msk [vmem:[#allocation3 + $0x28] sm:$0xff] %vm11385_vm3, %v9243_v20  ;;  %6912 = vrot.lane.b32.xlu0 %v6911_v13, %s6982_s15  ;;  %vm11396_vm3 = vmmov %vm11378_vm0 }
 0x61a   :  { %6927 = vrot.lane.b32.xlu1 %v6926_v15, %s6982_s15 }
 0x61b   :  { %6922 = vrot.lane.b32.xlu0 %v6921_v26, %s6982_s15 }
 0x629   :  { %v6898_v12 = vpop.permute.xlu1 %6897  ;;  %v6893_v36 = vpop.permute.xlu0 %6892 }
 0x62a   :  { %v6899_v61 = vunpack.i.l.bf16 %v6898_v12  ;;  %v6895_v10 = vunpack.i.h.bf16 %v6893_v36  ;;  %v6894_v57 = vunpack.i.l.bf16 %v6893_v36  ;;  %v6900_v48 = vunpack.i.h.bf16 %v6898_v12 }
 0x62c   :  { %v3366_v51 = vsel %vm11386_vm11, %v9675_v1, %v6894_v57  ;;  %v3364_v20 = vsel %vm11387_vm9, %v9683_v44, %v6895_v10  ;;  %v3367_v58 = vsel %vm11388_vm8, %v9665_v19, %v6899_v61  ;;  %v3508_v1 = vld [vmem:[%s10930_s5 + $0x228] sm:$0xff]  ;;  %v3365_v44 = vsel %vm11389_vm14, %v3298_v11, %v6900_v48  ;;  %v3506_v19 = vld [vmem:[%s10930_s5 + $0x218] sm:$0xff]  ;;  %vm11397_vm11 = vmmov %vm11378_vm0 }
 0x62d   :  { %3587 = vmatprep.mubr.f32.mxu0 %v3366_v51  ;;  %vm11398_vm9 = vmmov %vm11378_vm0  ;;  %v3836_v48 = vld [vmem:[%s10931_s6 + $0x10] sm:$0xff] }
 0x62e   :  { %3588 = vmatmul.mubr.f32.vlgmr.msra.gmra.mxu0 %v3364_v20  ;;  %vm11399_vm8 = vmmov %vm11378_vm0  ;;  %v3394_v20 = vsel %vm9598_vm2, %v9795_v40, 0.0  ;;  %v3835_v40 = vld [vmem:[%s10931_s6 + $0x8] sm:$0xff] }
 0x62f   :  { %3592 = vmatprep.mubr.f32.mxu0 %v3367_v58  ;;  %6481 = vmatpush3.msra.mxu0 %v9673_v34  ;;  %v3505_v34 = vld [vmem:[%s10930_s5 + $0x210] sm:$0xff]  ;;  %vm11400_vm14 = vmmov %vm11378_vm0  ;;  %v3834_v58 = vld [vmem:[%s10931_s6] sm:$0xff] }
 0x630   :  { %6482 = vmatprep.subr.mxu0 %v3509_v45 }
 0x631   :  { %6483 = vmatpush3.msra.mxu0 %v3509_v45 }
 0x632   :  { %3593 = vmatmul.mubr.f32.gmra.mxu0 %v3365_v44  ;;  %6484 = vmatprep.subr.mxu0 %v3508_v1 }
 0x633   :  { %6485 = vmatpush3.msra.mxu0 %v3508_v1 }
 0x634   :  { %6486 = vmatprep.subr.mxu0 %v3507_v4 }
 0x635   :  { %6487 = vmatpush3.msra.mxu0 %v3507_v4 }
 0x636   :  { %6488 = vmatprep.subr.mxu0 %v3506_v19 }
 0x637   :  { %6489 = vmatpush3.msra.mxu0 %v3506_v19 }
 0x638   :  { %6490 = vmatprep.subr.mxu0 %v3505_v34 }
 0x639   :  { %6491 = vmatpush3.msra.mxu0 %v3505_v34 }
 0x63a   :  { %6492 = vmatprep.subr.mxu0 %v3504_v18 }
 0x63b   :  { %6493 = vmatpush3.msra.mxu0 %v3504_v18 }
 0x63c   :  { %6494 = vmatprep.subr.mxu0 %v3503_v53 }
 0x63d   :  { %6495 = vmatpush3.msra.mxu0 %v3503_v53 }
 0x63e   :  { %6502 = vmatprep.subr.mxu0 %v3837_v59 }
 0x684   :  { %v6908_v60 = vpop.permute.xlu1 %6907 }
 0x685   :  { %v6903_v30 = vpop.permute.xlu0 %6902  ;;  %v6910_v31 = vunpack.i.h.bf16 %v6908_v60  ;;  %v6909_v8 = vunpack.i.l.bf16 %v6908_v60 }
 0x686   :  { %v6905_v24 = vunpack.i.h.bf16 %v6903_v30  ;;  %v6904_v49 = vunpack.i.l.bf16 %v6903_v30 }
 0x687   :  { %v3431_v28 = vsel %vm11391_vm7, %v9781_v3, %v6910_v31  ;;  %v3368_v50 = vsel %vm11392_vm6, %v3319_v29, %v6909_v8  ;;  %vm11402_vm7 = vmmov %vm11378_vm0 }
 0x688   :  { %v3433_v63 = vsel %vm11378_vm0, %v9777_v54, %v6905_v24  ;;  %v3370_v11 = vsel %vm11390_vm5, %v3326_v37, %v6904_v49  ;;  %v6918_v52 = vpop.permute.xlu1 %6917  ;;  %v3320_v54 = vsel %vm9598_vm2, %v9690_v43, 0.0  ;;  %v3330_v43 = vsel %vm9610_vm15, %v9616_v27, 0.0  ;;  %vm11401_vm5 = vmmov %vm11378_vm0 }
 0x689   :  { %v6913_v7 = vpop.permute.xlu0 %6912  ;;  %3597 = vmatprep.mubr.f32.mxu0 %v3433_v63  ;;  %3672 = vmatprep.mubr.f32.mxu1 %v3370_v11  ;;  %v6920_v21 = vunpack.i.h.bf16 %v6918_v52  ;;  %v6919_v33 = vunpack.i.l.bf16 %v6918_v52  ;;  %v3331_v27 = vsel %vm9602_vm1, %v9785_v46, 0.0  ;;  %v3387_v46 = vsel %vm9598_vm2, %v9797_v6, 0.0  ;;  %vm11403_vm6 = vmmov %vm11378_vm0  ;;  %v9921_v6 = vld [vmem:[#allocation4] sm:$0xff] }
 0x68a   :  { %v6915_v13 = vunpack.i.h.bf16 %v6913_v7  ;;  %v6914_v0 = vunpack.i.l.bf16 %v6913_v7  ;;  %3598 = vmatmul.mubr.f32.gmra.mxu0 %v3431_v28  ;;  %3673 = vmatmul.mubr.f32.vlgmr.msra.gmra.mxu1 %v3368_v50 }
 0x68b   :  { %v3432_v35 = vsel %vm11395_vm10, %v9789_v32, %v6920_v21  ;;  %v3369_v15 = vsel %vm11396_vm3, %v3320_v54, %v6919_v33  ;;  %v3386_v32 = vsel %vm9606_vm12, %v9783_v17, 0.0  ;;  %v3397_v17 = vsel %vm9610_vm15, %v9764_v25, 0.0 }
 0x68c   :  { %v3434_v3 = vsel %vm11393_vm13, %v9775_v22, %v6915_v13  ;;  %v3371_v5 = vsel %vm11394_vm4, %v3327_v14, %v6914_v0  ;;  %v6928_v26 = vpop.permute.xlu1 %6927  ;;  %v3393_v22 = vsel %vm9606_vm12, %v9755_v47, 0.0  ;;  %v3398_v25 = vsel %vm9602_vm1, %v9801_v23, 0.0 }
 0x68d   :  { %v6923_v12 = vpop.permute.xlu0 %6922  ;;  %3602 = vmatprep.mubr.f32.mxu0 %v3434_v3  ;;  %3677 = vmatprep.mubr.f32.mxu1 %v3371_v5  ;;  %v6929_v36 = vunpack.i.l.bf16 %v6928_v26  ;;  %v6930_v51 = vunpack.i.h.bf16 %v6928_v26  ;;  %vm11404_vm13 = vcmask 261120  }
 0x68e   :  { %v6925_v38 = vunpack.i.h.bf16 %v6923_v12  ;;  %v6924_v61 = vunpack.i.l.bf16 %v6923_v12  ;;  %3603 = vmatmul.mubr.f32.gmra.mxu0 %v3432_v35  ;;  %3678 = vmatmul.mubr.f32.gmra.mxu1 %v3369_v15  ;;  %vm11405_vm4 = vmmov %vm11404_vm13 }
 0x68f   :  { %6496 = vmatprep.mubr.msk.f32.mxu0 %vm11397_vm11, %v3330_v43  ;;  %v3438_v47 = vsel %vm11378_vm0, %v3394_v20, %v6929_v36  ;;  %v3436_v45 = vsel %vm11402_vm7, %v3387_v46, %v6930_v51  ;;  %vm11406_vm10 = vmmov %vm11405_vm4 }
 0x690   :  { %v3437_v10 = vsel %vm11398_vm9, %v3393_v22, %v6924_v61  ;;  %v3435_v57 = vsel %vm11399_vm8, %v3386_v32, %v6925_v38  ;;  %vm11407_vm3 = vmmov %vm11405_vm4 }
 0x691   :  { %3682 = vmatprep.mubr.f32.mxu1 %v3437_v10  ;;  %vm11408_vm11 = vmmov %vm11378_vm0 }
 0x692   :  { %3683 = vmatmul.mubr.f32.gmra.mxu1 %v3435_v57  ;;  %6497 = vmatmul.mubr.msk.f32.vlgmr.msra.gmra.mxu0 %vm11400_vm14, %v3331_v27  ;;  %vm11409_vm9 = vmmov %vm11378_vm0 }
 0x693   :  { %3687 = vmatprep.mubr.f32.mxu1 %v3438_v47  ;;  %6499 = vmatprep.mubr.msk.f32.mxu0 %vm11401_vm5, %v3397_v17  ;;  %vm11410_vm8 = vmmov %vm11378_vm0 }
 0x694   :  { %6503 = vmatpush3.msra.mxu0 %v3837_v59  ;;  %vm11411_vm14 = vmmov %vm11378_vm0 }
 0x695   :  { %6504 = vmatprep.subr.mxu0 %v3836_v48  ;;  %vm11412_vm5 = vmmov %vm11378_vm0 }
 0x696   :  { %6505 = vmatpush3.msra.mxu0 %v3836_v48  ;;  %3688 = vmatmul.mubr.f32.gmra.mxu1 %v3436_v45  ;;  %vm11413_vm7 = vmmov %vm11378_vm0 }
 0x697   :  { %6500 = vmatmul.mubr.msk.f32.gmra.mxu0 %vm11403_vm6, %v3398_v25  ;;  %6506 = vmatprep.subr.mxu0 %v3835_v40  ;;  %vm11414_vm6 = vmmov %vm11378_vm0 }
 0x698   :  { %6507 = vmatpush3.msra.mxu0 %v3835_v40  ;;  %6510 = vmatprep.mubr.msk.f32.mxu0 %vm11404_vm13, %v9470_v16  ;;  %vm11415_vm13 = vmmov %vm11378_vm0 }
 0x699   :  { %6508 = vmatprep.subr.mxu0 %v3834_v58 }
 0x69a   :  { %6509 = vmatpush3.msra.mxu0 %v3834_v58 }
 0x69b   :  { %6511 = vmatmul.mubr.msk.f32.vlgmr.msra.gmra.mxu0 %vm11405_vm4, %v9472_v62  ;;  %vm11416_vm4 = vmmov %vm11378_vm0 }
 0x69c   :  { %6513 = vmatprep.mubr.msk.f32.mxu0 %vm11406_vm10, %v9476_v41  ;;  %vm11417_vm10 = vmmov %vm11378_vm0 }
 0x69f   :  { %6514 = vmatmul.mubr.msk.f32.gmra.mxu0 %vm11407_vm3, %v9478_v2  ;;  %vm11418_vm3 = vmmov %vm11378_vm0 }
 0x6a0   :  { %4157 = vmatprep.mubr.f32.mxu0 %v9921_v6 }
 0x6ee   :  { %v6024_v23 = vpop.f32.mrf.mxu0 }
 0x6f0   :  { %v6025_v1 = vpop.f32.mrf.mxu0 }
 0x6f1   :  { %v6026_v30 = vadd.f32 %v6025_v1, %v6024_v23 }
 0x6f2   :  { %v6027_v44 = vpop.f32.mrf.mxu0 }
 0x6f4   :  { %v6028_v4 = vpop.f32.mrf.mxu0 }
 0x6f5   :  { %v6029_v31 = vadd.f32 %v6028_v4, %v6027_v44 }
 0x74a   :  { %v6030_v16 = vpop.f32.mrf.mxu0  ;;  %v6068_v19 = vpop.f32.mrf.mxu1 }
 0x74c   :  { %v6031_v34 = vpop.f32.mrf.mxu0  ;;  %v6069_v18 = vpop.f32.mrf.mxu1 }
 0x74d   :  { %v6070_v59 = vadd.f32 %v6069_v18, %v6068_v19  ;;  %v6032_v11 = vadd.f32 %v6031_v34, %v6030_v16 }
 0x74e   :  { %v6033_v53 = vpop.f32.mrf.mxu0  ;;  %v6071_v62 = vpop.f32.mrf.mxu1 }
 0x74f   :  { %v3675_v37 = vadd.f32 %v6070_v59, %v6026_v30 }
 0x750   :  { %v6034_v60 = vpop.f32.mrf.mxu0  ;;  %v6072_v41 = vpop.f32.mrf.mxu1 }
 0x751   :  { %v6073_v2 = vadd.f32 %v6072_v41, %v6071_v62  ;;  %v6035_v3 = vadd.f32 %v6034_v60, %v6033_v53 }
 0x752   :  { %v6074_v8 = vpop.f32.mrf.mxu1  ;;  %v6498_v24 = vpop.f32.mrf.mxu0 }
 0x753   :  { %v3680_v49 = vadd.f32 %v6073_v2, %v6029_v31 }
 0x754   :  { %v6075_v29 = vpop.f32.mrf.mxu1  ;;  %v3759_v63 = vpop.f32.mrf.mxu0 }
 0x755   :  { %v3765_v28 = vadd.f32 %v6498_v24, %v3680_v49  ;;  %v6076_v50 = vadd.f32 %v6075_v29, %v6074_v8  ;;  %v3760_v52 = vadd.f32 %v3759_v63, %v3675_v37 }
 0x756   :  { %v6077_v7 = vpop.f32.mrf.mxu1 }
 0x757   :  { %v3779_v21 = vsel %vm11408_vm11, %v3765_v28, 0.0  ;;  %v3778_v33 = vsel %vm11409_vm9, %v3760_v52, 0.0  ;;  %v6501_v13 = vpop.f32.mrf.mxu0  ;;  %v3685_v0 = vadd.f32 %v6076_v50, %v6032_v11  ;;  %vm4089_vm11 = vcmask 130048  }
 0x758   :  { %v3780_v14 = vadd.f32 %v3779_v21, %v3778_v33  ;;  %v6078_v54 = vpop.f32.mrf.mxu1  ;;  %vm6983_vm9 = vmmov 0  }
 0x759   :  { %v6079_v5 = vadd.f32 %v6078_v54, %v6077_v7  ;;  %v3769_v35 = vpop.f32.mrf.mxu0  ;;  %6520 = vmatprep.mubr.msk.f32.mxu1 %vm6983_vm9, %v9921_v6 }
 0x75a   :  { %v3781_v15 = vrot.slane %v3780_v14, 4  ;;  %v3770_v12 = vadd.f32 %v3769_v35, %v3685_v0 }
 0x75b   :  { %v3690_v26 = vadd.f32 %v6079_v5, %v6035_v3  ;;  %v6512_v33 = vpop.f32.mrf.mxu0 }
 0x75c   :  { %v3782_v36 = vadd.f32 %v3781_v15, %v3780_v14  ;;  %v3806_v43 = vsel %vm11410_vm8, %v3770_v12, 0.0  ;;  %vm11419_vm8 = vmmov %vm11378_vm0 }
 0x75d   :  { %v3775_v38 = vadd.f32 %v6501_v13, %v3690_v26  ;;  %v3916_v54 = vpop.f32.mrf.mxu0 }
 0x75e   :  { %v3783_v61 = vrot.slane %v3782_v36, 2 }
 0x75f   :  { %v3807_v22 = vsel %vm11411_vm14, %v3775_v38, 0.0  ;;  %v6515_v26 = vpop.f32.mrf.mxu0  ;;  %vm11420_vm14 = vmmov %vm11378_vm0 }
 0x760   :  { %v3784_v32 = vadd.f32 %v3783_v61, %v3782_v36  ;;  %v3808_v10 = vadd.f32 %v3807_v22, %v3806_v43 }
 0x761   :  { %v3926_v61 = vpop.f32.mrf.mxu0 }
 0x762   :  { %v3785_v57 = vrot.slane %v3784_v32, 1  ;;  %v3809_v51 = vrot.slane %v3808_v10, 4 }
 0x764   :  { %v3786_v27 = vadd.f32 %v3785_v57, %v3784_v32  ;;  %v3810_v20 = vadd.f32 %v3809_v51, %v3808_v10 }
 0x766   :  { %v3787_v47 = vmul.f32 0.0625, %v3786_v27  ;;  %v3811_v17 = vrot.slane %v3810_v20, 2 }
 0x768   :  { %v3788_v48 = vsub.f32 %v3760_v52, %v3787_v47  ;;  %v3812_v46 = vadd.f32 %v3811_v17, %v3810_v20  ;;  %v3789_v40 = vsub.f32 %v3765_v28, %v3787_v47 }
 0x76a   :  { %v3790_v45 = vmul.f32 %v3788_v48, %v3788_v48  ;;  %v3813_v25 = vrot.slane %v3812_v46, 1  ;;  %v3791_v58 = vmul.f32 %v3789_v40, %v3789_v40 }
 0x76c   :  { %v3792_v23 = vsel %vm11378_vm0, %v3790_v45, 0.0  ;;  %v3814_v1 = vadd.f32 %v3813_v25, %v3812_v46  ;;  %v3793_v44 = vsel %vm11412_vm5, %v3791_v58, 0.0  ;;  %vm11421_vm5 = vmmov %vm11378_vm0 }
 0x76d   :  { %v3794_v4 = vadd.f32 %v3793_v44, %v3792_v23 }
 0x76e   :  { %v3815_v16 = vmul.f32 0.0625, %v3814_v1 }
 0x76f   :  { %v3795_v19 = vrot.slane %v3794_v4, 4 }
 0x770   :  { %v3816_v34 = vsub.f32 %v3770_v12, %v3815_v16  ;;  %v3817_v18 = vsub.f32 %v3775_v38, %v3815_v16 }
 0x771   :  { %v3796_v53 = vadd.f32 %v3795_v19, %v3794_v4  ;;  %v9971_v19 = vld [vmem:[%s10932_s11] sm:$0xf] }
 0x772   :  { %v3818_v62 = vmul.f32 %v3816_v34, %v3816_v34  ;;  %v3819_v59 = vmul.f32 %v3817_v18, %v3817_v18 }
 0x773   :  { %v3797_v60 = vrot.slane %v3796_v53, 2 }
 0x774   :  { %v3820_v41 = vsel %vm11413_vm7, %v3818_v62, 0.0  ;;  %v3821_v30 = vsel %vm11414_vm6, %v3819_v59, 0.0  ;;  %vm11422_vm7 = vmmov %vm11378_vm0 }
 0x775   :  { %v3798_v31 = vadd.f32 %v3797_v60, %v3796_v53  ;;  %v3822_v2 = vadd.f32 %v3821_v30, %v3820_v41  ;;  %vm11423_vm6 = vmmov %vm11378_vm0 }
 0x777   :  { %v3799_v8 = vrot.slane %v3798_v31, 1  ;;  %v3823_v24 = vrot.slane %v3822_v2, 4 }
 0x779   :  { %v3800_v49 = vadd.f32 %v3799_v8, %v3798_v31  ;;  %v3824_v37 = vadd.f32 %v3823_v24, %v3822_v2 }
 0x77b   :  { %v3801_v29 = vmul.f32 0.0625, %v3800_v49  ;;  %v3825_v63 = vrot.slane %v3824_v37, 2 }
 0x77d   :  { %v3802_v11 = vadd.f32 1e-05, %v3801_v29  ;;  %v3826_v28 = vadd.f32 %v3825_v63, %v3824_v37 }
 0x77f   :  { %6943 = vrsqrt.f32 %v3802_v11  ;;  %v3827_v50 = vrot.slane %v3826_v28, 1 }
 0x781   :  { %v3828_v52 = vadd.f32 %v3827_v50, %v3826_v28 }
 0x783   :  { %v3829_v7 = vmul.f32 0.0625, %v3828_v52 }
 0x785   :  { %v3830_v21 = vadd.f32 1e-05, %v3829_v7 }
 0x787   :  { %6945 = vrsqrt.f32 %v3830_v21 }
 0x78c   :  { %v6944_v13 = vpop.eup %6943 }
 0x78d   :  { %v3805_v0 = vmul.f32 %v6944_v13, %v3789_v40  ;;  %v3804_v14 = vmul.f32 %v6944_v13, %v3788_v48 }
 0x78f   :  { %v3936_v3 = vadd.f32 %v6512_v33, %v3805_v0  ;;  %v3935_v5 = vadd.f32 %v3916_v54, %v3804_v14 }
 0x791   :  { %v3940_v35 = vmax.f32 %v3936_v3, 0.0  ;;  %v3939_v15 = vmax.f32 %v3935_v5, 0.0 }
 0x793   :  { %3951 = vst.msk [vmem:[#allocation3 + $0x10] sm:$0xff] %vm11415_vm13, %v3940_v35  ;;  %vm11424_vm13 = vmmov %vm11378_vm0 }
 0x794   :  { %3950 = vst.msk [vmem:[#allocation3 + $0x8] sm:$0xff] %vm11416_vm4, %v3939_v15  ;;  %v6946_v12 = vpop.eup %6945  ;;  %vm11425_vm4 = vmmov %vm11378_vm0 }
 0x795   :  { %v3833_v36 = vmul.f32 %v6946_v12, %v3817_v18  ;;  %v3832_v38 = vmul.f32 %v6946_v12, %v3816_v34 }
 0x797   :  { %v3938_v43 = vadd.f32 %v6515_v26, %v3833_v36  ;;  %v3937_v22 = vadd.f32 %v3926_v61, %v3832_v38 }
 0x799   :  { %v3942_v32 = vmax.f32 %v3938_v43, 0.0  ;;  %v3941_v10 = vmax.f32 %v3937_v22, 0.0 }
 0x79a   :  { %v3977_v57 = vld [vmem:[#allocation3 + $0x14] sm:$0xff] }
 0x79b   :  { %v9934_v51 = vld [vmem:[#allocation3 + $0xb] sm:$0xff]  ;;  %3953 = vst.msk [vmem:[#allocation3 + $0x24] sm:$0xff] %vm11417_vm10, %v3942_v32  ;;  %4009 = vrot.lane.b32.xlu0 %v3977_v57, %s6982_s15  ;;  %v3956_v20 = vld [vmem:[#allocation3 + $0x3] sm:$0xff]  ;;  %v3974_v21 = vld [vmem:[#allocation3 + $0x13] sm:$0xff] }
 0x79c   :  { %3952 = vst.msk [vmem:[#allocation3 + $0x1c] sm:$0xff] %vm11418_vm3, %v3941_v10  ;;  %v3959_v27 = vsel %vm9598_vm2, %v9934_v51, 0.0  ;;  %v3961_v47 = vld [vmem:[#allocation3 + $0xc] sm:$0xff]  ;;  %v3958_v17 = vsel %vm9606_vm12, %v3956_v20, 0.0  ;;  %v3960_v0 = vld [vmem:[#allocation3 + $0x4] sm:$0xff]  ;;  %v3976_v15 = vsel %vm9598_vm2, %v3974_v21, 0.0  ;;  %vm11426_vm10 = vmmov %vm11378_vm0 }
 0x79d   :  { %3985 = vrot.lane.b32.xlu1 %v3959_v27, %s6982_s15  ;;  %v3963_v48 = vld [vmem:[#allocation3 + $0xd] sm:$0xff]  ;;  %v3962_v58 = vld [vmem:[#allocation3 + $0x5] sm:$0xff]  ;;  %v3975_v61 = vsel %vm9606_vm12, %v9934_v51, 0.0  ;;  %vm11427_vm3 = vmmov %vm11378_vm0 }
 0x79e   :  { %v3971_v46 = vld [vmem:[#allocation3 + $0x11] sm:$0xff]  ;;  %v3965_v45 = vsel %vm9602_vm1, %v3963_v48, 0.0  ;;  %v3970_v23 = vld [vmem:[#allocation3 + $0x9] sm:$0xff]  ;;  %v3964_v1 = vsel %vm9610_vm15, %v3962_v58, 0.0 }
 0x79f   :  { %4007 = vrot.lane.b32.xlu0 %v3961_v47, %s6982_s15  ;;  %v3973_v25 = vsel %vm9602_vm1, %v3971_v46, 0.0  ;;  %v3972_v44 = vsel %vm9610_vm15, %v3970_v23, 0.0  ;;  %v3955_v28 = vld [vmem:[#allocation3 + $0x10] sm:$0xff]  ;;  %v3954_v14 = vld [vmem:[#allocation3 + $0x8] sm:$0xff] }
 0x7a0   :  { %v3967_v33 = vld [vmem:[#allocation3 + $0xf] sm:$0xff]  ;;  %v3966_v35 = vld [vmem:[#allocation3 + $0x7] sm:$0xff] }
 0x7a1   :  { %3983 = vrot.lane.b32.xlu1 %v3958_v17, %s6982_s15  ;;  %v3969_v26 = vsel %vm9598_vm2, %v3967_v33, 0.0  ;;  %v3968_v43 = vsel %vm9606_vm12, %v3966_v35, 0.0  ;;  %v4549_v21 = vld [vmem:[%s10933_s7 + $0x58] sm:$0xff]  ;;  %v4564_v33 = vld [vmem:[%s10933_s7 + $0xd0] sm:$0xff] }
 0x7a2   :  { %v4038_v41 = vld [vmem:[#allocation3 + $0x25] sm:$0xff]  ;;  %v4545_v35 = vld [vmem:[%s10933_s7 + $0x38] sm:$0xff] }
 0x7a3   :  { %v3978_v40 = vld [vmem:[#allocation3 + $0x15] sm:$0xff]  ;;  %3993 = vrot.lane.b32.xlu0 %v3965_v45, %s6982_s15  ;;  %v9963_v4 = vld [vmem:[#allocation3 + $0x21] sm:$0xff]  ;;  %v4040_v31 = vsel %vm9602_vm1, %v4038_v41, 0.0  ;;  %v4045_v23 = vld [vmem:[#allocation3 + $0x29] sm:$0xff] }
 0x7a4   :  { %6517 = vmatpush3.msk.msra.mxu1 %vm9602_vm1, %v3978_v40  ;;  %v9966_v16 = vld [vmem:[#allocation3 + $0x1f] sm:$0xff]  ;;  %v4032_v34 = vsel %vm9602_vm1, %v9963_v4, 0.0  ;;  %v4023_v62 = vld [vmem:[#allocation3 + $0x17] sm:$0xff]  ;;  %v4044_v30 = vld [vmem:[#allocation3 + $0x28] sm:$0xff] }
 0x7a5   :  { %6518 = vmatprep.subr.mxu1 %v9921_v6  ;;  %4001 = vrot.lane.b32.xlu1 %v3973_v25, %s6982_s15  ;;  %v4026_v18 = vsel %vm9598_vm2, %v9966_v16, 0.0  ;;  %v4029_v53 = vld [vmem:[#allocation3 + $0x19] sm:$0xff]  ;;  %v4025_v60 = vsel %vm9606_vm12, %v4023_v62, 0.0  ;;  %v4022_v57 = vld [vmem:[#allocation3 + $0x24] sm:$0xff]  ;;  %v4042_v41 = vsel %vm9606_vm12, %v9966_v16, 0.0 }
 0x7a6   :  { %6519 = vmatpush3.msk.msra.mxu1 %vm9610_vm15, %v3963_v48  ;;  %v4031_v59 = vsel %vm9610_vm15, %v4029_v53, 0.0  ;;  %v4037_v2 = vld [vmem:[#allocation3 + $0x1d] sm:$0xff]  ;;  %v4041_v40 = vld [vmem:[#allocation3 + $0x27] sm:$0xff]  ;;  %v4601_v53 = vld [vmem:[%s10933_s7 + $0x1f8] sm:$0xff] }
 0x7a7   :  { %3991 = vrot.lane.b32.xlu0 %v3964_v1, %s6982_s15  ;;  %6521 = vmatmul.mubr.msk.f32.vlgmr.msra.gmra.mxu1 %vm4089_vm11, %v9971_v19  ;;  %v4028_v8 = vld [vmem:[#allocation3 + $0x20] sm:$0xff]  ;;  %v4039_v24 = vsel %vm9610_vm15, %v4037_v2, 0.0  ;;  %v4027_v51 = vld [vmem:[#allocation3 + $0x18] sm:$0xff]  ;;  %v4043_v1 = vsel %vm9598_vm2, %v4041_v40, 0.0  ;;  %v4569_v2 = vld [vmem:[%s10933_s7 + $0xf8] sm:$0xff] }
 0x7a8   :  { %4440 = vmatprep.mubr.f32.mxu1 %v9921_v6  ;;  %v4021_v17 = vld [vmem:[#allocation3 + $0x1c] sm:$0xff]  ;;  %v4540_v40 = vld [vmem:[%s10933_s7 + $0x10] sm:$0xff] }
 0x7a9   :  { %3999 = vrot.lane.b32.xlu1 %v3972_v44, %s6982_s15  ;;  %v4034_v25 = vld [vmem:[#allocation3 + $0x23] sm:$0xff]  ;;  %v4033_v56 = vld [vmem:[#allocation3 + $0x1b] sm:$0xff] }
 0x7aa   :  { %v4036_v44 = vsel %vm9598_vm2, %v4034_v25, 0.0  ;;  %v4035_v55 = vsel %vm9606_vm12, %v4033_v56, 0.0  ;;  %vm11431_vm2 = vmmov %vm11378_vm0  ;;  %v4555_v25 = vld [vmem:[%s10933_s7 + $0x88] sm:$0xff]  ;;  %vm4532_vm12 = vcmask 1043456  }
 0x7ab   :  { %4060 = vrot.lane.b32.xlu0 %v4032_v34, %s6982_s15 }
 0x7ad   :  { %4052 = vrot.lane.b32.xlu1 %v4026_v18, %s6982_s15 }
 0x7af   :  { %4058 = vrot.lane.b32.xlu0 %v4031_v59, %s6982_s15  ;;  %v4600_v59 = vld [vmem:[%s10933_s7 + $0x1f0] sm:$0xff] }
 0x7b1   :  { %4050 = vrot.lane.b32.xlu1 %v4025_v60, %s6982_s15 }
 0x7b3   :  { %4076 = vrot.lane.b32.xlu0 %v4044_v30, %s6982_s15  ;;  %v4584_v30 = vld [vmem:[%s10933_s7 + $0x170] sm:$0xff] }
 0x7b5   :  { %4068 = vrot.lane.b32.xlu1 %v4040_v31, %s6982_s15 }
 0x7b7   :  { %4074 = vrot.lane.b32.xlu0 %v4028_v8, %s6982_s15 }
 0x7b9   :  { %4066 = vrot.lane.b32.xlu1 %v4039_v24, %s6982_s15  ;;  %v4568_v24 = vld [vmem:[%s10933_s7 + $0xf0] sm:$0xff] }
 0x80d   :  { %v4010_v49 = vpop.permute.xlu0 %4009 }
 0x80e   :  { %v4020_v12 = vsel %vm11422_vm7, %v3976_v15, %v4010_v49  ;;  %v4583_v49 = vld [vmem:[%s10933_s7 + $0x168] sm:$0xff]  ;;  %v4560_v15 = vld [vmem:[%s10933_s7 + $0xb0] sm:$0xff] }
 0x80f   :  { %v3986_v37 = vpop.permute.xlu1 %3985 }
 0x810   :  { %v4014_v7 = vsel %vm11420_vm14, %v3955_v28, %v3986_v37  ;;  %vm11429_vm14 = vmmov %vm11378_vm0  ;;  %v4552_v37 = vld [vmem:[%s10933_s7 + $0x70] sm:$0xff]  ;;  %v4597_v28 = vld [vmem:[%s10933_s7 + $0x1d8] sm:$0xff] }
 0x811   :  { %v4008_v29 = vpop.permute.xlu0 %4007 }
 0x812   :  { %v4019_v32 = vsel %vm11424_vm13, %v3975_v61, %v4008_v29  ;;  %v4598_v29 = vld [vmem:[%s10933_s7 + $0x1e0] sm:$0xff]  ;;  %v4580_v61 = vld [vmem:[%s10933_s7 + $0x150] sm:$0xff] }
 0x813   :  { %v3984_v63 = vpop.permute.xlu1 %3983 }
 0x814   :  { %v4013_v5 = vsel %vm11421_vm5, %v3954_v14, %v3984_v63  ;;  %vm11430_vm5 = vmmov %vm11378_vm0  ;;  %v4567_v63 = vld [vmem:[%s10933_s7 + $0xe8] sm:$0xff] }
 0x815   :  { %v3994_v11 = vpop.permute.xlu0 %3993  ;;  %v4547_v14 = vld [vmem:[%s10933_s7 + $0x48] sm:$0xff] }
 0x816   :  { %v4016_v52 = vsel %vm11419_vm8, %v3961_v47, %v3994_v11  ;;  %vm11428_vm8 = vmmov %vm11378_vm0  ;;  %v4582_v11 = vld [vmem:[%s10933_s7 + $0x160] sm:$0xff] }
 0x817   :  { %v4002_v50 = vpop.permute.xlu1 %4001  ;;  %4121 = vmatprep.subr.mxu0 %v4016_v52  ;;  %v4550_v52 = vld [vmem:[%s10933_s7 + $0x60] sm:$0xff] }
 0x818   :  { %4122 = vmatpush1.msra.mxu0 %v4014_v7  ;;  %v4018_v36 = vsel %vm11423_vm6, %v3969_v26, %v4002_v50  ;;  %v4566_v50 = vld [vmem:[%s10933_s7 + $0xe0] sm:$0xff]  ;;  %v4565_v7 = vld [vmem:[%s10933_s7 + $0xd8] sm:$0xff]  ;;  %vm11438_vm6 = vmmov %vm11378_vm0 }
 0x819   :  { %v3992_v13 = vpop.permute.xlu0 %3991  ;;  %v4581_v26 = vld [vmem:[%s10933_s7 + $0x158] sm:$0xff] }
 0x81a   :  { %v4015_v3 = vsel %vm11378_vm0, %v3960_v0, %v3992_v13  ;;  %v4548_v13 = vld [vmem:[%s10933_s7 + $0x50] sm:$0xff]  ;;  %v4563_v0 = vld [vmem:[%s10933_s7 + $0xc8] sm:$0xff] }
 0x81b   :  { %v4000_v54 = vpop.permute.xlu1 %3999  ;;  %4123 = vmatprep.subr.mxu0 %v4015_v3  ;;  %v4546_v3 = vld [vmem:[%s10933_s7 + $0x40] sm:$0xff] }
 0x81c   :  { %4124 = vmatpush1.msra.mxu0 %v4013_v5  ;;  %v4017_v10 = vsel %vm11425_vm4, %v3968_v43, %v4000_v54  ;;  %v4562_v54 = vld [vmem:[%s10933_s7 + $0xc0] sm:$0xff]  ;;  %v4561_v5 = vld [vmem:[%s10933_s7 + $0xb8] sm:$0xff]  ;;  %v4543_v43 = vld [vmem:[%s10933_s7 + $0x28] sm:$0xff] }
 0x81d   :  { %v4061_v38 = vpop.permute.xlu0 %4060  ;;  %5789 = vmatmul.mubr.msk.f32.vlgmr.msra.gmra.mxu0 %vm4089_vm11, %v9971_v19  ;;  %4192 = vmatprep.subr.mxu0 %v4020_v12  ;;  %v4544_v12 = vld [vmem:[%s10933_s7 + $0x30] sm:$0xff] }
 0x81e   :  { %4193 = vmatpush1.msra.mxu0 %v4018_v36  ;;  %4228 = vmatprep.mubr.f32.mxu0 %v9921_v6  ;;  %v4083_v27 = vsel %vm11426_vm10, %v4028_v8, %v4061_v38  ;;  %v4553_v8 = vld [vmem:[%s10933_s7 + $0x78] sm:$0xff]  ;;  %v4596_v36 = vld [vmem:[%s10933_s7 + $0x1d0] sm:$0xff]  ;;  %v4559_v38 = vld [vmem:[%s10933_s7 + $0xa8] sm:$0xff] }
 0x81f   :  { %v4053_v22 = vpop.permute.xlu1 %4052  ;;  %4194 = vmatprep.subr.mxu0 %v4019_v32  ;;  %v4558_v32 = vld [vmem:[%s10933_s7 + $0xa0] sm:$0xff] }
 0x820   :  { %4195 = vmatpush1.msra.mxu0 %v4017_v10  ;;  %v4081_v20 = vsel %vm11427_vm3, %v4022_v57, %v4053_v22  ;;  %v4595_v22 = vld [vmem:[%s10933_s7 + $0x1c8] sm:$0xff]  ;;  %v4542_v57 = vld [vmem:[%s10933_s7 + $0x20] sm:$0xff] }
 0x821   :  { %v4059_v47 = vpop.permute.xlu0 %4058  ;;  %5790 = vmatmul.mubr.msk.f32.vlgmr.msra.gmra.mxu0 %vm4089_vm11, %v9971_v19  ;;  %4333 = vmatprep.subr.mxu0 %v4083_v27  ;;  %v4579_v10 = vld [vmem:[%s10933_s7 + $0x148] sm:$0xff]  ;;  %v4594_v27 = vld [vmem:[%s10933_s7 + $0x1c0] sm:$0xff] }
 0x822   :  { %4334 = vmatpush1.msra.mxu0 %v4081_v20  ;;  %v4082_v46 = vsel %vm11428_vm8, %v4027_v51, %v4059_v47  ;;  %4369 = vmatprep.mubr.f32.mxu0 %v9921_v6  ;;  %v4557_v20 = vld [vmem:[%s10933_s7 + $0x98] sm:$0xff]  ;;  %v4578_v47 = vld [vmem:[%s10933_s7 + $0x140] sm:$0xff] }
 0x823   :  { %v4051_v48 = vpop.permute.xlu1 %4050  ;;  %4335 = vmatprep.subr.mxu0 %v4082_v46  ;;  %v4541_v51 = vld [vmem:[%s10933_s7 + $0x18] sm:$0xff] }
 0x824   :  { %v4080_v45 = vsel %vm11429_vm14, %v4021_v17, %v4051_v48  ;;  %v4593_v17 = vld [vmem:[%s10933_s7 + $0x1b8] sm:$0xff]  ;;  %v4556_v48 = vld [vmem:[%s10933_s7 + $0x90] sm:$0xff] }
 0x825   :  { %4336 = vmatpush1.msra.mxu0 %v4080_v45  ;;  %v4077_v58 = vpop.permute.xlu0 %4076  ;;  %v4577_v46 = vld [vmem:[%s10933_s7 + $0x138] sm:$0xff]  ;;  %v4592_v45 = vld [vmem:[%s10933_s7 + $0x1b0] sm:$0xff] }
 0x826   :  { %5794 = vmatmul.mubr.msk.f32.vlgmr.msra.gmra.mxu0 %vm4089_vm11, %v9971_v19  ;;  %6523 = vmatprep.subr.mxu0 %v9921_v6  ;;  %v4087_v18 = vsel %vm11378_vm0, %v4043_v1, %v4077_v58  ;;  %v4576_v58 = vld [vmem:[%s10933_s7 + $0x130] sm:$0xff]  ;;  %v4591_v1 = vld [vmem:[%s10933_s7 + $0x1a8] sm:$0xff] }
 0x827   :  { %v4069_v34 = vpop.permute.xlu1 %4068  ;;  %6524 = vmatpush3.msk.msra.mxu0 %vm9602_vm1, %v4045_v23  ;;  %6527 = vmatprep.mubr.msk.f32.mxu0 %vm6983_vm9, %v9921_v6  ;;  %vm11432_vm1 = vmmov %vm11378_vm0  ;;  %v4539_v23 = vld [vmem:[%s10933_s7 + $0x8] sm:$0xff] }
 0x828   :  { %v4085_v62 = vsel %vm11430_vm5, %v4036_v44, %v4069_v34  ;;  %4404 = vmatprep.subr.mxu1 %v4087_v18  ;;  %6525 = vmatprep.subr.mxu0 %v9921_v6  ;;  %v4554_v34 = vld [vmem:[%s10933_s7 + $0x80] sm:$0xff]  ;;  %v4575_v18 = vld [vmem:[%s10933_s7 + $0x128] sm:$0xff] }
 0x829   :  { %4405 = vmatpush1.msra.mxu1 %v4085_v62  ;;  %6526 = vmatpush3.msk.msra.mxu0 %vm9610_vm15, %v9963_v4  ;;  %v4075_v60 = vpop.permute.xlu0 %4074  ;;  %v4590_v62 = vld [vmem:[%s10933_s7 + $0x1a0] sm:$0xff]  ;;  %vm11433_vm15 = vmmov %vm11378_vm0 }
 0x82a   :  { %6528 = vmatmul.mubr.msk.f32.vlgmr.msra.gmra.mxu0 %vm4089_vm11, %v9971_v19  ;;  %6141 = vmatprep.subr.mxu0 %v4601_v53  ;;  %v4086_v31 = vsel %vm11431_vm2, %v4042_v41, %v4075_v60  ;;  %v4538_v53 = vld [vmem:[%s10933_s7] sm:$0xff]  ;;  %v4573_v60 = vld [vmem:[%s10933_s7 + $0x118] sm:$0xff]  ;;  %v4588_v41 = vld [vmem:[%s10933_s7 + $0x190] sm:$0xff] }
 0x82b   :  { %v4067_v4 = vpop.permute.xlu1 %4066  ;;  %6142 = vmatpush3.msra.mxu0 %v4585_v39  ;;  %4406 = vmatprep.subr.mxu1 %v4086_v31  ;;  %v4574_v39 = vld [vmem:[%s10933_s7 + $0x120] sm:$0xff] }
 0x82c   :  { %v4084_v16 = vsel %vm11432_vm1, %v4035_v55, %v4067_v4  ;;  %6143 = vmatprep.subr.mxu0 %v4600_v59  ;;  %v4589_v59 = vld [vmem:[%s10933_s7 + $0x198] sm:$0xff]  ;;  %v4587_v55 = vld [vmem:[%s10933_s7 + $0x188] sm:$0xff]  ;;  %v4586_v31 = vld [vmem:[%s10933_s7 + $0x180] sm:$0xff] }
 0x82d   :  { %4407 = vmatpush1.msra.mxu1 %v4084_v16  ;;  %6144 = vmatpush3.msra.mxu0 %v4584_v30  ;;  %v4572_v30 = vld [vmem:[%s10933_s7 + $0x110] sm:$0xff]  ;;  %v4571_v4 = vld [vmem:[%s10933_s7 + $0x108] sm:$0xff] }
 0x82e   :  { %5795 = vmatmul.mubr.msk.f32.vlgmr.msra.gmra.mxu1 %vm4089_vm11, %v9971_v19  ;;  %6106 = vmatprep.subr.mxu1 %v4569_v2  ;;  %v4551_v19 = vld [vmem:[%s10933_s7 + $0x68] sm:$0xff]  ;;  %v4570_v2 = vld [vmem:[%s10933_s7 + $0x100] sm:$0xff] }
 0x82f   :  { %6107 = vmatpush3.msra.mxu1 %v4553_v8  ;;  %6145 = vmatprep.subr.mxu0 %v4599_v9 }
 0x830   :  { %6108 = vmatprep.subr.mxu1 %v4568_v24  ;;  %6146 = vmatpush3.msra.mxu0 %v4583_v49 }
 0x831   :  { %6109 = vmatpush3.msra.mxu1 %v4552_v37  ;;  %6147 = vmatprep.subr.mxu0 %v4598_v29 }
 0x832   :  { %6110 = vmatprep.subr.mxu1 %v4567_v63  ;;  %6148 = vmatpush3.msra.mxu0 %v4582_v11 }
 0x833   :  { %6111 = vmatpush3.msra.mxu1 %v4551_v19  ;;  %6149 = vmatprep.subr.mxu0 %v4597_v28  ;;  %v4609_v28 = vld [vmem:[%s10933_s7 + $0x238] sm:$0xff] }
 0x834   :  { %6112 = vmatprep.subr.mxu1 %v4566_v50  ;;  %6150 = vmatpush3.msra.mxu0 %v4581_v26  ;;  %v4603_v26 = vld [vmem:[%s10933_s7 + $0x208] sm:$0xff] }
 0x835   :  { %6113 = vmatpush3.msra.mxu1 %v4550_v52  ;;  %6151 = vmatprep.subr.mxu0 %v4596_v36  ;;  %v4602_v36 = vld [vmem:[%s10933_s7 + $0x200] sm:$0xff] }
 0x836   :  { %6114 = vmatprep.subr.mxu1 %v4565_v7  ;;  %6152 = vmatpush3.msra.mxu0 %v4580_v61  ;;  %v4608_v7 = vld [vmem:[%s10933_s7 + $0x230] sm:$0xff]  ;;  %v4989_v61 = vld [vmem:[%s10934_s8 + $0xf8] sm:$0xff] }
 0x837   :  { %6115 = vmatpush3.msra.mxu1 %v4549_v21  ;;  %6153 = vmatprep.subr.mxu0 %v4595_v22  ;;  %v4973_v22 = vld [vmem:[%s10934_s8 + $0x78] sm:$0xff] }
 0x838   :  { %6116 = vmatprep.subr.mxu1 %v4564_v33  ;;  %6154 = vmatpush3.msra.mxu0 %v4579_v10  ;;  %v4607_v33 = vld [vmem:[%s10933_s7 + $0x228] sm:$0xff]  ;;  %v4988_v10 = vld [vmem:[%s10934_s8 + $0xf0] sm:$0xff] }
 0x839   :  { %6117 = vmatpush3.msra.mxu1 %v4548_v13  ;;  %6155 = vmatprep.subr.mxu0 %v4594_v27  ;;  %v4972_v27 = vld [vmem:[%s10934_s8 + $0x70] sm:$0xff] }
 0x83a   :  { %6118 = vmatprep.subr.mxu1 %v4563_v0  ;;  %6156 = vmatpush3.msra.mxu0 %v4578_v47  ;;  %v4987_v47 = vld [vmem:[%s10934_s8 + $0xe8] sm:$0xff] }
 0x83b   :  { %6119 = vmatpush3.msra.mxu1 %v4547_v14  ;;  %6157 = vmatprep.subr.mxu0 %v4593_v17  ;;  %v4971_v17 = vld [vmem:[%s10934_s8 + $0x68] sm:$0xff] }
 0x83c   :  { %6120 = vmatprep.subr.mxu1 %v4562_v54  ;;  %6158 = vmatpush3.msra.mxu0 %v4577_v46  ;;  %v4606_v54 = vld [vmem:[%s10933_s7 + $0x220] sm:$0xff] }
 0x83d   :  { %6121 = vmatpush3.msra.mxu1 %v4546_v3  ;;  %6159 = vmatprep.subr.mxu0 %v4592_v45  ;;  %v4986_v46 = vld [vmem:[%s10934_s8 + $0xe0] sm:$0xff] }
 0x83e   :  { %6122 = vmatprep.subr.mxu1 %v4561_v5  ;;  %6160 = vmatpush3.msra.mxu0 %v4576_v58  ;;  %v4605_v5 = vld [vmem:[%s10933_s7 + $0x218] sm:$0xff]  ;;  %v4970_v45 = vld [vmem:[%s10934_s8 + $0x60] sm:$0xff] }
 0x83f   :  { %6123 = vmatpush3.msra.mxu1 %v4545_v35  ;;  %6161 = vmatprep.subr.mxu0 %v4591_v1  ;;  %v4985_v58 = vld [vmem:[%s10934_s8 + $0xd8] sm:$0xff] }
 0x840   :  { %6124 = vmatprep.subr.mxu1 %v4560_v15  ;;  %6162 = vmatpush3.msra.mxu0 %v4575_v18  ;;  %v4604_v15 = vld [vmem:[%s10933_s7 + $0x210] sm:$0xff]  ;;  %v4969_v1 = vld [vmem:[%s10934_s8 + $0x58] sm:$0xff] }
 0x841   :  { %6125 = vmatpush3.msra.mxu1 %v4544_v12  ;;  %6163 = vmatprep.subr.mxu0 %v4590_v62  ;;  %v5016_v18 = vld [vmem:[%s10934_s8 + $0x1d0] sm:$0xff] }
 0x842   :  { %6126 = vmatprep.subr.mxu1 %v4559_v38  ;;  %6164 = vmatpush3.msra.mxu0 %v4574_v39  ;;  %v5000_v62 = vld [vmem:[%s10934_s8 + $0x150] sm:$0xff]  ;;  %v5015_v39 = vld [vmem:[%s10934_s8 + $0x1c8] sm:$0xff] }
 0x843   :  { %6127 = vmatpush3.msra.mxu1 %v4543_v43  ;;  %6165 = vmatprep.subr.mxu0 %v4589_v59  ;;  %v5021_v43 = vld [vmem:[%s10934_s8 + $0x1f8] sm:$0xff]  ;;  %v4967_v59 = vld [vmem:[%s10934_s8 + $0x48] sm:$0xff] }
 0x844   :  { %6128 = vmatprep.subr.mxu1 %v4558_v32  ;;  %6166 = vmatpush3.msra.mxu0 %v4573_v60  ;;  %v5005_v32 = vld [vmem:[%s10934_s8 + $0x178] sm:$0xff]  ;;  %v4999_v60 = vld [vmem:[%s10934_s8 + $0x148] sm:$0xff] }
 0x845   :  { %6129 = vmatpush3.msra.mxu1 %v4542_v57  ;;  %6167 = vmatprep.subr.mxu0 %v4588_v41  ;;  %v5020_v57 = vld [vmem:[%s10934_s8 + $0x1f0] sm:$0xff]  ;;  %v4982_v41 = vld [vmem:[%s10934_s8 + $0xc0] sm:$0xff] }
 0x846   :  { %6130 = vmatprep.subr.mxu1 %v4557_v20  ;;  %6168 = vmatpush3.msra.mxu0 %v4572_v30  ;;  %v5004_v20 = vld [vmem:[%s10934_s8 + $0x170] sm:$0xff]  ;;  %v5014_v30 = vld [vmem:[%s10934_s8 + $0x1c0] sm:$0xff] }
 0x847   :  { %6131 = vmatpush3.msra.mxu1 %v4541_v51  ;;  %6169 = vmatprep.subr.mxu0 %v4587_v55  ;;  %v5019_v51 = vld [vmem:[%s10934_s8 + $0x1e8] sm:$0xff]  ;;  %v4966_v55 = vld [vmem:[%s10934_s8 + $0x40] sm:$0xff] }
 0x848   :  { %6132 = vmatprep.subr.mxu1 %v4556_v48  ;;  %6170 = vmatpush3.msra.mxu0 %v4571_v4  ;;  %v5003_v48 = vld [vmem:[%s10934_s8 + $0x168] sm:$0xff]  ;;  %v4998_v4 = vld [vmem:[%s10934_s8 + $0x140] sm:$0xff] }
 0x849   :  { %6133 = vmatpush3.msra.mxu1 %v4540_v40  ;;  %6171 = vmatprep.subr.mxu0 %v4586_v31  ;;  %v5018_v40 = vld [vmem:[%s10934_s8 + $0x1e0] sm:$0xff]  ;;  %v4981_v31 = vld [vmem:[%s10934_s8 + $0xb8] sm:$0xff] }
 0x84a   :  { %6134 = vmatprep.subr.mxu1 %v4555_v25  ;;  %6172 = vmatpush3.msra.mxu0 %v4570_v2  ;;  %v5002_v25 = vld [vmem:[%s10934_s8 + $0x160] sm:$0xff]  ;;  %v5013_v2 = vld [vmem:[%s10934_s8 + $0x1b8] sm:$0xff] }
 0x84b   :  { %6135 = vmatpush3.msra.mxu1 %v4539_v23  ;;  %6185 = vmatprep.subr.mxu0 %v4989_v61  ;;  %v5017_v23 = vld [vmem:[%s10934_s8 + $0x1d8] sm:$0xff]  ;;  %v5006_v61 = vld [vmem:[%s10934_s8 + $0x180] sm:$0xff] }
 0x84c   :  { %6136 = vmatprep.subr.mxu1 %v4554_v34  ;;  %v4984_v34 = vld [vmem:[%s10934_s8 + $0xd0] sm:$0xff] }
 0x84d   :  { %6137 = vmatpush3.msra.mxu1 %v4538_v53  ;;  %v4968_v53 = vld [vmem:[%s10934_s8 + $0x50] sm:$0xff] }
 0x84e   :  { %6530 = vmatprep.subr.mxu1 %v9921_v6 }
 0x867   :  { %v10208_v44 = vpop.f32.mrf.mxu1 }
 0x869   :  { %v6522_v56 = vpop.f32.mrf.mxu1 }
 0x86a   :  { %v4983_v56 = vld [vmem:[%s10934_s8 + $0xc8] sm:$0xff] }
 0x8dd   :  { %v4159_v16 = vpop.f32.mrf.mxu0 }
 0x8df   :  { %v4161_v8 = vpop.f32.mrf.mxu0 }
 0x8e1   :  { %v4230_v9 = vpop.f32.mrf.mxu0 }
 0x8e3   :  { %v4232_v24 = vpop.f32.mrf.mxu0 }
 0x8e6   :  { %v4371_v49 = vpop.f32.mrf.mxu0 }
 0x8e7   :  { %v4522_v37 = vrot.slane %v4371_v49, 4  ;;  %v4964_v49 = vld [vmem:[%s10934_s8 + $0x30] sm:$0xff] }
 0x8e8   :  { %v4373_v29 = vpop.f32.mrf.mxu0 }
 0x8e9   :  { %v4523_v63 = vrot.slane %v4373_v29, 4  ;;  %v10255_v50 = vsel %vm4532_vm12, %v4159_v16, %v4522_v37  ;;  %v4965_v16 = vld [vmem:[%s10934_s8 + $0x38] sm:$0xff]  ;;  %v4996_v37 = vld [vmem:[%s10934_s8 + $0x130] sm:$0xff]  ;;  %v4979_v29 = vld [vmem:[%s10934_s8 + $0xa8] sm:$0xff] }
 0x8ea   :  { %v4513_v11 = vpop.f32.mrf.mxu0 }
 0x8eb   :  { %v4534_v19 = vsel %vm4532_vm12, %v4161_v8, %v4523_v63  ;;  %v4526_v12 = vrot.slane %v4513_v11, 4  ;;  %v4997_v8 = vld [vmem:[%s10934_s8 + $0x138] sm:$0xff]  ;;  %v5011_v63 = vld [vmem:[%s10934_s8 + $0x1a8] sm:$0xff] }
 0x8ec   :  { %4677 = vmatprep.mubr.f32.mxu1 %v4534_v19  ;;  %v6529_v52 = vpop.f32.mrf.mxu0  ;;  %v4963_v11 = vld [vmem:[%s10934_s8 + $0x28] sm:$0xff] }
 0x8ed   :  { %4678 = vmatmul.mubr.f32.vlgmr.msra.gmra.mxu1 %v10255_v50  ;;  %v4537_v38 = vsel %vm4532_vm12, %v10208_v44, %v4526_v12  ;;  %v5001_v44 = vld [vmem:[%s10934_s8 + $0x158] sm:$0xff]  ;;  %v4995_v19 = vld [vmem:[%s10934_s8 + $0x128] sm:$0xff]  ;;  %v5010_v52 = vld [vmem:[%s10934_s8 + $0x1a0] sm:$0xff] }
 0x8ee   :  { %6531 = vmatpush3.msra.mxu1 %v4609_v28  ;;  %v4442_v21 = vpop.f32.mrf.mxu1  ;;  %6546 = vmatprep.mubr.msk.f32.mxu1 %vm6983_vm9, %v9921_v6  ;;  %v4978_v28 = vld [vmem:[%s10934_s8 + $0xa0] sm:$0xff]  ;;  %v4959_v12 = vld [vmem:[%s10934_s8 + $0x8] sm:$0xff] }
 0x8ef   :  { %6532 = vmatprep.subr.mxu1 %v9921_v6  ;;  %v4524_v13 = vrot.slane %v4442_v21, 4  ;;  %v4994_v21 = vld [vmem:[%s10934_s8 + $0x120] sm:$0xff] }
 0x8f0   :  { %6533 = vmatpush3.msra.mxu1 %v4608_v7  ;;  %v4444_v0 = vpop.f32.mrf.mxu1  ;;  %v4962_v7 = vld [vmem:[%s10934_s8 + $0x20] sm:$0xff] }
 0x8f1   :  { %v4525_v14 = vrot.slane %v4444_v0, 4  ;;  %6534 = vmatprep.subr.mxu1 %v9921_v6  ;;  %v4535_v35 = vsel %vm4532_vm12, %v4230_v9, %v4524_v13  ;;  %v4980_v9 = vld [vmem:[%s10934_s8 + $0xb0] sm:$0xff]  ;;  %v5009_v13 = vld [vmem:[%s10934_s8 + $0x198] sm:$0xff] }
 0x8f2   :  { %6535 = vmatpush3.msra.mxu1 %v4607_v33  ;;  %v4977_v33 = vld [vmem:[%s10934_s8 + $0x98] sm:$0xff] }
 0x8f3   :  { %6536 = vmatprep.subr.mxu1 %v9921_v6  ;;  %v4536_v3 = vsel %vm4532_vm12, %v4232_v24, %v4525_v14  ;;  %v5012_v24 = vld [vmem:[%s10934_s8 + $0x1b0] sm:$0xff]  ;;  %v4961_v0 = vld [vmem:[%s10934_s8 + $0x18] sm:$0xff] }
 0x8f4   :  { %6537 = vmatpush3.msra.mxu1 %v4606_v54  ;;  %4747 = vmatprep.mubr.f32.mxu0 %v4536_v3  ;;  %v4993_v14 = vld [vmem:[%s10934_s8 + $0x118] sm:$0xff]  ;;  %v4976_v54 = vld [vmem:[%s10934_s8 + $0x90] sm:$0xff] }
 0x8f5   :  { %6538 = vmatprep.subr.mxu1 %v9921_v6  ;;  %4748 = vmatmul.mubr.f32.vlgmr.msra.gmra.mxu0 %v4535_v35  ;;  %v5008_v3 = vld [vmem:[%s10934_s8 + $0x190] sm:$0xff] }
 0x8f6   :  { %6539 = vmatpush3.msra.mxu1 %v4605_v5  ;;  %6186 = vmatpush3.msra.mxu0 %v4973_v22  ;;  %v4960_v5 = vld [vmem:[%s10934_s8 + $0x10] sm:$0xff]  ;;  %v4990_v22 = vld [vmem:[%s10934_s8 + $0x100] sm:$0xff] }
 0x8f7   :  { %6540 = vmatprep.subr.mxu1 %v9921_v6  ;;  %6187 = vmatprep.subr.mxu0 %v4988_v10  ;;  %v4992_v35 = vld [vmem:[%s10934_s8 + $0x110] sm:$0xff]  ;;  %v5085_v10 = vld [vmem:[%s10934_s8 + $0x3f8] sm:$0xff] }
 0x8f8   :  { %6541 = vmatpush3.msra.mxu1 %v4604_v15  ;;  %6188 = vmatpush3.msra.mxu0 %v4972_v27  ;;  %v4975_v15 = vld [vmem:[%s10934_s8 + $0x88] sm:$0xff] }
 0x8f9   :  { %6542 = vmatprep.subr.mxu1 %v9921_v6  ;;  %6189 = vmatprep.subr.mxu0 %v4987_v47 }
 0x8fa   :  { %6543 = vmatpush3.msra.mxu1 %v4603_v26  ;;  %6190 = vmatpush3.msra.mxu0 %v4971_v17  ;;  %v5007_v26 = vld [vmem:[%s10934_s8 + $0x188] sm:$0xff] }
 0x8fb   :  { %6544 = vmatprep.subr.mxu1 %v9921_v6  ;;  %6191 = vmatprep.subr.mxu0 %v4986_v46 }
 0x8fc   :  { %6545 = vmatpush3.msra.mxu1 %v4602_v36  ;;  %6192 = vmatpush3.msra.mxu0 %v4970_v45  ;;  %v4991_v36 = vld [vmem:[%s10934_s8 + $0x108] sm:$0xff] }
 0x8fd   :  { %6547 = vmatmul.mubr.msk.f32.vlgmr.msra.gmra.mxu1 %vm11433_vm15, %v4537_v38  ;;  %6220 = vmatprep.subr.mxu1 %v5021_v43  ;;  %v4974_v38 = vld [vmem:[%s10934_s8 + $0x80] sm:$0xff] }
 0x8fe   :  { %6221 = vmatpush3.msra.mxu1 %v5005_v32  ;;  %6193 = vmatprep.subr.mxu0 %v4985_v58  ;;  %v4958_v43 = vld [vmem:[%s10934_s8] sm:$0xff]  ;;  %v5053_v32 = vld [vmem:[%s10934_s8 + $0x2f8] sm:$0xff] }
 0x8ff   :  { %6222 = vmatprep.subr.mxu1 %v5020_v57  ;;  %6194 = vmatpush3.msra.mxu0 %v4969_v1 }
 0x900   :  { %6223 = vmatpush3.msra.mxu1 %v5004_v20  ;;  %6195 = vmatprep.subr.mxu0 %v4984_v34 }
 0x901   :  { %6224 = vmatprep.subr.mxu1 %v5019_v51  ;;  %6196 = vmatpush3.msra.mxu0 %v4968_v53 }
 0x902   :  { %6225 = vmatpush3.msra.mxu1 %v5003_v48  ;;  %6197 = vmatprep.subr.mxu0 %v4983_v56 }
 0x903   :  { %6226 = vmatprep.subr.mxu1 %v5018_v40  ;;  %6198 = vmatpush3.msra.mxu0 %v4967_v59 }
 0x904   :  { %6227 = vmatpush3.msra.mxu1 %v5002_v25  ;;  %6199 = vmatprep.subr.mxu0 %v4982_v41 }
 0x905   :  { %6228 = vmatprep.subr.mxu1 %v5017_v23  ;;  %6200 = vmatpush3.msra.mxu0 %v4966_v55 }
 0x906   :  { %6229 = vmatpush3.msra.mxu1 %v5001_v44  ;;  %6201 = vmatprep.subr.mxu0 %v4981_v31 }
 0x907   :  { %6230 = vmatprep.subr.mxu1 %v5016_v18  ;;  %6202 = vmatpush3.msra.mxu0 %v4965_v16 }
 0x908   :  { %6231 = vmatpush3.msra.mxu1 %v5000_v62  ;;  %6203 = vmatprep.subr.mxu0 %v4980_v9 }
 0x909   :  { %6232 = vmatprep.subr.mxu1 %v5015_v39  ;;  %6204 = vmatpush3.msra.mxu0 %v4964_v49 }
 0x90a   :  { %6233 = vmatpush3.msra.mxu1 %v4999_v60  ;;  %6205 = vmatprep.subr.mxu0 %v4979_v29 }
 0x90b   :  { %6234 = vmatprep.subr.mxu1 %v5014_v30  ;;  %6206 = vmatpush3.msra.mxu0 %v4963_v11 }
 0x90c   :  { %6235 = vmatpush3.msra.mxu1 %v4998_v4  ;;  %6207 = vmatprep.subr.mxu0 %v4978_v28 }
 0x90d   :  { %6236 = vmatprep.subr.mxu1 %v5013_v2  ;;  %6208 = vmatpush3.msra.mxu0 %v4962_v7 }
 0x90e   :  { %6237 = vmatpush3.msra.mxu1 %v4997_v8  ;;  %6209 = vmatprep.subr.mxu0 %v4977_v33 }
 0x90f   :  { %6238 = vmatprep.subr.mxu1 %v5012_v24  ;;  %6210 = vmatpush3.msra.mxu0 %v4961_v0 }
 0x910   :  { %6239 = vmatpush3.msra.mxu1 %v4996_v37  ;;  %6211 = vmatprep.subr.mxu0 %v4976_v54 }
 0x911   :  { %6240 = vmatprep.subr.mxu1 %v5011_v63  ;;  %6212 = vmatpush3.msra.mxu0 %v4960_v5 }
 0x912   :  { %6241 = vmatpush3.msra.mxu1 %v4995_v19  ;;  %6213 = vmatprep.subr.mxu0 %v4975_v15 }
 0x913   :  { %6242 = vmatprep.subr.mxu1 %v5010_v52  ;;  %6214 = vmatpush3.msra.mxu0 %v4959_v12 }
 0x914   :  { %6243 = vmatpush3.msra.mxu1 %v4994_v21  ;;  %6215 = vmatprep.subr.mxu0 %v4974_v38 }
 0x915   :  { %6244 = vmatprep.subr.mxu1 %v5009_v13  ;;  %6216 = vmatpush3.msra.mxu0 %v4958_v43  ;;  %v5100_v43 = vld [vmem:[%s10934_s8 + $0x470] sm:$0xff] }
 0x916   :  { %6245 = vmatpush3.msra.mxu1 %v4993_v14  ;;  %6255 = vmatprep.subr.mxu0 %v5053_v32 }
 0x917   :  { %6246 = vmatprep.subr.mxu1 %v5008_v3 }
 0x918   :  { %6247 = vmatpush3.msra.mxu1 %v4992_v35 }
 0x919   :  { %6248 = vmatprep.subr.mxu1 %v5007_v26 }
 0x91a   :  { %6249 = vmatpush3.msra.mxu1 %v4991_v36 }
 0x91b   :  { %6250 = vmatprep.subr.mxu1 %v5006_v61  ;;  %v4883_v61 = vand.u32 1, %v11365_v42 }
 0x91c   :  { %6251 = vmatpush3.msra.mxu1 %v4990_v22  ;;  %v5063_v22 = vld [vmem:[%s10934_s8 + $0x348] sm:$0xff] }
 0x91d   :  { %6290 = vmatprep.subr.mxu1 %v5085_v10  ;;  %vm10497_vm11 = vcmp.ne.s32.totalorder %v4883_v61, 0  ;;  %vm10501_vm7 = vcmp.ne.s32.totalorder %v4883_v61, 1  ;;  %v5031_v61 = vld [vmem:[%s10934_s8 + $0x248] sm:$0xff] }
 0x9ad   :  { %v6138_v57 = vpop.f32.mrf.mxu1 }
 0x9af   :  { %v6139_v27 = vpop.f32.mrf.mxu1 }
 0x9b0   :  { %v6140_v51 = vadd.f32 %v6139_v27, %v6138_v57 }
 0x9b5   :  { %v6173_v20 = vpop.f32.mrf.mxu0 }
 0x9b7   :  { %v6174_v47 = vpop.f32.mrf.mxu0 }
 0x9b8   :  { %v6175_v17 = vadd.f32 %v6174_v47, %v6173_v20 }
 0x9ba   :  { %v4750_v48 = vadd.f32 %v6175_v17, %v6140_v51 }
 0x9bd   :  { %v4819_v46 = vpop.f32.mrf.mxu1 }
 0x9be   :  { %v4820_v40 = vadd.f32 %v4819_v46, %v4750_v48  ;;  %v5037_v48 = vld [vmem:[%s10934_s8 + $0x278] sm:$0xff] }
 0x9bf   :  { %v6548_v45 = vpop.f32.mrf.mxu1 }
 0x9c0   :  { %v4823_v25 = vsel %vm4532_vm12, %v4820_v40, 0.0  ;;  %v4846_v58 = vrot.slane %v4820_v40, 4 }
 0x9c1   :  { %v4824_v23 = vrot.slane %v4823_v25, 4 }
 0x9c2   :  { %v4848_v1 = vsel %vm4532_vm12, %v4846_v58, 0.0  ;;  %v5069_v58 = vld [vmem:[%s10934_s8 + $0x378] sm:$0xff] }
 0x9c3   :  { %v4825_v44 = vadd.f32 %v4824_v23, %v4823_v25  ;;  %v4849_v34 = vrot.slane %v4848_v1, 4 }
 0x9c5   :  { %v4826_v18 = vrot.slane %v4825_v44, 2  ;;  %v4850_v53 = vadd.f32 %v4849_v34, %v4848_v1 }
 0x9c7   :  { %v4827_v62 = vadd.f32 %v4826_v18, %v4825_v44  ;;  %v4851_v56 = vrot.slane %v4850_v53, 2 }
 0x9c9   :  { %v4828_v39 = vrot.slane %v4827_v62, 1  ;;  %v4852_v59 = vadd.f32 %v4851_v56, %v4850_v53 }
 0x9cb   :  { %v4829_v60 = vadd.f32 %v4828_v39, %v4827_v62  ;;  %v4853_v41 = vrot.slane %v4852_v59, 1  ;;  %v5052_v39 = vld [vmem:[%s10934_s8 + $0x2f0] sm:$0xff] }
 0x9cd   :  { %v4831_v30 = vmul.f32 0.25, %v4829_v60  ;;  %v4854_v55 = vadd.f32 %v4853_v41, %v4852_v59 }
 0x9cf   :  { %v4832_v4 = vsub.f32 %v4820_v40, %v4831_v30  ;;  %v4855_v31 = vmul.f32 0.25, %v4854_v55  ;;  %v5084_v55 = vld [vmem:[%s10934_s8 + $0x3f0] sm:$0xff] }
 0x9d1   :  { %v4833_v2 = vmul.f32 %v4832_v4, %v4832_v4  ;;  %v4856_v16 = vsub.f32 %v4820_v40, %v4855_v31 }
 0x9d3   :  { %v4834_v8 = vsel %vm4532_vm12, %v4833_v2, 0.0  ;;  %v4857_v9 = vmul.f32 %v4856_v16, %v4856_v16 }
 0x9d4   :  { %v4835_v24 = vrot.slane %v4834_v8, 4 }
 0x9d5   :  { %v4859_v49 = vrot.slane %v4857_v9, 4 }
 0x9d6   :  { %v4836_v37 = vadd.f32 %v4835_v24, %v4834_v8 }
 0x9d7   :  { %v4861_v29 = vsel %vm4532_vm12, %v4859_v49, 0.0 }
 0x9d8   :  { %v4837_v63 = vrot.slane %v4836_v37, 2  ;;  %v4862_v11 = vrot.slane %v4861_v29, 4 }
 0x9da   :  { %v4838_v19 = vadd.f32 %v4837_v63, %v4836_v37  ;;  %v4863_v28 = vadd.f32 %v4862_v11, %v4861_v29  ;;  %v5068_v37 = vld [vmem:[%s10934_s8 + $0x370] sm:$0xff]  ;;  %v5051_v29 = vld [vmem:[%s10934_s8 + $0x2e8] sm:$0xff] }
 0x9db   :  { %v5083_v11 = vld [vmem:[%s10934_s8 + $0x3e8] sm:$0xff] }
 0x9dc   :  { %v4839_v52 = vrot.slane %v4838_v19, 1  ;;  %v4864_v7 = vrot.slane %v4863_v28, 2 }
 0x9de   :  { %v4840_v21 = vadd.f32 %v4839_v52, %v4838_v19  ;;  %v4865_v33 = vadd.f32 %v4864_v7, %v4863_v28  ;;  %v5035_v19 = vld [vmem:[%s10934_s8 + $0x268] sm:$0xff]  ;;  %v5050_v7 = vld [vmem:[%s10934_s8 + $0x2e0] sm:$0xff] }
 0x9df   :  { %v5067_v52 = vld [vmem:[%s10934_s8 + $0x368] sm:$0xff] }
 0x9e0   :  { %v4841_v13 = vmul.f32 0.25, %v4840_v21  ;;  %v4866_v0 = vrot.slane %v4865_v33, 1  ;;  %v5082_v21 = vld [vmem:[%s10934_s8 + $0x3e0] sm:$0xff] }
 0x9e2   :  { %v4842_v14 = vadd.f32 1e-05, %v4841_v13  ;;  %v4867_v54 = vadd.f32 %v4866_v0, %v4865_v33  ;;  %v5034_v33 = vld [vmem:[%s10934_s8 + $0x260] sm:$0xff] }
 0x9e3   :  { %v5066_v0 = vld [vmem:[%s10934_s8 + $0x360] sm:$0xff] }
 0x9e4   :  { %v4868_v3 = vmul.f32 0.25, %v4867_v54  ;;  %6947 = vrsqrt.f32 %v4842_v14  ;;  %v5049_v14 = vld [vmem:[%s10934_s8 + $0x2d8] sm:$0xff] }
 0x9e5   :  { %v5081_v54 = vld [vmem:[%s10934_s8 + $0x3d8] sm:$0xff] }
 0x9e6   :  { %v4869_v5 = vadd.f32 1e-05, %v4868_v3  ;;  %v5033_v3 = vld [vmem:[%s10934_s8 + $0x258] sm:$0xff] }
 0x9e8   :  { %6949 = vrsqrt.f32 %v4869_v5  ;;  %v5065_v5 = vld [vmem:[%s10934_s8 + $0x358] sm:$0xff] }
 0x9f1   :  { %v6948_v35 = vpop.eup %6947 }
 0x9f2   :  { %v4844_v26 = vmul.f32 %v6948_v35, %v4832_v4  ;;  %v5048_v35 = vld [vmem:[%s10934_s8 + $0x2d0] sm:$0xff] }
 0x9f5   :  { %v6950_v15 = vpop.eup %6949 }
 0x9f6   :  { %v4871_v12 = vmul.f32 %v6950_v15, %v4856_v16  ;;  %v5036_v16 = vld [vmem:[%s10934_s8 + $0x270] sm:$0xff] }
 0x9f7   :  { %v5080_v15 = vld [vmem:[%s10934_s8 + $0x3d0] sm:$0xff] }
 0x9f8   :  { %v4872_v36 = vsel %vm4532_vm12, %v4844_v26, %v4871_v12  ;;  %v5032_v26 = vld [vmem:[%s10934_s8 + $0x250] sm:$0xff] }
 0x9f9   :  { %v4873_v38 = vmax.f32 %v4872_v36, 0.0  ;;  %v5064_v12 = vld [vmem:[%s10934_s8 + $0x350] sm:$0xff]  ;;  %v5047_v36 = vld [vmem:[%s10934_s8 + $0x2c8] sm:$0xff] }
 0x9fb   :  { %4877 = vst [vmem:[#allocation4 + $0x4] ss:$6 sps:$4 sm:$0xff] %v4873_v38   ;;  %v5079_v38 = vld [vmem:[%s10934_s8 + $0x3c8] sm:$0xff] }
 0xa02   :  { %v4894_v32 = vld [vmem:[#allocation4 + $0x1] sm:$0xf]  ;;  %v4908_v10 = vld [vmem:[#allocation4 + $0x7] sm:$0xf]  ;;  %v10528_v18 = vld [vmem:[#allocation4 + $0xb] sm:$0xf] }
 0xa03   :  { %v4911_v57 = vsel %vm10497_vm11, %v4908_v10, 0.0  ;;  %v10507_v27 = vld [vmem:[#allocation4 + $0x3] sm:$0xf]  ;;  %v10509_v20 = vld [vmem:[#allocation4 + $0x9] sm:$0xf]  ;;  %v4897_v42 = vsel %vm10497_vm11, %v4894_v32, 0.0 }
 0xa04   :  { %v4932_v47 = vrot.slane %v4911_v57, 4  ;;  %v4914_v51 = vsel %vm10501_vm7, %v10509_v20, 0.0  ;;  %v4910_v17 = vld [vmem:[#allocation4 + $0xa] sm:$0xf]  ;;  %v4893_v40 = vld [vmem:[#allocation4 + $0x4] sm:$0xf] }
 0xa05   :  { %v4934_v46 = vrot.slane %v4914_v51, 4  ;;  %v4931_v45 = vrot.slane %v4910_v17, 4  ;;  %v4912_v25 = vld [vmem:[#allocation4 + $0x8] sm:$0xf]  ;;  %v4902_v1 = vsel %vm10501_vm7, %v10507_v27, 0.0  ;;  %v4917_v59 = vsel %vm10501_vm7, %v10528_v18, 0.0 }
 0xa06   :  { %v4950_v23 = vsel %vm4532_vm12, %v4897_v42, %v4932_v47  ;;  %v4933_v44 = vrot.slane %v4912_v25, 4  ;;  %v10526_v34 = vld [vmem:[#allocation4 + $0x5] sm:$0xf]  ;;  %v4919_v60 = vld [vmem:[#allocation4 + $0xc] sm:$0xf]  ;;  %v4936_v30 = vrot.slane %v4917_v59, 4 }
 0xa07   :  { %5166 = vmatprep.mubr.f32.mxu0 %v4950_v23  ;;  %v4952_v53 = vsel %vm4532_vm12, %v4902_v1, %v4934_v46  ;;  %v4949_v62 = vsel %vm4532_vm12, %v4893_v40, %v4931_v45  ;;  %v4898_v56 = vld [vmem:[#allocation4 + $0x2] sm:$0xf]  ;;  %v4938_v4 = vrot.slane %v4919_v60, 4  ;;  %v4920_v31 = vld [vmem:[#allocation4 + $0xd] sm:$0xf]  ;;  %v4905_v2 = vsel %vm10501_vm7, %v10526_v34, 0.0 }
 0xa08   :  { %5236 = vmatprep.mubr.f32.mxu1 %v4952_v53  ;;  %5167 = vmatmul.mubr.f32.vlgmr.msra.gmra.mxu0 %v4949_v62  ;;  %v4951_v41 = vsel %vm4532_vm12, %v4898_v56, %v4933_v44  ;;  %v4909_v8 = vsel %vm10501_vm7, %v4908_v10, 0.0  ;;  %v4921_v9 = vsel %vm10501_vm7, %v4920_v31, 0.0  ;;  %v4954_v24 = vsel %vm4532_vm12, %v4905_v2, %v4936_v30  ;;  %v4907_v49 = vld [vmem:[#allocation4 + $0x6] sm:$0xf]  ;;  %v5045_v47 = vld [vmem:[%s10934_s8 + $0x2b8] sm:$0xff]  ;;  %v5044_v46 = vld [vmem:[%s10934_s8 + $0x2b0] sm:$0xff] }
 0xa09   :  { %5237 = vmatmul.mubr.f32.vlgmr.msra.gmra.mxu1 %v4951_v41  ;;  %6256 = vmatpush3.msra.mxu0 %v5037_v48  ;;  %v4956_v63 = vsel %vm4532_vm12, %v4907_v49, %v4938_v4  ;;  %v4939_v28 = vrot.slane %v4921_v9, 4  ;;  %v5046_v32 = vld [vmem:[%s10934_s8 + $0x2c0] sm:$0xff]  ;;  %v5077_v51 = vld [vmem:[%s10934_s8 + $0x3b8] sm:$0xff]  ;;  %v5076_v40 = vld [vmem:[%s10934_s8 + $0x3b0] sm:$0xff]  ;;  %v4915_v2 = vsel %vm10497_vm11, %v10509_v20, 0.0  ;;  %v4918_v9 = vsel %vm10497_vm11, %v10528_v18, 0.0 }
 0xa0a   :  { %6291 = vmatpush3.msra.mxu1 %v5069_v58  ;;  %6257 = vmatprep.subr.mxu0 %v5052_v39  ;;  %v5078_v10 = vld [vmem:[%s10934_s8 + $0x3c0] sm:$0xff]  ;;  %v5029_v17 = vld [vmem:[%s10934_s8 + $0x238] sm:$0xff]  ;;  %v5028_v45 = vld [vmem:[%s10934_s8 + $0x230] sm:$0xff] }
 0xa0b   :  { %5306 = vmatprep.mubr.f32.mxu0 %v4954_v24  ;;  %6292 = vmatprep.subr.mxu1 %v5084_v55  ;;  %v10579_v13 = vsel %vm4532_vm12, %v4909_v8, %v4939_v28  ;;  %v5030_v57 = vld [vmem:[%s10934_s8 + $0x240] sm:$0xff]  ;;  %v5061_v48 = vld [vmem:[%s10934_s8 + $0x338] sm:$0xff]  ;;  %v5060_v25 = vld [vmem:[%s10934_s8 + $0x330] sm:$0xff]  ;;  %v4903_v28 = vsel %vm10497_vm11, %v10507_v27, 0.0 }
 0xa0c   :  { %5376 = vmatprep.mubr.f32.mxu1 %v4956_v63  ;;  %6258 = vmatpush3.msra.mxu0 %v5036_v16  ;;  %v5062_v42 = vld [vmem:[%s10934_s8 + $0x340] sm:$0xff]  ;;  %v5043_v58 = vld [vmem:[%s10934_s8 + $0x2a8] sm:$0xff]  ;;  %v5041_v59 = vld [vmem:[%s10934_s8 + $0x298] sm:$0xff] }
 0xa0d   :  { %6293 = vmatpush3.msra.mxu1 %v5068_v37  ;;  %6259 = vmatprep.subr.mxu0 %v5051_v29  ;;  %v5075_v23 = vld [vmem:[%s10934_s8 + $0x3a8] sm:$0xff]  ;;  %v5042_v53 = vld [vmem:[%s10934_s8 + $0x2a0] sm:$0xff]  ;;  %v5073_v60 = vld [vmem:[%s10934_s8 + $0x398] sm:$0xff]  ;;  %v4935_v37 = vrot.slane %v4915_v2, 4 }
 0xa0e   :  { %6294 = vmatprep.subr.mxu1 %v5083_v11  ;;  %6260 = vmatpush3.msra.mxu0 %v5035_v19  ;;  %v5027_v1 = vld [vmem:[%s10934_s8 + $0x228] sm:$0xff]  ;;  %v5074_v62 = vld [vmem:[%s10934_s8 + $0x3a0] sm:$0xff]  ;;  %v5025_v41 = vld [vmem:[%s10934_s8 + $0x218] sm:$0xff]  ;;  %v4937_v11 = vrot.slane %v4918_v9, 4 }
 0xa0f   :  { %6295 = vmatpush3.msra.mxu1 %v5067_v52  ;;  %6261 = vmatprep.subr.mxu0 %v5050_v7  ;;  %v5059_v44 = vld [vmem:[%s10934_s8 + $0x328] sm:$0xff]  ;;  %v5026_v56 = vld [vmem:[%s10934_s8 + $0x220] sm:$0xff]  ;;  %v5057_v30 = vld [vmem:[%s10934_s8 + $0x318] sm:$0xff]  ;;  %v4953_v52 = vsel %vm4532_vm12, %v4903_v28, %v4935_v37  ;;  %v4906_v7 = vsel %vm10497_vm11, %v10526_v34, 0.0 }
 0xa10   :  { %6296 = vmatprep.subr.mxu1 %v5082_v21  ;;  %6262 = vmatpush3.msra.mxu0 %v5034_v33  ;;  %v5058_v39 = vld [vmem:[%s10934_s8 + $0x320] sm:$0xff]  ;;  %v5040_v55 = vld [vmem:[%s10934_s8 + $0x290] sm:$0xff]  ;;  %v5039_v8 = vld [vmem:[%s10934_s8 + $0x288] sm:$0xff]  ;;  %v4955_v33 = vsel %vm4532_vm12, %v4906_v7, %v4937_v11 }
 0xa11   :  { %6297 = vmatpush3.msra.mxu1 %v5066_v0  ;;  %6263 = vmatprep.subr.mxu0 %v5049_v14  ;;  %v5072_v4 = vld [vmem:[%s10934_s8 + $0x390] sm:$0xff]  ;;  %v5071_v20 = vld [vmem:[%s10934_s8 + $0x388] sm:$0xff]  ;;  %v5038_v18 = vld [vmem:[%s10934_s8 + $0x280] sm:$0xff] }
 0xa12   :  { %6298 = vmatprep.subr.mxu1 %v5081_v54  ;;  %6264 = vmatpush3.msra.mxu0 %v5033_v3  ;;  %v5024_v31 = vld [vmem:[%s10934_s8 + $0x210] sm:$0xff]  ;;  %v5023_v24 = vld [vmem:[%s10934_s8 + $0x208] sm:$0xff]  ;;  %v5070_v29 = vld [vmem:[%s10934_s8 + $0x380] sm:$0xff] }
 0xa13   :  { %6299 = vmatpush3.msra.mxu1 %v5065_v5  ;;  %6265 = vmatprep.subr.mxu0 %v5048_v35  ;;  %v5056_v16 = vld [vmem:[%s10934_s8 + $0x310] sm:$0xff]  ;;  %v5055_v49 = vld [vmem:[%s10934_s8 + $0x308] sm:$0xff]  ;;  %v5022_v63 = vld [vmem:[%s10934_s8 + $0x200] sm:$0xff] }
 0xa14   :  { %6300 = vmatprep.subr.mxu1 %v5080_v15  ;;  %6266 = vmatpush3.msra.mxu0 %v5032_v26  ;;  %v5054_v19 = vld [vmem:[%s10934_s8 + $0x300] sm:$0xff]  ;;  %v5101_v21 = vld [vmem:[%s10934_s8 + $0x478] sm:$0xff]  ;;  %v5507_v34 = vld [vmem:[%s10935_s9 + $0x30] sm:$0xff] }
 0xa15   :  { %6301 = vmatpush3.msra.mxu1 %v5064_v12  ;;  %6267 = vmatprep.subr.mxu0 %v5047_v36  ;;  %v5508_v27 = vld [vmem:[%s10935_s9 + $0x38] sm:$0xff]  ;;  %v5099_v0 = vld [vmem:[%s10934_s8 + $0x468] sm:$0xff]  ;;  %v5098_v54 = vld [vmem:[%s10934_s8 + $0x460] sm:$0xff] }
 0xa16   :  { %6302 = vmatprep.subr.mxu1 %v5079_v38  ;;  %6268 = vmatpush3.msra.mxu0 %v5031_v61  ;;  %v5506_v14 = vld [vmem:[%s10935_s9 + $0x28] sm:$0xff]  ;;  %v5505_v3 = vld [vmem:[%s10935_s9 + $0x20] sm:$0xff]  ;;  %v5097_v5 = vld [vmem:[%s10934_s8 + $0x458] sm:$0xff] }
 0xa17   :  { %6303 = vmatpush3.msra.mxu1 %v5063_v22  ;;  %6269 = vmatprep.subr.mxu0 %v5046_v32  ;;  %v5504_v35 = vld [vmem:[%s10935_s9 + $0x18] sm:$0xff]  ;;  %v5096_v15 = vld [vmem:[%s10934_s8 + $0x450] sm:$0xff]  ;;  %v5095_v12 = vld [vmem:[%s10934_s8 + $0x448] sm:$0xff] }
 0xa18   :  { %6304 = vmatprep.subr.mxu1 %v5078_v10  ;;  %6270 = vmatpush3.msra.mxu0 %v5030_v57  ;;  %v5503_v26 = vld [vmem:[%s10935_s9 + $0x10] sm:$0xff]  ;;  %v5502_v36 = vld [vmem:[%s10935_s9 + $0x8] sm:$0xff]  ;;  %v5094_v38 = vld [vmem:[%s10934_s8 + $0x440] sm:$0xff] }
 0xa19   :  { %6305 = vmatpush3.msra.mxu1 %v5062_v42  ;;  %6271 = vmatprep.subr.mxu0 %v5045_v47  ;;  %v5501_v61 = vld [vmem:[%s10935_s9] sm:$0xff]  ;;  %v5093_v22 = vld [vmem:[%s10934_s8 + $0x438] sm:$0xff]  ;;  %v5092_v32 = vld [vmem:[%s10934_s8 + $0x430] sm:$0xff] }
 0xa1a   :  { %6306 = vmatprep.subr.mxu1 %v5077_v51  ;;  %6272 = vmatpush3.msra.mxu0 %v5029_v17  ;;  %v5091_v10 = vld [vmem:[%s10934_s8 + $0x428] sm:$0xff]  ;;  %v5089_v57 = vld [vmem:[%s10934_s8 + $0x418] sm:$0xff]  ;;  %v5088_v42 = vld [vmem:[%s10934_s8 + $0x410] sm:$0xff] }
 0xa1b   :  { %6307 = vmatpush3.msra.mxu1 %v5061_v48  ;;  %6273 = vmatprep.subr.mxu0 %v5044_v46  ;;  %v5087_v47 = vld [vmem:[%s10934_s8 + $0x408] sm:$0xff]  ;;  %v5086_v51 = vld [vmem:[%s10934_s8 + $0x400] sm:$0xff]  ;;  %v5620_v17 = vld [vmem:[%s10936_s12 + $0x78] sm:$0xff] }
 0xa1c   :  { %6308 = vmatprep.subr.mxu1 %v5076_v40  ;;  %6274 = vmatpush3.msra.mxu0 %v5028_v45  ;;  %v5619_v48 = vld [vmem:[%s10936_s12 + $0x70] sm:$0xff]  ;;  %v5618_v46 = vld [vmem:[%s10936_s12 + $0x68] sm:$0xff]  ;;  %v5616_v40 = vld [vmem:[%s10936_s12 + $0x58] sm:$0xff] }
 0xa1d   :  { %6309 = vmatpush3.msra.mxu1 %v5060_v25  ;;  %6275 = vmatprep.subr.mxu0 %v5043_v58  ;;  %v5615_v45 = vld [vmem:[%s10936_s12 + $0x50] sm:$0xff]  ;;  %v5614_v25 = vld [vmem:[%s10936_s12 + $0x48] sm:$0xff]  ;;  %v5613_v58 = vld [vmem:[%s10936_s12 + $0x40] sm:$0xff] }
 0xa1e   :  { %6310 = vmatprep.subr.mxu1 %v5075_v23  ;;  %6276 = vmatpush3.msra.mxu0 %v5027_v1  ;;  %v5612_v23 = vld [vmem:[%s10936_s12 + $0x38] sm:$0xff]  ;;  %v5611_v1 = vld [vmem:[%s10936_s12 + $0x30] sm:$0xff] }
 0xa1f   :  { %6311 = vmatpush3.msra.mxu1 %v5059_v44  ;;  %6277 = vmatprep.subr.mxu0 %v5042_v53  ;;  %v5610_v44 = vld [vmem:[%s10936_s12 + $0x28] sm:$0xff]  ;;  %v5609_v53 = vld [vmem:[%s10936_s12 + $0x20] sm:$0xff] }
 0xa20   :  { %6312 = vmatprep.subr.mxu1 %v5074_v62  ;;  %6278 = vmatpush3.msra.mxu0 %v5026_v56  ;;  %v5608_v62 = vld [vmem:[%s10936_s12 + $0x18] sm:$0xff]  ;;  %v5607_v56 = vld [vmem:[%s10936_s12 + $0x10] sm:$0xff] }
 0xa21   :  { %6313 = vmatpush3.msra.mxu1 %v5058_v39  ;;  %6279 = vmatprep.subr.mxu0 %v5041_v59  ;;  %v5606_v39 = vld [vmem:[%s10936_s12 + $0x8] sm:$0xff]  ;;  %v5605_v59 = vld [vmem:[%s10936_s12] sm:$0xff] }
 0xa22   :  { %6314 = vmatprep.subr.mxu1 %v5073_v60  ;;  %6280 = vmatpush3.msra.mxu0 %v5025_v41 }
 0xa23   :  { %6315 = vmatpush3.msra.mxu1 %v5057_v30  ;;  %6281 = vmatprep.subr.mxu0 %v5040_v55 }
 0xa24   :  { %6316 = vmatprep.subr.mxu1 %v5072_v4  ;;  %6282 = vmatpush3.msra.mxu0 %v5024_v31 }
 0xa25   :  { %6317 = vmatpush3.msra.mxu1 %v5056_v16  ;;  %6283 = vmatprep.subr.mxu0 %v5039_v8 }
 0xa26   :  { %6318 = vmatprep.subr.mxu1 %v5071_v20  ;;  %6284 = vmatpush3.msra.mxu0 %v5023_v24 }
 0xa27   :  { %6319 = vmatpush3.msra.mxu1 %v5055_v49  ;;  %6285 = vmatprep.subr.mxu0 %v5038_v18 }
 0xa28   :  { %6320 = vmatprep.subr.mxu1 %v5070_v29  ;;  %6286 = vmatpush3.msra.mxu0 %v5022_v63 }
 0xa29   :  { %6321 = vmatpush3.msra.mxu1 %v5054_v19  ;;  %5307 = vmatmul.mubr.f32.vlgmr.msra.gmra.mxu0 %v4953_v52 }
 0xa2a   :  { %5377 = vmatmul.mubr.f32.vlgmr.msra.gmra.mxu1 %v4955_v33  ;;  %6549 = vmatprep.subr.mxu0 %v9921_v6 }
 0xa2b   :  { %6584 = vmatprep.subr.mxu1 %v9921_v6  ;;  %6550 = vmatpush3.msra.mxu0 %v5101_v21 }
 0xa2c   :  { %6585 = vmatpush3.msra.mxu1 %v5508_v27  ;;  %6551 = vmatprep.subr.mxu0 %v9921_v6 }
 0xa2d   :  { %6586 = vmatprep.subr.mxu1 %v9921_v6  ;;  %6552 = vmatpush3.msra.mxu0 %v5100_v43 }
 0xa2e   :  { %6587 = vmatpush3.msra.mxu1 %v5507_v34  ;;  %6553 = vmatprep.subr.mxu0 %v9921_v6 }
 0xa2f   :  { %6588 = vmatprep.subr.mxu1 %v9921_v6  ;;  %6554 = vmatpush3.msra.mxu0 %v5099_v0 }
 0xa30   :  { %6589 = vmatpush3.msra.mxu1 %v5506_v14  ;;  %6555 = vmatprep.subr.mxu0 %v9921_v6 }
 0xa31   :  { %6590 = vmatprep.subr.mxu1 %v9921_v6  ;;  %6556 = vmatpush3.msra.mxu0 %v5098_v54 }
 0xa32   :  { %6591 = vmatpush3.msra.mxu1 %v5505_v3  ;;  %6557 = vmatprep.subr.mxu0 %v9921_v6 }
 0xa33   :  { %6592 = vmatprep.subr.mxu1 %v9921_v6  ;;  %6558 = vmatpush3.msra.mxu0 %v5097_v5 }
 0xa34   :  { %6593 = vmatpush3.msra.mxu1 %v5504_v35  ;;  %6559 = vmatprep.subr.mxu0 %v9921_v6 }
 0xa35   :  { %6594 = vmatprep.subr.mxu1 %v9921_v6  ;;  %6560 = vmatpush3.msra.mxu0 %v5096_v15 }
 0xa36   :  { %6595 = vmatpush3.msra.mxu1 %v5503_v26  ;;  %6561 = vmatprep.subr.mxu0 %v9921_v6 }
 0xa37   :  { %6596 = vmatprep.subr.mxu1 %v9921_v6  ;;  %6562 = vmatpush3.msra.mxu0 %v5095_v12 }
 0xa38   :  { %6597 = vmatpush3.msra.mxu1 %v5502_v36  ;;  %6563 = vmatprep.subr.mxu0 %v9921_v6 }
 0xa39   :  { %6598 = vmatprep.subr.mxu1 %v9921_v6  ;;  %6564 = vmatpush3.msra.mxu0 %v5094_v38 }
 0xa3a   :  { %6599 = vmatpush3.msra.mxu1 %v5501_v61  ;;  %6600 = vmatprep.mubr.msk.f32.mxu1 %vm6983_vm9, %v9921_v6 }
 0xa3b   :  { %6565 = vmatprep.subr.mxu0 %v9921_v6  ;;  %6601 = vmatmul.mubr.msk.f32.vlgmr.msra.gmra.mxu1 %vm11438_vm6, %v10255_v50  ;;  %v5090_v50 = vld [vmem:[%s10934_s8 + $0x420] sm:$0xff] }
 0xa3c   :  { %6566 = vmatpush3.msra.mxu0 %v5093_v22  ;;  %6581 = vmatprep.mubr.msk.f32.mxu0 %vm6983_vm9, %v9921_v6 }
 0xa3d   :  { %6567 = vmatprep.subr.mxu0 %v9921_v6  ;;  %6603 = vmatprep.subr.mxu1 %v9921_v6 }
 0xa3e   :  { %6568 = vmatpush3.msra.mxu0 %v5092_v32  ;;  %6635 = vmatprep.mubr.msk.f32.mxu1 %vm6983_vm9, %v9921_v6  ;;  %vm5603_vm9 = vcmask 1040384  }
 0xa3f   :  { %6569 = vmatprep.subr.mxu0 %v9921_v6  ;;  %6604 = vmatpush3.msra.mxu1 %v5620_v17 }
 0xa40   :  { %6570 = vmatpush3.msra.mxu0 %v5091_v10  ;;  %6605 = vmatprep.subr.mxu1 %v9921_v6 }
 0xa41   :  { %6571 = vmatprep.subr.mxu0 %v9921_v6  ;;  %6606 = vmatpush3.msra.mxu1 %v5619_v48 }
 0xa42   :  { %6572 = vmatpush3.msra.mxu0 %v5090_v50  ;;  %6607 = vmatprep.subr.mxu1 %v9921_v6 }
 0xa43   :  { %6573 = vmatprep.subr.mxu0 %v9921_v6  ;;  %6608 = vmatpush3.msra.mxu1 %v5618_v46 }
 0xa44   :  { %6574 = vmatpush3.msra.mxu0 %v5089_v57  ;;  %6609 = vmatprep.subr.mxu1 %v9921_v6 }
 0xa45   :  { %6575 = vmatprep.subr.mxu0 %v9921_v6 }
 0xa46   :  { %6576 = vmatpush3.msra.mxu0 %v5088_v42 }
 0xa47   :  { %6577 = vmatprep.subr.mxu0 %v9921_v6 }
 0xa48   :  { %6578 = vmatpush3.msra.mxu0 %v5087_v47 }
 0xa49   :  { %6579 = vmatprep.subr.mxu0 %v9921_v6 }
 0xa4a   :  { %6580 = vmatpush3.msra.mxu0 %v5086_v51 }
 0xa4b   :  { %6582 = vmatmul.mubr.f32.vlgmr.msra.gmra.mxu0 %v10579_v13  ;;  %v5617_v13 = vld [vmem:[%s10936_s12 + $0x60] sm:$0xff] }
 0xa4c   :  { %6610 = vmatpush3.msra.mxu1 %v5617_v13 }
 0xa4d   :  { %6611 = vmatprep.subr.mxu1 %v9921_v6 }
 0xa4e   :  { %6612 = vmatpush3.msra.mxu1 %v5616_v40 }
 0xa4f   :  { %6613 = vmatprep.subr.mxu1 %v9921_v6 }
 0xa50   :  { %6614 = vmatpush3.msra.mxu1 %v5615_v45 }
 0xa51   :  { %6615 = vmatprep.subr.mxu1 %v9921_v6 }
 0xa52   :  { %6616 = vmatpush3.msra.mxu1 %v5614_v25 }
 0xa53   :  { %6617 = vmatprep.subr.mxu1 %v9921_v6 }
 0xa54   :  { %6618 = vmatpush3.msra.mxu1 %v5613_v58 }
 0xa55   :  { %6619 = vmatprep.subr.mxu1 %v9921_v6 }
 0xa56   :  { %6620 = vmatpush3.msra.mxu1 %v5612_v23 }
 0xa57   :  { %6621 = vmatprep.subr.mxu1 %v9921_v6 }
 0xa58   :  { %6622 = vmatpush3.msra.mxu1 %v5611_v1 }
 0xa59   :  { %6623 = vmatprep.subr.mxu1 %v9921_v6 }
 0xa5a   :  { %6624 = vmatpush3.msra.mxu1 %v5610_v44 }
 0xa5b   :  { %6625 = vmatprep.subr.mxu1 %v9921_v6 }
 0xa5c   :  { %6626 = vmatpush3.msra.mxu1 %v5609_v53 }
 0xa5d   :  { %6627 = vmatprep.subr.mxu1 %v9921_v6 }
 0xa5e   :  { %6628 = vmatpush3.msra.mxu1 %v5608_v62 }
 0xa5f   :  { %6629 = vmatprep.subr.mxu1 %v9921_v6 }
 0xa60   :  { %6630 = vmatpush3.msra.mxu1 %v5607_v56 }
 0xa61   :  { %6631 = vmatprep.subr.mxu1 %v9921_v6 }
 0xa62   :  { %6632 = vmatpush3.msra.mxu1 %v5606_v39 }
 0xa63   :  { %6633 = vmatprep.subr.mxu1 %v9921_v6 }
 0xa64   :  { %6634 = vmatpush3.msra.mxu1 %v5605_v59 }
 0xac8   :  { %v6217_v30 = vpop.f32.mrf.mxu0 }
 0xac9   :  { %v6252_v60 = vpop.f32.mrf.mxu1 }
 0xaca   :  { %v6218_v4 = vpop.f32.mrf.mxu0 }
 0xacb   :  { %v6253_v41 = vpop.f32.mrf.mxu1  ;;  %v6219_v20 = vadd.f32 %v6218_v4, %v6217_v30 }
 0xacc   :  { %v6254_v24 = vadd.f32 %v6253_v41, %v6252_v60 }
 0xace   :  { %v5239_v18 = vadd.f32 %v6254_v24, %v6219_v20 }
 0xae9   :  { %v6287_v2 = vpop.f32.mrf.mxu0 }
 0xaea   :  { %v6322_v55 = vpop.f32.mrf.mxu1 }
 0xaeb   :  { %v6288_v9 = vpop.f32.mrf.mxu0 }
 0xaec   :  { %v6323_v31 = vpop.f32.mrf.mxu1  ;;  %v6289_v49 = vadd.f32 %v6288_v9, %v6287_v2 }
 0xaed   :  { %v6324_v29 = vadd.f32 %v6323_v31, %v6322_v55 }
 0xaee   :  { %v5309_v37 = vadd.f32 %v6289_v49, %v5239_v18 }
 0xaf0   :  { %v5379_v63 = vadd.f32 %v6324_v29, %v5309_v37 }
 0xafb   :  { %v5578_v16 = vpop.f32.mrf.mxu1 }
 0xafd   :  { %v6602_v8 = vpop.f32.mrf.mxu1 }
 0xb0b   :  { %v5448_v11 = vpop.f32.mrf.mxu0 }
 0xb0c   :  { %v5449_v6 = vadd.f32 %v5448_v11, %v5379_v63 }
 0xb0d   :  { %v6583_v19 = vpop.f32.mrf.mxu0 }
 0xb0e   :  { %v5452_v28 = vsel %vm4532_vm12, %v5449_v6, 0.0  ;;  %v5474_v52 = vrot.slane %v5449_v6, 4 }
 0xb0f   :  { %v5453_v7 = vrot.slane %v5452_v28, 4 }
 0xb10   :  { %v5476_v21 = vsel %vm4532_vm12, %v5474_v52, 0.0  ;;  %v5801_v52 = vld [vmem:[%s10937_s13] ss:$0 sm:$0xff] }
 0xb11   :  { %v5454_v33 = vadd.f32 %v5453_v7, %v5452_v28  ;;  %v5477_v27 = vrot.slane %v5476_v21, 4 }
 0xb13   :  { %v5455_v43 = vrot.slane %v5454_v33, 2  ;;  %v5478_v34 = vadd.f32 %v5477_v27, %v5476_v21 }
 0xb15   :  { %v5456_v0 = vadd.f32 %v5455_v43, %v5454_v33  ;;  %v5479_v14 = vrot.slane %v5478_v34, 2 }
 0xb17   :  { %v5457_v54 = vrot.slane %v5456_v0, 1  ;;  %v5480_v3 = vadd.f32 %v5479_v14, %v5478_v34 }
 0xb19   :  { %v5458_v5 = vadd.f32 %v5457_v54, %v5456_v0  ;;  %v5481_v35 = vrot.slane %v5480_v3, 1 }
 0xb1b   :  { %v5459_v15 = vmul.f32 0.25, %v5458_v5  ;;  %v5482_v26 = vadd.f32 %v5481_v35, %v5480_v3 }
 0xb1d   :  { %v5460_v12 = vsub.f32 %v5449_v6, %v5459_v15  ;;  %v5483_v36 = vmul.f32 0.25, %v5482_v26 }
 0xb1f   :  { %v5461_v38 = vmul.f32 %v5460_v12, %v5460_v12  ;;  %v5484_v61 = vsub.f32 %v5449_v6, %v5483_v36 }
 0xb21   :  { %v5462_v22 = vsel %vm4532_vm12, %v5461_v38, 0.0  ;;  %v5485_v32 = vmul.f32 %v5484_v61, %v5484_v61 }
 0xb22   :  { %v5463_v10 = vrot.slane %v5462_v22, 4 }
 0xb23   :  { %v5487_v50 = vrot.slane %v5485_v32, 4 }
 0xb24   :  { %v5464_v57 = vadd.f32 %v5463_v10, %v5462_v22 }
 0xb25   :  { %v5489_v42 = vsel %vm4532_vm12, %v5487_v50, 0.0 }
 0xb26   :  { %v5465_v47 = vrot.slane %v5464_v57, 2  ;;  %v5490_v51 = vrot.slane %v5489_v42, 4 }
 0xb28   :  { %v5466_v17 = vadd.f32 %v5465_v47, %v5464_v57  ;;  %v5491_v48 = vadd.f32 %v5490_v51, %v5489_v42 }
 0xb2a   :  { %v5467_v46 = vrot.slane %v5466_v17, 1  ;;  %v5492_v13 = vrot.slane %v5491_v48, 2 }
 0xb2c   :  { %v5468_v40 = vadd.f32 %v5467_v46, %v5466_v17  ;;  %v5493_v45 = vadd.f32 %v5492_v13, %v5491_v48 }
 0xb2e   :  { %v5469_v25 = vmul.f32 0.25, %v5468_v40  ;;  %v5494_v58 = vrot.slane %v5493_v45, 1 }
 0xb30   :  { %v5470_v23 = vadd.f32 1e-05, %v5469_v25  ;;  %v5495_v1 = vadd.f32 %v5494_v58, %v5493_v45 }
 0xb32   :  { %v5496_v44 = vmul.f32 0.25, %v5495_v1  ;;  %6951 = vrsqrt.f32 %v5470_v23 }
 0xb34   :  { %v5497_v53 = vadd.f32 1e-05, %v5496_v44 }
 0xb36   :  { %6953 = vrsqrt.f32 %v5497_v53 }
 0xb3f   :  { %v6952_v62 = vpop.eup %6951 }
 0xb40   :  { %v5472_v39 = vmul.f32 %v6952_v62, %v5460_v12 }
 0xb43   :  { %v6954_v56 = vpop.eup %6953 }
 0xb44   :  { %v5499_v59 = vmul.f32 %v6954_v56, %v5484_v61 }
 0xb46   :  { %v5500_v60 = vsel %vm4532_vm12, %v5472_v39, %v5499_v59 }
 0xb47   :  { %v5582_v41 = vadd.f32 %v5578_v16, %v5500_v60 }
 0xb49   :  { %v5583_v30 = vmax.f32 %v5582_v41, 0.0 }
 0xb4b   :  { %v5584_v55 = vsel %vm4532_vm12, %v5583_v30, 0.0  ;;  %v5593_v4 = vrot.slane %v5583_v30, 4 }
 0xb4c   :  { %v5585_v31 = vrot.slane %v5584_v55, 4 }
 0xb4d   :  { %v5595_v2 = vsel %vm4532_vm12, %v5593_v4, 0.0 }
 0xb4e   :  { %v5586_v8 = vadd.f32 %v5585_v31, %v5584_v55  ;;  %v5596_v9 = vrot.slane %v5595_v2, 4 }
 0xb50   :  { %v5587_v20 = vrot.slane %v5586_v8, 2  ;;  %v5597_v24 = vadd.f32 %v5596_v9, %v5595_v2 }
 0xb52   :  { %v5588_v49 = vadd.f32 %v5587_v20, %v5586_v8  ;;  %v5598_v18 = vrot.slane %v5597_v24, 2 }
 0xb54   :  { %v5589_v37 = vrot.slane %v5588_v49, 1  ;;  %v5599_v29 = vadd.f32 %v5598_v18, %v5597_v24 }
 0xb56   :  { %v5590_v63 = vadd.f32 %v5589_v37, %v5588_v49  ;;  %v5600_v11 = vrot.slane %v5599_v29, 1 }
 0xb58   :  { %v5601_v6 = vadd.f32 %v5600_v11, %v5599_v29  ;;  %v5591_v16 = vmul.f32 0.25, %v5590_v63 }
 0xb5a   :  { %v5602_v19 = vmul.f32 0.25, %v5601_v6 }
 0xb5c   :  { %v5604_v28 = vsel %vm5603_vm9, %v5591_v16, %v5602_v19 }
 0xb5d   :  { %6636 = vmatmul.mubr.f32.vlgmr.msra.gmra.mxu1 %v5604_v28 }
 0xc1d   :  { %v5694_v7 = vpop.f32.mrf.mxu1 }
 0xc1e   :  { %v5695_v21 = vadd.f32 %v5801_v52, %v5694_v7 }
 0xc1f   :  { %v6637_v33 = vpop.f32.mrf.mxu1 }
 0xc20   :  { %5698 = vst [vmem:[%s10938_s14] sm:$0x3] %v5695_v21 }

</bundles_post_ra>
